<compile_context>
chip_gen: v6e
topology: v6e:2x2x1
jax: 0.10.0
libtpu: 0.0.40
codegen_flags: <defaults>
</compile_context>

<pallas_src>
import jax
import jax.numpy as jnp
from jax.experimental import pallas as pl
from jax.experimental.pallas import tpu as pltpu

LANE = 128


def convblock_kernel(xp_ref, w1_ref, b1_ref, w2_ref, b2_ref, out_ref):
    """Processes B_TILE batch elements per grid step.

    xp_ref : (Bt, H+2, W+2, Cip)  bf16  zero-padded NHWC input (channels padded)
    w1_ref : (9*Cip, Cop)         bf16  conv1 weights, taps folded into K
    b1_ref : (1, Cop)             f32
    w2_ref : (9*Cop, Cop)         bf16  conv2 weights, taps folded into K
    b2_ref : (1, Cop)             f32
    out_ref: (Bt, H, W, Cop)      f32
    """
    Bt, Hp2, Wp2, _ = xp_ref.shape
    H, W = Hp2 - 2, Wp2 - 2
    Cop = out_ref.shape[3]

    def im2col(ap):
        # ap: (Bt, H+2, W+2, C) -> (Bt*H*W, 9*C); tap order (dy, dx, c) matches
        # the (3,3,C,Cout)->(9*C,Cout) weight reshape done in the wrapper.
        slabs = [ap[:, dy:dy + H, dx:dx + W, :]
                 for dy in range(3) for dx in range(3)]
        p = jnp.concatenate(slabs, axis=-1)              # (Bt, H, W, 9*C)
        return p.reshape(Bt * H * W, 9 * ap.shape[-1])

    # ---- conv1: single MXU contraction (K = 9*Cip), f32 accumulation ----
    p1 = im2col(xp_ref[...])
    acc1 = jnp.dot(p1, w1_ref[...], preferred_element_type=jnp.float32)
    act1 = jnp.maximum(acc1 + b1_ref[...], 0.0)          # (Bt*H*W, Cop) f32

    # zero-pad the intermediate activation at the value level (no scratch)
    a1 = act1.astype(jnp.bfloat16).reshape(Bt, H, W, Cop)
    zr = jnp.zeros((Bt, 1, W, Cop), jnp.bfloat16)
    a1p = jnp.concatenate([zr, a1, zr], axis=1)          # (Bt, H+2, W, Cop)
    zc = jnp.zeros((Bt, H + 2, 1, Cop), jnp.bfloat16)
    a1p = jnp.concatenate([zc, a1p, zc], axis=2)         # (Bt, H+2, W+2, Cop)

    # ---- conv2: single MXU contraction (K = 9*Cop) ----
    p2 = im2col(a1p)
    acc2 = jnp.dot(p2, w2_ref[...], preferred_element_type=jnp.float32)
    act2 = jnp.maximum(acc2 + b2_ref[...], 0.0)

    # lane-dense store: last dim is a full 128-lane multiple -> unmasked vst
    out_ref[...] = act2.reshape(Bt, H, W, Cop).astype(out_ref.dtype)


def _round_up(x, m):
    return (x + m - 1) // m * m


@jax.jit
def conv_block_forward(x_nchw, w1, b1, w2, b2):
    """Forward pass matching torch ConvBlock.forward (NCHW in / NCHW out).

    x_nchw: (N, Cin, H, W) f32
    w1    : (Cout, Cin, 3, 3)   b1: (Cout,)
    w2    : (Cout, Cout, 3, 3)  b2: (Cout,)
    """
    N, Cin, H, W = x_nchw.shape
    Cout = w1.shape[0]
    Cip = _round_up(Cin, LANE)
    Cop = _round_up(Cout, LANE)

    # batch tile: largest divisor of N that is <= 8 (amortize per-step overhead)
    bt = min(N, 8)
    while N % bt:
        bt -= 1

    # ---- wrapper-side layout glue (XLA ops, outside the kernel) ----
    x_nhwc = jnp.transpose(x_nchw, (0, 2, 3, 1))                         # NHWC
    xp = jnp.pad(x_nhwc, ((0, 0), (1, 1), (1, 1), (0, Cip - Cin)))
    xp = xp.astype(jnp.bfloat16)                                         # (N,H+2,W+2,Cip)

    w1_k = jnp.transpose(w1, (2, 3, 1, 0))                               # (3,3,Cin,Cout)
    w1_k = jnp.pad(w1_k, ((0, 0), (0, 0), (0, Cip - Cin), (0, Cop - Cout)))
    w1_k = w1_k.reshape(9 * Cip, Cop).astype(jnp.bfloat16)
    w2_k = jnp.transpose(w2, (2, 3, 1, 0))                               # (3,3,Cout,Cout)
    w2_k = jnp.pad(w2_k, ((0, 0), (0, 0), (0, Cop - Cout), (0, Cop - Cout)))
    w2_k = w2_k.reshape(9 * Cop, Cop).astype(jnp.bfloat16)
    b1_k = jnp.pad(b1, (0, Cop - Cout)).reshape(1, Cop).astype(jnp.float32)
    b2_k = jnp.pad(b2, (0, Cop - Cout)).reshape(1, Cop).astype(jnp.float32)

    out_nhwc = pl.pallas_call(
        convblock_kernel,
        out_shape=jax.ShapeDtypeStruct((N, H, W, Cop), jnp.float32),
        grid_spec=pltpu.PrefetchScalarGridSpec(
            num_scalar_prefetch=0,
            grid=(N // bt,),
            in_specs=[
                pl.BlockSpec((bt, H + 2, W + 2, Cip), lambda n: (n, 0, 0, 0)),
                # constant index_map -> block stays resident, no re-DMA per step
                pl.BlockSpec((9 * Cip, Cop), lambda n: (0, 0)),
                pl.BlockSpec((1, Cop), lambda n: (0, 0)),
                pl.BlockSpec((9 * Cop, Cop), lambda n: (0, 0)),
                pl.BlockSpec((1, Cop), lambda n: (0, 0)),
            ],
            out_specs=pl.BlockSpec((bt, H, W, Cop), lambda n: (n, 0, 0, 0)),
        ),
        compiler_params=pltpu.CompilerParams(
            dimension_semantics=("parallel",)),
    )(xp, w1_k, b1_k, w2_k, b2_k)

    out = out_nhwc[:, :, :, :Cout]                                       # drop channel pad
    return jnp.transpose(out, (0, 3, 1, 2)).astype(x_nchw.dtype)         # back to NCHW


def _reference(x_nchw, w1, b1, w2, b2):
    """Pure-JAX reference (lax conv) for correctness check."""
    dn = jax.lax.conv_dimension_numbers(x_nchw.shape, w1.shape,
                                        ("NCHW", "OIHW", "NCHW"))
    y = jax.lax.conv_general_dilated(x_nchw, w1, (1, 1), ((1, 1), (1, 1)),
                                     dimension_numbers=dn)
    y = jnp.maximum(y + b1[None, :, None, None], 0.0)
    y = jax.lax.conv_general_dilated(y, w2, (1, 1), ((1, 1), (1, 1)),
                                     dimension_numbers=dn)
    y = jnp.maximum(y + b2[None, :, None, None], 0.0)
    return y


if __name__ == "__main__":
    # small shapes consistent with the module (nn.Conv2d(in, out, 3, 1, 1))
    N, Cin, Cout, H, W = 2, 3, 8, 16, 16

    key = jax.random.PRNGKey(0)
    kx, kw1, kb1, kw2, kb2 = jax.random.split(key, 5)

    x = jax.random.normal(kx, (N, Cin, H, W), jnp.float32)
    w1 = jax.random.normal(kw1, (Cout, Cin, 3, 3), jnp.float32) * 0.1
    b1 = jax.random.normal(kb1, (Cout,), jnp.float32) * 0.1
    w2 = jax.random.normal(kw2, (Cout, Cout, 3, 3), jnp.float32) * 0.1
    b2 = jax.random.normal(kb2, (Cout,), jnp.float32) * 0.1

    out = conv_block_forward(x, w1, b1, w2, b2)
    out = jax.block_until_ready(out)

    ref = _reference(x, w1, b1, w2, b2)
    assert out.shape == (N, Cout, H, W), f"bad shape {out.shape}"
    # bf16 MXU operands -> relaxed tolerance vs the f32 reference
    assert jnp.allclose(out, ref, atol=5e-2, rtol=5e-2), "mismatch vs reference"

    print("KERNEL_OK")
</pallas_src>

<mosaic_0001>
module attributes {stable_mosaic.version = 11 : i64} {
  func.func @convblock_kernel(%arg0: i32, %arg1: memref<2x18x18x128xbf16, #tpu.memory_space<vmem>>, %arg2: memref<1152x128xbf16, #tpu.memory_space<vmem>>, %arg3: memref<1x128xf32, #tpu.memory_space<vmem>>, %arg4: memref<1152x128xbf16, #tpu.memory_space<vmem>>, %arg5: memref<1x128xf32, #tpu.memory_space<vmem>>, %arg6: memref<2x16x16x128xf32, #tpu.memory_space<vmem>>) attributes {dimension_semantics = [#tpu.dimension_semantics<parallel>], iteration_bounds = array<i64: 1>, scalar_prefetch = 0 : i64, scratch_operands = 0 : i64, tpu.core_type = #tpu.core_type<tc>, window_params = [{transform_indices = @transform_0, window_bounds = array<i64: 2, 18, 18, 128>}, {pipeline_mode = #tpu.pipeline_mode<synchronous>, transform_indices = @transform_1, window_bounds = array<i64: 1152, 128>}, {pipeline_mode = #tpu.pipeline_mode<synchronous>, transform_indices = @transform_2, window_bounds = array<i64: 1, 128>}, {pipeline_mode = #tpu.pipeline_mode<synchronous>, transform_indices = @transform_3, window_bounds = array<i64: 1152, 128>}, {pipeline_mode = #tpu.pipeline_mode<synchronous>, transform_indices = @transform_4, window_bounds = array<i64: 1, 128>}, {transform_indices = @transform_5, window_bounds = array<i64: 2, 16, 16, 128>}]} {
    %c0 = arith.constant 0 : index
    %c0_0 = arith.constant 0 : index
    %c0_1 = arith.constant 0 : index
    %c0_2 = arith.constant 0 : index
    %0 = vector.load %arg1[%c0, %c0_0, %c0_1, %c0_2] : memref<2x18x18x128xbf16, #tpu.memory_space<vmem>>, vector<2x18x18x128xbf16>
    %1 = vector.extract_strided_slice %0 {offsets = [0, 0, 0, 0], sizes = [2, 16, 16, 128], strides = [1, 1, 1, 1]} : vector<2x18x18x128xbf16> to vector<2x16x16x128xbf16>
    %2 = vector.extract_strided_slice %0 {offsets = [0, 0, 1, 0], sizes = [2, 16, 16, 128], strides = [1, 1, 1, 1]} : vector<2x18x18x128xbf16> to vector<2x16x16x128xbf16>
    %3 = vector.extract_strided_slice %0 {offsets = [0, 0, 2, 0], sizes = [2, 16, 16, 128], strides = [1, 1, 1, 1]} : vector<2x18x18x128xbf16> to vector<2x16x16x128xbf16>
    %4 = vector.extract_strided_slice %0 {offsets = [0, 1, 0, 0], sizes = [2, 16, 16, 128], strides = [1, 1, 1, 1]} : vector<2x18x18x128xbf16> to vector<2x16x16x128xbf16>
    %5 = vector.extract_strided_slice %0 {offsets = [0, 1, 1, 0], sizes = [2, 16, 16, 128], strides = [1, 1, 1, 1]} : vector<2x18x18x128xbf16> to vector<2x16x16x128xbf16>
    %6 = vector.extract_strided_slice %0 {offsets = [0, 1, 2, 0], sizes = [2, 16, 16, 128], strides = [1, 1, 1, 1]} : vector<2x18x18x128xbf16> to vector<2x16x16x128xbf16>
    %7 = vector.extract_strided_slice %0 {offsets = [0, 2, 0, 0], sizes = [2, 16, 16, 128], strides = [1, 1, 1, 1]} : vector<2x18x18x128xbf16> to vector<2x16x16x128xbf16>
    %8 = vector.extract_strided_slice %0 {offsets = [0, 2, 1, 0], sizes = [2, 16, 16, 128], strides = [1, 1, 1, 1]} : vector<2x18x18x128xbf16> to vector<2x16x16x128xbf16>
    %9 = vector.extract_strided_slice %0 {offsets = [0, 2, 2, 0], sizes = [2, 16, 16, 128], strides = [1, 1, 1, 1]} : vector<2x18x18x128xbf16> to vector<2x16x16x128xbf16>
    %10 = tpu.concatenate %1, %2, %3, %4, %5, %6, %7, %8, %9 in 3 : vector<2x16x16x128xbf16>, vector<2x16x16x128xbf16>, vector<2x16x16x128xbf16>, vector<2x16x16x128xbf16>, vector<2x16x16x128xbf16>, vector<2x16x16x128xbf16>, vector<2x16x16x128xbf16>, vector<2x16x16x128xbf16>, vector<2x16x16x128xbf16> -> vector<2x16x16x1152xbf16>
    %11 = vector.shape_cast %10 : vector<2x16x16x1152xbf16> to vector<512x1152xbf16>
    %c0_3 = arith.constant 0 : index
    %c0_4 = arith.constant 0 : index
    %12 = vector.load %arg2[%c0_3, %c0_4] : memref<1152x128xbf16, #tpu.memory_space<vmem>>, vector<1152x128xbf16>
    %cst = arith.constant dense<0.000000e+00> : vector<512x128xf32>
    %13 = tpu.matmul %11, %12, %cst {dimension_numbers = #tpu.dot_dimension_numbers<[1], [0], [0], [1], [0, 0, 1, 1], [], []>} : vector<512x1152xbf16>, vector<1152x128xbf16>, vector<512x128xf32> -> vector<512x128xf32>
    %c0_5 = arith.constant 0 : index
    %c0_6 = arith.constant 0 : index
    %14 = vector.load %arg3[%c0_5, %c0_6] : memref<1x128xf32, #tpu.memory_space<vmem>>, vector<1x128xf32>
    %15 = vector.broadcast %14 : vector<1x128xf32> to vector<512x128xf32>
    %16 = arith.addf %13, %15 : vector<512x128xf32>
    %cst_7 = arith.constant 0.000000e+00 : f32
    %17 = vector.broadcast %cst_7 : f32 to vector<512x128xf32>
    %18 = arith.maximumf %16, %17 : vector<512x128xf32>
    %19 = arith.truncf %18 : vector<512x128xf32> to vector<512x128xbf16>
    %20 = vector.shape_cast %19 : vector<512x128xbf16> to vector<2x16x16x128xbf16>
    %cst_8 = arith.constant 0.000000e+00 : bf16
    %21 = vector.broadcast %cst_8 : bf16 to vector<2x1x16x128xbf16>
    %22 = tpu.concatenate %21, %20, %21 in 1 : vector<2x1x16x128xbf16>, vector<2x16x16x128xbf16>, vector<2x1x16x128xbf16> -> vector<2x18x16x128xbf16>
    %cst_9 = arith.constant 0.000000e+00 : bf16
    %23 = vector.broadcast %cst_9 : bf16 to vector<2x18x1x128xbf16>
    %24 = tpu.concatenate %23, %22, %23 in 2 : vector<2x18x1x128xbf16>, vector<2x18x16x128xbf16>, vector<2x18x1x128xbf16> -> vector<2x18x18x128xbf16>
    %25 = vector.extract_strided_slice %24 {offsets = [0, 0, 0, 0], sizes = [2, 16, 16, 128], strides = [1, 1, 1, 1]} : vector<2x18x18x128xbf16> to vector<2x16x16x128xbf16>
    %26 = vector.extract_strided_slice %24 {offsets = [0, 0, 1, 0], sizes = [2, 16, 16, 128], strides = [1, 1, 1, 1]} : vector<2x18x18x128xbf16> to vector<2x16x16x128xbf16>
    %27 = vector.extract_strided_slice %24 {offsets = [0, 0, 2, 0], sizes = [2, 16, 16, 128], strides = [1, 1, 1, 1]} : vector<2x18x18x128xbf16> to vector<2x16x16x128xbf16>
    %28 = vector.extract_strided_slice %24 {offsets = [0, 1, 0, 0], sizes = [2, 16, 16, 128], strides = [1, 1, 1, 1]} : vector<2x18x18x128xbf16> to vector<2x16x16x128xbf16>
    %29 = vector.extract_strided_slice %24 {offsets = [0, 1, 1, 0], sizes = [2, 16, 16, 128], strides = [1, 1, 1, 1]} : vector<2x18x18x128xbf16> to vector<2x16x16x128xbf16>
    %30 = vector.extract_strided_slice %24 {offsets = [0, 1, 2, 0], sizes = [2, 16, 16, 128], strides = [1, 1, 1, 1]} : vector<2x18x18x128xbf16> to vector<2x16x16x128xbf16>
    %31 = vector.extract_strided_slice %24 {offsets = [0, 2, 0, 0], sizes = [2, 16, 16, 128], strides = [1, 1, 1, 1]} : vector<2x18x18x128xbf16> to vector<2x16x16x128xbf16>
    %32 = vector.extract_strided_slice %24 {offsets = [0, 2, 1, 0], sizes = [2, 16, 16, 128], strides = [1, 1, 1, 1]} : vector<2x18x18x128xbf16> to vector<2x16x16x128xbf16>
    %33 = vector.extract_strided_slice %24 {offsets = [0, 2, 2, 0], sizes = [2, 16, 16, 128], strides = [1, 1, 1, 1]} : vector<2x18x18x128xbf16> to vector<2x16x16x128xbf16>
    %34 = tpu.concatenate %25, %26, %27, %28, %29, %30, %31, %32, %33 in 3 : vector<2x16x16x128xbf16>, vector<2x16x16x128xbf16>, vector<2x16x16x128xbf16>, vector<2x16x16x128xbf16>, vector<2x16x16x128xbf16>, vector<2x16x16x128xbf16>, vector<2x16x16x128xbf16>, vector<2x16x16x128xbf16>, vector<2x16x16x128xbf16> -> vector<2x16x16x1152xbf16>
    %35 = vector.shape_cast %34 : vector<2x16x16x1152xbf16> to vector<512x1152xbf16>
    %c0_10 = arith.constant 0 : index
    %c0_11 = arith.constant 0 : index
    %36 = vector.load %arg4[%c0_10, %c0_11] : memref<1152x128xbf16, #tpu.memory_space<vmem>>, vector<1152x128xbf16>
    %cst_12 = arith.constant dense<0.000000e+00> : vector<512x128xf32>
    %37 = tpu.matmul %35, %36, %cst_12 {dimension_numbers = #tpu.dot_dimension_numbers<[1], [0], [0], [1], [0, 0, 1, 1], [], []>} : vector<512x1152xbf16>, vector<1152x128xbf16>, vector<512x128xf32> -> vector<512x128xf32>
    %c0_13 = arith.constant 0 : index
    %c0_14 = arith.constant 0 : index
    %38 = vector.load %arg5[%c0_13, %c0_14] : memref<1x128xf32, #tpu.memory_space<vmem>>, vector<1x128xf32>
    %39 = vector.broadcast %38 : vector<1x128xf32> to vector<512x128xf32>
    %40 = arith.addf %37, %39 : vector<512x128xf32>
    %cst_15 = arith.constant 0.000000e+00 : f32
    %41 = vector.broadcast %cst_15 : f32 to vector<512x128xf32>
    %42 = arith.maximumf %40, %41 : vector<512x128xf32>
    %43 = vector.shape_cast %42 : vector<512x128xf32> to vector<2x16x16x128xf32>
    %c0_16 = arith.constant 0 : index
    %c0_17 = arith.constant 0 : index
    %c0_18 = arith.constant 0 : index
    %c0_19 = arith.constant 0 : index
    %44 = vector.load %arg6[%c0_16, %c0_17, %c0_18, %c0_19] : memref<2x16x16x128xf32, #tpu.memory_space<vmem>>, vector<2x16x16x128xf32>
    tpu.vector_store %arg6[%c0_16, %c0_17, %c0_18, %c0_19], %43 {strides = array<i32>} : memref<2x16x16x128xf32, #tpu.memory_space<vmem>>, vector<2x16x16x128xf32>,
    return
  }
  func.func @transform_0(%arg0: i32) -> (i32, i32, i32, i32) {
    %c0_i32 = arith.constant 0 : i32
    %c0_i32_0 = arith.constant 0 : i32
    %c0_i32_1 = arith.constant 0 : i32
    %c0_i32_2 = arith.constant 0 : i32
    return %arg0, %c0_i32, %c0_i32_0, %c0_i32_1 : i32, i32, i32, i32
  }
  func.func @transform_1(%arg0: i32) -> (i32, i32) {
    %c0_i32 = arith.constant 0 : i32
    %c0_i32_0 = arith.constant 0 : i32
    %c0_i32_1 = arith.constant 0 : i32
    return %c0_i32, %c0_i32_0 : i32, i32
  }
  func.func @transform_2(%arg0: i32) -> (i32, i32) {
    %c0_i32 = arith.constant 0 : i32
    %c0_i32_0 = arith.constant 0 : i32
    %c0_i32_1 = arith.constant 0 : i32
    return %c0_i32, %c0_i32_0 : i32, i32
  }
  func.func @transform_3(%arg0: i32) -> (i32, i32) {
    %c0_i32 = arith.constant 0 : i32
    %c0_i32_0 = arith.constant 0 : i32
    %c0_i32_1 = arith.constant 0 : i32
    return %c0_i32, %c0_i32_0 : i32, i32
  }
  func.func @transform_4(%arg0: i32) -> (i32, i32) {
    %c0_i32 = arith.constant 0 : i32
    %c0_i32_0 = arith.constant 0 : i32
    %c0_i32_1 = arith.constant 0 : i32
    return %c0_i32, %c0_i32_0 : i32, i32
  }
  func.func @transform_5(%arg0: i32) -> (i32, i32, i32, i32) {
    %c0_i32 = arith.constant 0 : i32
    %c0_i32_0 = arith.constant 0 : i32
    %c0_i32_1 = arith.constant 0 : i32
    %c0_i32_2 = arith.constant 0 : i32
    return %arg0, %c0_i32, %c0_i32_0, %c0_i32_1 : i32, i32, i32, i32
  }
}

</mosaic_0001>

<bundles_post_ra>
// kernel: conv_block_forward.1
= control target key start
LH: loop header
LB: loop body
LE: loop exit
PB: predicated region body
PF: predicated region fallthrough
CT: control target
= control target key end

     0   :  { %v10669_v0 = vmov 0   ;;  %vm417_vm0 = vsmask.f32 7424  ;;  %vm834_vm1 = vcmask 1046528   ;;  %vm3488_vm2 = vcmask 1040384   ;;  %s10663_s1 = inlined_call_operand.vmem [shape: bf16[1152,128], index: 1, kind: input, shape index: {}]   ;;  %s10664_s0 = inlined_call_operand.vmem [shape: bf16[2,18,18,128], index: 0, kind: input, shape index: {}]   ;;  %s10665_s2 = inlined_call_operand.vmem [shape: f32[1,128], index: 2, kind: input, shape index: {}]   ;;  %s10666_s3 = inlined_call_operand.vmem [shape: bf16[1152,128], index: 3, kind: input, shape index: {}]   ;;  %s10667_s4 = inlined_call_operand.vmem [shape: f32[1,128], index: 4, kind: input, shape index: {}]   ;;  %s10668_s5 = inlined_call_operand.vmem [shape: f32[2,16,16,128], index: 5, kind: output, shape index: {}]  }
   0x1   :  { %1650 = vmatprep.subr.bf16.mxu0 %v10669_v0  ;;  %v6803_v1 = vld [vmem:[%s10663_s1 + $0x38] sm:$0xff]   ;;  %1939 = vmatprep.subr.bf16.mxu1 %v10669_v0  ;;  %v6805_v3 = vld [vmem:[%s10663_s1 + $0x30] sm:$0xff]   ;;  %v6807_v5 = vld [vmem:[%s10663_s1 + $0x28] sm:$0xff]   ;;  %vm3489_vm3 = vsmask.f32 256 }
   0x2   :  { %v6804_v2 = vld [vmem:[%s10663_s1 + $0xb8] sm:$0xff]   ;;  %1651 = vmatpush1.bf16.msra.mxu0 %v6803_v1  ;;  %v6806_v4 = vld [vmem:[%s10663_s1 + $0xb0] sm:$0xff]   ;;  %v6808_v6 = vld [vmem:[%s10663_s1 + $0xa8] sm:$0xff]  }
   0x3   :  { %1940 = vmatpush1.bf16.msra.mxu1 %v6804_v2  ;;  %1652 = vmatprep.subr.bf16.mxu0 %v10669_v0  ;;  %v6809_v7 = vld [vmem:[%s10663_s1 + $0x20] sm:$0xff]   ;;  %v6811_v9 = vld [vmem:[%s10663_s1 + $0x18] sm:$0xff]   ;;  %v6813_v11 = vld [vmem:[%s10663_s1 + $0x10] sm:$0xff]  }
   0x4   :  { %1941 = vmatprep.subr.bf16.mxu1 %v10669_v0  ;;  %v6810_v8 = vld [vmem:[%s10663_s1 + $0xa0] sm:$0xff]   ;;  %v6812_v10 = vld [vmem:[%s10663_s1 + $0x98] sm:$0xff]   ;;  %v6814_v12 = vld [vmem:[%s10663_s1 + $0x90] sm:$0xff]  }
   0x5   :  { %v6815_v13 = vld [vmem:[%s10663_s1 + $0x8] sm:$0xff]   ;;  %v6817_v15 = vld [vmem:[%s10663_s1] sm:$0xff]   ;;  %v6819_v17 = vld [vmem:[%s10663_s1 + $0x78] sm:$0xff]  }
   0x6   :  { %1653 = vmatpush1.bf16.msra.mxu0 %v6805_v3  ;;  %v6816_v14 = vld [vmem:[%s10663_s1 + $0x88] sm:$0xff]   ;;  %v6818_v16 = vld [vmem:[%s10663_s1 + $0x80] sm:$0xff]   ;;  %v6820_v18 = vld [vmem:[%s10663_s1 + $0xf8] sm:$0xff]  }
   0x7   :  { %1942 = vmatpush1.bf16.msra.mxu1 %v6806_v4  ;;  %1654 = vmatprep.subr.bf16.mxu0 %v10669_v0  ;;  %v7159_v19 = vld [vmem:[%s10664_s0] sm:$0xff]   ;;  %v7164_v20 = vld [vmem:[%s10664_s0 + $0x8] ss:$0 sps:$4 sm:$0x11]   ;;  %v6821_v21 = vld [vmem:[%s10663_s1 + $0x70] sm:$0xff]  }
   0x8   :  { %1943 = vmatprep.subr.bf16.mxu1 %v10669_v0  ;;  %v419_v22 = vshrl.u32 %v7159_v19, 16  ;;  %v421_v23 = vshll.u32 %v7159_v19, 16  ;;  %v426_v24 = vshll.u32 %v7164_v20, 16  ;;  %v7175_v25 = vld [vmem:[%s10664_s0 + $0xc] sm:$0xff]   ;;  %v6825_v33 = vld [vmem:[%s10663_s1 + $0x60] sm:$0xff]   ;;  %v6827_v35 = vld [vmem:[%s10663_s1 + $0x58] sm:$0xff]  }
   0x9   :  { %v6822_v26 = vld [vmem:[%s10663_s1 + $0xf0] sm:$0xff]   ;;  %1971 = vmatprep.mubr.bf16.mxu1 %v7175_v25  ;;  %v6823_v29 = vld [vmem:[%s10663_s1 + $0x68] sm:$0xff]   ;;  %v6826_v34 = vld [vmem:[%s10663_s1 + $0xe0] sm:$0xff]   ;;  %v433_v40 = vshll.u32 %v7175_v25, 16  ;;  %v431_v44 = vshrl.u32 %v7175_v25, 16  ;;  %v835_v50 = vrot.slane %v7159_v19, 1 }
   0xa   :  { %1655 = vmatpush1.bf16.msra.mxu0 %v6807_v5  ;;  %v423_v27 = vrot.slane %v421_v23, 1  ;;  %v428_v28 = vrot.slane %v426_v24, 1  ;;  %v6824_v31 = vld [vmem:[%s10663_s1 + $0xe8] sm:$0xff]   ;;  %v6828_v36 = vld [vmem:[%s10663_s1 + $0xd8] sm:$0xff]   ;;  %v6829_v37 = vld [vmem:[%s10663_s1 + $0x50] sm:$0xff]   ;;  %v836_v51 = vrot.slane %v7164_v20, 1 }
   0xb   :  { %1944 = vmatpush1.bf16.msra.mxu1 %v6808_v6  ;;  %1656 = vmatprep.subr.bf16.mxu0 %v10669_v0  ;;  %v6830_v38 = vld [vmem:[%s10663_s1 + $0xd0] sm:$0xff]   ;;  %v6831_v41 = vld [vmem:[%s10663_s1 + $0x48] sm:$0xff]   ;;  %v7230_v43 = vld [vmem:[%s10664_s0 + $0x18] sm:$0xff]   ;;  %v435_v45 = vrot.slane %v433_v40, 1  ;;  %v838_v62 = vrot.slane %v7175_v25, 1 }
   0xc   :  { %1945 = vmatprep.subr.bf16.mxu1 %v10669_v0  ;;  %v424_v30 = vor.u32 %v423_v27, %v419_v22  ;;  %v6839_v39 = vld [vmem:[%s10664_s0 + $0x14] ss:$0 sps:$4 sm:$0x11]   ;;  %v6832_v42 = vld [vmem:[%s10663_s1 + $0xc8] sm:$0xff]   ;;  %v6833_v47 = vld [vmem:[%s10663_s1 + $0x40] sm:$0xff]   ;;  %v445_v52 = vshll.u32 %v7230_v43, 16  ;;  %v837_v57 = vsel %vm834_vm1, %v835_v50, %v836_v51 }
   0xd   :  { %v438_v46 = vshll.u32 %v6839_v39, 16  ;;  %v6841_v48 = vld [vmem:[%s10664_s0 + $0x20] ss:$0 sps:$4 sm:$0x11]   ;;  %v436_v53 = vor.u32 %v435_v45, %v431_v44  ;;  %v6838_v55 = vld [vmem:[%s10663_s1 + $0x138] sm:$0xff]   ;;  %v443_v58 = vshrl.u32 %v7230_v43, 16  ;;  %vm8675_vm4 = vmand %vm3488_vm2, %vm3489_vm3 }
   0xe   :  { %1657 = vmatpush1.bf16.msra.mxu0 %v6809_v7  ;;  %v429_v32 = vsel %vm417_vm0, %v424_v30, %v428_v28  ;;  %v6836_v49 = vld [vmem:[%s10663_s1 + $0xc0] sm:$0xff]   ;;  %v450_v56 = vshll.u32 %v6841_v48, 16  ;;  %v447_v59 = vrot.slane %v445_v52, 1  ;;  %v839_v63 = vrot.slane %v6839_v39, 1  ;;  %v6843_v2 = vld [vmem:[%s10663_s1 + $0x130] sm:$0xff]   ;;  %v7343_v39 = vld [vmem:[%s10664_s0 + $0x48] sm:$0xff]  }
   0xf   :  { %1946 = vmatpush1.bf16.msra.mxu1 %v6810_v8  ;;  %1658 = vmatprep.subr.bf16.mxu0 %v10669_v0  ;;  %v440_v54 = vrot.slane %v438_v46, 1  ;;  %v7257_v60 = vld [vmem:[%s10664_s0 + $0x24] sm:$0xff]   ;;  %v6844_v4 = vld [vmem:[%s10664_s0 + $0x2c] ss:$0 sps:$4 sm:$0x11]   ;;  %v7281_v7 = vld [vmem:[%s10664_s0 + $0x30] sm:$0xff]  }
  0x10   :  { %1947 = vmatprep.subr.bf16.mxu1 %v10669_v0  ;;  %1682 = vmatprep.mubr.bf16.mxu0 %v429_v32  ;;  %v452_v1 = vrot.slane %v450_v56, 1  ;;  %v448_v3 = vor.u32 %v447_v59, %v443_v58  ;;  %v457_v5 = vshll.u32 %v7257_v60, 16  ;;  %v7276_v6 = vsel %vm834_vm1, %v838_v62, %v839_v63  ;;  %v6868_v40 = vld [vmem:[%s10663_s1 + $0x108] sm:$0xff]   ;;  %v6854_v59 = vld [vmem:[%s10664_s0 + $0x5c] ss:$0 sps:$4 sm:$0x11]  }
  0x11   :  { %v7260_v61 = vsel %vm417_vm0, %v436_v53, %v440_v54  ;;  %v467_v23 = vshrl.u32 %v7281_v7, 16  ;;  %v844_v27 = vrot.slane %v7257_v60, 1  ;;  %v845_v28 = vrot.slane %v6844_v4, 1  ;;  %v6879_v54 = vld [vmem:[%s10663_s1 + $0x178] sm:$0xff]   ;;  %v6884_v62 = vld [vmem:[%s10663_s1 + $0x170] sm:$0xff]  }
  0x12   :  { %1659 = vmatpush1.bf16.msra.mxu0 %v6811_v9  ;;  %v7284_v8 = vsel %vm417_vm0, %v448_v3, %v452_v1  ;;  %v455_v9 = vshrl.u32 %v7257_v60, 16  ;;  %v493_v46 = vshll.u32 %v7343_v39, 16  ;;  %v491_v51 = vshrl.u32 %v7343_v39, 16 }
  0x13   :  { %1948 = vmatpush1.bf16.msra.mxu1 %v6812_v10  ;;  %1660 = vmatprep.subr.bf16.mxu0 %v10669_v0  ;;  %v459_v10 = vrot.slane %v457_v5, 1  ;;  %v6855_v5 = vld [vmem:[%s10664_s0 + $0x60] sm:$0xff]  }
  0x14   :  { %1949 = vmatprep.subr.bf16.mxu1 %v10669_v0  ;;  %v495_v52 = vrot.slane %v493_v46, 1 }
  0x16   :  { %1661 = vmatpush1.bf16.msra.mxu0 %v6813_v11  ;;  %v462_v11 = vshll.u32 %v6844_v4, 16  ;;  %v510_v4 = vshll.u32 %v6854_v59, 16 }
  0x17   :  { %1950 = vmatpush1.bf16.msra.mxu1 %v6814_v12  ;;  %1662 = vmatprep.subr.bf16.mxu0 %v10669_v0  ;;  %v6848_v12 = vld [vmem:[%s10663_s1 + $0x128] sm:$0xff]  }
  0x18   :  { %1951 = vmatprep.subr.bf16.mxu1 %v10669_v0 }
  0x1a   :  { %1663 = vmatpush1.bf16.msra.mxu0 %v6815_v13  ;;  %v6846_v13 = vld [vmem:[%s10664_s0 + $0x38] ss:$0 sps:$4 sm:$0x11]  }
  0x1b   :  { %1952 = vmatpush1.bf16.msra.mxu1 %v6816_v14  ;;  %1664 = vmatprep.subr.bf16.mxu0 %v10669_v0  ;;  %v841_v14 = vrot.slane %v7230_v43, 1 }
  0x1c   :  { %1953 = vmatprep.subr.bf16.mxu1 %v10669_v0 }
  0x1e   :  { %1665 = vmatpush1.bf16.msra.mxu0 %v6817_v15  ;;  %v842_v15 = vrot.slane %v6841_v48, 1 }
  0x1f   :  { %1954 = vmatpush1.bf16.msra.mxu1 %v6818_v16  ;;  %1666 = vmatprep.subr.bf16.mxu0 %v10669_v0  ;;  %v460_v16 = vor.u32 %v459_v10, %v455_v9  ;;  %v853_v9 = vrot.slane %v7343_v39, 1 }
  0x20   :  { %1955 = vmatprep.subr.bf16.mxu1 %v10669_v0  ;;  %v7305_v20 = vsel %vm834_vm1, %v841_v14, %v842_v15  ;;  %v517_v14 = vshll.u32 %v6855_v5, 16  ;;  %v515_v15 = vshrl.u32 %v6855_v5, 16 }
  0x22   :  { %1667 = vmatpush2.bf16.msra.mxu0 %v6819_v17  ;;  %v464_v17 = vrot.slane %v462_v11, 1  ;;  %v6856_v11 = vld [vmem:[%s10664_s0 + $0x68] ss:$0 sps:$4 sm:$0x11]  }
  0x23   :  { %1956 = vmatpush2.bf16.msra.mxu1 %v6820_v18  ;;  %1668 = vmatprep.subr.bf16.mxu0 %v10669_v0  ;;  %v469_v18 = vshll.u32 %v7281_v7, 16 }
  0x24   :  { %1957 = vmatprep.subr.bf16.mxu1 %v10669_v0  ;;  %v7313_v22 = vsel %vm417_vm0, %v460_v16, %v464_v17  ;;  %v7417_v16 = vld [vmem:[%s10664_s0 + $0x6c] sm:$0xff]  }
  0x25   :  { %v471_v24 = vrot.slane %v469_v18, 1 }
  0x26   :  { %1669 = vmatpush2.bf16.msra.mxu0 %v6821_v21  ;;  %v7310_v21 = vld [vmem:[%s10664_s0 + $0x3c] sm:$0xff]  }
  0x27   :  { %1958 = vmatpush2.bf16.msra.mxu1 %v6822_v26  ;;  %1670 = vmatprep.subr.bf16.mxu0 %v10669_v0  ;;  %v6858_v26 = vld [vmem:[%s10663_s1 + $0x118] sm:$0xff]   ;;  %v481_v30 = vshll.u32 %v7310_v21, 16 }
  0x28   :  { %1959 = vmatprep.subr.bf16.mxu1 %v10669_v0 }
  0x2a   :  { %1671 = vmatpush2.bf16.msra.mxu0 %v6823_v29  ;;  %v6849_v29 = vld [vmem:[%s10664_s0 + $0x44] ss:$0 sps:$4 sm:$0x11]  }
  0x2b   :  { %1960 = vmatpush2.bf16.msra.mxu1 %v6824_v31  ;;  %1672 = vmatprep.subr.bf16.mxu0 %v10669_v0  ;;  %v472_v31 = vor.u32 %v471_v24, %v467_v23  ;;  %v851_v56 = vrot.slane %v6849_v29, 1  ;;  %v6859_v23 = vld [vmem:[%s10664_s0 + $0x74] ss:$0 sps:$4 sm:$0x11]   ;;  %v6894_v24 = vld [vmem:[%s10663_s1 + $0x160] sm:$0xff]  }
  0x2c   :  { %1961 = vmatprep.subr.bf16.mxu1 %v10669_v0 }
  0x2e   :  { %1673 = vmatpush2.bf16.msra.mxu0 %v6825_v33  ;;  %v6863_v33 = vld [vmem:[%s10663_s1 + $0x110] sm:$0xff]  }
  0x2f   :  { %1962 = vmatpush2.bf16.msra.mxu1 %v6826_v34  ;;  %1674 = vmatprep.subr.bf16.mxu0 %v10669_v0  ;;  %v479_v34 = vshrl.u32 %v7310_v21, 16 }
  0x30   :  { %1963 = vmatprep.subr.bf16.mxu1 %v10669_v0 }
  0x32   :  { %1675 = vmatpush2.bf16.msra.mxu0 %v6827_v35  ;;  %v7335_v35 = vsel %vm834_vm1, %v844_v27, %v845_v28 }
  0x33   :  { %1964 = vmatpush2.bf16.msra.mxu1 %v6828_v36  ;;  %1676 = vmatprep.subr.bf16.mxu0 %v10669_v0 }
  0x34   :  { %1965 = vmatprep.subr.bf16.mxu1 %v10669_v0 }
  0x36   :  { %1677 = vmatpush2.bf16.msra.mxu0 %v6829_v37  ;;  %v483_v37 = vrot.slane %v481_v30, 1  ;;  %v527_v30 = vshrl.u32 %v7417_v16, 16 }
  0x37   :  { %1966 = vmatpush2.bf16.msra.mxu1 %v6830_v38  ;;  %1678 = vmatprep.subr.bf16.mxu0 %v10669_v0  ;;  %v486_v38 = vshll.u32 %v6849_v29, 16  ;;  %v529_v29 = vshll.u32 %v7417_v16, 16 }
  0x38   :  { %1967 = vmatprep.subr.bf16.mxu1 %v10669_v0  ;;  %v484_v44 = vor.u32 %v483_v37, %v479_v34  ;;  %v534_v37 = vshll.u32 %v6859_v23, 16 }
  0x39   :  { %v488_v45 = vrot.slane %v486_v38, 1  ;;  %v531_v34 = vrot.slane %v529_v29, 1  ;;  %v6861_v38 = vld [vmem:[%s10664_s0 + $0x80] ss:$0 sps:$4 sm:$0x11]  }
  0x3a   :  { %1679 = vmatpush2.bf16.msra.mxu0 %v6831_v41  ;;  %v847_v41 = vrot.slane %v7281_v7, 1 }
  0x3b   :  { %1968 = vmatpush2.bf16.msra.mxu1 %v6832_v42  ;;  %1680 = vmatprep.subr.bf16.mxu0 %v10669_v0  ;;  %v848_v42 = vrot.slane %v6846_v13, 1  ;;  %v7371_v50 = vsel %vm417_vm0, %v484_v44, %v488_v45  ;;  %v546_v45 = vshll.u32 %v6861_v38, 16 }
  0x3c   :  { %1969 = vmatprep.subr.bf16.mxu1 %v10669_v0 }
  0x3d   :  { %v7363_v48 = vsel %vm834_vm1, %v847_v41, %v848_v42  ;;  %v532_v41 = vor.u32 %v531_v34, %v527_v30  ;;  %v536_v42 = vrot.slane %v534_v37, 1  ;;  %v6908_v30 = vld [vmem:[%s10663_s1 + $0x150] sm:$0xff]   ;;  %v6909_v34 = vld [vmem:[%s10663_s1 + $0x198] sm:$0xff]  }
  0x3e   :  { %1681 = vmatpush2.bf16.msra.mxu0 %v6833_v47  ;;  %v6873_v47 = vld [vmem:[%s10663_s1 + $0x100] sm:$0xff]  }
  0x3f   :  { %1970 = vmatpush2.bf16.msra.mxu1 %v6836_v49  ;;  %2228 = vmatprep.subr.bf16.mxu0 %v10669_v0  ;;  %v7368_v49 = vld [vmem:[%s10664_s0 + $0x54] sm:$0xff]  }
  0x40   :  { %2517 = vmatprep.subr.bf16.mxu1 %v10669_v0 }
  0x41   :  { %1683 = vmatmul.mubr.bf16.vlgmr.msra.gmra.mxu0 %v7159_v19  ;;  %v6853_v19 = vld [vmem:[%s10663_s1 + $0x120] sm:$0xff]  }
  0x42   :  { %2229 = vmatpush1.bf16.msra.mxu0 %v6838_v55  ;;  %1972 = vmatmul.mubr.bf16.vlgmr.msra.gmra.mxu1 %v837_v57  ;;  %v850_v55 = vrot.slane %v7310_v21, 1  ;;  %v496_v57 = vor.u32 %v495_v52, %v491_v51  ;;  %v7467_v51 = vld [vmem:[%s10664_s0 + $0x84] sm:$0xff]   ;;  %v862_v52 = vrot.slane %v7417_v16, 1 }
  0x43   :  { %1690 = vmatprep.mubr.bf16.mxu0 %v7260_v61  ;;  %1979 = vmatprep.mubr.bf16.mxu1 %v7230_v43 }
  0x44   :  { %2230 = vmatprep.subr.bf16.mxu0 %v10669_v0  ;;  %v7392_v63 = vsel %vm834_vm1, %v850_v55, %v851_v56  ;;  %v6899_v55 = vld [vmem:[%s10663_s1 + $0x158] sm:$0xff]  }
  0x45   :  { %v6900_v56 = vld [vmem:[%s10663_s1 + $0x1b8] sm:$0xff]  }
  0x46   :  { %2231 = vmatpush1.bf16.msra.mxu0 %v6843_v2  ;;  %v503_v2 = vshrl.u32 %v7368_v49, 16  ;;  %2518 = vmatpush1.bf16.msra.mxu1 %v6900_v56 }
  0x47   :  { %2232 = vmatprep.subr.bf16.mxu0 %v10669_v0  ;;  %2519 = vmatprep.subr.bf16.mxu1 %v10669_v0 }
  0x49   :  { %1691 = vmatmul.mubr.bf16.gmra.mxu0 %v7175_v25  ;;  %v474_v25 = vshll.u32 %v6846_v13, 16  ;;  %v512_v13 = vrot.slane %v510_v4, 1 }
  0x4a   :  { %1980 = vmatmul.mubr.bf16.gmra.mxu1 %v7276_v6  ;;  %1698 = vmatprep.mubr.bf16.mxu0 %v7284_v8 }
  0x4b   :  { %1987 = vmatprep.mubr.bf16.mxu1 %v7257_v60  ;;  %2233 = vmatpush1.bf16.msra.mxu0 %v6848_v12  ;;  %v476_v32 = vrot.slane %v474_v25, 1  ;;  %v856_v25 = vrot.slane %v7368_v49, 1 }
  0x4c   :  { %2234 = vmatprep.subr.bf16.mxu0 %v10669_v0 }
  0x4d   :  { %v7338_v36 = vsel %vm417_vm0, %v472_v31, %v476_v32  ;;  %v7441_v31 = vld [vmem:[%s10664_s0 + $0x78] sm:$0xff]  }
  0x4e   :  { %v539_v44 = vshrl.u32 %v7441_v31, 16 }
  0x4f   :  { %2235 = vmatpush1.bf16.msra.mxu0 %v6853_v19  ;;  %v519_v19 = vrot.slane %v517_v14, 1 }
  0x50   :  { %2236 = vmatprep.subr.bf16.mxu0 %v10669_v0 }
  0x51   :  { %1699 = vmatmul.mubr.bf16.gmra.mxu0 %v7230_v43  ;;  %v6851_v43 = vld [vmem:[%s10664_s0 + $0x50] ss:$0 sps:$4 sm:$0x11]   ;;  %v520_v27 = vor.u32 %v519_v19, %v515_v15 }
  0x52   :  { %1988 = vmatmul.mubr.bf16.gmra.mxu1 %v7305_v20  ;;  %1706 = vmatprep.mubr.bf16.mxu0 %v7313_v22  ;;  %v498_v53 = vshll.u32 %v6851_v43, 16  ;;  %v854_v10 = vrot.slane %v6851_v43, 1  ;;  %v541_v43 = vshll.u32 %v7441_v31, 16 }
  0x53   :  { %1995 = vmatprep.mubr.bf16.mxu1 %v7281_v7  ;;  %2237 = vmatpush1.bf16.msra.mxu0 %v6858_v26  ;;  %v857_v26 = vrot.slane %v6854_v59, 1  ;;  %v553_v59 = vshll.u32 %v7467_v51, 16 }
  0x54   :  { %2238 = vmatprep.subr.bf16.mxu0 %v10669_v0  ;;  %v500_v58 = vrot.slane %v498_v53, 1  ;;  %v7420_v17 = vsel %vm834_vm1, %v853_v9, %v854_v10  ;;  %v863_v53 = vrot.slane %v6859_v23, 1  ;;  %v6866_v9 = vld [vmem:[%s10664_s0 + $0x98] ss:$0 sps:$4 sm:$0x11]   ;;  %v865_v10 = vrot.slane %v7441_v31, 1 }
  0x55   :  { %v7444_v32 = vsel %vm834_vm1, %v856_v25, %v857_v26  ;;  %v570_v26 = vshll.u32 %v6866_v9, 16 }
  0x56   :  { %v7395_v1 = vsel %vm417_vm0, %v496_v57, %v500_v58  ;;  %v6864_v58 = vld [vmem:[%s10664_s0 + $0x8c] ss:$0 sps:$4 sm:$0x11]  }
  0x57   :  { %2239 = vmatpush1.bf16.msra.mxu0 %v6863_v33  ;;  %v572_v37 = vrot.slane %v570_v26, 1 }
  0x58   :  { %2240 = vmatprep.subr.bf16.mxu0 %v10669_v0 }
  0x59   :  { %1707 = vmatmul.mubr.bf16.gmra.mxu0 %v7257_v60  ;;  %v505_v60 = vshll.u32 %v7368_v49, 16 }
  0x5a   :  { %1996 = vmatmul.mubr.bf16.gmra.mxu1 %v7335_v35  ;;  %1714 = vmatprep.mubr.bf16.mxu0 %v7338_v36 }
  0x5b   :  { %2003 = vmatprep.mubr.bf16.mxu1 %v7310_v21  ;;  %2241 = vmatpush1.bf16.msra.mxu0 %v6868_v40  ;;  %v507_v3 = vrot.slane %v505_v60, 1  ;;  %v860_v40 = vrot.slane %v6856_v11, 1  ;;  %v7486_v60 = vld [vmem:[%s10664_s0 + $0x90] sm:$0xff]  }
  0x5c   :  { %2242 = vmatprep.subr.bf16.mxu0 %v10669_v0  ;;  %v565_v15 = vshll.u32 %v7486_v60, 16  ;;  %v563_v19 = vshrl.u32 %v7486_v60, 16 }
  0x5d   :  { %v508_v12 = vor.u32 %v507_v3, %v503_v2  ;;  %v6902_v2 = vld [vmem:[%s10663_s1 + $0x1b0] sm:$0xff]   ;;  %v7495_v3 = vsel %vm834_vm1, %v862_v52, %v863_v53  ;;  %v872_v53 = vrot.slane %v6866_v9, 1 }
  0x5e   :  { %2520 = vmatpush1.bf16.msra.mxu1 %v6902_v2  ;;  %v567_v25 = vrot.slane %v565_v15, 1  ;;  %v6871_v52 = vld [vmem:[%s10664_s0 + $0xb0] ss:$0 sps:$4 sm:$0x11]  }
  0x5f   :  { %2243 = vmatpush1.bf16.msra.mxu0 %v6873_v47  ;;  %v7423_v18 = vsel %vm417_vm0, %v508_v12, %v512_v13  ;;  %v7462_v47 = vsel %vm417_vm0, %v532_v41, %v536_v42  ;;  %2521 = vmatprep.subr.bf16.mxu1 %v10669_v0  ;;  %v866_v12 = vrot.slane %v6861_v38, 1  ;;  %v6869_v38 = vld [vmem:[%s10664_s0 + $0xa4] ss:$0 sps:$4 sm:$0x11]   ;;  %v6911_v41 = vld [vmem:[%s10663_s1 + $0x190] sm:$0xff]  }
  0x60   :  { %2244 = vmatprep.subr.bf16.mxu0 %v10669_v0 }
  0x61   :  { %1715 = vmatmul.mubr.bf16.gmra.mxu0 %v7281_v7  ;;  %v6889_v7 = vld [vmem:[%s10663_s1 + $0x168] sm:$0xff]   ;;  %v7524_v23 = vsel %vm834_vm1, %v865_v10, %v866_v12  ;;  %v875_v10 = vrot.slane %v6869_v38, 1  ;;  %v6918_v12 = vld [vmem:[%s10663_s1 + $0x1f8] sm:$0xff]  }
  0x62   :  { %2004 = vmatmul.mubr.bf16.gmra.mxu1 %v7363_v48  ;;  %1722 = vmatprep.mubr.bf16.mxu0 %v7371_v50 }
  0x63   :  { %2011 = vmatprep.mubr.bf16.mxu1 %v7343_v39  ;;  %2245 = vmatpush2.bf16.msra.mxu0 %v6879_v54  ;;  %v548_v54 = vrot.slane %v546_v45, 1  ;;  %v7560_v45 = vld [vmem:[%s10664_s0 + $0xa8] sm:$0xff]  }
  0x64   :  { %2246 = vmatprep.subr.bf16.mxu0 %v10669_v0  ;;  %v589_v56 = vshll.u32 %v7560_v45, 16 }
  0x66   :  { %v591_v2 = vrot.slane %v589_v56, 1 }
  0x67   :  { %2247 = vmatpush2.bf16.msra.mxu0 %v6884_v62  ;;  %v551_v62 = vshrl.u32 %v7467_v51, 16 }
  0x68   :  { %2248 = vmatprep.subr.bf16.mxu0 %v10669_v0 }
  0x69   :  { %1723 = vmatmul.mubr.bf16.gmra.mxu0 %v7310_v21  ;;  %v522_v21 = vshll.u32 %v6856_v11, 16  ;;  %v6904_v11 = vld [vmem:[%s10663_s1 + $0x1a8] sm:$0xff]  }
  0x6a   :  { %2012 = vmatmul.mubr.bf16.gmra.mxu1 %v7392_v63  ;;  %1730 = vmatprep.mubr.bf16.mxu0 %v7395_v1 }
  0x6b   :  { %2019 = vmatprep.mubr.bf16.mxu1 %v7368_v49  ;;  %2249 = vmatpush2.bf16.msra.mxu0 %v6889_v7  ;;  %v524_v28 = vrot.slane %v522_v21, 1  ;;  %v558_v7 = vshll.u32 %v6864_v58, 16  ;;  %v6906_v21 = vld [vmem:[%s10663_s1 + $0x1a0] sm:$0xff]  }
  0x6c   :  { %2250 = vmatprep.subr.bf16.mxu0 %v10669_v0  ;;  %2522 = vmatpush1.bf16.msra.mxu1 %v6904_v11  ;;  %v6917_v11 = vld [vmem:[%s10663_s1 + $0x148] sm:$0xff]  }
  0x6d   :  { %v7447_v33 = vsel %vm417_vm0, %v520_v27, %v524_v28  ;;  %v560_v14 = vrot.slane %v558_v7, 1  ;;  %2523 = vmatprep.subr.bf16.mxu1 %v10669_v0  ;;  %v868_v27 = vrot.slane %v7467_v51, 1  ;;  %v869_v28 = vrot.slane %v6864_v58, 1  ;;  %v6915_v58 = vld [vmem:[%s10663_s1 + $0x180] sm:$0xff]   ;;  %v7589_v7 = vld [vmem:[%s10664_s0 + $0xb4] sm:$0xff]  }
  0x6e   :  { %v601_v15 = vshll.u32 %v7589_v7, 16  ;;  %v599_v26 = vshrl.u32 %v7589_v7, 16 }
  0x6f   :  { %2251 = vmatpush2.bf16.msra.mxu0 %v6894_v24  ;;  %v7552_v42 = vsel %vm834_vm1, %v868_v27, %v869_v28 }
  0x70   :  { %2252 = vmatprep.subr.bf16.mxu0 %v10669_v0  ;;  %2524 = vmatpush1.bf16.msra.mxu1 %v6906_v21  ;;  %v6920_v21 = vld [vmem:[%s10663_s1 + $0x1f0] sm:$0xff]   ;;  %v603_v27 = vrot.slane %v601_v15, 1 }
  0x71   :  { %1731 = vmatmul.mubr.bf16.gmra.mxu0 %v7343_v39  ;;  %v859_v39 = vrot.slane %v6855_v5, 1  ;;  %2525 = vmatprep.subr.bf16.mxu1 %v10669_v0  ;;  %v6881_v15 = vld [vmem:[%s10664_s0 + $0xf0] sm:$0xff]  }
  0x72   :  { %2020 = vmatmul.mubr.bf16.gmra.mxu1 %v7420_v17  ;;  %1738 = vmatprep.mubr.bf16.mxu0 %v7423_v18 }
  0x73   :  { %2027 = vmatprep.mubr.bf16.mxu1 %v6855_v5  ;;  %v7459_v46 = vsel %vm834_vm1, %v859_v39, %v860_v40  ;;  %2253 = vmatpush2.bf16.msra.mxu0 %v6899_v55 }
  0x74   :  { %2254 = vmatprep.subr.bf16.mxu0 %v10669_v0  ;;  %2526 = vmatpush1.bf16.msra.mxu1 %v6909_v34  ;;  %v878_v34 = vrot.slane %v6871_v52, 1 }
  0x75   :  { %2527 = vmatprep.subr.bf16.mxu1 %v10669_v0 }
  0x77   :  { %2255 = vmatpush2.bf16.msra.mxu0 %v6908_v30  ;;  %v877_v30 = vrot.slane %v7560_v45, 1 }
  0x78   :  { %2256 = vmatprep.subr.bf16.mxu0 %v10669_v0  ;;  %2528 = vmatpush1.bf16.msra.mxu1 %v6911_v41  ;;  %v6924_v41 = vld [vmem:[%s10663_s1 + $0x1e0] sm:$0xff]  }
  0x79   :  { %1739 = vmatmul.mubr.bf16.gmra.mxu0 %v7368_v49  ;;  %v543_v49 = vrot.slane %v541_v43, 1  ;;  %2529 = vmatprep.subr.bf16.mxu1 %v10669_v0 }
  0x7a   :  { %2028 = vmatmul.mubr.bf16.gmra.mxu1 %v7444_v32  ;;  %1746 = vmatprep.mubr.bf16.mxu0 %v7447_v33 }
  0x7b   :  { %2035 = vmatprep.mubr.bf16.mxu1 %v7417_v16  ;;  %v544_v57 = vor.u32 %v543_v49, %v539_v44  ;;  %v582_v44 = vshll.u32 %v6869_v38, 16  ;;  %v871_v49 = vrot.slane %v7486_v60, 1  ;;  %2257 = vmatpush2.bf16.msra.mxu0 %v6917_v11  ;;  %v6929_v11 = vld [vmem:[%s10663_s1 + $0x1d0] sm:$0xff]  }
  0x7c   :  { %2258 = vmatprep.subr.bf16.mxu0 %v10669_v0 }
  0x7d   :  { %v7498_v4 = vsel %vm417_vm0, %v544_v57, %v548_v54  ;;  %v6913_v54 = vld [vmem:[%s10663_s1 + $0x188] sm:$0xff]   ;;  %v584_v55 = vrot.slane %v582_v44, 1  ;;  %v7577_v57 = vsel %vm834_vm1, %v871_v49, %v872_v53  ;;  %v6875_v49 = vld [vmem:[%s10664_s0 + $0xc0] sm:$0xff]  }
  0x7e   :  { %2530 = vmatpush1.bf16.msra.mxu1 %v6913_v54 }
  0x7f   :  { %2531 = vmatprep.subr.bf16.mxu1 %v10669_v0 }
  0x81   :  { %1747 = vmatmul.mubr.bf16.gmra.mxu0 %v6855_v5  ;;  %v555_v5 = vrot.slane %v553_v59, 1 }
  0x82   :  { %2036 = vmatmul.mubr.bf16.gmra.mxu1 %v7459_v46  ;;  %1754 = vmatprep.mubr.bf16.mxu0 %v7462_v47 }
  0x83   :  { %2043 = vmatprep.mubr.bf16.mxu1 %v7441_v31  ;;  %v556_v13 = vor.u32 %v555_v5, %v551_v62  ;;  %v587_v62 = vshrl.u32 %v7560_v45, 16  ;;  %v594_v5 = vshll.u32 %v6871_v52, 16  ;;  %2532 = vmatpush1.bf16.msra.mxu1 %v6915_v58  ;;  %v6926_v58 = vld [vmem:[%s10663_s1 + $0x140] sm:$0xff]  }
  0x84   :  { %2533 = vmatprep.subr.bf16.mxu1 %v10669_v0  ;;  %2259 = vmatpush2.bf16.msra.mxu0 %v6926_v58 }
  0x85   :  { %v7527_v24 = vsel %vm417_vm0, %v556_v13, %v560_v14  ;;  %v596_v13 = vrot.slane %v594_v5, 1  ;;  %v6874_v14 = vld [vmem:[%s10664_s0 + $0xbc] ss:$0 sps:$4 sm:$0x11]  }
  0x86   :  { %v606_v28 = vshll.u32 %v6874_v14, 16  ;;  %v881_v56 = vrot.slane %v6874_v14, 1  ;;  %v6880_v5 = vld [vmem:[%s10664_s0 + $0xec] ss:$0 sps:$4 sm:$0x11]  }
  0x87   :  { %2534 = vmatpush2.bf16.msra.mxu1 %v6918_v12  ;;  %v630_v14 = vshll.u32 %v6880_v5, 16 }
  0x88   :  { %2535 = vmatprep.subr.bf16.mxu1 %v10669_v0  ;;  %v608_v38 = vrot.slane %v606_v28, 1 }
  0x89   :  { %1755 = vmatmul.mubr.bf16.gmra.mxu0 %v7417_v16  ;;  %v7516_v16 = vld [vmem:[%s10664_s0 + $0x9c] sm:$0xff]  }
  0x8a   :  { %2044 = vmatmul.mubr.bf16.gmra.mxu1 %v7495_v3  ;;  %1762 = vmatprep.mubr.bf16.mxu0 %v7498_v4  ;;  %v577_v29 = vshll.u32 %v7516_v16, 16  ;;  %v575_v39 = vshrl.u32 %v7516_v16, 16  ;;  %v874_v9 = vrot.slane %v7516_v16, 1 }
  0x8b   :  { %2051 = vmatprep.mubr.bf16.mxu1 %v7467_v51  ;;  %2536 = vmatpush2.bf16.msra.mxu1 %v6920_v21 }
  0x8c   :  { %v579_v40 = vrot.slane %v577_v29, 1  ;;  %v7622_v29 = vld [vmem:[%s10664_s0 + $0xd8] sm:$0xff]   ;;  %2537 = vmatprep.subr.bf16.mxu1 %v10669_v0 }
  0x8d   :  { %v611_v52 = vshrl.u32 %v7622_v29, 16  ;;  %v883_v21 = vrot.slane %v7622_v29, 1 }
  0x91   :  { %1763 = vmatmul.mubr.bf16.gmra.mxu0 %v7441_v31  ;;  %v568_v31 = vor.u32 %v567_v25, %v563_v19  ;;  %v7610_v19 = vsel %vm834_vm1, %v874_v9, %v875_v10 }
  0x92   :  { %2052 = vmatmul.mubr.bf16.gmra.mxu1 %v7524_v23  ;;  %1770 = vmatprep.mubr.bf16.mxu0 %v7527_v24  ;;  %10798 = vst [vmem:[#allocation2_spill] sm:$0xff] %v7610_v19 }
  0x93   :  { %2059 = vmatprep.mubr.bf16.mxu1 %v7486_v60  ;;  %v7555_v43 = vsel %vm417_vm0, %v568_v31, %v572_v37  ;;  %v6922_v31 = vld [vmem:[%s10663_s1 + $0x1e8] sm:$0xff]   ;;  %v604_v37 = vor.u32 %v603_v27, %v599_v26 }
  0x94   :  { %2538 = vmatpush2.bf16.msra.mxu1 %v6922_v31  ;;  %v6931_v27 = vld [vmem:[%s10663_s1 + $0x1c8] sm:$0xff]  }
  0x95   :  { %2539 = vmatprep.subr.bf16.mxu1 %v10669_v0  ;;  %v7645_v44 = vsel %vm417_vm0, %v604_v37, %v608_v38  ;;  %v6932_v37 = vld [vmem:[%s10663_s1 + $0x1c0] sm:$0xff]  }
  0x98   :  { %2540 = vmatpush2.bf16.msra.mxu1 %v6924_v41 }
  0x99   :  { %1771 = vmatmul.mubr.bf16.gmra.mxu0 %v7467_v51  ;;  %v580_v51 = vor.u32 %v579_v40, %v575_v39  ;;  %v613_v39 = vshll.u32 %v7622_v29, 16  ;;  %v7639_v40 = vsel %vm834_vm1, %v877_v30, %v878_v34  ;;  %2541 = vmatprep.subr.bf16.mxu1 %v10669_v0  ;;  %v632_v30 = vrot.slane %v630_v14, 1 }
  0x9a   :  { %2060 = vmatmul.mubr.bf16.gmra.mxu1 %v7552_v42  ;;  %1778 = vmatprep.mubr.bf16.mxu0 %v7555_v43  ;;  %v637_v34 = vshll.u32 %v6881_v15, 16 }
  0x9b   :  { %2067 = vmatprep.mubr.bf16.mxu1 %v7516_v16  ;;  %v7583_v59 = vsel %vm417_vm0, %v580_v51, %v584_v55  ;;  %v615_v53 = vrot.slane %v613_v39, 1  ;;  %v7654_v51 = vld [vmem:[%s10664_s0 + $0xe4] sm:$0xff]   ;;  %v880_v55 = vrot.slane %v7589_v7, 1 }
  0x9c   :  { %v625_v9 = vshll.u32 %v7654_v51, 16  ;;  %v639_v39 = vrot.slane %v637_v34, 1 }
  0x9d   :  { %v7673_v10 = vsel %vm834_vm1, %v880_v55, %v881_v56 }
  0xa1   :  { %1779 = vmatmul.mubr.bf16.gmra.mxu0 %v7486_v60  ;;  %v592_v60 = vor.u32 %v591_v2, %v587_v62  ;;  %v6927_v62 = vld [vmem:[%s10663_s1 + $0x1d8] sm:$0xff]   ;;  %v616_v2 = vor.u32 %v615_v53, %v611_v52  ;;  %v886_v52 = vrot.slane %v7654_v51, 1  ;;  %v887_v53 = vrot.slane %v6880_v5, 1 }
  0xa2   :  { %2068 = vmatmul.mubr.bf16.gmra.mxu1 %v7577_v57  ;;  %1786 = vmatprep.mubr.bf16.mxu0 %v7583_v59 }
  0xa3   :  { %2075 = vmatprep.mubr.bf16.mxu1 %v7560_v45  ;;  %v7616_v25 = vsel %vm417_vm0, %v592_v60, %v596_v13  ;;  %2542 = vmatpush2.bf16.msra.mxu1 %v6927_v62  ;;  %v623_v60 = vshrl.u32 %v7654_v51, 16  ;;  %v627_v13 = vrot.slane %v625_v9, 1  ;;  %v7719_v62 = vsel %vm834_vm1, %v886_v52, %v887_v53 }
  0xa4   :  { %2543 = vmatprep.subr.bf16.mxu1 %v10669_v0 }
  0xa5   :  { %v628_v28 = vor.u32 %v627_v13, %v623_v60 }
  0xa7   :  { %2544 = vmatpush2.bf16.msra.mxu1 %v6929_v11  ;;  %v7700_v38 = vsel %vm417_vm0, %v628_v28, %v632_v30  ;;  %v6886_v11 = vld [vmem:[%s10664_s0 + $0x108] sm:$0xff]  }
  0xa8   :  { %2545 = vmatprep.subr.bf16.mxu1 %v10669_v0 }
  0xa9   :  { %1787 = vmatmul.mubr.bf16.gmra.mxu0 %v7516_v16  ;;  %v6877_v16 = vld [vmem:[%s10664_s0 + $0xe0] ss:$0 sps:$4 sm:$0x11]  }
  0xaa   :  { %2076 = vmatmul.mubr.bf16.gmra.mxu1 %v7610_v19  ;;  %1794 = vmatprep.mubr.bf16.mxu0 %v7616_v25  ;;  %v618_v54 = vshll.u32 %v6877_v16, 16  ;;  %v884_v26 = vrot.slane %v6877_v16, 1  ;;  %v635_v16 = vshrl.u32 %v6881_v15, 16 }
  0xab   :  { %2083 = vmatprep.mubr.bf16.mxu1 %v7589_v7  ;;  %2546 = vmatpush2.bf16.msra.mxu1 %v6931_v27 }
  0xac   :  { %2547 = vmatprep.subr.bf16.mxu1 %v10669_v0  ;;  %v885_v31 = vsel %vm834_vm1, %v883_v21, %v884_v26  ;;  %v640_v55 = vor.u32 %v639_v39, %v635_v16  ;;  %v6887_v21 = vld [vmem:[%s10664_s0 + $0x110] ss:$0 sps:$4 sm:$0x11]   ;;  %v661_v26 = vshll.u32 %v6886_v11, 16 }
  0xad   :  { %v666_v34 = vshll.u32 %v6887_v21, 16 }
  0xae   :  { %v663_v30 = vrot.slane %v661_v26, 1 }
  0xaf   :  { %2548 = vmatpush2.bf16.msra.mxu1 %v6932_v37  ;;  %v668_v39 = vrot.slane %v666_v34, 1 }
  0xb0   :  { %4767 = vmatprep.subr.bf16.mxu1 %v10669_v0 }
  0xb1   :  { %1795 = vmatmul.mubr.bf16.gmra.mxu0 %v7560_v45  ;;  %v620_v45 = vrot.slane %v618_v54, 1  ;;  %v7712_v54 = vld [vmem:[%s10663_s1 + $0x238] sm:$0xff]  }
  0xb2   :  { %2084 = vmatmul.mubr.bf16.gmra.mxu1 %v7639_v40  ;;  %1802 = vmatprep.mubr.bf16.mxu0 %v7645_v44 }
  0xb3   :  { %2091 = vmatprep.mubr.bf16.mxu1 %v6875_v49  ;;  %v621_v12 = vsel %vm417_vm0, %v616_v2, %v620_v45  ;;  %v6883_v49 = vld [vmem:[%s10664_s0 + $0xfc] sm:$0xff]   ;;  %6642 = vmatprep.subr.bf16.mxu0 %v7712_v54 }
  0xb4   :  { %v649_v58 = vshll.u32 %v6883_v49, 16  ;;  %v647_v45 = vshrl.u32 %v6883_v49, 16 }
  0xb6   :  { %v651_v5 = vrot.slane %v649_v58, 1 }
  0xb8   :  { %v652_v13 = vor.u32 %v651_v5, %v647_v45  ;;  %v895_v45 = vrot.slane %v6886_v11, 1  ;;  %v896_v5 = vrot.slane %v6887_v21, 1  ;;  %v6893_v21 = vld [vmem:[%s10664_s0 + $0x12c] sm:$0xff]  }
  0xb9   :  { %1803 = vmatmul.mubr.bf16.gmra.mxu0 %v7589_v7  ;;  %v6882_v7 = vld [vmem:[%s10664_s0 + $0xf8] ss:$0 sps:$4 sm:$0x11]  }
  0xba   :  { %2092 = vmatmul.mubr.bf16.gmra.mxu1 %v7673_v10  ;;  %1810 = vmatprep.mubr.bf16.mxu0 %v621_v12  ;;  %v642_v41 = vshll.u32 %v6882_v7, 16  ;;  %v889_v12 = vrot.slane %v6881_v15, 1  ;;  %v890_v60 = vrot.slane %v6882_v7, 1  ;;  %v6888_v7 = vld [vmem:[%s10664_s0 + $0x114] sm:$0xff]  }
  0xbb   :  { %2099 = vmatprep.mubr.bf16.mxu1 %v7654_v51  ;;  %v673_v52 = vshll.u32 %v6888_v7, 16  ;;  %v898_v34 = vrot.slane %v6888_v7, 1 }
  0xbc   :  { %v644_v56 = vrot.slane %v642_v41, 1  ;;  %v7734_v27 = vsel %vm834_vm1, %v889_v12, %v890_v60  ;;  %v6890_v41 = vld [vmem:[%s10664_s0 + $0x11c] ss:$0 sps:$4 sm:$0x11]  }
  0xbd   :  { %v678_v58 = vshll.u32 %v6890_v41, 16  ;;  %v6892_v60 = vld [vmem:[%s10664_s0 + $0x128] ss:$0 sps:$4 sm:$0x11]  }
  0xbe   :  { %v7722_v2 = vsel %vm417_vm0, %v640_v55, %v644_v56  ;;  %v675_v56 = vrot.slane %v673_v52, 1  ;;  %v697_v52 = vshll.u32 %v6893_v21, 16 }
  0xbf   :  { %v680_v12 = vrot.slane %v678_v58, 1 }
  0xc0   :  { %v699_v58 = vrot.slane %v697_v52, 1 }
  0xc1   :  { %1811 = vmatmul.mubr.bf16.gmra.mxu0 %v7622_v29  ;;  %v6885_v29 = vld [vmem:[%s10664_s0 + $0x104] ss:$0 sps:$4 sm:$0x11]  }
  0xc2   :  { %2100 = vmatmul.mubr.bf16.gmra.mxu1 %v885_v31  ;;  %1818 = vmatprep.mubr.bf16.mxu0 %v7700_v38  ;;  %v654_v9 = vshll.u32 %v6885_v29, 16  ;;  %v892_v31 = vrot.slane %v6883_v49, 1  ;;  %v893_v37 = vrot.slane %v6885_v29, 1  ;;  %v6891_v29 = vld [vmem:[%s10664_s0 + $0x120] sm:$0xff]  }
  0xc3   :  { %2107 = vmatprep.mubr.bf16.mxu1 %v6881_v15 }
  0xc4   :  { %v656_v14 = vrot.slane %v654_v9, 1  ;;  %v7748_v53 = vsel %vm834_vm1, %v892_v31, %v893_v37  ;;  %v899_v31 = vrot.slane %v6890_v41, 1  ;;  %v6896_v41 = vld [vmem:[%s10664_s0 + $0x138] sm:$0xff]  }
  0xc6   :  { %v7737_v28 = vsel %vm417_vm0, %v652_v13, %v656_v14  ;;  %v685_v13 = vshll.u32 %v6891_v29, 16  ;;  %v7762_v14 = vsel %vm834_vm1, %v895_v45, %v896_v5  ;;  %v901_v5 = vrot.slane %v6891_v29, 1 }
  0xc9   :  { %1819 = vmatmul.mubr.bf16.gmra.mxu0 %v7654_v51  ;;  %v659_v51 = vshrl.u32 %v6886_v11, 16 }
  0xca   :  { %2108 = vmatmul.mubr.bf16.gmra.mxu1 %v7719_v62  ;;  %1826 = vmatprep.mubr.bf16.mxu0 %v7722_v2 }
  0xcb   :  { %2115 = vmatprep.mubr.bf16.mxu1 %v6883_v49  ;;  %v664_v16 = vor.u32 %v663_v30, %v659_v51  ;;  %v687_v51 = vrot.slane %v685_v13, 1  ;;  %v690_v30 = vshll.u32 %v6892_v60, 16 }
  0xcd   :  { %v7751_v55 = vsel %vm417_vm0, %v664_v16, %v668_v39  ;;  %v692_v16 = vrot.slane %v690_v30, 1  ;;  %v6895_v39 = vld [vmem:[%s10664_s0 + $0x134] ss:$0 sps:$4 sm:$0x11]  }
  0xce   :  { %v702_v45 = vshll.u32 %v6895_v39, 16  ;;  %v905_v52 = vrot.slane %v6895_v39, 1  ;;  %v7816_v39 = vld [vmem:[%s10664_s0 + $0x150] sm:$0xff]  }
  0xd0   :  { %v704_v13 = vrot.slane %v702_v45, 1  ;;  %v6901_v45 = vld [vmem:[%s10664_s0 + $0x14c] ss:$0 sps:$4 sm:$0x11]  }
  0xd1   :  { %1827 = vmatmul.mubr.bf16.gmra.mxu0 %v6881_v15  ;;  %v671_v15 = vshrl.u32 %v6888_v7, 16 }
  0xd2   :  { %2116 = vmatmul.mubr.bf16.gmra.mxu1 %v7734_v27  ;;  %1834 = vmatprep.mubr.bf16.mxu0 %v7737_v28 }
  0xd3   :  { %2123 = vmatprep.mubr.bf16.mxu1 %v6886_v11  ;;  %v676_v9 = vor.u32 %v675_v56, %v671_v15  ;;  %v7776_v15 = vsel %vm834_vm1, %v898_v34, %v899_v31 }
  0xd4   :  { %10800 = vst [vmem:[#allocation4_spill] sm:$0xff] %v7776_v15 }
  0xd5   :  { %v7765_v26 = vsel %vm417_vm0, %v676_v9, %v680_v12  ;;  %v902_v9 = vrot.slane %v6892_v60, 1  ;;  %v7798_v60 = vld [vmem:[%s10664_s0 + $0x144] sm:$0xff]  }
  0xd6   :  { %10799 = vst [vmem:[#allocation3_spill] sm:$0xff] %v7765_v26 }
  0xd7   :  { %v7790_v30 = vsel %vm834_vm1, %v901_v5, %v902_v9  ;;  %v721_v5 = vshll.u32 %v7798_v60, 16 }
  0xd8   :  { %10802 = vst [vmem:[#allocation6_spill] sm:$0xff] %v7790_v30 }
  0xd9   :  { %1835 = vmatmul.mubr.bf16.gmra.mxu0 %v6883_v49  ;;  %v683_v49 = vshrl.u32 %v6891_v29, 16 }
  0xda   :  { %2124 = vmatmul.mubr.bf16.gmra.mxu1 %v7748_v53  ;;  %1842 = vmatprep.mubr.bf16.mxu0 %v7751_v55 }
  0xdb   :  { %2131 = vmatprep.mubr.bf16.mxu1 %v6888_v7  ;;  %v688_v37 = vor.u32 %v687_v51, %v683_v49  ;;  %v6897_v49 = vld [vmem:[%s10664_s0 + $0x140] ss:$0 sps:$4 sm:$0x11]   ;;  %v709_v51 = vshll.u32 %v6896_v41, 16 }
  0xdd   :  { %v7779_v56 = vsel %vm417_vm0, %v688_v37, %v692_v16  ;;  %v711_v31 = vrot.slane %v709_v51, 1  ;;  %v714_v37 = vshll.u32 %v6897_v49, 16  ;;  %v904_v16 = vrot.slane %v6893_v21, 1 }
  0xde   :  { %10801 = vst [vmem:[#allocation5_spill] sm:$0xff] %v7779_v56  ;;  %v726_v51 = vshll.u32 %v6901_v45, 16 }
  0xdf   :  { %v7807_v9 = vsel %vm834_vm1, %v904_v16, %v905_v52  ;;  %v6905_v52 = vld [vmem:[%s10664_s0 + $0x158] ss:$0 sps:$4 sm:$0x11]  }
  0xe0   :  { %10804 = vst [vmem:[#allocation8_spill] sm:$0xff] %v7807_v9  ;;  %v728_v16 = vrot.slane %v726_v51, 1  ;;  %v7840_v51 = vld [vmem:[%s10664_s0 + $0x15c] sm:$0xff]  }
  0xe1   :  { %1843 = vmatmul.mubr.bf16.gmra.mxu0 %v6886_v11  ;;  %v695_v11 = vshrl.u32 %v6893_v21, 16 }
  0xe2   :  { %2132 = vmatmul.mubr.bf16.gmra.mxu1 %v7762_v14  ;;  %1850 = vmatprep.mubr.bf16.mxu0 %v7765_v26 }
  0xe3   :  { %2139 = vmatprep.mubr.bf16.mxu1 %v6891_v29  ;;  %v700_v12 = vor.u32 %v699_v58, %v695_v11  ;;  %v716_v58 = vrot.slane %v714_v37, 1 }
  0xe5   :  { %v7793_v34 = vsel %vm417_vm0, %v700_v12, %v704_v13  ;;  %v719_v12 = vshrl.u32 %v7798_v60, 16  ;;  %v723_v13 = vrot.slane %v721_v5, 1  ;;  %v731_v5 = vshrl.u32 %v7816_v39, 16 }
  0xe6   :  { %10803 = vst [vmem:[#allocation7_spill] sm:$0xff] %v7793_v34 }
  0xe7   :  { %v724_v37 = vor.u32 %v723_v13, %v719_v12  ;;  %v738_v13 = vshll.u32 %v6905_v52, 16 }
  0xe9   :  { %1851 = vmatmul.mubr.bf16.gmra.mxu0 %v6888_v7  ;;  %v707_v7 = vshrl.u32 %v6896_v41, 16 }
  0xea   :  { %2140 = vmatmul.mubr.bf16.gmra.mxu1 %v7776_v15  ;;  %1858 = vmatprep.mubr.bf16.mxu0 %v7779_v56 }
  0xeb   :  { %2147 = vmatprep.mubr.bf16.mxu1 %v6893_v21  ;;  %v712_v11 = vor.u32 %v711_v31, %v707_v7  ;;  %v907_v7 = vrot.slane %v6896_v41, 1  ;;  %v908_v31 = vrot.slane %v6897_v49, 1  ;;  %v7834_v49 = vsel %vm417_vm0, %v724_v37, %v728_v16 }
  0xec   :  { %10807 = vst [vmem:[#allocation11_spill] sm:$0xff] %v7834_v49  ;;  %v910_v37 = vrot.slane %v7798_v60, 1  ;;  %v911_v16 = vrot.slane %v6901_v45, 1 }
  0xee   :  { %v7857_v45 = vsel %vm834_vm1, %v910_v37, %v911_v16  ;;  %v913_v16 = vrot.slane %v7816_v39, 1 }
  0xef   :  { %10809 = vst [vmem:[#allocation13_spill] sm:$0xff] %v7857_v45 }
  0xf1   :  { %1859 = vmatmul.mubr.bf16.gmra.mxu0 %v6891_v29  ;;  %v7810_v29 = vsel %vm417_vm0, %v712_v11, %v716_v58  ;;  %v733_v11 = vshll.u32 %v7816_v39, 16  ;;  %v7826_v58 = vsel %vm834_vm1, %v907_v7, %v908_v31 }
  0xf2   :  { %2148 = vmatmul.mubr.bf16.gmra.mxu1 %v7790_v30  ;;  %1866 = vmatprep.mubr.bf16.mxu0 %v7793_v34  ;;  %10805 = vst [vmem:[#allocation9_spill] sm:$0xff] %v7810_v29  ;;  %10806 = vst [vmem:[#allocation10_spill] sm:$0xff] %v7826_v58  ;;  %v7850_v34 = vld [vmem:[%s10664_s0 + $0x164] ss:$0 sps:$4 sm:$0x11]  }
  0xf3   :  { %2155 = vmatprep.mubr.bf16.mxu1 %v6896_v41  ;;  %v735_v12 = vrot.slane %v733_v11, 1  ;;  %v750_v15 = vshll.u32 %v7850_v34, 16 }
  0xf5   :  { %v736_v11 = vor.u32 %v735_v12, %v731_v5  ;;  %v743_v12 = vshrl.u32 %v7840_v51, 16 }
  0xf9   :  { %1867 = vmatmul.mubr.bf16.gmra.mxu0 %v6893_v21  ;;  %v7831_v21 = vld [vmem:[%s10665_s2] ss:$0 sm:$0xff] }
  0xfa   :  { %2156 = vmatmul.mubr.bf16.gmra.mxu1 %v7807_v9  ;;  %1874 = vmatprep.mubr.bf16.mxu0 %v7810_v29  ;;  %v740_v9 = vrot.slane %v738_v13, 1 }
  0xfb   :  { %2163 = vmatprep.mubr.bf16.mxu1 %v7798_v60 }
  0xfc   :  { %v7860_v5 = vsel %vm417_vm0, %v736_v11, %v740_v9  ;;  %v914_v11 = vrot.slane %v6905_v52, 1 }
  0xfd   :  { %10810 = vst [vmem:[#allocation14_spill] sm:$0xff] %v7860_v5 }
  0xfe   :  { %v7887_v52 = vsel %vm834_vm1, %v913_v16, %v914_v11 }
  0xff   :  { %10813 = vst [vmem:[#allocation17_spill] sm:$0xff] %v7887_v52 }
 0x101   :  { %v1684_v0 = vpop.f32.mrf.mxu0  ;;  %1875 = vmatmul.mubr.bf16.gmra.mxu0 %v6896_v41 }
 0x102   :  { %v1685_v7 = vadd.f32 %v7831_v21, %v1684_v0  ;;  %v1973_v31 = vpop.f32.mrf.mxu1  ;;  %2164 = vmatmul.mubr.bf16.gmra.mxu1 %v7826_v58  ;;  %1882 = vmatprep.mubr.bf16.mxu0 %v7834_v49  ;;  %v745_v0 = vshll.u32 %v7840_v51, 16 }
 0x103   :  { %v1686_v29 = vpop.f32.mrf.mxu0  ;;  %2171 = vmatprep.mubr.bf16.mxu1 %v7816_v39 }
 0x104   :  { %v7853_v41 = vadd.f32 %v1973_v31, %v1685_v7  ;;  %v1975_v58 = vpop.f32.mrf.mxu1  ;;  %v747_v13 = vrot.slane %v745_v0, 1 }
 0x105   :  { %v1687_v30 = vpop.f32.mrf.mxu0  ;;  %v7867_v58 = vld [vmem:[%s10664_s0 + $0x168] sm:$0xff]  }
 0x106   :  { %10808 = vst [vmem:[#allocation12_spill] sm:$0xff] %v7853_v41  ;;  %v1688_v49 = vadd.f32 %v7831_v21, %v1687_v30  ;;  %v1976_v56 = vpop.f32.mrf.mxu1 }
 0x107   :  { %v1689_v29 = vpop.f32.mrf.mxu0 }
 0x108   :  { %v7869_v7 = vadd.f32 %v1976_v56, %v1688_v49  ;;  %v1978_v30 = vpop.f32.mrf.mxu1  ;;  %v748_v29 = vor.u32 %v747_v13, %v743_v12  ;;  %v752_v56 = vrot.slane %v750_v15, 1  ;;  %v7880_v49 = vld [vmem:[%s10664_s0 + $0x170] ss:$0 sps:$4 sm:$0x11]   ;;  %v755_v12 = vshrl.u32 %v7867_v58, 16 }
 0x109   :  { %v1692_v31 = vpop.f32.mrf.mxu0  ;;  %1883 = vmatmul.mubr.bf16.gmra.mxu0 %v7798_v60  ;;  %v757_v60 = vshll.u32 %v7867_v58, 16 }
 0x10a   :  { %10811 = vst [vmem:[#allocation15_spill] sm:$0xff] %v7869_v7  ;;  %v1693_v37 = vadd.f32 %v7831_v21, %v1692_v31  ;;  %v1981_v9 = vpop.f32.mrf.mxu1  ;;  %2172 = vmatmul.mubr.bf16.gmra.mxu1 %v7857_v45  ;;  %1890 = vmatprep.mubr.bf16.mxu0 %v7860_v5  ;;  %v7890_v15 = vsel %vm417_vm0, %v748_v29, %v752_v56  ;;  %v762_v45 = vshll.u32 %v7880_v49, 16  ;;  %v916_v29 = vrot.slane %v7840_v51, 1 }
 0x10b   :  { %v1694_v0 = vpop.f32.mrf.mxu0  ;;  %2179 = vmatprep.mubr.bf16.mxu1 %v7840_v51  ;;  %10814 = vst [vmem:[#allocation18_spill] sm:$0xff] %v7890_v15  ;;  %v759_v13 = vrot.slane %v757_v60, 1  ;;  %v917_v56 = vrot.slane %v7850_v34, 1 }
 0x10c   :  { %v7883_v30 = vadd.f32 %v1981_v9, %v1693_v37  ;;  %v1983_v31 = vpop.f32.mrf.mxu1  ;;  %v7897_v37 = vld [vmem:[%s10664_s0 + $0x174] sm:$0xff]  }
 0x10d   :  { %v1695_v7 = vpop.f32.mrf.mxu0  ;;  %v7918_v34 = vsel %vm834_vm1, %v916_v29, %v917_v56 }
 0x10e   :  { %10812 = vst [vmem:[#allocation16_spill] sm:$0xff] %v7883_v30  ;;  %v1696_v41 = vadd.f32 %v7831_v21, %v1695_v7  ;;  %v1984_v5 = vpop.f32.mrf.mxu1  ;;  %10817 = vst [vmem:[#allocation21_spill] sm:$0xff] %v7918_v34 }
 0x10f   :  { %v1697_v0 = vpop.f32.mrf.mxu0 }
 0x110   :  { %v7899_v9 = vadd.f32 %v1984_v5, %v1696_v41  ;;  %v1986_v7 = vpop.f32.mrf.mxu1  ;;  %v760_v41 = vor.u32 %v759_v13, %v755_v12  ;;  %v764_v5 = vrot.slane %v762_v45, 1  ;;  %v769_v0 = vshll.u32 %v7897_v37, 16 }
 0x111   :  { %v1700_v31 = vpop.f32.mrf.mxu0  ;;  %1891 = vmatmul.mubr.bf16.gmra.mxu0 %v7816_v39  ;;  %v7911_v39 = vld [vmem:[%s10664_s0 + $0x17c] ss:$0 sps:$4 sm:$0x11]   ;;  %v767_v12 = vshrl.u32 %v7897_v37, 16 }
 0x112   :  { %10815 = vst [vmem:[#allocation19_spill] sm:$0xff] %v7899_v9  ;;  %v1701_v16 = vadd.f32 %v7831_v21, %v1700_v31  ;;  %v1989_v11 = vpop.f32.mrf.mxu1  ;;  %2180 = vmatmul.mubr.bf16.gmra.mxu1 %v7887_v52  ;;  %1898 = vmatprep.mubr.bf16.mxu0 %v7890_v15  ;;  %v7921_v45 = vsel %vm417_vm0, %v760_v41, %v764_v5  ;;  %v771_v13 = vrot.slane %v769_v0, 1  ;;  %v774_v52 = vshll.u32 %v7911_v39, 16 }
 0x113   :  { %v1702_v60 = vpop.f32.mrf.mxu0  ;;  %2187 = vmatprep.mubr.bf16.mxu1 %v7867_v58  ;;  %10818 = vst [vmem:[#allocation22_spill] sm:$0xff] %v7921_v45  ;;  %v919_v41 = vrot.slane %v7867_v58, 1  ;;  %v920_v5 = vrot.slane %v7880_v49, 1 }
 0x114   :  { %v7914_v7 = vadd.f32 %v1989_v11, %v1701_v16  ;;  %v1991_v31 = vpop.f32.mrf.mxu1  ;;  %v7928_v16 = vld [vmem:[%s10664_s0 + $0x180] sm:$0xff]  }
 0x115   :  { %v1703_v9 = vpop.f32.mrf.mxu0  ;;  %v7949_v49 = vsel %vm834_vm1, %v919_v41, %v920_v5 }
 0x116   :  { %10816 = vst [vmem:[#allocation20_spill] sm:$0xff] %v7914_v7  ;;  %v1704_v30 = vadd.f32 %v7831_v21, %v1703_v9  ;;  %v1992_v15 = vpop.f32.mrf.mxu1  ;;  %10821 = vst [vmem:[#allocation25_spill] sm:$0xff] %v7949_v49 }
 0x117   :  { %v1705_v60 = vpop.f32.mrf.mxu0 }
 0x118   :  { %v7930_v11 = vadd.f32 %v1992_v15, %v1704_v30  ;;  %v1994_v9 = vpop.f32.mrf.mxu1  ;;  %v772_v30 = vor.u32 %v771_v13, %v767_v12  ;;  %v776_v15 = vrot.slane %v774_v52, 1  ;;  %v781_v60 = vshll.u32 %v7928_v16, 16 }
 0x119   :  { %v1708_v31 = vpop.f32.mrf.mxu0  ;;  %1899 = vmatmul.mubr.bf16.gmra.mxu0 %v7840_v51  ;;  %v7942_v51 = vld [vmem:[%s10664_s0 + $0x188] ss:$0 sps:$4 sm:$0x11]   ;;  %v779_v12 = vshrl.u32 %v7928_v16, 16 }
 0x11a   :  { %10819 = vst [vmem:[#allocation23_spill] sm:$0xff] %v7930_v11  ;;  %v1709_v29 = vadd.f32 %v7831_v21, %v1708_v31  ;;  %v1997_v56 = vpop.f32.mrf.mxu1  ;;  %2188 = vmatmul.mubr.bf16.gmra.mxu1 %v7918_v34  ;;  %1906 = vmatprep.mubr.bf16.mxu0 %v7921_v45  ;;  %v7952_v52 = vsel %vm417_vm0, %v772_v30, %v776_v15  ;;  %v783_v13 = vrot.slane %v781_v60, 1  ;;  %v786_v34 = vshll.u32 %v7942_v51, 16 }
 0x11b   :  { %v1710_v0 = vpop.f32.mrf.mxu0  ;;  %2195 = vmatprep.mubr.bf16.mxu1 %v7897_v37  ;;  %10822 = vst [vmem:[#allocation26_spill] sm:$0xff] %v7952_v52  ;;  %v922_v30 = vrot.slane %v7897_v37, 1  ;;  %v923_v15 = vrot.slane %v7911_v39, 1 }
 0x11c   :  { %v7945_v9 = vadd.f32 %v1997_v56, %v1709_v29  ;;  %v1999_v31 = vpop.f32.mrf.mxu1  ;;  %v7959_v29 = vld [vmem:[%s10664_s0 + $0x18c] sm:$0xff]  }
 0x11d   :  { %v1711_v11 = vpop.f32.mrf.mxu0  ;;  %v7978_v39 = vsel %vm834_vm1, %v922_v30, %v923_v15  ;;  %v925_v15 = vrot.slane %v7928_v16, 1 }
 0x11e   :  { %10820 = vst [vmem:[#allocation24_spill] sm:$0xff] %v7945_v9  ;;  %v1712_v7 = vadd.f32 %v7831_v21, %v1711_v11  ;;  %v2000_v45 = vpop.f32.mrf.mxu1  ;;  %10824 = vst [vmem:[#allocation28_spill] sm:$0xff] %v7978_v39 }
 0x11f   :  { %v1713_v0 = vpop.f32.mrf.mxu0 }
 0x120   :  { %v7961_v56 = vadd.f32 %v2000_v45, %v1712_v7  ;;  %v2002_v11 = vpop.f32.mrf.mxu1  ;;  %v784_v7 = vor.u32 %v783_v13, %v779_v12  ;;  %v788_v45 = vrot.slane %v786_v34, 1  ;;  %v793_v0 = vshll.u32 %v7959_v29, 16 }
 0x121   :  { %v1716_v31 = vpop.f32.mrf.mxu0  ;;  %1907 = vmatmul.mubr.bf16.gmra.mxu0 %v7867_v58  ;;  %v6928_v58 = vld [vmem:[%s10664_s0 + $0x194] ss:$0 sps:$4 sm:$0x11]   ;;  %v791_v34 = vshrl.u32 %v7959_v29, 16 }
 0x122   :  { %10823 = vst [vmem:[#allocation27_spill] sm:$0xff] %v7961_v56  ;;  %v1717_v41 = vadd.f32 %v7831_v21, %v1716_v31  ;;  %v2005_v5 = vpop.f32.mrf.mxu1  ;;  %2196 = vmatmul.mubr.bf16.gmra.mxu1 %v7949_v49  ;;  %1914 = vmatprep.mubr.bf16.mxu0 %v7952_v52  ;;  %v7981_v12 = vsel %vm417_vm0, %v784_v7, %v788_v45  ;;  %v795_v13 = vrot.slane %v793_v0, 1  ;;  %v798_v49 = vshll.u32 %v6928_v58, 16 }
 0x123   :  { %v1718_v60 = vpop.f32.mrf.mxu0  ;;  %2203 = vmatprep.mubr.bf16.mxu1 %v7928_v16  ;;  %v926_v7 = vrot.slane %v7942_v51, 1  ;;  %v6930_v51 = vld [vmem:[%s10664_s0 + $0x198] sm:$0xff]  }
 0x124   :  { %v7974_v11 = vadd.f32 %v2005_v5, %v1717_v41  ;;  %v2007_v31 = vpop.f32.mrf.mxu1 }
 0x125   :  { %v1719_v56 = vpop.f32.mrf.mxu0 }
 0x126   :  { %v1720_v9 = vadd.f32 %v7831_v21, %v1719_v56  ;;  %v2008_v52 = vpop.f32.mrf.mxu1 }
 0x127   :  { %v1721_v60 = vpop.f32.mrf.mxu0 }
 0x128   :  { %v7984_v26 = vadd.f32 %v2008_v52, %v1720_v9  ;;  %v2010_v41 = vpop.f32.mrf.mxu1  ;;  %v796_v9 = vor.u32 %v795_v13, %v791_v34  ;;  %v800_v52 = vrot.slane %v798_v49, 1 }
 0x129   :  { %v1724_v5 = vpop.f32.mrf.mxu0  ;;  %1915 = vmatmul.mubr.bf16.gmra.mxu0 %v7897_v37 }
 0x12a   :  { %10825 = vst [vmem:[#allocation29_spill] sm:$0xff] %v7984_v26  ;;  %v1725_v56 = vadd.f32 %v7831_v21, %v1724_v5  ;;  %v2013_v31 = vpop.f32.mrf.mxu1  ;;  %2204 = vmatmul.mubr.bf16.gmra.mxu1 %v7978_v39  ;;  %1922 = vmatprep.mubr.bf16.mxu0 %v7981_v12  ;;  %v7997_v26 = vsel %vm834_vm1, %v925_v15, %v926_v7  ;;  %v928_v7 = vrot.slane %v7959_v29, 1 }
 0x12b   :  { %v1726_v30 = vpop.f32.mrf.mxu0  ;;  %2211 = vmatprep.mubr.bf16.mxu1 %v7959_v29  ;;  %10826 = vst [vmem:[#allocation30_spill] sm:$0xff] %v7997_v26 }
 0x12c   :  { %v7993_v45 = vadd.f32 %v2013_v31, %v1725_v56  ;;  %v2015_v0 = vpop.f32.mrf.mxu1  ;;  %v8000_v30 = vsel %vm417_vm0, %v796_v9, %v800_v52  ;;  %v929_v9 = vrot.slane %v6928_v58, 1 }
 0x12d   :  { %v1727_v37 = vpop.f32.mrf.mxu0 }
 0x12e   :  { %v1728_v60 = vadd.f32 %v7831_v21, %v1727_v37  ;;  %v2016_v41 = vpop.f32.mrf.mxu1 }
 0x12f   :  { %v1729_v5 = vpop.f32.mrf.mxu0 }
 0x130   :  { %v8005_v34 = vadd.f32 %v2016_v41, %v1728_v60  ;;  %v2018_v49 = vpop.f32.mrf.mxu1  ;;  %v8016_v5 = vsel %vm834_vm1, %v928_v7, %v929_v9 }
 0x131   :  { %v1732_v13 = vpop.f32.mrf.mxu0  ;;  %1923 = vmatmul.mubr.bf16.gmra.mxu0 %v7928_v16  ;;  %10828 = vst [vmem:[#allocation32_spill] sm:$0xff] %v8016_v5 }
 0x132   :  { %10827 = vst [vmem:[#allocation31_spill] sm:$0xff] %v8005_v34  ;;  %v1733_v56 = vadd.f32 %v7831_v21, %v1732_v13  ;;  %v2021_v31 = vpop.f32.mrf.mxu1  ;;  %2212 = vmatmul.mubr.bf16.gmra.mxu1 %v7997_v26  ;;  %1930 = vmatprep.mubr.bf16.mxu0 %v8000_v30 }
 0x133   :  { %v1734_v15 = vpop.f32.mrf.mxu0  ;;  %2219 = vmatprep.mubr.bf16.mxu1 %v6930_v51 }
 0x134   :  { %v8012_v52 = vadd.f32 %v2021_v31, %v1733_v56  ;;  %v2023_v0 = vpop.f32.mrf.mxu1 }
 0x135   :  { %v1735_v37 = vpop.f32.mrf.mxu0 }
 0x136   :  { %v1736_v60 = vadd.f32 %v7831_v21, %v1735_v37  ;;  %v2024_v41 = vpop.f32.mrf.mxu1 }
 0x137   :  { %v1737_v16 = vpop.f32.mrf.mxu0 }
 0x138   :  { %v8018_v49 = vadd.f32 %v2024_v41, %v1736_v60  ;;  %v2026_v13 = vpop.f32.mrf.mxu1 }
 0x139   :  { %v1740_v34 = vpop.f32.mrf.mxu0  ;;  %1931 = vmatmul.mubr.bf16.gmra.mxu0 %v7959_v29  ;;  %v7019_v13 = vld [vmem:[%s10664_s0 + $0x18] sm:$0xff]  }
 0x13a   :  { %v1741_v51 = vadd.f32 %v7831_v21, %v1740_v34  ;;  %v2029_v58 = vpop.f32.mrf.mxu1  ;;  %2220 = vmatmul.mubr.bf16.gmra.mxu1 %v8016_v5  ;;  %2260 = vmatprep.mubr.bf16.mxu0 %v7276_v6  ;;  %v6934_v34 = vld [vmem:[%s10663_s1 + $0x230] sm:$0xff]  }
 0x13b   :  { %v1742_v56 = vpop.f32.mrf.mxu0  ;;  %2549 = vmatprep.mubr.bf16.mxu1 %v7284_v8 }
 0x13c   :  { %v8025_v31 = vadd.f32 %v2029_v58, %v1741_v51  ;;  %v2031_v15 = vpop.f32.mrf.mxu1  ;;  %v6935_v58 = vld [vmem:[%s10663_s1 + $0x228] sm:$0xff]  }
 0x13d   :  { %v1743_v7 = vpop.f32.mrf.mxu0 }
 0x13e   :  { %v1744_v9 = vadd.f32 %v7831_v21, %v1743_v7  ;;  %v2032_v0 = vpop.f32.mrf.mxu1 }
 0x13f   :  { %v1745_v37 = vpop.f32.mrf.mxu0 }
 0x140   :  { %v8028_v60 = vadd.f32 %v2032_v0, %v1744_v9  ;;  %v2034_v29 = vpop.f32.mrf.mxu1 }
 0x141   :  { %v1748_v41 = vpop.f32.mrf.mxu0  ;;  %2261 = vmatmul.mubr.bf16.vlgmr.msra.gmra.mxu0 %v7260_v61  ;;  %v6936_v29 = vld [vmem:[%s10663_s1 + $0x220] sm:$0xff]  }
 0x142   :  { %v1749_v6 = vadd.f32 %v7831_v21, %v1748_v41  ;;  %6643 = vmatpush3.bf16.msra.mxu0 %v7712_v54  ;;  %v2037_v16 = vpop.f32.mrf.mxu1  ;;  %2550 = vmatmul.mubr.bf16.vlgmr.msra.gmra.mxu1 %v7019_v13  ;;  %v7020_v13 = vld [vmem:[%s10664_s0 + $0x24] sm:$0xff]  }
 0x143   :  { %v1750_v51 = vpop.f32.mrf.mxu0  ;;  %2268 = vmatprep.mubr.bf16.mxu0 %v7305_v20  ;;  %2557 = vmatprep.mubr.bf16.mxu1 %v7313_v22 }
 0x144   :  { %v8044_v61 = vadd.f32 %v2037_v16, %v1749_v6  ;;  %v2039_v56 = vpop.f32.mrf.mxu1  ;;  %6644 = vmatprep.subr.bf16.mxu0 %v6934_v34 }
 0x145   :  { %v1751_v54 = vpop.f32.mrf.mxu0 }
 0x146   :  { %v1752_v15 = vadd.f32 %v7831_v21, %v1751_v54  ;;  %v2040_v7 = vpop.f32.mrf.mxu1  ;;  %6645 = vmatpush3.bf16.msra.mxu0 %v6934_v34 }
 0x147   :  { %v1753_v9 = vpop.f32.mrf.mxu0  ;;  %6646 = vmatprep.subr.bf16.mxu0 %v6935_v58 }
 0x148   :  { %v8047_v0 = vadd.f32 %v2040_v7, %v1752_v15  ;;  %v2042_v37 = vpop.f32.mrf.mxu1 }
 0x149   :  { %v1756_v41 = vpop.f32.mrf.mxu0  ;;  %2269 = vmatmul.mubr.bf16.gmra.mxu0 %v7284_v8  ;;  %v6940_v8 = vld [vmem:[%s10663_s1 + $0x218] sm:$0xff]  }
 0x14a   :  { %v1757_v6 = vadd.f32 %v7831_v21, %v1756_v41  ;;  %v2045_v16 = vpop.f32.mrf.mxu1  ;;  %2558 = vmatmul.mubr.bf16.gmra.mxu1 %v7020_v13  ;;  %2276 = vmatprep.mubr.bf16.mxu0 %v7335_v35 }
 0x14b   :  { %v1758_v34 = vpop.f32.mrf.mxu0  ;;  %2565 = vmatprep.mubr.bf16.mxu1 %v7338_v36  ;;  %6647 = vmatpush3.bf16.msra.mxu0 %v6935_v58 }
 0x14c   :  { %v8059_v51 = vadd.f32 %v2045_v16, %v1757_v6  ;;  %v2047_v56 = vpop.f32.mrf.mxu1  ;;  %6648 = vmatprep.subr.bf16.mxu0 %v6936_v29  ;;  %v7021_v16 = vld [vmem:[%s10664_s0 + $0x30] sm:$0xff]  }
 0x14d   :  { %v1759_v54 = vpop.f32.mrf.mxu0 }
 0x14e   :  { %v1760_v15 = vadd.f32 %v7831_v21, %v1759_v54  ;;  %v2048_v7 = vpop.f32.mrf.mxu1 }
 0x14f   :  { %v1761_v9 = vpop.f32.mrf.mxu0  ;;  %6649 = vmatpush3.bf16.msra.mxu0 %v6936_v29 }
 0x150   :  { %v8065_v37 = vadd.f32 %v2048_v7, %v1760_v15  ;;  %v2050_v41 = vpop.f32.mrf.mxu1  ;;  %6650 = vmatprep.subr.bf16.mxu0 %v6940_v8 }
 0x151   :  { %v1764_v13 = vpop.f32.mrf.mxu0  ;;  %2277 = vmatmul.mubr.bf16.gmra.mxu0 %v7313_v22 }
 0x152   :  { %v1765_v58 = vadd.f32 %v7831_v21, %v1764_v13  ;;  %v2053_v6 = vpop.f32.mrf.mxu1  ;;  %2566 = vmatmul.mubr.bf16.gmra.mxu1 %v7021_v16  ;;  %2284 = vmatprep.mubr.bf16.mxu0 %v7363_v48 }
 0x153   :  { %v1766_v34 = vpop.f32.mrf.mxu0  ;;  %2573 = vmatprep.mubr.bf16.mxu1 %v7371_v50  ;;  %6651 = vmatpush3.bf16.msra.mxu0 %v6940_v8  ;;  %v7022_v8 = vld [vmem:[%s10664_s0 + $0x3c] sm:$0xff]  }
 0x154   :  { %v8074_v29 = vadd.f32 %v2053_v6, %v1765_v58  ;;  %v2055_v56 = vpop.f32.mrf.mxu1 }
 0x155   :  { %v1767_v54 = vpop.f32.mrf.mxu0 }
 0x156   :  { %v1768_v22 = vadd.f32 %v7831_v21, %v1767_v54  ;;  %v2056_v15 = vpop.f32.mrf.mxu1 }
 0x157   :  { %v1769_v7 = vpop.f32.mrf.mxu0 }
 0x158   :  { %v8077_v9 = vadd.f32 %v2056_v15, %v1768_v22  ;;  %v2058_v41 = vpop.f32.mrf.mxu1 }
 0x159   :  { %v1772_v13 = vpop.f32.mrf.mxu0  ;;  %2285 = vmatmul.mubr.bf16.gmra.mxu0 %v7338_v36 }
 0x15a   :  { %10829 = vst [vmem:[#allocation33_spill] sm:$0xff] %v8077_v9  ;;  %v1773_v16 = vadd.f32 %v7831_v21, %v1772_v13  ;;  %v2061_v34 = vpop.f32.mrf.mxu1  ;;  %2574 = vmatmul.mubr.bf16.gmra.mxu1 %v7022_v8  ;;  %2292 = vmatprep.mubr.bf16.mxu0 %v7392_v63 }
 0x15b   :  { %v1774_v58 = vpop.f32.mrf.mxu0  ;;  %2581 = vmatprep.mubr.bf16.mxu1 %v7395_v1 }
 0x15c   :  { %v8086_v6 = vadd.f32 %v2061_v34, %v1773_v16  ;;  %v2063_v56 = vpop.f32.mrf.mxu1  ;;  %v7023_v16 = vld [vmem:[%s10664_s0 + $0x48] sm:$0xff]   ;;  %v6941_v34 = vld [vmem:[%s10663_s1 + $0x210] sm:$0xff]  }
 0x15d   :  { %v1775_v54 = vpop.f32.mrf.mxu0  ;;  %6652 = vmatprep.subr.bf16.mxu0 %v6941_v34 }
 0x15e   :  { %v1776_v22 = vadd.f32 %v7831_v21, %v1775_v54  ;;  %v2064_v36 = vpop.f32.mrf.mxu1  ;;  %6653 = vmatpush3.bf16.msra.mxu0 %v6941_v34 }
 0x15f   :  { %v1777_v15 = vpop.f32.mrf.mxu0 }
 0x160   :  { %v8089_v7 = vadd.f32 %v2064_v36, %v1776_v22  ;;  %v2066_v41 = vpop.f32.mrf.mxu1 }
 0x161   :  { %v1780_v13 = vpop.f32.mrf.mxu0  ;;  %2293 = vmatmul.mubr.bf16.gmra.mxu0 %v7371_v50 }
 0x162   :  { %10830 = vst [vmem:[#allocation34_spill] sm:$0xff] %v8089_v7  ;;  %v1781_v8 = vadd.f32 %v7831_v21, %v1780_v13  ;;  %v2069_v9 = vpop.f32.mrf.mxu1  ;;  %2582 = vmatmul.mubr.bf16.gmra.mxu1 %v7023_v16  ;;  %2300 = vmatprep.mubr.bf16.mxu0 %v7420_v17 }
 0x163   :  { %v1782_v58 = vpop.f32.mrf.mxu0  ;;  %2589 = vmatprep.mubr.bf16.mxu1 %v7423_v18 }
 0x164   :  { %v8101_v56 = vadd.f32 %v2069_v9, %v1781_v8  ;;  %v2071_v50 = vpop.f32.mrf.mxu1  ;;  %v7024_v9 = vld [vmem:[%s10664_s0 + $0x54] sm:$0xff]  }
 0x165   :  { %v1783_v54 = vpop.f32.mrf.mxu0 }
 0x166   :  { %v1784_v22 = vadd.f32 %v7831_v21, %v1783_v54  ;;  %v2072_v36 = vpop.f32.mrf.mxu1 }
 0x167   :  { %v1785_v15 = vpop.f32.mrf.mxu0 }
 0x168   :  { %v8104_v41 = vadd.f32 %v2072_v36, %v1784_v22  ;;  %v2074_v13 = vpop.f32.mrf.mxu1 }
 0x169   :  { %v1788_v16 = vpop.f32.mrf.mxu0  ;;  %2301 = vmatmul.mubr.bf16.gmra.mxu0 %v7395_v1 }
 0x16a   :  { %10831 = vst [vmem:[#allocation35_spill] sm:$0xff] %v8104_v41  ;;  %v1789_v58 = vadd.f32 %v7831_v21, %v1788_v16  ;;  %v2077_v7 = vpop.f32.mrf.mxu1  ;;  %2590 = vmatmul.mubr.bf16.gmra.mxu1 %v7024_v9  ;;  %2308 = vmatprep.mubr.bf16.mxu0 %v7444_v32 }
 0x16b   :  { %v1790_v8 = vpop.f32.mrf.mxu0  ;;  %2597 = vmatprep.mubr.bf16.mxu1 %v7447_v33 }
 0x16c   :  { %v8113_v34 = vadd.f32 %v2077_v7, %v1789_v58  ;;  %v2079_v50 = vpop.f32.mrf.mxu1  ;;  %v7025_v7 = vld [vmem:[%s10664_s0 + $0x60] sm:$0xff]  }
 0x16d   :  { %v1791_v54 = vpop.f32.mrf.mxu0 }
 0x16e   :  { %10832 = vst [vmem:[#allocation36_spill] sm:$0xff] %v8113_v34  ;;  %v1792_v22 = vadd.f32 %v7831_v21, %v1791_v54  ;;  %v2080_v1 = vpop.f32.mrf.mxu1 }
 0x16f   :  { %v1793_v36 = vpop.f32.mrf.mxu0 }
 0x170   :  { %v8116_v15 = vadd.f32 %v2080_v1, %v1792_v22  ;;  %v2082_v13 = vpop.f32.mrf.mxu1 }
 0x171   :  { %v1796_v16 = vpop.f32.mrf.mxu0  ;;  %2309 = vmatmul.mubr.bf16.gmra.mxu0 %v7423_v18 }
 0x172   :  { %10833 = vst [vmem:[#allocation37_spill] sm:$0xff] %v8116_v15  ;;  %v1797_v9 = vadd.f32 %v7831_v21, %v1796_v16  ;;  %v2085_v41 = vpop.f32.mrf.mxu1  ;;  %2598 = vmatmul.mubr.bf16.gmra.mxu1 %v7025_v7  ;;  %2316 = vmatprep.mubr.bf16.mxu0 %v7459_v46 }
 0x173   :  { %v1798_v58 = vpop.f32.mrf.mxu0  ;;  %2605 = vmatprep.mubr.bf16.mxu1 %v7462_v47 }
 0x174   :  { %v8125_v8 = vadd.f32 %v2085_v41, %v1797_v9  ;;  %v2087_v50 = vpop.f32.mrf.mxu1  ;;  %v7026_v41 = vld [vmem:[%s10664_s0 + $0x6c] sm:$0xff]  }
 0x175   :  { %v1799_v54 = vpop.f32.mrf.mxu0 }
 0x176   :  { %10834 = vst [vmem:[#allocation38_spill] sm:$0xff] %v8125_v8  ;;  %v1800_v22 = vadd.f32 %v7831_v21, %v1799_v54  ;;  %v2088_v18 = vpop.f32.mrf.mxu1 }
 0x177   :  { %v1801_v1 = vpop.f32.mrf.mxu0 }
 0x178   :  { %v8128_v36 = vadd.f32 %v2088_v18, %v1800_v22  ;;  %v2090_v13 = vpop.f32.mrf.mxu1 }
 0x179   :  { %v1804_v16 = vpop.f32.mrf.mxu0  ;;  %2317 = vmatmul.mubr.bf16.gmra.mxu0 %v7447_v33 }
 0x17a   :  { %10835 = vst [vmem:[#allocation39_spill] sm:$0xff] %v8128_v36  ;;  %v1805_v7 = vadd.f32 %v7831_v21, %v1804_v16  ;;  %v2093_v15 = vpop.f32.mrf.mxu1  ;;  %2606 = vmatmul.mubr.bf16.gmra.mxu1 %v7026_v41  ;;  %2324 = vmatprep.mubr.bf16.mxu0 %v7495_v3 }
 0x17b   :  { %v1806_v9 = vpop.f32.mrf.mxu0  ;;  %2613 = vmatprep.mubr.bf16.mxu1 %v7498_v4 }
 0x17c   :  { %v8137_v58 = vadd.f32 %v2093_v15, %v1805_v7  ;;  %v2095_v50 = vpop.f32.mrf.mxu1  ;;  %v7027_v15 = vld [vmem:[%s10664_s0 + $0x78] sm:$0xff]   ;;  %v6942_v7 = vld [vmem:[%s10663_s1 + $0x208] sm:$0xff]  }
 0x17d   :  { %v1807_v54 = vpop.f32.mrf.mxu0  ;;  %6654 = vmatprep.subr.bf16.mxu0 %v6942_v7 }
 0x17e   :  { %10836 = vst [vmem:[#allocation40_spill] sm:$0xff] %v8137_v58  ;;  %v1808_v22 = vadd.f32 %v7831_v21, %v1807_v54  ;;  %v2096_v33 = vpop.f32.mrf.mxu1  ;;  %6655 = vmatpush3.bf16.msra.mxu0 %v6942_v7 }
 0x17f   :  { %v1809_v18 = vpop.f32.mrf.mxu0 }
 0x180   :  { %v8140_v1 = vadd.f32 %v2096_v33, %v1808_v22  ;;  %v2098_v13 = vpop.f32.mrf.mxu1 }
 0x181   :  { %v1812_v16 = vpop.f32.mrf.mxu0  ;;  %2325 = vmatmul.mubr.bf16.gmra.mxu0 %v7462_v47 }
 0x182   :  { %10837 = vst [vmem:[#allocation41_spill] sm:$0xff] %v8140_v1  ;;  %v1813_v41 = vadd.f32 %v7831_v21, %v1812_v16  ;;  %v2101_v36 = vpop.f32.mrf.mxu1  ;;  %2614 = vmatmul.mubr.bf16.gmra.mxu1 %v7027_v15  ;;  %2332 = vmatprep.mubr.bf16.mxu0 %v7524_v23 }
 0x183   :  { %v1814_v9 = vpop.f32.mrf.mxu0  ;;  %2621 = vmatprep.mubr.bf16.mxu1 %v7527_v24 }
 0x184   :  { %v8152_v50 = vadd.f32 %v2101_v36, %v1813_v41  ;;  %v2103_v47 = vpop.f32.mrf.mxu1  ;;  %v7028_v36 = vld [vmem:[%s10664_s0 + $0x84] sm:$0xff]  }
 0x185   :  { %v1815_v54 = vpop.f32.mrf.mxu0 }
 0x186   :  { %10838 = vst [vmem:[#allocation42_spill] sm:$0xff] %v8152_v50  ;;  %v1816_v22 = vadd.f32 %v7831_v21, %v1815_v54  ;;  %v2104_v33 = vpop.f32.mrf.mxu1 }
 0x187   :  { %v1817_v18 = vpop.f32.mrf.mxu0 }
 0x188   :  { %v8155_v13 = vadd.f32 %v2104_v33, %v1816_v22  ;;  %v2106_v16 = vpop.f32.mrf.mxu1  ;;  %v8170_v33 = vld [vmem:[%s10664_s0 + $0xc8] ss:$0 sps:$4 sm:$0x11]  }
 0x189   :  { %v1820_v15 = vpop.f32.mrf.mxu0  ;;  %2333 = vmatmul.mubr.bf16.gmra.mxu0 %v7498_v4 }
 0x18a   :  { %10839 = vst [vmem:[#allocation43_spill] sm:$0xff] %v8155_v13  ;;  %v1821_v9 = vadd.f32 %v7831_v21, %v1820_v15  ;;  %v2109_v1 = vpop.f32.mrf.mxu1  ;;  %2622 = vmatmul.mubr.bf16.gmra.mxu1 %v7028_v36  ;;  %2340 = vmatprep.mubr.bf16.mxu0 %v7552_v42 }
 0x18b   :  { %v1822_v41 = vpop.f32.mrf.mxu0  ;;  %2629 = vmatprep.mubr.bf16.mxu1 %v7555_v43 }
 0x18c   :  { %v8164_v7 = vadd.f32 %v2109_v1, %v1821_v9  ;;  %v2111_v47 = vpop.f32.mrf.mxu1  ;;  %v7029_v41 = vld [vmem:[%s10664_s0 + $0x90] sm:$0xff]  }
 0x18d   :  { %v1823_v54 = vpop.f32.mrf.mxu0  ;;  %v8183_v47 = vld [vmem:[%s10664_s0 + $0xc0] sm:$0xff]  }
 0x18e   :  { %10840 = vst [vmem:[#allocation44_spill] sm:$0xff] %v8164_v7  ;;  %v1824_v22 = vadd.f32 %v7831_v21, %v1823_v54  ;;  %v2112_v4 = vpop.f32.mrf.mxu1  ;;  %v984_v54 = vshll.u32 %v8183_v47, 16 }
 0x18f   :  { %v1825_v18 = vpop.f32.mrf.mxu0 }
 0x190   :  { %v8172_v16 = vadd.f32 %v2112_v4, %v1824_v22  ;;  %v2114_v15 = vpop.f32.mrf.mxu1  ;;  %v989_v22 = vshll.u32 %v8170_v33, 16  ;;  %v986_v13 = vrot.slane %v984_v54, 1 }
 0x191   :  { %v1828_v36 = vpop.f32.mrf.mxu0  ;;  %2341 = vmatmul.mubr.bf16.gmra.mxu0 %v7527_v24  ;;  %v8190_v24 = vld [vmem:[%s10664_s0 + $0xcc] sm:$0xff]  }
 0x192   :  { %10841 = vst [vmem:[#allocation45_spill] sm:$0xff] %v8172_v16  ;;  %v1829_v1 = vadd.f32 %v7831_v21, %v1828_v36  ;;  %v2117_v9 = vpop.f32.mrf.mxu1  ;;  %2630 = vmatmul.mubr.bf16.gmra.mxu1 %v7029_v41  ;;  %2348 = vmatprep.mubr.bf16.mxu0 %v7577_v57  ;;  %v982_v41 = vshrl.u32 %v8183_v47, 16  ;;  %v991_v50 = vrot.slane %v989_v22, 1  ;;  %v1036_v58 = vshll.u32 %v8190_v24, 16 }
 0x193   :  { %v1830_v4 = vpop.f32.mrf.mxu0  ;;  %2637 = vmatprep.mubr.bf16.mxu1 %v7583_v59 }
 0x194   :  { %v8193_v18 = vadd.f32 %v2117_v9, %v1829_v1  ;;  %v2119_v15 = vpop.f32.mrf.mxu1  ;;  %v6943_v4 = vld [vmem:[%s10666_s3 + $0x38] sm:$0xff]  }
 0x195   :  { %v1831_v36 = vpop.f32.mrf.mxu0  ;;  %4768 = vmatpush1.bf16.msra.mxu1 %v6943_v4 }
 0x196   :  { %10842 = vst [vmem:[#allocation46_spill] sm:$0xff] %v8193_v18  ;;  %v1832_v16 = vadd.f32 %v7831_v21, %v1831_v36  ;;  %v2120_v7 = vpop.f32.mrf.mxu1 }
 0x197   :  { %v1833_v8 = vpop.f32.mrf.mxu0 }
 0x198   :  { %v8202_v1 = vadd.f32 %v2120_v7, %v1832_v16  ;;  %v2122_v9 = vpop.f32.mrf.mxu1  ;;  %v7031_v8 = vld [vmem:[%s10664_s0 + $0x9c] sm:$0xff]   ;;  %v10844_v7 = vmov 0  }
 0x199   :  { %v1836_v15 = vpop.f32.mrf.mxu0  ;;  %2349 = vmatmul.mubr.bf16.gmra.mxu0 %v7555_v43  ;;  %4769 = vmatprep.subr.bf16.mxu1 %v10844_v7 }
 0x19a   :  { %10843 = vst [vmem:[#allocation47_spill] sm:$0xff] %v8202_v1  ;;  %v1837_v36 = vadd.f32 %v7831_v21, %v1836_v15  ;;  %v2125_v54 = vpop.f32.mrf.mxu1  ;;  %2638 = vmatmul.mubr.bf16.gmra.mxu1 %v7031_v8  ;;  %2356 = vmatprep.mubr.bf16.mxu0 %v7610_v19  ;;  %v6939_v8 = vld [vmem:[%s10664_s0 + $0xd4] ss:$0 sps:$4 sm:$0x11]  }
 0x19b   :  { %v1838_v22 = vpop.f32.mrf.mxu0  ;;  %2645 = vmatprep.mubr.bf16.mxu1 %v7616_v25 }
 0x19c   :  { %v8212_v16 = vadd.f32 %v2125_v54, %v1837_v36  ;;  %v2127_v9 = vpop.f32.mrf.mxu1  ;;  %v7032_v54 = vld [vmem:[%s10664_s0 + $0xa8] sm:$0xff]  }
 0x19d   :  { %v1839_v43 = vpop.f32.mrf.mxu0 }
 0x19e   :  { %10845 = vst [vmem:[#allocation48_spill] sm:$0xff] %v8212_v16  ;;  %v1840_v4 = vadd.f32 %v7831_v21, %v1839_v43  ;;  %v2128_v15 = vpop.f32.mrf.mxu1 }
 0x19f   :  { %v1841_v34 = vpop.f32.mrf.mxu0 }
 0x1a0   :  { %v8215_v1 = vadd.f32 %v2128_v15, %v1840_v4  ;;  %v2130_v18 = vpop.f32.mrf.mxu1  ;;  %v1038_v34 = vrot.slane %v1036_v58, 1  ;;  %v987_v4 = vor.u32 %v986_v13, %v982_v41  ;;  %v6945_v58 = vld [vmem:[%s10666_s3 + $0x30] sm:$0xff]  }
 0x1a1   :  { %v1844_v22 = vpop.f32.mrf.mxu0  ;;  %2357 = vmatmul.mubr.bf16.gmra.mxu0 %v7583_v59  ;;  %v6944_v18 = vld [vmem:[%s10663_s1 + $0x200] sm:$0xff]   ;;  %4770 = vmatpush1.bf16.msra.mxu1 %v6945_v58 }
 0x1a2   :  { %10846 = vst [vmem:[#allocation49_spill] sm:$0xff] %v8215_v1  ;;  %v1845_v19 = vadd.f32 %v7831_v21, %v1844_v22  ;;  %v2133_v36 = vpop.f32.mrf.mxu1  ;;  %2646 = vmatmul.mubr.bf16.gmra.mxu1 %v7032_v54  ;;  %2364 = vmatprep.mubr.bf16.mxu0 %v7639_v40  ;;  %v1041_v1 = vshll.u32 %v6939_v8, 16 }
 0x1a3   :  { %v1846_v9 = vpop.f32.mrf.mxu0  ;;  %2653 = vmatprep.mubr.bf16.mxu1 %v7645_v44  ;;  %6656 = vmatprep.subr.bf16.mxu0 %v6944_v18 }
 0x1a4   :  { %v8230_v43 = vadd.f32 %v2133_v36, %v1845_v19  ;;  %v2135_v59 = vpop.f32.mrf.mxu1  ;;  %6657 = vmatpush3.bf16.msra.mxu0 %v6944_v18  ;;  %v992_v36 = vsel %vm417_vm0, %v987_v4, %v991_v50  ;;  %4771 = vmatprep.subr.bf16.mxu1 %v10844_v7  ;;  %v7033_v18 = vld [vmem:[%s10664_s0 + $0xb4] sm:$0xff]   ;;  %v1007_v50 = vrot.slane %v8183_v47, 1  ;;  %v1008_v4 = vrot.slane %v8170_v33, 1 }
 0x1a5   :  { %v1847_v15 = vpop.f32.mrf.mxu0  ;;  %5056 = vmatprep.subr.bf16.mxu0 %v10844_v7 }
 0x1a6   :  { %v1848_v22 = vadd.f32 %v7831_v21, %v1847_v15  ;;  %v2136_v54 = vpop.f32.mrf.mxu1  ;;  %v1043_v15 = vrot.slane %v1041_v1, 1 }
 0x1a7   :  { %v1849_v9 = vpop.f32.mrf.mxu0 }
 0x1a8   :  { %v8237_v16 = vadd.f32 %v2136_v54, %v1848_v22  ;;  %v2138_v19 = vpop.f32.mrf.mxu1  ;;  %v8256_v9 = vld [vmem:[%s10665_s2] ss:$0 sm:$0xff] }
 0x1a9   :  { %v1852_v13 = vpop.f32.mrf.mxu0  ;;  %2365 = vmatmul.mubr.bf16.gmra.mxu0 %v7616_v25 }
 0x1aa   :  { %10847 = vst [vmem:[#allocation50_spill] sm:$0xff] %v8237_v16  ;;  %v1853_v41 = vadd.f32 %v7831_v21, %v1852_v13  ;;  %v2141_v8 = vpop.f32.mrf.mxu1  ;;  %2654 = vmatmul.mubr.bf16.gmra.mxu1 %v7033_v18  ;;  %2372 = vmatprep.mubr.bf16.mxu0 %v7673_v10  ;;  %v10849_v21 = vshrl.u32 %v8190_v24, 16 }
 0x1ab   :  { %v1854_v59 = vpop.f32.mrf.mxu0  ;;  %2661 = vmatprep.mubr.bf16.mxu1 %v992_v36 }
 0x1ac   :  { %v8249_v25 = vadd.f32 %v2141_v8, %v1853_v41  ;;  %v2143_v22 = vpop.f32.mrf.mxu1  ;;  %v1039_v54 = vor.u32 %v1038_v34, %v10849_v21  ;;  %v8260_v59 = vsel %vm834_vm1, %v1007_v50, %v1008_v4 }
 0x1ad   :  { %v1855_v58 = vpop.f32.mrf.mxu0 }
 0x1ae   :  { %10848 = vst [vmem:[#allocation51_spill] sm:$0xff] %v8249_v25  ;;  %v1856_v19 = vadd.f32 %v8256_v9, %v1855_v58  ;;  %v2144_v13 = vpop.f32.mrf.mxu1  ;;  %v1044_v41 = vsel %vm417_vm0, %v1039_v54, %v1043_v15 }
 0x1af   :  { %v1857_v18 = vpop.f32.mrf.mxu0 }
 0x1b0   :  { %v8262_v33 = vadd.f32 %v2144_v13, %v1856_v19  ;;  %v2146_v1 = vpop.f32.mrf.mxu1 }
 0x1b1   :  { %v1860_v8 = vpop.f32.mrf.mxu0  ;;  %2373 = vmatmul.mubr.bf16.gmra.mxu0 %v7645_v44  ;;  %v6947_v44 = vld [vmem:[%s10666_s3 + $0x28] sm:$0xff]  }
 0x1b2   :  { %10850 = vst [vmem:[#allocation52_spill] sm:$0xff] %v8262_v33  ;;  %v1861_v34 = vadd.f32 %v8256_v9, %v1860_v8  ;;  %v2149_v22 = vpop.f32.mrf.mxu1  ;;  %2662 = vmatmul.mubr.bf16.gmra.mxu1 %v8183_v47  ;;  %2380 = vmatprep.mubr.bf16.mxu0 %v8260_v59 }
 0x1b3   :  { %v1862_v21 = vpop.f32.mrf.mxu0  ;;  %2669 = vmatprep.mubr.bf16.mxu1 %v1044_v41  ;;  %4772 = vmatpush1.bf16.msra.mxu1 %v6947_v44 }
 0x1b4   :  { %v8269_v58 = vadd.f32 %v2149_v22, %v1861_v34  ;;  %v2151_v50 = vpop.f32.mrf.mxu1  ;;  %4773 = vmatprep.subr.bf16.mxu1 %v10844_v7 }
 0x1b5   :  { %v1863_v4 = vpop.f32.mrf.mxu0 }
 0x1b6   :  { %10851 = vst [vmem:[#allocation53_spill] sm:$0xff] %v8269_v58  ;;  %v1864_v19 = vadd.f32 %v8256_v9, %v1863_v4  ;;  %v2152_v13 = vpop.f32.mrf.mxu1 }
 0x1b7   :  { %v1865_v15 = vpop.f32.mrf.mxu0 }
 0x1b8   :  { %v8275_v54 = vadd.f32 %v2152_v13, %v1864_v19  ;;  %v2154_v18 = vpop.f32.mrf.mxu1  ;;  %v7035_v15 = vld [vmem:[%s10664_s0 + $0xf0] sm:$0xff]  }
 0x1b9   :  { %v1868_v47 = vpop.f32.mrf.mxu0  ;;  %2381 = vmatmul.mubr.bf16.gmra.mxu0 %v992_v36 }
 0x1ba   :  { %10852 = vst [vmem:[#allocation54_spill] sm:$0xff] %v8275_v54  ;;  %v1869_v1 = vadd.f32 %v8256_v9, %v1868_v47  ;;  %v2157_v41 = vpop.f32.mrf.mxu1  ;;  %2670 = vmatmul.mubr.bf16.gmra.mxu1 %v8190_v24  ;;  %2388 = vmatprep.mubr.bf16.mxu0 %v7719_v62 }
 0x1bb   :  { %v1870_v8 = vpop.f32.mrf.mxu0  ;;  %2677 = vmatprep.mubr.bf16.mxu1 %v7722_v2 }
 0x1bc   :  { %v8282_v34 = vadd.f32 %v2157_v41, %v1869_v1  ;;  %v2159_v22 = vpop.f32.mrf.mxu1 }
 0x1bd   :  { %v1871_v21 = vpop.f32.mrf.mxu0  ;;  %v6950_v22 = vld [vmem:[%s10666_s3 + $0x20] sm:$0xff]  }
 0x1be   :  { %10853 = vst [vmem:[#allocation55_spill] sm:$0xff] %v8282_v34  ;;  %v1872_v50 = vadd.f32 %v8256_v9, %v1871_v21  ;;  %v2160_v4 = vpop.f32.mrf.mxu1  ;;  %4774 = vmatpush1.bf16.msra.mxu1 %v6950_v22 }
 0x1bf   :  { %v1873_v36 = vpop.f32.mrf.mxu0  ;;  %4775 = vmatprep.subr.bf16.mxu1 %v10844_v7 }
 0x1c0   :  { %v8285_v19 = vadd.f32 %v2160_v4, %v1872_v50  ;;  %v2162_v13 = vpop.f32.mrf.mxu1 }
 0x1c1   :  { %v1876_v44 = vpop.f32.mrf.mxu0  ;;  %2389 = vmatmul.mubr.bf16.gmra.mxu0 %v7700_v38 }
 0x1c2   :  { %10854 = vst [vmem:[#allocation56_spill] sm:$0xff] %v8285_v19  ;;  %v1877_v24 = vadd.f32 %v8256_v9, %v1876_v44  ;;  %v2165_v62 = vpop.f32.mrf.mxu1  ;;  %2678 = vmatmul.mubr.bf16.gmra.mxu1 %v7035_v15  ;;  %2396 = vmatprep.mubr.bf16.mxu0 %v7734_v27 }
 0x1c3   :  { %v1878_v18 = vpop.f32.mrf.mxu0  ;;  %2685 = vmatprep.mubr.bf16.mxu1 %v7737_v28 }
 0x1c4   :  { %v8294_v47 = vadd.f32 %v2165_v62, %v1877_v24  ;;  %v2167_v1 = vpop.f32.mrf.mxu1  ;;  %v7036_v24 = vld [vmem:[%s10664_s0 + $0xfc] sm:$0xff]  }
 0x1c5   :  { %v1879_v41 = vpop.f32.mrf.mxu0 }
 0x1c6   :  { %10855 = vst [vmem:[#allocation57_spill] sm:$0xff] %v8294_v47  ;;  %v1880_v8 = vadd.f32 %v8256_v9, %v1879_v41  ;;  %v2168_v38 = vpop.f32.mrf.mxu1 }
 0x1c7   :  { %v1881_v21 = vpop.f32.mrf.mxu0 }
 0x1c8   :  { %v8300_v50 = vadd.f32 %v2168_v38, %v1880_v8  ;;  %v2170_v4 = vpop.f32.mrf.mxu1 }
 0x1c9   :  { %v1884_v36 = vpop.f32.mrf.mxu0  ;;  %2397 = vmatmul.mubr.bf16.gmra.mxu0 %v7722_v2 }
 0x1ca   :  { %10856 = vst [vmem:[#allocation58_spill] sm:$0xff] %v8300_v50  ;;  %v1885_v13 = vadd.f32 %v8256_v9, %v1884_v36  ;;  %v2173_v44 = vpop.f32.mrf.mxu1  ;;  %2686 = vmatmul.mubr.bf16.gmra.mxu1 %v7036_v24  ;;  %2404 = vmatprep.mubr.bf16.mxu0 %v7748_v53  ;;  %v10859_v24 = vld [vmem:[#allocation3_spill] sm:$0xff] }
 0x1cb   :  { %v1886_v62 = vpop.f32.mrf.mxu0  ;;  %2693 = vmatprep.mubr.bf16.mxu1 %v7751_v55 }
 0x1cc   :  { %v8310_v15 = vadd.f32 %v2173_v44, %v1885_v13  ;;  %v2175_v18 = vpop.f32.mrf.mxu1  ;;  %v7037_v13 = vld [vmem:[%s10664_s0 + $0x108] sm:$0xff]  }
 0x1cd   :  { %v1887_v1 = vpop.f32.mrf.mxu0 }
 0x1ce   :  { %10857 = vst [vmem:[#allocation59_spill] sm:$0xff] %v8310_v15  ;;  %v1888_v2 = vadd.f32 %v8256_v9, %v1887_v1  ;;  %v2176_v41 = vpop.f32.mrf.mxu1 }
 0x1cf   :  { %v1889_v8 = vpop.f32.mrf.mxu0 }
 0x1d0   :  { %v8313_v38 = vadd.f32 %v2176_v41, %v1888_v2  ;;  %v2178_v22 = vpop.f32.mrf.mxu1  ;;  %v6951_v41 = vld [vmem:[%s10666_s3 + $0x18] sm:$0xff]  }
 0x1d1   :  { %v1892_v21 = vpop.f32.mrf.mxu0  ;;  %2405 = vmatmul.mubr.bf16.gmra.mxu0 %v7737_v28  ;;  %4776 = vmatpush1.bf16.msra.mxu1 %v6951_v41 }
 0x1d2   :  { %10858 = vst [vmem:[#allocation60_spill] sm:$0xff] %v8313_v38  ;;  %v1893_v4 = vadd.f32 %v8256_v9, %v1892_v21  ;;  %v2181_v36 = vpop.f32.mrf.mxu1  ;;  %2694 = vmatmul.mubr.bf16.gmra.mxu1 %v7037_v13  ;;  %2412 = vmatprep.mubr.bf16.mxu0 %v7762_v14 }
 0x1d3   :  { %v1894_v44 = vpop.f32.mrf.mxu0  ;;  %2701 = vmatprep.mubr.bf16.mxu1 %v10859_v24  ;;  %4777 = vmatprep.subr.bf16.mxu1 %v10844_v7 }
 0x1d4   :  { %v8322_v62 = vadd.f32 %v2181_v36, %v1893_v4  ;;  %v2183_v18 = vpop.f32.mrf.mxu1  ;;  %v7038_v44 = vld [vmem:[%s10664_s0 + $0x114] sm:$0xff]  }
 0x1d5   :  { %v1895_v1 = vpop.f32.mrf.mxu0  ;;  %v10862_v18 = vld [vmem:[#allocation4_spill] sm:$0xff] }
 0x1d6   :  { %10860 = vst [vmem:[#allocation3_spill] sm:$0xff] %v8322_v62  ;;  %v1896_v2 = vadd.f32 %v8256_v9, %v1895_v1  ;;  %v2184_v28 = vpop.f32.mrf.mxu1 }
 0x1d7   :  { %v1897_v8 = vpop.f32.mrf.mxu0 }
 0x1d8   :  { %v8328_v22 = vadd.f32 %v2184_v28, %v1896_v2  ;;  %v2186_v21 = vpop.f32.mrf.mxu1  ;;  %v10863_v2 = vld [vmem:[#allocation5_spill] sm:$0xff] }
 0x1d9   :  { %v1900_v13 = vpop.f32.mrf.mxu0  ;;  %2413 = vmatmul.mubr.bf16.gmra.mxu0 %v7751_v55 }
 0x1da   :  { %10861 = vst [vmem:[#allocation61_spill] sm:$0xff] %v8328_v22  ;;  %v1901_v4 = vadd.f32 %v8256_v9, %v1900_v13  ;;  %v2189_v36 = vpop.f32.mrf.mxu1  ;;  %2702 = vmatmul.mubr.bf16.gmra.mxu1 %v7038_v44  ;;  %2420 = vmatprep.mubr.bf16.mxu0 %v10862_v18 }
 0x1db   :  { %v1902_v1 = vpop.f32.mrf.mxu0  ;;  %2709 = vmatprep.mubr.bf16.mxu1 %v10863_v2 }
 0x1dc   :  { %v8338_v28 = vadd.f32 %v2189_v36, %v1901_v4  ;;  %v2191_v41 = vpop.f32.mrf.mxu1  ;;  %v7039_v4 = vld [vmem:[%s10664_s0 + $0x120] sm:$0xff]  }
 0x1dd   :  { %v1903_v8 = vpop.f32.mrf.mxu0  ;;  %v10866_v36 = vld [vmem:[#allocation6_spill] sm:$0xff]  ;;  %v10867_v41 = vld [vmem:[#allocation7_spill] sm:$0xff] }
 0x1de   :  { %10864 = vst [vmem:[#allocation4_spill] sm:$0xff] %v8338_v28  ;;  %v1904_v55 = vadd.f32 %v8256_v9, %v1903_v8  ;;  %v2192_v21 = vpop.f32.mrf.mxu1 }
 0x1df   :  { %v1905_v22 = vpop.f32.mrf.mxu0 }
 0x1e0   :  { %v8341_v13 = vadd.f32 %v2192_v21, %v1904_v55  ;;  %v2194_v62 = vpop.f32.mrf.mxu1 }
 0x1e1   :  { %v1908_v38 = vpop.f32.mrf.mxu0  ;;  %2421 = vmatmul.mubr.bf16.gmra.mxu0 %v10859_v24 }
 0x1e2   :  { %10865 = vst [vmem:[#allocation5_spill] sm:$0xff] %v8341_v13  ;;  %v1909_v44 = vadd.f32 %v8256_v9, %v1908_v38  ;;  %v2197_v15 = vpop.f32.mrf.mxu1  ;;  %2710 = vmatmul.mubr.bf16.gmra.mxu1 %v7039_v4  ;;  %2428 = vmatprep.mubr.bf16.mxu0 %v10866_v36  ;;  %v6952_v38 = vld [vmem:[%s10666_s3 + $0x10] sm:$0xff]  }
 0x1e3   :  { %v1910_v1 = vpop.f32.mrf.mxu0  ;;  %2717 = vmatprep.mubr.bf16.mxu1 %v10867_v41  ;;  %4778 = vmatpush1.bf16.msra.mxu1 %v6952_v38 }
 0x1e4   :  { %v8350_v22 = vadd.f32 %v2197_v15, %v1909_v44  ;;  %v2199_v8 = vpop.f32.mrf.mxu1  ;;  %4779 = vmatprep.subr.bf16.mxu1 %v10844_v7  ;;  %v7040_v1 = vld [vmem:[%s10664_s0 + $0x12c] sm:$0xff]  }
 0x1e5   :  { %v1911_v62 = vpop.f32.mrf.mxu0  ;;  %v10870_v8 = vld [vmem:[#allocation8_spill] sm:$0xff] }
 0x1e6   :  { %10868 = vst [vmem:[#allocation6_spill] sm:$0xff] %v8350_v22  ;;  %v1912_v55 = vadd.f32 %v8256_v9, %v1911_v62  ;;  %v2200_v24 = vpop.f32.mrf.mxu1 }
 0x1e7   :  { %v1913_v21 = vpop.f32.mrf.mxu0 }
 0x1e8   :  { %v8356_v13 = vadd.f32 %v2200_v24, %v1912_v55  ;;  %v2202_v4 = vpop.f32.mrf.mxu1  ;;  %v10871_v55 = vld [vmem:[#allocation9_spill] sm:$0xff] }
 0x1e9   :  { %v1916_v28 = vpop.f32.mrf.mxu0  ;;  %2429 = vmatmul.mubr.bf16.gmra.mxu0 %v10863_v2 }
 0x1ea   :  { %10869 = vst [vmem:[#allocation7_spill] sm:$0xff] %v8356_v13  ;;  %v1917_v15 = vadd.f32 %v8256_v9, %v1916_v28  ;;  %v2205_v44 = vpop.f32.mrf.mxu1  ;;  %2718 = vmatmul.mubr.bf16.gmra.mxu1 %v7040_v1  ;;  %2436 = vmatprep.mubr.bf16.mxu0 %v10870_v8 }
 0x1eb   :  { %v1918_v62 = vpop.f32.mrf.mxu0  ;;  %2725 = vmatprep.mubr.bf16.mxu1 %v10871_v55 }
 0x1ec   :  { %v8366_v24 = vadd.f32 %v2205_v44, %v1917_v15  ;;  %v2207_v38 = vpop.f32.mrf.mxu1  ;;  %v7041_v15 = vld [vmem:[%s10664_s0 + $0x138] sm:$0xff]   ;;  %v10874_v44 = vld [vmem:[#allocation10_spill] sm:$0xff] }
 0x1ed   :  { %v1919_v21 = vpop.f32.mrf.mxu0  ;;  %v10875_v38 = vld [vmem:[#allocation11_spill] sm:$0xff] }
 0x1ee   :  { %10872 = vst [vmem:[#allocation8_spill] sm:$0xff] %v8366_v24  ;;  %v1920_v2 = vadd.f32 %v8256_v9, %v1919_v21  ;;  %v2208_v4 = vpop.f32.mrf.mxu1 }
 0x1ef   :  { %v1921_v13 = vpop.f32.mrf.mxu0 }
 0x1f0   :  { %v8369_v28 = vadd.f32 %v2208_v4, %v1920_v2  ;;  %v2210_v22 = vpop.f32.mrf.mxu1 }
 0x1f1   :  { %v1924_v50 = vpop.f32.mrf.mxu0  ;;  %2437 = vmatmul.mubr.bf16.gmra.mxu0 %v10867_v41 }
 0x1f2   :  { %10873 = vst [vmem:[#allocation9_spill] sm:$0xff] %v8369_v28  ;;  %v1925_v1 = vadd.f32 %v8256_v9, %v1924_v50  ;;  %v2213_v47 = vpop.f32.mrf.mxu1  ;;  %2726 = vmatmul.mubr.bf16.gmra.mxu1 %v7041_v15  ;;  %2444 = vmatprep.mubr.bf16.mxu0 %v10874_v44  ;;  %v6953_v50 = vld [vmem:[%s10666_s3 + $0x8] sm:$0xff]  }
 0x1f3   :  { %v1926_v62 = vpop.f32.mrf.mxu0  ;;  %2733 = vmatprep.mubr.bf16.mxu1 %v10875_v38  ;;  %4780 = vmatpush1.bf16.msra.mxu1 %v6953_v50 }
 0x1f4   :  { %v8378_v13 = vadd.f32 %v2213_v47, %v1925_v1  ;;  %v2215_v21 = vpop.f32.mrf.mxu1  ;;  %4781 = vmatprep.subr.bf16.mxu1 %v10844_v7  ;;  %v7042_v62 = vld [vmem:[%s10664_s0 + $0x144] sm:$0xff]  }
 0x1f5   :  { %v1927_v22 = vpop.f32.mrf.mxu0  ;;  %v10878_v21 = vld [vmem:[#allocation13_spill] sm:$0xff] }
 0x1f6   :  { %10876 = vst [vmem:[#allocation10_spill] sm:$0xff] %v8378_v13  ;;  %v1928_v2 = vadd.f32 %v8256_v9, %v1927_v22  ;;  %v2216_v41 = vpop.f32.mrf.mxu1 }
 0x1f7   :  { %v1929_v4 = vpop.f32.mrf.mxu0 }
 0x1f8   :  { %v8384_v28 = vadd.f32 %v2216_v41, %v1928_v2  ;;  %v2218_v15 = vpop.f32.mrf.mxu1  ;;  %v10879_v2 = vld [vmem:[#allocation14_spill] sm:$0xff] }
 0x1f9   :  { %v1932_v24 = vpop.f32.mrf.mxu0  ;;  %2445 = vmatmul.mubr.bf16.gmra.mxu0 %v10871_v55 }
 0x1fa   :  { %10877 = vst [vmem:[#allocation11_spill] sm:$0xff] %v8384_v28  ;;  %v1933_v47 = vadd.f32 %v8256_v9, %v1932_v24  ;;  %v2221_v1 = vpop.f32.mrf.mxu1  ;;  %2734 = vmatmul.mubr.bf16.gmra.mxu1 %v7042_v62  ;;  %2452 = vmatprep.mubr.bf16.mxu0 %v10878_v21  ;;  %v10882_v62 = vld [vmem:[#allocation12_spill] sm:$0xff] }
 0x1fb   :  { %v1934_v22 = vpop.f32.mrf.mxu0  ;;  %2741 = vmatprep.mubr.bf16.mxu1 %v10879_v2 }
 0x1fc   :  { %v8394_v41 = vadd.f32 %v2221_v1, %v1933_v47  ;;  %v2223_v50 = vpop.f32.mrf.mxu1  ;;  %v7043_v47 = vld [vmem:[%s10664_s0 + $0x150] sm:$0xff]   ;;  %v10883_v1 = vld [vmem:[#allocation17_spill] sm:$0xff] }
 0x1fd   :  { %v1935_v4 = vpop.f32.mrf.mxu0 }
 0x1fe   :  { %10880 = vst [vmem:[#allocation13_spill] sm:$0xff] %v8394_v41  ;;  %v1936_v55 = vadd.f32 %v8256_v9, %v1935_v4  ;;  %v2224_v15 = vpop.f32.mrf.mxu1  ;;  %v10884_v9 = vld [vmem:[#allocation18_spill] sm:$0xff]  ;;  %v10886_v4 = vld [vmem:[#allocation15_spill] sm:$0xff] }
 0x1ff   :  { %v1937_v28 = vpop.f32.mrf.mxu0 }
 0x200   :  { %v8397_v24 = vadd.f32 %v2224_v15, %v1936_v55  ;;  %v2226_v13 = vpop.f32.mrf.mxu1 }
 0x201   :  { %v2262_v19 = vpop.f32.mrf.mxu0  ;;  %2453 = vmatmul.mubr.bf16.gmra.mxu0 %v10875_v38 }
 0x202   :  { %10881 = vst [vmem:[#allocation14_spill] sm:$0xff] %v8397_v24  ;;  %v2263_v34 = vadd.f32 %v2262_v19, %v10882_v62  ;;  %v2551_v54 = vpop.f32.mrf.mxu1  ;;  %2742 = vmatmul.mubr.bf16.gmra.mxu1 %v7043_v47  ;;  %2460 = vmatprep.mubr.bf16.mxu0 %v10883_v1  ;;  %v6954_v19 = vld [vmem:[%s10666_s3] sm:$0xff]  }
 0x203   :  { %v2264_v22 = vpop.f32.mrf.mxu0  ;;  %2749 = vmatprep.mubr.bf16.mxu1 %v10884_v9  ;;  %4782 = vmatpush1.bf16.msra.mxu1 %v6954_v19 }
 0x204   :  { %v8406_v28 = vadd.f32 %v2551_v54, %v2263_v34  ;;  %v2553_v50 = vpop.f32.mrf.mxu1  ;;  %4783 = vmatprep.subr.bf16.mxu1 %v10844_v7  ;;  %v10888_v54 = vld [vmem:[#allocation16_spill] sm:$0xff] }
 0x205   :  { %v2265_v13 = vpop.f32.mrf.mxu0  ;;  %v7044_v50 = vld [vmem:[%s10664_s0 + $0x15c] sm:$0xff]  }
 0x206   :  { %10885 = vst [vmem:[#allocation12_spill] sm:$0xff] %v8406_v28  ;;  %v2266_v55 = vadd.f32 %v2265_v13, %v10886_v4  ;;  %v2554_v38 = vpop.f32.mrf.mxu1  ;;  %v10889_v13 = vld [vmem:[#allocation21_spill] sm:$0xff] }
 0x207   :  { %v2267_v15 = vpop.f32.mrf.mxu0 }
 0x208   :  { %v8412_v62 = vadd.f32 %v2554_v38, %v2266_v55  ;;  %v2556_v47 = vpop.f32.mrf.mxu1  ;;  %v10890_v55 = vld [vmem:[#allocation22_spill] sm:$0xff] }
 0x209   :  { %v2270_v24 = vpop.f32.mrf.mxu0  ;;  %2461 = vmatmul.mubr.bf16.gmra.mxu0 %v10879_v2  ;;  %v10892_v2 = vld [vmem:[#allocation19_spill] sm:$0xff] }
 0x20a   :  { %10887 = vst [vmem:[#allocation17_spill] sm:$0xff] %v8412_v62  ;;  %v2271_v34 = vadd.f32 %v2270_v24, %v10888_v54  ;;  %v2559_v22 = vpop.f32.mrf.mxu1  ;;  %2750 = vmatmul.mubr.bf16.gmra.mxu1 %v7044_v50  ;;  %2468 = vmatprep.mubr.bf16.mxu0 %v10889_v13  ;;  %v10894_v50 = vld [vmem:[#allocation20_spill] sm:$0xff] }
 0x20b   :  { %v2272_v4 = vpop.f32.mrf.mxu0  ;;  %2757 = vmatprep.mubr.bf16.mxu1 %v10890_v55 }
 0x20c   :  { %v8422_v38 = vadd.f32 %v2559_v22, %v2271_v34  ;;  %v2561_v19 = vpop.f32.mrf.mxu1  ;;  %v7045_v34 = vld [vmem:[%s10664_s0 + $0x168] sm:$0xff]   ;;  %v10895_v22 = vld [vmem:[#allocation25_spill] sm:$0xff] }
 0x20d   :  { %v2273_v15 = vpop.f32.mrf.mxu0  ;;  %v10896_v19 = vld [vmem:[#allocation26_spill] sm:$0xff] }
 0x20e   :  { %10891 = vst [vmem:[#allocation18_spill] sm:$0xff] %v8422_v38  ;;  %v2274_v47 = vadd.f32 %v2273_v15, %v10892_v2  ;;  %v2562_v62 = vpop.f32.mrf.mxu1  ;;  %v10898_v2 = vld [vmem:[#allocation23_spill] sm:$0xff] }
 0x20f   :  { %v2275_v28 = vpop.f32.mrf.mxu0 }
 0x210   :  { %v8425_v24 = vadd.f32 %v2562_v62, %v2274_v47  ;;  %v2564_v54 = vpop.f32.mrf.mxu1 }
 0x211   :  { %v2278_v41 = vpop.f32.mrf.mxu0  ;;  %2469 = vmatmul.mubr.bf16.gmra.mxu0 %v10884_v9 }
 0x212   :  { %10893 = vst [vmem:[#allocation15_spill] sm:$0xff] %v8425_v24  ;;  %v2279_v58 = vadd.f32 %v2278_v41, %v10894_v50  ;;  %v2567_v33 = vpop.f32.mrf.mxu1  ;;  %2758 = vmatmul.mubr.bf16.gmra.mxu1 %v7045_v34  ;;  %2476 = vmatprep.mubr.bf16.mxu0 %v10895_v22  ;;  %v6955_v41 = vld [vmem:[%s10666_s3 + $0x78] sm:$0xff]  }
 0x213   :  { %v2280_v4 = vpop.f32.mrf.mxu0  ;;  %2765 = vmatprep.mubr.bf16.mxu1 %v10896_v19  ;;  %4784 = vmatpush2.bf16.msra.mxu1 %v6955_v41 }
 0x214   :  { %v8434_v28 = vadd.f32 %v2567_v33, %v2279_v58  ;;  %v2569_v62 = vpop.f32.mrf.mxu1  ;;  %4785 = vmatprep.subr.bf16.mxu1 %v10844_v7  ;;  %v10900_v33 = vld [vmem:[#allocation24_spill] sm:$0xff] }
 0x215   :  { %v2281_v15 = vpop.f32.mrf.mxu0  ;;  %v7046_v62 = vld [vmem:[%s10664_s0 + $0x174] sm:$0xff]  }
 0x216   :  { %10897 = vst [vmem:[#allocation16_spill] sm:$0xff] %v8434_v28  ;;  %v2282_v47 = vadd.f32 %v2281_v15, %v10898_v2  ;;  %v2570_v9 = vpop.f32.mrf.mxu1  ;;  %v8453_v2 = vld [vmem:[%s10664_s0 + $0x1a0] ss:$0 sps:$4 sm:$0x11]  }
 0x217   :  { %v2283_v54 = vpop.f32.mrf.mxu0  ;;  %v1001_v28 = vshll.u32 %v8453_v2, 16 }
 0x218   :  { %v8440_v50 = vadd.f32 %v2570_v9, %v2282_v47  ;;  %v2572_v34 = vpop.f32.mrf.mxu1  ;;  %v10902_v54 = vld [vmem:[#allocation27_spill] sm:$0xff] }
 0x219   :  { %v2286_v24 = vpop.f32.mrf.mxu0  ;;  %2477 = vmatmul.mubr.bf16.gmra.mxu0 %v10890_v55  ;;  %v8458_v55 = vld [vmem:[%s10664_s0 + $0x198] sm:$0xff]  }
 0x21a   :  { %10899 = vst [vmem:[#allocation21_spill] sm:$0xff] %v8440_v50  ;;  %v2287_v58 = vadd.f32 %v2286_v24, %v10900_v33  ;;  %v2575_v4 = vpop.f32.mrf.mxu1  ;;  %2766 = vmatmul.mubr.bf16.gmra.mxu1 %v7046_v62  ;;  %2484 = vmatprep.mubr.bf16.mxu0 %v7978_v39  ;;  %v996_v24 = vshll.u32 %v8458_v55, 16  ;;  %v8471_v39 = vld [vmem:[%s10664_s0 + $0x1a4] sm:$0xff]  }
 0x21b   :  { %v2288_v15 = vpop.f32.mrf.mxu0  ;;  %2773 = vmatprep.mubr.bf16.mxu1 %v7981_v12 }
 0x21c   :  { %v8461_v47 = vadd.f32 %v2575_v4, %v2287_v58  ;;  %v2577_v9 = vpop.f32.mrf.mxu1  ;;  %v994_v15 = vshrl.u32 %v8458_v55, 16  ;;  %v998_v50 = vrot.slane %v996_v24, 1  ;;  %v7048_v24 = vld [vmem:[%s10664_s0 + $0x180] sm:$0xff]  }
 0x21d   :  { %v2289_v41 = vpop.f32.mrf.mxu0 }
 0x21e   :  { %10901 = vst [vmem:[#allocation22_spill] sm:$0xff] %v8461_v47  ;;  %v2290_v34 = vadd.f32 %v2289_v41, %v10902_v54  ;;  %v2578_v33 = vpop.f32.mrf.mxu1  ;;  %v1003_v54 = vrot.slane %v1001_v28, 1 }
 0x21f   :  { %v2291_v62 = vpop.f32.mrf.mxu0 }
 0x220   :  { %v8466_v38 = vadd.f32 %v2578_v33, %v2290_v34  ;;  %v2580_v25 = vpop.f32.mrf.mxu1 }
 0x221   :  { %v2294_v58 = vpop.f32.mrf.mxu0  ;;  %2485 = vmatmul.mubr.bf16.gmra.mxu0 %v10896_v19  ;;  %v999_v25 = vor.u32 %v998_v50, %v994_v15  ;;  %v1048_v19 = vshll.u32 %v8471_v39, 16 }
 0x222   :  { %10903 = vst [vmem:[#allocation19_spill] sm:$0xff] %v8466_v38  ;;  %v2295_v4 = vadd.f32 %v2294_v58, %v7974_v11  ;;  %v2583_v9 = vpop.f32.mrf.mxu1  ;;  %2774 = vmatmul.mubr.bf16.gmra.mxu1 %v7048_v24  ;;  %2492 = vmatprep.mubr.bf16.mxu0 %v7997_v26  ;;  %v8485_v11 = vld [vmem:[%s10664_s0 + $0x1ac] ss:$0 sps:$4 sm:$0x11]   ;;  %v10906_v58 = vld [vmem:[#allocation29_spill] sm:$0xff] }
 0x223   :  { %v2296_v41 = vpop.f32.mrf.mxu0  ;;  %2781 = vmatprep.mubr.bf16.mxu1 %v8000_v30  ;;  %10905 = vst [vmem:[#allocation25_spill] sm:$0xff] %v8485_v11  ;;  %v1004_v28 = vsel %vm417_vm0, %v999_v25, %v1003_v54  ;;  %v1010_v54 = vrot.slane %v8458_v55, 1 }
 0x224   :  { %v8480_v34 = vadd.f32 %v2583_v9, %v2295_v4  ;;  %v2585_v33 = vpop.f32.mrf.mxu1  ;;  %v6956_v41 = vld [vmem:[%s10666_s3 + $0x70] sm:$0xff]   ;;  %v1046_v9 = vshrl.u32 %v8471_v39, 16 }
 0x225   :  { %v2297_v62 = vpop.f32.mrf.mxu0  ;;  %v1050_v33 = vrot.slane %v1048_v19, 1  ;;  %4786 = vmatpush2.bf16.msra.mxu1 %v6956_v41  ;;  %v1011_v19 = vrot.slane %v8453_v2, 1 }
 0x226   :  { %10904 = vst [vmem:[#allocation20_spill] sm:$0xff] %v8480_v34  ;;  %v2298_v24 = vadd.f32 %v2297_v62, %v10906_v58  ;;  %v2586_v38 = vpop.f32.mrf.mxu1  ;;  %v1053_v34 = vshll.u32 %v8485_v11, 16  ;;  %4787 = vmatprep.subr.bf16.mxu1 %v10844_v7 }
 0x227   :  { %v2299_v50 = vpop.f32.mrf.mxu0  ;;  %v1051_v41 = vor.u32 %v1050_v33, %v1046_v9 }
 0x228   :  { %v8493_v15 = vadd.f32 %v2586_v38, %v2298_v24  ;;  %v2588_v4 = vpop.f32.mrf.mxu1  ;;  %v7049_v38 = vld [vmem:[%s10664_s0 + $0x18c] sm:$0xff]   ;;  %v1055_v50 = vrot.slane %v1053_v34, 1 }
 0x229   :  { %v2302_v47 = vpop.f32.mrf.mxu0  ;;  %2493 = vmatmul.mubr.bf16.gmra.mxu0 %v7981_v12 }
 0x22a   :  { %10907 = vst [vmem:[#allocation26_spill] sm:$0xff] %v8493_v15  ;;  %v2303_v62 = vadd.f32 %v2302_v47, %v7993_v45  ;;  %v2591_v58 = vpop.f32.mrf.mxu1  ;;  %2782 = vmatmul.mubr.bf16.gmra.mxu1 %v7049_v38  ;;  %2500 = vmatprep.mubr.bf16.mxu0 %v8016_v5  ;;  %v10908_v47 = vld [vmem:[#allocation31_spill] sm:$0xff]  ;;  %v8510_v38 = vsel %vm834_vm1, %v1010_v54, %v1011_v19 }
 0x22b   :  { %v2304_v25 = vpop.f32.mrf.mxu0  ;;  %2789 = vmatprep.mubr.bf16.mxu1 %v1004_v28  ;;  %v1056_v26 = vsel %vm417_vm0, %v1051_v41, %v1055_v50 }
 0x22c   :  { %v8506_v24 = vadd.f32 %v2591_v58, %v2303_v62  ;;  %v2593_v12 = vpop.f32.mrf.mxu1 }
 0x22d   :  { %v2305_v45 = vpop.f32.mrf.mxu0 }
 0x22e   :  { %v2306_v4 = vadd.f32 %v2305_v45, %v10908_v47  ;;  %v2594_v15 = vpop.f32.mrf.mxu1 }
 0x22f   :  { %v2307_v11 = vpop.f32.mrf.mxu0 }
 0x230   :  { %v8512_v5 = vadd.f32 %v2594_v15, %v2306_v4  ;;  %v2596_v25 = vpop.f32.mrf.mxu1 }
 0x231   :  { %v2310_v16 = vpop.f32.mrf.mxu0  ;;  %2501 = vmatmul.mubr.bf16.gmra.mxu0 %v8000_v30  ;;  %v6957_v30 = vld [vmem:[%s10666_s3 + $0x68] sm:$0xff]  }
 0x232   :  { %v2311_v2 = vadd.f32 %v2310_v16, %v8012_v52  ;;  %v2599_v9 = vpop.f32.mrf.mxu1  ;;  %2790 = vmatmul.mubr.bf16.gmra.mxu1 %v8458_v55  ;;  %2508 = vmatprep.mubr.bf16.mxu0 %v8510_v38 }
 0x233   :  { %v2312_v34 = vpop.f32.mrf.mxu0  ;;  %2797 = vmatprep.mubr.bf16.mxu1 %v1056_v26  ;;  %4788 = vmatpush2.bf16.msra.mxu1 %v6957_v30 }
 0x234   :  { %v8519_v11 = vadd.f32 %v2599_v9, %v2311_v2  ;;  %v2601_v33 = vpop.f32.mrf.mxu1  ;;  %4789 = vmatprep.subr.bf16.mxu1 %v10844_v7 }
 0x235   :  { %v2313_v15 = vpop.f32.mrf.mxu0 }
 0x236   :  { %v2314_v62 = vadd.f32 %v2313_v15, %v8018_v49  ;;  %v2602_v58 = vpop.f32.mrf.mxu1 }
 0x237   :  { %v2315_v54 = vpop.f32.mrf.mxu0 }
 0x238   :  { %v8525_v52 = vadd.f32 %v2602_v58, %v2314_v62  ;;  %v2604_v16 = vpop.f32.mrf.mxu1  ;;  %v6958_v58 = vld [vmem:[%s10666_s3 + $0x60] sm:$0xff]  }
 0x239   :  { %v2318_v55 = vpop.f32.mrf.mxu0  ;;  %2509 = vmatmul.mubr.bf16.gmra.mxu0 %v1004_v28  ;;  %4790 = vmatpush2.bf16.msra.mxu1 %v6958_v58 }
 0x23a   :  { %v2319_v26 = vadd.f32 %v2318_v55, %v8025_v31  ;;  %v2607_v19 = vpop.f32.mrf.mxu1  ;;  %2798 = vmatmul.mubr.bf16.gmra.mxu1 %v8471_v39  ;;  %6658 = vmatprep.mubr.bf16.mxu0 %v7305_v20 }
 0x23b   :  { %v2320_v49 = vpop.f32.mrf.mxu0  ;;  %4791 = vmatprep.subr.bf16.mxu1 %v10844_v7 }
 0x23c   :  { %v8531_v12 = vadd.f32 %v2607_v19, %v2319_v26  ;;  %v2609_v41 = vpop.f32.mrf.mxu1 }
 0x23d   :  { %v2321_v50 = vpop.f32.mrf.mxu0 }
 0x23e   :  { %v2322_v45 = vadd.f32 %v2321_v50, %v8028_v60  ;;  %v2610_v47 = vpop.f32.mrf.mxu1 }
 0x23f   :  { %v2323_v4 = vpop.f32.mrf.mxu0 }
 0x240   :  { %v8534_v25 = vadd.f32 %v2610_v47, %v2322_v45  ;;  %v2612_v28 = vpop.f32.mrf.mxu1 }
 0x241   :  { %v2326_v2 = vpop.f32.mrf.mxu0  ;;  %6659 = vmatmul.mubr.bf16.vlgmr.msra.gmra.mxu0 %v7335_v35 }
 0x242   :  { %v2327_v31 = vadd.f32 %v2326_v2, %v8044_v61  ;;  %v2615_v9 = vpop.f32.mrf.mxu1  ;;  %6662 = vmatprep.mubr.bf16.mxu0 %v7363_v48 }
 0x243   :  { %v2328_v20 = vpop.f32.mrf.mxu0 }
 0x244   :  { %v8539_v34 = vadd.f32 %v2615_v9, %v2327_v31  ;;  %v2617_v33 = vpop.f32.mrf.mxu1  ;;  %v10909_v9 = vld [vmem:[#allocation33_spill] sm:$0xff] }
 0x245   :  { %v2329_v15 = vpop.f32.mrf.mxu0 }
 0x246   :  { %v2330_v60 = vadd.f32 %v2329_v15, %v8047_v0  ;;  %v2618_v62 = vpop.f32.mrf.mxu1 }
 0x247   :  { %v2331_v30 = vpop.f32.mrf.mxu0 }
 0x248   :  { %v8545_v54 = vadd.f32 %v2618_v62, %v2330_v60  ;;  %v2620_v35 = vpop.f32.mrf.mxu1  ;;  %v6961_v62 = vld [vmem:[%s10666_s3 + $0xb0] sm:$0xff]  }
 0x249   :  { %v2334_v61 = vpop.f32.mrf.mxu0  ;;  %6663 = vmatmul.mubr.bf16.gmra.mxu0 %v7392_v63 }
 0x24a   :  { %v2335_v48 = vadd.f32 %v2334_v61, %v8059_v51  ;;  %v2623_v16 = vpop.f32.mrf.mxu1  ;;  %6666 = vmatprep.mubr.bf16.mxu0 %v7420_v17 }
 0x24b   :  { %v2336_v0 = vpop.f32.mrf.mxu0 }
 0x24c   :  { %v8551_v55 = vadd.f32 %v2623_v16, %v2335_v48  ;;  %v2625_v26 = vpop.f32.mrf.mxu1  ;;  %v10910_v0 = vld [vmem:[#allocation34_spill] sm:$0xff] }
 0x24d   :  { %v2337_v19 = vpop.f32.mrf.mxu0 }
 0x24e   :  { %v2338_v49 = vadd.f32 %v2337_v19, %v8065_v37  ;;  %v2626_v41 = vpop.f32.mrf.mxu1  ;;  %v6960_v37 = vld [vmem:[%s10666_s3 + $0xb8] sm:$0xff]  }
 0x24f   :  { %v2339_v50 = vpop.f32.mrf.mxu0  ;;  %5057 = vmatpush1.bf16.msra.mxu0 %v6960_v37 }
 0x250   :  { %v8554_v45 = vadd.f32 %v2626_v41, %v2338_v49  ;;  %v2628_v47 = vpop.f32.mrf.mxu1  ;;  %5058 = vmatprep.subr.bf16.mxu0 %v10844_v7  ;;  %v6963_v50 = vld [vmem:[%s10666_s3 + $0xa0] sm:$0xff]  }
 0x251   :  { %v2342_v63 = vpop.f32.mrf.mxu0  ;;  %6667 = vmatmul.mubr.bf16.gmra.mxu0 %v7444_v32  ;;  %v6959_v32 = vld [vmem:[%s10666_s3 + $0x58] sm:$0xff]  }
 0x252   :  { %v2343_v51 = vadd.f32 %v2342_v63, %v8074_v29  ;;  %v2631_v4 = vpop.f32.mrf.mxu1  ;;  %6670 = vmatprep.mubr.bf16.mxu0 %v7459_v46  ;;  %4792 = vmatpush2.bf16.msra.mxu1 %v6959_v32 }
 0x253   :  { %v2344_v17 = vpop.f32.mrf.mxu0  ;;  %4793 = vmatprep.subr.bf16.mxu1 %v10844_v7  ;;  %5059 = vmatpush1.bf16.msra.mxu0 %v6961_v62 }
 0x254   :  { %v8559_v28 = vadd.f32 %v2631_v4, %v2343_v51  ;;  %v2633_v2 = vpop.f32.mrf.mxu1  ;;  %5060 = vmatprep.subr.bf16.mxu0 %v10844_v7 }
 0x255   :  { %v2345_v31 = vpop.f32.mrf.mxu0 }
 0x256   :  { %v2346_v20 = vadd.f32 %v2345_v31, %v10909_v9  ;;  %v2634_v33 = vpop.f32.mrf.mxu1  ;;  %v10911_v31 = vld [vmem:[#allocation35_spill] sm:$0xff] }
 0x257   :  { %v2347_v29 = vpop.f32.mrf.mxu0 }
 0x258   :  { %v8568_v15 = vadd.f32 %v2634_v33, %v2346_v20  ;;  %v2636_v46 = vpop.f32.mrf.mxu1  ;;  %v10912_v29 = vld [vmem:[#allocation2_spill] sm:$0xff] }
 0x259   :  { %v2350_v60 = vpop.f32.mrf.mxu0  ;;  %6671 = vmatmul.mubr.bf16.gmra.mxu0 %v7495_v3  ;;  %v6962_v3 = vld [vmem:[%s10666_s3 + $0xa8] sm:$0xff]   ;;  %v6966_v46 = vld [vmem:[%s10666_s3 + $0x90] sm:$0xff]  }
 0x25a   :  { %v2351_v58 = vadd.f32 %v2350_v60, %v8086_v6  ;;  %v2639_v30 = vpop.f32.mrf.mxu1  ;;  %6674 = vmatprep.mubr.bf16.mxu0 %v7524_v23  ;;  %5061 = vmatpush1.bf16.msra.mxu0 %v6962_v3  ;;  %v10913_v60 = vld [vmem:[#allocation36_spill] sm:$0xff]  ;;  %v6967_v3 = vld [vmem:[%s10666_s3 + $0x88] sm:$0xff]  }
 0x25b   :  { %v2352_v35 = vpop.f32.mrf.mxu0  ;;  %5062 = vmatprep.subr.bf16.mxu0 %v10844_v7 }
 0x25c   :  { %v8578_v61 = vadd.f32 %v2639_v30, %v2351_v58  ;;  %v2641_v48 = vpop.f32.mrf.mxu1 }
 0x25d   :  { %v2353_v16 = vpop.f32.mrf.mxu0 }
 0x25e   :  { %v2354_v26 = vadd.f32 %v2353_v16, %v10910_v0  ;;  %v2642_v19 = vpop.f32.mrf.mxu1  ;;  %5063 = vmatpush1.bf16.msra.mxu0 %v6963_v50  ;;  %v10914_v0 = vld [vmem:[#allocation37_spill] sm:$0xff]  ;;  %v6968_v50 = vld [vmem:[%s10666_s3 + $0x80] sm:$0xff]  }
 0x25f   :  { %v2355_v49 = vpop.f32.mrf.mxu0  ;;  %5064 = vmatprep.subr.bf16.mxu0 %v10844_v7 }
 0x260   :  { %v8585_v6 = vadd.f32 %v2642_v19, %v2354_v26  ;;  %v2644_v23 = vpop.f32.mrf.mxu1 }
 0x261   :  { %v2358_v41 = vpop.f32.mrf.mxu0  ;;  %6675 = vmatmul.mubr.bf16.gmra.mxu0 %v7552_v42  ;;  %v6965_v42 = vld [vmem:[%s10666_s3 + $0x98] sm:$0xff]  }
 0x262   :  { %v2359_v47 = vadd.f32 %v2358_v41, %v8101_v56  ;;  %v2647_v63 = vpop.f32.mrf.mxu1  ;;  %6678 = vmatprep.mubr.bf16.mxu0 %v7577_v57  ;;  %v6964_v56 = vld [vmem:[%s10666_s3 + $0x50] sm:$0xff]   ;;  %5065 = vmatpush1.bf16.msra.mxu0 %v6965_v42 }
 0x263   :  { %v2360_v51 = vpop.f32.mrf.mxu0  ;;  %4794 = vmatpush2.bf16.msra.mxu1 %v6964_v56  ;;  %5066 = vmatprep.subr.bf16.mxu0 %v10844_v7  ;;  %v7051_v42 = vld [vmem:[%s10664_s0 + $0xd4] ss:$0 sps:$4 sm:$0x11]  }
 0x264   :  { %v8594_v4 = vadd.f32 %v2647_v63, %v2359_v47  ;;  %v2649_v17 = vpop.f32.mrf.mxu1  ;;  %4795 = vmatprep.subr.bf16.mxu1 %v10844_v7  ;;  %v10915_v47 = vld [vmem:[#allocation38_spill] sm:$0xff] }
 0x265   :  { %v2361_v2 = vpop.f32.mrf.mxu0  ;;  %v7050_v17 = vld [vmem:[%s10664_s0 + $0xcc] sm:$0xff]  }
 0x266   :  { %v2362_v37 = vadd.f32 %v2361_v2, %v10911_v31  ;;  %v2650_v9 = vpop.f32.mrf.mxu1  ;;  %5067 = vmatpush1.bf16.msra.mxu0 %v6966_v46  ;;  %v1059_v2 = vrot.slane %v7050_v17, 1  ;;  %v1060_v31 = vrot.slane %v7051_v42, 1  ;;  %v6969_v46 = vld [vmem:[%s10666_s3 + $0x48] sm:$0xff]   ;;  %v6973_v42 = vld [vmem:[%s10666_s3 + $0xe0] sm:$0xff]  }
 0x267   :  { %v2363_v57 = vpop.f32.mrf.mxu0  ;;  %5068 = vmatprep.subr.bf16.mxu0 %v10844_v7  ;;  %4796 = vmatpush2.bf16.msra.mxu1 %v6969_v46 }
 0x268   :  { %v8604_v20 = vadd.f32 %v2650_v9, %v2362_v37  ;;  %v2652_v33 = vpop.f32.mrf.mxu1  ;;  %v10916_v57 = vld [vmem:[#allocation39_spill] sm:$0xff]  ;;  %4797 = vmatprep.subr.bf16.mxu1 %v10844_v7 }
 0x269   :  { %v2366_v32 = vpop.f32.mrf.mxu0  ;;  %6679 = vmatmul.mubr.bf16.gmra.mxu0 %v10912_v29  ;;  %v1061_v29 = vsel %vm834_vm1, %v1059_v2, %v1060_v31  ;;  %v10919_v31 = vld [vmem:[#allocation42_spill] sm:$0xff] }
 0x26a   :  { %v2367_v62 = vadd.f32 %v2366_v32, %v10913_v60  ;;  %v2655_v58 = vpop.f32.mrf.mxu1  ;;  %6682 = vmatprep.mubr.bf16.mxu0 %v7639_v40  ;;  %5069 = vmatpush1.bf16.msra.mxu0 %v6967_v3 }
 0x26b   :  { %v2368_v30 = vpop.f32.mrf.mxu0  ;;  %5070 = vmatprep.subr.bf16.mxu0 %v10844_v7 }
 0x26c   :  { %v8614_v35 = vadd.f32 %v2655_v58, %v2367_v62  ;;  %v2657_v48 = vpop.f32.mrf.mxu1 }
 0x26d   :  { %v2369_v16 = vpop.f32.mrf.mxu0  ;;  %v6971_v48 = vld [vmem:[%s10666_s3 + $0xf0] sm:$0xff]  }
 0x26e   :  { %v2370_v26 = vadd.f32 %v2369_v16, %v10914_v0  ;;  %v2658_v19 = vpop.f32.mrf.mxu1  ;;  %5071 = vmatpush1.bf16.msra.mxu0 %v6968_v50  ;;  %v10917_v16 = vld [vmem:[#allocation40_spill] sm:$0xff]  ;;  %v10918_v50 = vld [vmem:[#allocation41_spill] sm:$0xff] }
 0x26f   :  { %v2371_v49 = vpop.f32.mrf.mxu0  ;;  %5072 = vmatprep.subr.bf16.mxu0 %v10844_v7 }
 0x270   :  { %v8621_v23 = vadd.f32 %v2658_v19, %v2370_v26  ;;  %v2660_v40 = vpop.f32.mrf.mxu1 }
 0x271   :  { %v2374_v41 = vpop.f32.mrf.mxu0  ;;  %6683 = vmatmul.mubr.bf16.gmra.mxu0 %v7673_v10 }
 0x272   :  { %v2375_v63 = vadd.f32 %v2374_v41, %v10915_v47  ;;  %v2663_v51 = vpop.f32.mrf.mxu1  ;;  %6686 = vmatprep.mubr.bf16.mxu0 %v8260_v59  ;;  %v6970_v59 = vld [vmem:[%s10666_s3 + $0xf8] sm:$0xff]   ;;  %v6972_v41 = vld [vmem:[%s10666_s3 + $0xe8] sm:$0xff]  }
 0x273   :  { %v2376_v10 = vpop.f32.mrf.mxu0  ;;  %5073 = vmatpush2.bf16.msra.mxu0 %v6970_v59 }
 0x274   :  { %v8636_v37 = vadd.f32 %v2663_v51, %v2375_v63  ;;  %v2665_v9 = vpop.f32.mrf.mxu1  ;;  %5074 = vmatprep.subr.bf16.mxu0 %v10844_v7 }
 0x275   :  { %v2377_v56 = vpop.f32.mrf.mxu0 }
 0x276   :  { %v2378_v33 = vadd.f32 %v2377_v56, %v10916_v57  ;;  %v2666_v32 = vpop.f32.mrf.mxu1 }
 0x277   :  { %v2379_v60 = vpop.f32.mrf.mxu0  ;;  %5075 = vmatpush2.bf16.msra.mxu0 %v6971_v48 }
 0x278   :  { %v8647_v62 = vadd.f32 %v2666_v32, %v2378_v33  ;;  %v2668_v58 = vpop.f32.mrf.mxu1  ;;  %5076 = vmatprep.subr.bf16.mxu0 %v10844_v7  ;;  %v6975_v32 = vld [vmem:[%s10666_s3 + $0xd8] sm:$0xff]  }
 0x279   :  { %v2382_v30 = vpop.f32.mrf.mxu0  ;;  %6687 = vmatmul.mubr.bf16.gmra.mxu0 %v1061_v29  ;;  %v10922_v29 = vld [vmem:[#allocation43_spill] sm:$0xff] }
 0x27a   :  { %v2383_v3 = vadd.f32 %v2382_v30, %v10917_v16  ;;  %v2671_v0 = vpop.f32.mrf.mxu1  ;;  %6690 = vmatprep.mubr.bf16.mxu0 %v7734_v27 }
 0x27b   :  { %v2384_v26 = vpop.f32.mrf.mxu0  ;;  %5077 = vmatpush2.bf16.msra.mxu0 %v6972_v41 }
 0x27c   :  { %v8656_v19 = vadd.f32 %v2671_v0, %v2383_v3  ;;  %v2673_v49 = vpop.f32.mrf.mxu1  ;;  %5078 = vmatprep.subr.bf16.mxu0 %v10844_v7 }
 0x27d   :  { %v2385_v40 = vpop.f32.mrf.mxu0  ;;  %v10924_v49 = vld [vmem:[#allocation44_spill] sm:$0xff] }
 0x27e   :  { %v2386_v47 = vadd.f32 %v2385_v40, %v10918_v50  ;;  %v2674_v63 = vpop.f32.mrf.mxu1  ;;  %v6974_v50 = vld [vmem:[%s10666_s3 + $0x40] sm:$0xff]  }
 0x27f   :  { %v2387_v51 = vpop.f32.mrf.mxu0  ;;  %5079 = vmatpush2.bf16.msra.mxu0 %v6973_v42  ;;  %4798 = vmatpush2.bf16.msra.mxu1 %v6974_v50 }
 0x280   :  { %v8663_v17 = vadd.f32 %v2674_v63, %v2386_v47  ;;  %v2676_v27 = vpop.f32.mrf.mxu1  ;;  %5080 = vmatprep.subr.bf16.mxu0 %v10844_v7  ;;  %v6976_v47 = vld [vmem:[%s10666_s3 + $0xd0] sm:$0xff]   ;;  %5345 = vmatprep.subr.bf16.mxu1 %v10844_v7 }
 0x281   :  { %v2390_v2 = vpop.f32.mrf.mxu0  ;;  %6691 = vmatmul.mubr.bf16.gmra.mxu0 %v7748_v53 }
 0x282   :  { %v2391_v10 = vadd.f32 %v2390_v2, %v10919_v31  ;;  %v2679_v9 = vpop.f32.mrf.mxu1  ;;  %6694 = vmatprep.mubr.bf16.mxu0 %v7762_v14  ;;  %v3194_v14 = vrot.slane %v10844_v7, 7 }
 0x283   :  { %v2392_v56 = vpop.f32.mrf.mxu0  ;;  %5081 = vmatpush2.bf16.msra.mxu0 %v6975_v32  ;;  %v6977_v32 = vld [vmem:[%s10666_s3 + $0xc8] sm:$0xff]  }
 0x284   :  { %v8672_v59 = vadd.f32 %v2679_v9, %v2391_v10  ;;  %v2681_v57 = vpop.f32.mrf.mxu1  ;;  %v8686_v30 = vsel %vm8675_vm4, 0, %v3194_v14  ;;  %5082 = vmatprep.subr.bf16.mxu0 %v10844_v7  ;;  %v8695_v26 = vsel %vm8675_vm4, %v3194_v14, 0  ;;  %v10925_v9 = vld [vmem:[#allocation45_spill] sm:$0xff] }
 0x285   :  { %v2393_v33 = vpop.f32.mrf.mxu0  ;;  %10923 = vst [vmem:[#allocation23_spill] sm:$0xff] %v8686_v30  ;;  %v3560_v3 = vshll.u32 %v8686_v30, 16  ;;  %v3558_v63 = vshrl.u32 %v8686_v30, 16  ;;  %v3565_v51 = vshll.u32 %v8695_v26, 16 }
 0x286   :  { %v2394_v46 = vadd.f32 %v2393_v33, %v10922_v29  ;;  %v2682_v60 = vpop.f32.mrf.mxu1 }
 0x287   :  { %v2395_v58 = vpop.f32.mrf.mxu0  ;;  %5083 = vmatpush2.bf16.msra.mxu0 %v6976_v47  ;;  %v3567_v31 = vrot.slane %v3565_v51, 1 }
 0x288   :  { %v8688_v48 = vadd.f32 %v2682_v60, %v2394_v46  ;;  %v2684_v16 = vpop.f32.mrf.mxu1  ;;  %5084 = vmatprep.subr.bf16.mxu0 %v10844_v7  ;;  %v10927_v58 = vld [vmem:[#allocation46_spill] sm:$0xff] }
 0x289   :  { %v2398_v0 = vpop.f32.mrf.mxu0  ;;  %6695 = vmatmul.mubr.bf16.gmra.mxu0 %v10862_v18  ;;  %v3562_v18 = vrot.slane %v3560_v3, 1 }
 0x28a   :  { %v2399_v40 = vadd.f32 %v2398_v0, %v10924_v49  ;;  %v2687_v41 = vpop.f32.mrf.mxu1  ;;  %6698 = vmatprep.mubr.bf16.mxu0 %v10866_v36  ;;  %v6978_v0 = vld [vmem:[%s10666_s3 + $0xc0] sm:$0xff]  }
 0x28b   :  { %v2400_v27 = vpop.f32.mrf.mxu0  ;;  %v3563_v36 = vor.u32 %v3562_v18, %v3558_v63  ;;  %5085 = vmatpush2.bf16.msra.mxu0 %v6977_v32  ;;  %v10930_v32 = vld [vmem:[#allocation49_spill] sm:$0xff] }
 0x28c   :  { %v8707_v2 = vadd.f32 %v2687_v41, %v2399_v40  ;;  %v2689_v42 = vpop.f32.mrf.mxu1  ;;  %5086 = vmatprep.subr.bf16.mxu0 %v10844_v7 }
 0x28d   :  { %v2401_v10 = vpop.f32.mrf.mxu0  ;;  %v8713_v33 = vsel %vm417_vm0, %v3563_v36, %v3567_v31  ;;  %v10929_v42 = vld [vmem:[#allocation48_spill] sm:$0xff] }
 0x28e   :  { %v2402_v56 = vadd.f32 %v2401_v10, %v10925_v9  ;;  %v2690_v57 = vpop.f32.mrf.mxu1  ;;  %10926 = vst [vmem:[#allocation24_spill] sm:$0xff] %v8713_v33  ;;  %4799 = vmatprep.mubr.bf16.mxu1 %v8713_v33 }
 0x28f   :  { %v2403_v14 = vpop.f32.mrf.mxu0  ;;  %4800 = vmatmul.mubr.bf16.vlgmr.msra.gmra.mxu1 %v8686_v30  ;;  %5087 = vmatpush2.bf16.msra.mxu0 %v6978_v0 }
 0x290   :  { %v8719_v29 = vadd.f32 %v2690_v57, %v2402_v56  ;;  %v2692_v46 = vpop.f32.mrf.mxu1  ;;  %5634 = vmatprep.subr.bf16.mxu0 %v10844_v7 }
 0x291   :  { %v2406_v60 = vpop.f32.mrf.mxu0  ;;  %6699 = vmatmul.mubr.bf16.gmra.mxu0 %v10870_v8  ;;  %v10928_v8 = vld [vmem:[#allocation47_spill] sm:$0xff] }
 0x292   :  { %v2407_v16 = vadd.f32 %v2406_v60, %v10927_v58  ;;  %v2695_v3 = vpop.f32.mrf.mxu1  ;;  %6702 = vmatprep.mubr.bf16.mxu0 %v10874_v44 }
 0x293   :  { %v2408_v49 = vpop.f32.mrf.mxu0 }
 0x294   :  { %v8729_v40 = vadd.f32 %v2695_v3, %v2407_v16  ;;  %v2697_v41 = vpop.f32.mrf.mxu1 }
 0x295   :  { %v2409_v50 = vpop.f32.mrf.mxu0 }
 0x296   :  { %v2410_v47 = vadd.f32 %v2409_v50, %v10928_v8  ;;  %v2698_v63 = vpop.f32.mrf.mxu1 }
 0x297   :  { %v2411_v18 = vpop.f32.mrf.mxu0 }
 0x298   :  { %v8733_v51 = vadd.f32 %v2698_v63, %v2410_v47  ;;  %v2700_v27 = vpop.f32.mrf.mxu1  ;;  %v10932_v47 = vld [vmem:[#allocation50_spill] sm:$0xff] }
 0x299   :  { %v2414_v44 = vpop.f32.mrf.mxu0  ;;  %6703 = vmatmul.mubr.bf16.gmra.mxu0 %v10878_v21  ;;  %v6979_v21 = vld [vmem:[%s10666_s3 + $0x138] sm:$0xff]  }
 0x29a   :  { %v2415_v36 = vadd.f32 %v2414_v44, %v10929_v42  ;;  %v2703_v31 = vpop.f32.mrf.mxu1  ;;  %6706 = vmatprep.mubr.bf16.mxu0 %v10883_v1  ;;  %5346 = vmatpush1.bf16.msra.mxu1 %v6979_v21 }
 0x29b   :  { %v2416_v10 = vpop.f32.mrf.mxu0  ;;  %5347 = vmatprep.subr.bf16.mxu1 %v10844_v7 }
 0x29c   :  { %v8738_v9 = vadd.f32 %v2703_v31, %v2415_v36  ;;  %v2705_v56 = vpop.f32.mrf.mxu1  ;;  %v10935_v36 = vld [vmem:[#allocation51_spill] sm:$0xff]  ;;  %v10936_v10 = vld [vmem:[#allocation30_spill] sm:$0xff] }
 0x29d   :  { %v2417_v57 = vpop.f32.mrf.mxu0 }
 0x29e   :  { %v2418_v14 = vadd.f32 %v2417_v57, %v10930_v32  ;;  %v2706_v46 = vpop.f32.mrf.mxu1 }
 0x29f   :  { %v2419_v60 = vpop.f32.mrf.mxu0 }
 0x2a0   :  { %v8741_v58 = vadd.f32 %v2706_v46, %v2418_v14  ;;  %v2708_v16 = vpop.f32.mrf.mxu1  ;;  %v10937_v46 = vld [vmem:[#allocation52_spill] sm:$0xff] }
 0x2a1   :  { %v2422_v3 = vpop.f32.mrf.mxu0  ;;  %6707 = vmatmul.mubr.bf16.gmra.mxu0 %v10889_v13 }
 0x2a2   :  { %v2423_v1 = vadd.f32 %v2422_v3, %v8230_v43  ;;  %v2711_v0 = vpop.f32.mrf.mxu1  ;;  %6710 = vmatprep.mubr.bf16.mxu0 %v10895_v22  ;;  %v10934_v43 = vld [vmem:[#allocation28_spill] sm:$0xff] }
 0x2a3   :  { %v2424_v49 = vpop.f32.mrf.mxu0 }
 0x2a4   :  { %v8750_v41 = vadd.f32 %v2711_v0, %v2423_v1  ;;  %v2713_v50 = vpop.f32.mrf.mxu1  ;;  %v6980_v0 = vld [vmem:[%s10666_s3 + $0x130] sm:$0xff]  }
 0x2a5   :  { %v2425_v8 = vpop.f32.mrf.mxu0  ;;  %v10939_v50 = vld [vmem:[#allocation32_spill] sm:$0xff]  ;;  %5348 = vmatpush1.bf16.msra.mxu1 %v6980_v0 }
 0x2a6   :  { %10931 = vst [vmem:[#allocation27_spill] sm:$0xff] %v8750_v41  ;;  %v2426_v63 = vadd.f32 %v2425_v8, %v10932_v47  ;;  %v2714_v18 = vpop.f32.mrf.mxu1  ;;  %v10940_v8 = vld [vmem:[#allocation53_spill] sm:$0xff]  ;;  %5349 = vmatprep.subr.bf16.mxu1 %v10844_v7 }
 0x2a7   :  { %v2427_v27 = vpop.f32.mrf.mxu0 }
 0x2a8   :  { %v8753_v44 = vadd.f32 %v2714_v18, %v2426_v63  ;;  %v2716_v13 = vpop.f32.mrf.mxu1  ;;  %v1062_v18 = vrot.slane %v8471_v39, 1  ;;  %v10941_v27 = vld [vmem:[#allocation25_spill] sm:$0xff] }
 0x2a9   :  { %v2430_v42 = vpop.f32.mrf.mxu0  ;;  %6711 = vmatmul.mubr.bf16.gmra.mxu0 %v10934_v43  ;;  %v1063_v13 = vrot.slane %v10941_v27, 1 }
 0x2aa   :  { %10933 = vst [vmem:[#allocation29_spill] sm:$0xff] %v8753_v44  ;;  %v2431_v22 = vadd.f32 %v2430_v42, %v10935_v36  ;;  %v2719_v31 = vpop.f32.mrf.mxu1  ;;  %6714 = vmatprep.mubr.bf16.mxu0 %v10936_v10 }
 0x2ab   :  { %v2432_v56 = vpop.f32.mrf.mxu0 }
 0x2ac   :  { %v8758_v57 = vadd.f32 %v2719_v31, %v2431_v22  ;;  %v2721_v32 = vpop.f32.mrf.mxu1  ;;  %v10943_v31 = vld [vmem:[#allocation54_spill] sm:$0xff] }
 0x2ad   :  { %v2433_v14 = vpop.f32.mrf.mxu0  ;;  %v1064_v32 = vsel %vm834_vm1, %v1062_v18, %v1063_v13  ;;  %v6981_v13 = vld [vmem:[%s10666_s3 + $0x128] sm:$0xff]  }
 0x2ae   :  { %v2434_v60 = vadd.f32 %v2433_v14, %v10937_v46  ;;  %v2722_v16 = vpop.f32.mrf.mxu1  ;;  %5350 = vmatpush1.bf16.msra.mxu1 %v6981_v13 }
 0x2af   :  { %v2435_v21 = vpop.f32.mrf.mxu0  ;;  %5351 = vmatprep.subr.bf16.mxu1 %v10844_v7 }
 0x2b0   :  { %v8761_v3 = vadd.f32 %v2722_v16, %v2434_v60  ;;  %v2724_v1 = vpop.f32.mrf.mxu1  ;;  %v10945_v60 = vld [vmem:[#allocation55_spill] sm:$0xff] }
 0x2b1   :  { %v2438_v49 = vpop.f32.mrf.mxu0  ;;  %6715 = vmatmul.mubr.bf16.gmra.mxu0 %v10939_v50 }
 0x2b2   :  { %10938 = vst [vmem:[#allocation31_spill] sm:$0xff] %v8761_v3  ;;  %v2439_v47 = vadd.f32 %v2438_v49, %v10940_v8  ;;  %v2727_v63 = vpop.f32.mrf.mxu1  ;;  %6718 = vmatprep.mubr.bf16.mxu0 %v8510_v38  ;;  %v10947_v8 = vld [vmem:[#allocation56_spill] sm:$0xff] }
 0x2b3   :  { %v2440_v42 = vpop.f32.mrf.mxu0 }
 0x2b4   :  { %v8772_v43 = vadd.f32 %v2727_v63, %v2439_v47  ;;  %v2729_v36 = vpop.f32.mrf.mxu1 }
 0x2b5   :  { %v2441_v22 = vpop.f32.mrf.mxu0 }
 0x2b6   :  { %10942 = vst [vmem:[#allocation33_spill] sm:$0xff] %v8772_v43  ;;  %v2442_v10 = vadd.f32 %v2441_v22, %v10943_v31  ;;  %v2730_v56 = vpop.f32.mrf.mxu1  ;;  %v10949_v22 = vld [vmem:[#allocation57_spill] sm:$0xff] }
 0x2b7   :  { %v2443_v14 = vpop.f32.mrf.mxu0 }
 0x2b8   :  { %v8776_v46 = vadd.f32 %v2730_v56, %v2442_v10  ;;  %v2732_v38 = vpop.f32.mrf.mxu1 }
 0x2b9   :  { %v2446_v39 = vpop.f32.mrf.mxu0  ;;  %6719 = vmatmul.mubr.bf16.gmra.mxu0 %v1064_v32 }
 0x2ba   :  { %10944 = vst [vmem:[#allocation34_spill] sm:$0xff] %v8776_v46  ;;  %v2447_v16 = vadd.f32 %v2446_v39, %v10945_v60  ;;  %v2735_v21 = vpop.f32.mrf.mxu1  ;;  %v10951_v39 = vld [vmem:[#allocation58_spill] sm:$0xff] }
 0x2bb   :  { %v2448_v1 = vpop.f32.mrf.mxu0 }
 0x2bc   :  { %v8779_v0 = vadd.f32 %v2735_v21, %v2447_v16  ;;  %v2737_v49 = vpop.f32.mrf.mxu1 }
 0x2bd   :  { %v2449_v50 = vpop.f32.mrf.mxu0 }
 0x2be   :  { %10946 = vst [vmem:[#allocation35_spill] sm:$0xff] %v8779_v0  ;;  %v2450_v47 = vadd.f32 %v2449_v50, %v10947_v8  ;;  %v2738_v63 = vpop.f32.mrf.mxu1  ;;  %v10953_v8 = vld [vmem:[#allocation59_spill] sm:$0xff] }
 0x2bf   :  { %v2451_v27 = vpop.f32.mrf.mxu0 }
 0x2c0   :  { %v8782_v42 = vadd.f32 %v2738_v63, %v2450_v47  ;;  %v2740_v18 = vpop.f32.mrf.mxu1 }
 0x2c1   :  { %v2454_v36 = vpop.f32.mrf.mxu0 }
 0x2c2   :  { %10948 = vst [vmem:[#allocation2_spill] sm:$0xff] %v8782_v42  ;;  %v2455_v31 = vadd.f32 %v2454_v36, %v10949_v22  ;;  %v2743_v10 = vpop.f32.mrf.mxu1  ;;  %v10955_v22 = vld [vmem:[#allocation60_spill] sm:$0xff] }
 0x2c3   :  { %v2456_v56 = vpop.f32.mrf.mxu0 }
 0x2c4   :  { %v8789_v32 = vadd.f32 %v2743_v10, %v2455_v31  ;;  %v2745_v14 = vpop.f32.mrf.mxu1 }
 0x2c5   :  { %v2457_v38 = vpop.f32.mrf.mxu0 }
 0x2c6   :  { %10950 = vst [vmem:[#allocation36_spill] sm:$0xff] %v8789_v32  ;;  %v2458_v60 = vadd.f32 %v2457_v38, %v10951_v39  ;;  %v2746_v16 = vpop.f32.mrf.mxu1  ;;  %v6982_v39 = vld [vmem:[%s10666_s3 + $0x120] sm:$0xff]  }
 0x2c7   :  { %v2459_v21 = vpop.f32.mrf.mxu0  ;;  %5352 = vmatpush1.bf16.msra.mxu1 %v6982_v39 }
 0x2c8   :  { %v8792_v1 = vadd.f32 %v2746_v16, %v2458_v60  ;;  %v2748_v49 = vpop.f32.mrf.mxu1  ;;  %v10957_v16 = vld [vmem:[#allocation3_spill] sm:$0xff]  ;;  %5353 = vmatprep.subr.bf16.mxu1 %v10844_v7 }
 0x2c9   :  { %v2462_v50 = vpop.f32.mrf.mxu0 }
 0x2ca   :  { %10952 = vst [vmem:[#allocation37_spill] sm:$0xff] %v8792_v1  ;;  %v2463_v47 = vadd.f32 %v2462_v50, %v10953_v8  ;;  %v2751_v63 = vpop.f32.mrf.mxu1 }
 0x2cb   :  { %v2464_v27 = vpop.f32.mrf.mxu0 }
 0x2cc   :  { %v8795_v18 = vadd.f32 %v2751_v63, %v2463_v47  ;;  %v2753_v13 = vpop.f32.mrf.mxu1  ;;  %v10959_v27 = vld [vmem:[#allocation61_spill] sm:$0xff] }
 0x2cd   :  { %v2465_v36 = vpop.f32.mrf.mxu0 }
 0x2ce   :  { %10954 = vst [vmem:[#allocation38_spill] sm:$0xff] %v8795_v18  ;;  %v2466_v31 = vadd.f32 %v2465_v36, %v10955_v22  ;;  %v2754_v10 = vpop.f32.mrf.mxu1 }
 0x2cf   :  { %v2467_v56 = vpop.f32.mrf.mxu0 }
 0x2d0   :  { %v8798_v14 = vadd.f32 %v2754_v10, %v2466_v31  ;;  %v2756_v38 = vpop.f32.mrf.mxu1 }
 0x2d1   :  { %v2470_v60 = vpop.f32.mrf.mxu0  ;;  %v10961_v38 = vld [vmem:[#allocation4_spill] sm:$0xff] }
 0x2d2   :  { %10956 = vst [vmem:[#allocation39_spill] sm:$0xff] %v8798_v14  ;;  %v2471_v21 = vadd.f32 %v2470_v60, %v10957_v16  ;;  %v2759_v49 = vpop.f32.mrf.mxu1 }
 0x2d3   :  { %v2472_v50 = vpop.f32.mrf.mxu0 }
 0x2d4   :  { %v8805_v8 = vadd.f32 %v2759_v49, %v2471_v21  ;;  %v2761_v47 = vpop.f32.mrf.mxu1  ;;  %v10963_v21 = vld [vmem:[#allocation5_spill] sm:$0xff] }
 0x2d5   :  { %v2473_v63 = vpop.f32.mrf.mxu0 }
 0x2d6   :  { %10958 = vst [vmem:[#allocation40_spill] sm:$0xff] %v8805_v8  ;;  %v2474_v13 = vadd.f32 %v2473_v63, %v10959_v27  ;;  %v2762_v36 = vpop.f32.mrf.mxu1  ;;  %v6983_v27 = vld [vmem:[%s10666_s3 + $0x118] sm:$0xff]  }
 0x2d7   :  { %v2475_v22 = vpop.f32.mrf.mxu0  ;;  %5354 = vmatpush1.bf16.msra.mxu1 %v6983_v27 }
 0x2d8   :  { %v8808_v31 = vadd.f32 %v2762_v36, %v2474_v13  ;;  %v2764_v10 = vpop.f32.mrf.mxu1  ;;  %v10965_v36 = vld [vmem:[#allocation6_spill] sm:$0xff]  ;;  %5355 = vmatprep.subr.bf16.mxu1 %v10844_v7 }
 0x2d9   :  { %v2478_v56 = vpop.f32.mrf.mxu0 }
 0x2da   :  { %10960 = vst [vmem:[#allocation41_spill] sm:$0xff] %v8808_v31  ;;  %v2479_v33 = vadd.f32 %v2478_v56, %v10961_v38  ;;  %v2767_v60 = vpop.f32.mrf.mxu1 }
 0x2db   :  { %v2480_v16 = vpop.f32.mrf.mxu0 }
 0x2dc   :  { %v8811_v39 = vadd.f32 %v2767_v60, %v2479_v33  ;;  %v2769_v50 = vpop.f32.mrf.mxu1 }
 0x2dd   :  { %v2481_v1 = vpop.f32.mrf.mxu0 }
 0x2de   :  { %10962 = vst [vmem:[#allocation42_spill] sm:$0xff] %v8811_v39  ;;  %v2482_v49 = vadd.f32 %v2481_v1, %v10963_v21  ;;  %v2770_v47 = vpop.f32.mrf.mxu1 }
 0x2df   :  { %v2483_v8 = vpop.f32.mrf.mxu0 }
 0x2e0   :  { %v8814_v14 = vadd.f32 %v2770_v47, %v2482_v49  ;;  %v2772_v63 = vpop.f32.mrf.mxu1  ;;  %v10967_v8 = vld [vmem:[#allocation7_spill] sm:$0xff] }
 0x2e1   :  { %v2486_v13 = vpop.f32.mrf.mxu0  ;;  %v10969_v63 = vld [vmem:[#allocation8_spill] sm:$0xff] }
 0x2e2   :  { %10964 = vst [vmem:[#allocation43_spill] sm:$0xff] %v8814_v14  ;;  %v2487_v22 = vadd.f32 %v2486_v13, %v10965_v36  ;;  %v2775_v10 = vpop.f32.mrf.mxu1 }
 0x2e3   :  { %v2488_v33 = vpop.f32.mrf.mxu0 }
 0x2e4   :  { %v8821_v56 = vadd.f32 %v2775_v10, %v2487_v22  ;;  %v2777_v1 = vpop.f32.mrf.mxu1  ;;  %v10971_v22 = vld [vmem:[#allocation9_spill] sm:$0xff] }
 0x2e5   :  { %v2489_v38 = vpop.f32.mrf.mxu0 }
 0x2e6   :  { %10966 = vst [vmem:[#allocation44_spill] sm:$0xff] %v8821_v56  ;;  %v2490_v60 = vadd.f32 %v2489_v38, %v10967_v8  ;;  %v2778_v16 = vpop.f32.mrf.mxu1  ;;  %v6984_v8 = vld [vmem:[%s10666_s3 + $0x110] sm:$0xff]  }
 0x2e7   :  { %v2491_v50 = vpop.f32.mrf.mxu0  ;;  %5356 = vmatpush1.bf16.msra.mxu1 %v6984_v8 }
 0x2e8   :  { %v8824_v21 = vadd.f32 %v2778_v16, %v2490_v60  ;;  %v2780_v49 = vpop.f32.mrf.mxu1  ;;  %v10973_v16 = vld [vmem:[#allocation10_spill] sm:$0xff]  ;;  %5357 = vmatprep.subr.bf16.mxu1 %v10844_v7 }
 0x2e9   :  { %v2494_v47 = vpop.f32.mrf.mxu0 }
 0x2ea   :  { %10968 = vst [vmem:[#allocation45_spill] sm:$0xff] %v8824_v21  ;;  %v2495_v31 = vadd.f32 %v2494_v47, %v10969_v63  ;;  %v2783_v13 = vpop.f32.mrf.mxu1 }
 0x2eb   :  { %v2496_v36 = vpop.f32.mrf.mxu0 }
 0x2ec   :  { %v8827_v27 = vadd.f32 %v2783_v13, %v2495_v31  ;;  %v2785_v33 = vpop.f32.mrf.mxu1 }
 0x2ed   :  { %v2497_v14 = vpop.f32.mrf.mxu0 }
 0x2ee   :  { %10970 = vst [vmem:[#allocation46_spill] sm:$0xff] %v8827_v27  ;;  %v2498_v10 = vadd.f32 %v2497_v14, %v10971_v22  ;;  %v2786_v1 = vpop.f32.mrf.mxu1 }
 0x2ef   :  { %v2499_v56 = vpop.f32.mrf.mxu0 }
 0x2f0   :  { %v8830_v39 = vadd.f32 %v2786_v1, %v2498_v10  ;;  %v2788_v38 = vpop.f32.mrf.mxu1  ;;  %v10975_v56 = vld [vmem:[#allocation11_spill] sm:$0xff] }
 0x2f1   :  { %v2502_v60 = vpop.f32.mrf.mxu0  ;;  %v10977_v38 = vld [vmem:[#allocation13_spill] sm:$0xff] }
 0x2f2   :  { %10972 = vst [vmem:[#allocation47_spill] sm:$0xff] %v8830_v39  ;;  %v2503_v50 = vadd.f32 %v2502_v60, %v10973_v16  ;;  %v2791_v49 = vpop.f32.mrf.mxu1 }
 0x2f3   :  { %v2504_v31 = vpop.f32.mrf.mxu0 }
 0x2f4   :  { %v8837_v47 = vadd.f32 %v2791_v49, %v2503_v50  ;;  %v2793_v14 = vpop.f32.mrf.mxu1  ;;  %v10979_v50 = vld [vmem:[#allocation14_spill] sm:$0xff] }
 0x2f5   :  { %v2505_v63 = vpop.f32.mrf.mxu0 }
 0x2f6   :  { %10974 = vst [vmem:[#allocation48_spill] sm:$0xff] %v8837_v47  ;;  %v2506_v13 = vadd.f32 %v2505_v63, %v10975_v56  ;;  %v2794_v36 = vpop.f32.mrf.mxu1  ;;  %v6985_v63 = vld [vmem:[%s10666_s3 + $0x108] sm:$0xff]  }
 0x2f7   :  { %v2507_v33 = vpop.f32.mrf.mxu0  ;;  %5358 = vmatpush1.bf16.msra.mxu1 %v6985_v63  ;;  %v10985_v63 = vld [vmem:[#allocation22_spill] sm:$0xff] }
 0x2f8   :  { %v8840_v22 = vadd.f32 %v2794_v36, %v2506_v13  ;;  %v2796_v10 = vpop.f32.mrf.mxu1  ;;  %5359 = vmatprep.subr.bf16.mxu1 %v10844_v7 }
 0x2f9   :  { %v2510_v1 = vpop.f32.mrf.mxu0 }
 0x2fa   :  { %10976 = vst [vmem:[#allocation49_spill] sm:$0xff] %v8840_v22  ;;  %v2511_v21 = vadd.f32 %v2510_v1, %v10977_v38  ;;  %v2799_v60 = vpop.f32.mrf.mxu1  ;;  %v10982_v1 = vld [vmem:[#allocation12_spill] sm:$0xff] }
 0x2fb   :  { %v2512_v16 = vpop.f32.mrf.mxu0 }
 0x2fc   :  { %v8843_v8 = vadd.f32 %v2799_v60, %v2511_v21  ;;  %v2801_v31 = vpop.f32.mrf.mxu1  ;;  %v10981_v21 = vld [vmem:[#allocation18_spill] sm:$0xff] }
 0x2fd   :  { %v2513_v39 = vpop.f32.mrf.mxu0 }
 0x2fe   :  { %10978 = vst [vmem:[#allocation50_spill] sm:$0xff] %v8843_v8  ;;  %v2514_v49 = vadd.f32 %v2513_v39, %v10979_v50  ;;  %v2802_v14 = vpop.f32.mrf.mxu1  ;;  %v10983_v39 = vld [vmem:[#allocation15_spill] sm:$0xff]  ;;  %v10984_v50 = vld [vmem:[#allocation17_spill] sm:$0xff] }
 0x2ff   :  { %v2515_v47 = vpop.f32.mrf.mxu0 }
 0x300   :  { %v8846_v27 = vadd.f32 %v2802_v14, %v2514_v49  ;;  %v2804_v56 = vpop.f32.mrf.mxu1 }
 0x301   :  { %v6660_v13 = vpop.f32.mrf.mxu0 }
 0x302   :  { %10980 = vst [vmem:[#allocation28_spill] sm:$0xff] %v8846_v27  ;;  %v2849_v33 = vadd.f32 %v6660_v13, %v10981_v21  ;;  %v6986_v13 = vld [vmem:[%s10666_s3 + $0x100] sm:$0xff]  }
 0x303   :  { %v2840_v36 = vpop.f32.mrf.mxu0  ;;  %5360 = vmatpush1.bf16.msra.mxu1 %v6986_v13  ;;  %v10988_v13 = vld [vmem:[#allocation21_spill] sm:$0xff] }
 0x304   :  { %v2841_v38 = vadd.f32 %v2840_v36, %v10982_v1  ;;  %v3097_v16 = vmax.f32 %v2849_v33, 0.0  ;;  %5361 = vmatprep.subr.bf16.mxu1 %v10844_v7 }
 0x305   :  { %v6661_v10 = vpop.f32.mrf.mxu0 }
 0x306   :  { %v2852_v60 = vadd.f32 %v6661_v10, %v10983_v39  ;;  %v3095_v22 = vmax.f32 %v2841_v38, 0.0 }
 0x307   :  { %v2843_v47 = vpop.f32.mrf.mxu0 }
 0x308   :  { %v3098_v31 = vmax.f32 %v2852_v60, 0.0  ;;  %v2844_v49 = vadd.f32 %v2843_v47, %v10984_v50  ;;  %v10986_v60 = vld [vmem:[#allocation19_spill] sm:$0xff] }
 0x309   :  { %v6664_v14 = vpop.f32.mrf.mxu0 }
 0x30a   :  { %v3160_v56 = vpack.c.bf16 %v3098_v31, %v3097_v16  ;;  %v3096_v27 = vmax.f32 %v2844_v49, 0.0  ;;  %v2865_v8 = vadd.f32 %v6664_v14, %v10985_v63  ;;  %v10987_v16 = vld [vmem:[#allocation16_spill] sm:$0xff]  ;;  %v4023_v49 = vrot.slane %v8695_v26, 1 }
 0x30b   :  { %v2856_v32 = vpop.f32.mrf.mxu0  ;;  %v4022_v14 = vrot.slane %v8686_v30, 1 }
 0x30c   :  { %v3206_v21 = vshrl.u32 %v3160_v56, 16  ;;  %v3159_v36 = vpack.c.bf16 %v3096_v27, %v3095_v22  ;;  %v3209_v33 = vshll.u32 %v3160_v56, 16  ;;  %v3101_v38 = vmax.f32 %v2865_v8, 0.0 }
 0x30d   :  { %v6665_v1 = vpop.f32.mrf.mxu0  ;;  %v2857_v31 = vadd.f32 %v2856_v32, %v10987_v16 }
 0x30e   :  { %v3208_v10 = vrot.slane %v3206_v21, 7  ;;  %v3199_v39 = vshrl.u32 %v3159_v36, 16  ;;  %v2868_v47 = vadd.f32 %v6665_v1, %v10986_v60  ;;  %v3202_v27 = vshll.u32 %v3159_v36, 16 }
 0x30f   :  { %v2859_v50 = vpop.f32.mrf.mxu0  ;;  %v3099_v26 = vmax.f32 %v2857_v31, 0.0 }
 0x310   :  { %v3211_v63 = vor.u32 %v3209_v33, %v3208_v10  ;;  %v3201_v18 = vrot.slane %v3199_v39, 7  ;;  %v3102_v22 = vmax.f32 %v2868_v47, 0.0  ;;  %v2860_v21 = vadd.f32 %v2859_v50, %v10988_v13 }
 0x311   :  { %v6668_v56 = vpop.f32.mrf.mxu0  ;;  %v8872_v32 = vsel %vm8675_vm4, %v3208_v10, 0  ;;  %v8877_v47 = vsel %vm834_vm1, %v4022_v14, %v4023_v49 }
 0x312   :  { %v3162_v46 = vpack.c.bf16 %v3102_v22, %v3101_v38  ;;  %v3204_v43 = vor.u32 %v3202_v27, %v3201_v18  ;;  %v8868_v1 = vsel %vm8675_vm4, 0, %v3211_v63  ;;  %v3100_v8 = vmax.f32 %v2860_v21, 0.0  ;;  %10989 = vst [vmem:[#allocation51_spill] sm:$0xff] %v8877_v47  ;;  %v10990_v63 = vld [vmem:[#allocation20_spill] sm:$0xff] }
 0x313   :  { %v2872_v60 = vpop.f32.mrf.mxu0  ;;  %v3584_v33 = vshll.u32 %v8868_v1, 16  ;;  %v2881_v39 = vadd.f32 %v6668_v56, %v8506_v24  ;;  %v3525_v38 = vsel %vm8675_vm4, %v3201_v18, 0  ;;  %v3582_v22 = vshrl.u32 %v8868_v1, 16 }
 0x314   :  { %v3220_v36 = vshrl.u32 %v3162_v46, 16  ;;  %v3161_v16 = vpack.c.bf16 %v3100_v8, %v3099_v26  ;;  %v3492_v10 = vsel %vm8675_vm4, 0, %v3204_v43  ;;  %v2873_v31 = vadd.f32 %v2872_v60, %v10990_v63  ;;  %v10991_v8 = vld [vmem:[#allocation26_spill] sm:$0xff] }
 0x315   :  { %v6669_v50 = vpop.f32.mrf.mxu0  ;;  %5088 = vmatprep.mubr.bf16.mxu0 %v3492_v10  ;;  %v3589_v24 = vshll.u32 %v8872_v32, 16  ;;  %v3572_v14 = vshll.u32 %v3492_v10, 16  ;;  %v3577_v18 = vshll.u32 %v3525_v38, 16  ;;  %v3586_v21 = vrot.slane %v3584_v33, 1 }
 0x316   :  { %v2884_v27 = vadd.f32 %v6669_v50, %v8512_v5  ;;  %v3213_v13 = vshrl.u32 %v3161_v16, 16  ;;  %5089 = vmatmul.mubr.bf16.vlgmr.msra.gmra.mxu0 %v8877_v47  ;;  %v8888_v56 = vrot.slane %v3220_v36, 7  ;;  %v3105_v26 = vmax.f32 %v2881_v39, 0.0  ;;  %v6987_v5 = vld [vmem:[%s10666_s3 + $0x178] sm:$0xff]  }
 0x317   :  { %v2875_v49 = vpop.f32.mrf.mxu0  ;;  %5096 = vmatprep.mubr.bf16.mxu0 %v8868_v1  ;;  %v6988_v50 = vld [vmem:[%s10666_s3 + $0x1b8] sm:$0xff]   ;;  %v3216_v47 = vshll.u32 %v3161_v16, 16  ;;  %v3570_v33 = vshrl.u32 %v3492_v10, 16  ;;  %v3574_v36 = vrot.slane %v3572_v14, 1  ;;  %v3103_v42 = vmax.f32 %v2873_v31, 0.0  ;;  %5362 = vmatpush2.bf16.msra.mxu1 %v6987_v5 }
 0x318   :  { %v3106_v43 = vmax.f32 %v2884_v27, 0.0  ;;  %v2876_v60 = vadd.f32 %v2875_v49, %v10991_v8  ;;  %v3215_v63 = vrot.slane %v3213_v13, 7  ;;  %v4025_v49 = vrot.slane %v3492_v10, 1  ;;  %5635 = vmatpush1.bf16.msra.mxu0 %v6988_v50  ;;  %5363 = vmatprep.subr.bf16.mxu1 %v10844_v7 }
 0x319   :  { %v6672_v30 = vpop.f32.mrf.mxu0  ;;  %v3575_v44 = vor.u32 %v3574_v36, %v3570_v33  ;;  %v3579_v3 = vrot.slane %v3577_v18, 1  ;;  %v3587_v41 = vor.u32 %v3586_v21, %v3582_v22  ;;  %5636 = vmatprep.subr.bf16.mxu0 %v10844_v7  ;;  %v3223_v16 = vshll.u32 %v3162_v46, 16 }
 0x31a   :  { %v8898_v39 = vpack.c.bf16 %v3106_v43, %v3105_v26  ;;  %v3104_v27 = vmax.f32 %v2876_v60, 0.0  ;;  %v3218_v8 = vor.u32 %v3216_v47, %v3215_v63  ;;  %v2897_v14 = vadd.f32 %v6672_v30, %v8531_v12 }
 0x31b   :  { %v2888_v0 = vpop.f32.mrf.mxu0  ;;  %v4026_v31 = vrot.slane %v3525_v38, 1  ;;  %v8904_v26 = vsel %vm417_vm0, %v3575_v44, %v3579_v3  ;;  %v3591_v60 = vrot.slane %v3589_v24, 1  ;;  %v3225_v22 = vor.u32 %v3223_v16, %v8888_v56 }
 0x31c   :  { %v3163_v13 = vpack.c.bf16 %v3104_v27, %v3103_v42  ;;  %v8908_v47 = vsel %vm8675_vm4, 0, %v3218_v8  ;;  %4807 = vmatprep.mubr.bf16.mxu1 %v8904_v26  ;;  %v2889_v12 = vadd.f32 %v2888_v0, %v8519_v11  ;;  %v8923_v3 = vsel %vm8675_vm4, %v3215_v63, 0 }
 0x31d   :  { %v6673_v43 = vpop.f32.mrf.mxu0  ;;  %v8914_v42 = vsel %vm834_vm1, %v4025_v49, %v4026_v31  ;;  %4808 = vmatmul.mubr.bf16.gmra.mxu1 %v3492_v10  ;;  %v8918_v30 = vsel %vm417_vm0, %v3587_v41, %v3591_v60  ;;  %v3596_v38 = vshll.u32 %v8908_v47, 16  ;;  %v3109_v24 = vmax.f32 %v2897_v14, 0.0 }
 0x31e   :  { %v3227_v18 = vshrl.u32 %v3163_v13, 16  ;;  %v2900_v46 = vadd.f32 %v6673_v43, %v8534_v25  ;;  %5097 = vmatmul.mubr.bf16.gmra.mxu0 %v8914_v42  ;;  %4815 = vmatprep.mubr.bf16.mxu1 %v8918_v30  ;;  %v3594_v41 = vshrl.u32 %v8908_v47, 16  ;;  %v3601_v21 = vshll.u32 %v8923_v3, 16 }
 0x31f   :  { %v2891_v44 = vpop.f32.mrf.mxu0  ;;  %5104 = vmatprep.mubr.bf16.mxu0 %v8908_v47  ;;  %v3598_v10 = vrot.slane %v3596_v38, 1  ;;  %v4028_v63 = vrot.slane %v8868_v1, 1  ;;  %v8936_v33 = vsel %vm8675_vm4, 0, %v3225_v22  ;;  %v3107_v36 = vmax.f32 %v2889_v12, 0.0 }
 0x320   :  { %v3110_v25 = vmax.f32 %v2900_v46, 0.0  ;;  %v2892_v11 = vadd.f32 %v2891_v44, %v8525_v52  ;;  %v3229_v5 = vrot.slane %v3227_v18, 7  ;;  %v3234_v52 = vshrl.u32 %v8898_v39, 16 }
 0x321   :  { %v6676_v0 = vpop.f32.mrf.mxu0  ;;  %v3599_v8 = vor.u32 %v3598_v10, %v3594_v41  ;;  %v3230_v16 = vshll.u32 %v3163_v13, 16  ;;  %v4029_v31 = vrot.slane %v8872_v32, 1  ;;  %v3603_v46 = vrot.slane %v3601_v21, 1 }
 0x322   :  { %v8931_v50 = vpack.c.bf16 %v3110_v25, %v3109_v24  ;;  %v3108_v27 = vmax.f32 %v2892_v11, 0.0  ;;  %v2913_v14 = vadd.f32 %v6676_v0, %v8551_v55  ;;  %v3608_v22 = vshll.u32 %v8936_v33, 16  ;;  %v6990_v11 = vld [vmem:[%s10666_s3 + $0x1b0] sm:$0xff]  }
 0x323   :  { %v2904_v49 = vpop.f32.mrf.mxu0  ;;  %v8948_v12 = vsel %vm8675_vm4, %v8888_v56, 0  ;;  %v3232_v44 = vor.u32 %v3230_v16, %v3229_v5  ;;  %v8952_v55 = vsel %vm834_vm1, %v4028_v63, %v4029_v31  ;;  %v8956_v32 = vsel %vm417_vm0, %v3599_v8, %v3603_v46  ;;  %5637 = vmatpush1.bf16.msra.mxu0 %v6990_v11 }
 0x324   :  { %v8941_v43 = vpack.c.bf16 %v3108_v27, %v3107_v36  ;;  %v2905_v60 = vadd.f32 %v2904_v49, %v8539_v34  ;;  %v3610_v38 = vrot.slane %v3608_v22, 1  ;;  %v3113_v24 = vmax.f32 %v2913_v14, 0.0  ;;  %5638 = vmatprep.subr.bf16.mxu0 %v10844_v7 }
 0x325   :  { %v6677_v18 = vpop.f32.mrf.mxu0  ;;  %4816 = vmatmul.mubr.bf16.gmra.mxu1 %v8868_v1  ;;  %v3236_v0 = vrot.slane %v3234_v52, 7  ;;  %v3606_v21 = vshrl.u32 %v8936_v33, 16  ;;  %v3613_v63 = vshll.u32 %v8948_v12, 16  ;;  %v4031_v27 = vrot.slane %v8908_v47, 1 }
 0x326   :  { %v2916_v13 = vadd.f32 %v6677_v18, %v8554_v45  ;;  %5105 = vmatmul.mubr.bf16.gmra.mxu0 %v8952_v55  ;;  %4823 = vmatprep.mubr.bf16.mxu1 %v8956_v32  ;;  %v6989_v45 = vld [vmem:[%s10666_s3 + $0x170] sm:$0xff]   ;;  %v3111_v41 = vmax.f32 %v2905_v60, 0.0  ;;  %v8975_v49 = vsel %vm8675_vm4, 0, %v3232_v44  ;;  %v3237_v8 = vshll.u32 %v8898_v39, 16 }
 0x327   :  { %v2907_v34 = vpop.f32.mrf.mxu0  ;;  %5112 = vmatprep.mubr.bf16.mxu0 %v8936_v33  ;;  %5364 = vmatpush2.bf16.msra.mxu1 %v6989_v45  ;;  %v3611_v16 = vor.u32 %v3610_v38, %v3606_v21  ;;  %v3241_v14 = vshrl.u32 %v8941_v43, 16  ;;  %v4032_v18 = vrot.slane %v8923_v3, 1  ;;  %v3615_v44 = vrot.slane %v3613_v63, 1 }
 0x328   :  { %v3114_v25 = vmax.f32 %v2916_v13, 0.0  ;;  %v2908_v56 = vadd.f32 %v2907_v34, %v8545_v54  ;;  %5365 = vmatprep.subr.bf16.mxu1 %v10844_v7  ;;  %v3239_v46 = vor.u32 %v3237_v8, %v3236_v0  ;;  %v3620_v13 = vshll.u32 %v8975_v49, 16 }
 0x329   :  { %v6680_v10 = vpop.f32.mrf.mxu0  ;;  %v8988_v34 = vsel %vm834_vm1, %v4031_v27, %v4032_v18  ;;  %v8992_v38 = vsel %vm8675_vm4, %v3229_v5, 0  ;;  %v3618_v11 = vshrl.u32 %v8975_v49, 16  ;;  %v3248_v21 = vshrl.u32 %v8931_v50, 16 }
 0x32a   :  { %v8970_v36 = vpack.c.bf16 %v3114_v25, %v3113_v24  ;;  %v3112_v54 = vmax.f32 %v2908_v56, 0.0  ;;  %v2929_v60 = vadd.f32 %v6680_v10, %v8578_v61  ;;  %v8997_v61 = vsel %vm417_vm0, %v3611_v16, %v3615_v44 }
 0x32b   :  { %v2920_v52 = vpop.f32.mrf.mxu0  ;;  %v3622_v25 = vrot.slane %v3620_v13, 1  ;;  %v9000_v56 = vrot.slane %v3241_v14, 7  ;;  %v9009_v10 = vsel %vm8675_vm4, 0, %v3239_v46  ;;  %v3244_v63 = vshll.u32 %v8941_v43, 16 }
 0x32c   :  { %v8981_v31 = vpack.c.bf16 %v3112_v54, %v3111_v41  ;;  %v2921_v24 = vadd.f32 %v2920_v52, %v8559_v28  ;;  %v3625_v41 = vshll.u32 %v8992_v38, 16  ;;  %v4034_v27 = vrot.slane %v8936_v33, 1 }
 0x32d   :  { %v6681_v22 = vpop.f32.mrf.mxu0  ;;  %4824 = vmatmul.mubr.bf16.gmra.mxu1 %v8908_v47  ;;  %v3623_v16 = vor.u32 %v3622_v25, %v3618_v11  ;;  %v3632_v14 = vshll.u32 %v9009_v10, 16  ;;  %v4035_v18 = vrot.slane %v8948_v12, 1  ;;  %v3246_v46 = vor.u32 %v3244_v63, %v9000_v56 }
 0x32e   :  { %v2932_v39 = vadd.f32 %v6681_v22, %v8585_v6  ;;  %5113 = vmatmul.mubr.bf16.gmra.mxu0 %v8988_v34  ;;  %v3117_v6 = vmax.f32 %v2929_v60, 0.0  ;;  %4831 = vmatprep.mubr.bf16.mxu1 %v8997_v61  ;;  %v3115_v8 = vmax.f32 %v2921_v24, 0.0  ;;  %v3627_v43 = vrot.slane %v3625_v41, 1 }
 0x32f   :  { %v2923_v3 = vpop.f32.mrf.mxu0  ;;  %5120 = vmatprep.mubr.bf16.mxu0 %v8975_v49  ;;  %v9024_v13 = vsel %vm8675_vm4, %v3236_v0, 0  ;;  %v3630_v41 = vshrl.u32 %v9009_v10, 16 }
 0x330   :  { %v3118_v45 = vmax.f32 %v2932_v39, 0.0  ;;  %v2924_v5 = vadd.f32 %v2923_v3, %v8568_v15  ;;  %v9029_v3 = vsel %vm834_vm1, %v4034_v27, %v4035_v18  ;;  %v9035_v12 = vsel %vm417_vm0, %v3623_v16, %v3627_v43 }
 0x331   :  { %v6684_v28 = vpop.f32.mrf.mxu0 }
 0x332   :  { %v9013_v54 = vpack.c.bf16 %v3118_v45, %v3117_v6  ;;  %v3116_v52 = vmax.f32 %v2924_v5, 0.0  ;;  %v2945_v60 = vadd.f32 %v6684_v28, %v8614_v35  ;;  %v9031_v35 = vrot.slane %v3248_v21, 7  ;;  %v6992_v5 = vld [vmem:[%s10666_s3 + $0x1a8] sm:$0xff]  }
 0x333   :  { %v2936_v15 = vpop.f32.mrf.mxu0  ;;  %v3634_v6 = vrot.slane %v3632_v14, 1  ;;  %v3251_v28 = vshll.u32 %v8931_v50, 16  ;;  %v3637_v21 = vshll.u32 %v9024_v13, 16  ;;  %5639 = vmatpush1.bf16.msra.mxu0 %v6992_v5 }
 0x334   :  { %v9020_v22 = vpack.c.bf16 %v3116_v52, %v3115_v8  ;;  %v2937_v39 = vadd.f32 %v2936_v15, %v8594_v4  ;;  %v3121_v0 = vmax.f32 %v2945_v60, 0.0  ;;  %v4037_v52 = vrot.slane %v8975_v49, 1  ;;  %5640 = vmatprep.subr.bf16.mxu0 %v10844_v7 }
 0x335   :  { %v6685_v44 = vpop.f32.mrf.mxu0  ;;  %4832 = vmatmul.mubr.bf16.gmra.mxu1 %v8936_v33  ;;  %v3253_v15 = vor.u32 %v3251_v28, %v9031_v35  ;;  %v3635_v16 = vor.u32 %v3634_v6, %v3630_v41  ;;  %v3255_v60 = vshrl.u32 %v8981_v31, 16  ;;  %v9073_v6 = vsel %vm8675_vm4, %v9000_v56, 0 }
 0x336   :  { %v2948_v24 = vadd.f32 %v6685_v44, %v8621_v23  ;;  %5121 = vmatmul.mubr.bf16.gmra.mxu0 %v9029_v3  ;;  %4839 = vmatprep.mubr.bf16.mxu1 %v9035_v12  ;;  %v6991_v23 = vld [vmem:[%s10666_s3 + $0x168] sm:$0xff]   ;;  %v3119_v63 = vmax.f32 %v2937_v39, 0.0  ;;  %v4038_v44 = vrot.slane %v8992_v38, 1  ;;  %v3639_v39 = vrot.slane %v3637_v21, 1 }
 0x337   :  { %v2939_v25 = vpop.f32.mrf.mxu0  ;;  %5128 = vmatprep.mubr.bf16.mxu0 %v9009_v10  ;;  %5366 = vmatpush2.bf16.msra.mxu1 %v6991_v23  ;;  %v3262_v41 = vshrl.u32 %v8970_v36, 16  ;;  %v3258_v21 = vshll.u32 %v8981_v31, 16 }
 0x338   :  { %v3122_v45 = vmax.f32 %v2948_v24, 0.0  ;;  %v2940_v4 = vadd.f32 %v2939_v25, %v8604_v20  ;;  %v9052_v20 = vsel %vm8675_vm4, 0, %v3246_v46  ;;  %5367 = vmatprep.subr.bf16.mxu1 %v10844_v7  ;;  %v9068_v25 = vsel %vm834_vm1, %v4037_v52, %v4038_v44 }
 0x339   :  { %v6688_v11 = vpop.f32.mrf.mxu0  ;;  %v3644_v14 = vshll.u32 %v9052_v20, 16  ;;  %v3642_v28 = vshrl.u32 %v9052_v20, 16 }
 0x33a   :  { %v9054_v27 = vpack.c.bf16 %v3122_v45, %v3121_v0  ;;  %v3120_v8 = vmax.f32 %v2940_v4, 0.0  ;;  %v2961_v46 = vadd.f32 %v6688_v11, %v8656_v19  ;;  %v9078_v19 = vsel %vm417_vm0, %v3635_v16, %v3639_v39 }
 0x33b   :  { %v2952_v50 = vpop.f32.mrf.mxu0  ;;  %v3646_v45 = vrot.slane %v3644_v14, 1  ;;  %v3649_v11 = vshll.u32 %v9073_v6, 16  ;;  %v9106_v39 = vsel %vm8675_vm4, %v9031_v35, 0 }
 0x33c   :  { %v9062_v18 = vpack.c.bf16 %v3120_v8, %v3119_v63  ;;  %v2953_v0 = vadd.f32 %v2952_v50, %v8636_v37  ;;  %v3125_v4 = vmax.f32 %v2961_v46, 0.0  ;;  %v9087_v37 = vsel %vm8675_vm4, 0, %v3253_v15 }
 0x33d   :  { %v6689_v43 = vpop.f32.mrf.mxu0  ;;  %4840 = vmatmul.mubr.bf16.gmra.mxu1 %v8975_v49  ;;  %10992 = vst [vmem:[#allocation30_spill] sm:$0xff] %v9087_v37  ;;  %v4040_v8 = vrot.slane %v9009_v10, 1  ;;  %v3647_v15 = vor.u32 %v3646_v45, %v3642_v28  ;;  %v3656_v14 = vshll.u32 %v9087_v37, 16  ;;  %v4041_v46 = vrot.slane %v9024_v13, 1 }
 0x33e   :  { %v2964_v24 = vadd.f32 %v6689_v43, %v8663_v17  ;;  %5129 = vmatmul.mubr.bf16.gmra.mxu0 %v9068_v25  ;;  %v9081_v17 = vrot.slane %v3255_v60, 7  ;;  %4847 = vmatprep.mubr.bf16.mxu1 %v9078_v19  ;;  %v3123_v52 = vmax.f32 %v2953_v0, 0.0  ;;  %v3651_v31 = vrot.slane %v3649_v11, 1 }
 0x33f   :  { %v2955_v38 = vpop.f32.mrf.mxu0  ;;  %5136 = vmatprep.mubr.bf16.mxu0 %v9052_v20  ;;  %v9113_v45 = vrot.slane %v3262_v41, 7  ;;  %v3265_v28 = vshll.u32 %v8970_v36, 16  ;;  %v3654_v41 = vshrl.u32 %v9087_v37, 16  ;;  %v3269_v36 = vshrl.u32 %v9020_v22, 16 }
 0x340   :  { %v3126_v23 = vmax.f32 %v2964_v24, 0.0  ;;  %v2956_v56 = vadd.f32 %v2955_v38, %v8647_v62  ;;  %v3260_v62 = vor.u32 %v3258_v21, %v9081_v17  ;;  %v9111_v38 = vsel %vm834_vm1, %v4040_v8, %v4041_v46 }
 0x341   :  { %v6692_v5 = vpop.f32.mrf.mxu0 }
 0x342   :  { %v9094_v63 = vpack.c.bf16 %v3126_v23, %v3125_v4  ;;  %v3124_v50 = vmax.f32 %v2956_v56, 0.0  ;;  %v2977_v60 = vadd.f32 %v6692_v5, %v8707_v2  ;;  %v9117_v2 = vsel %vm417_vm0, %v3647_v15, %v3651_v31  ;;  %v6993_v56 = vld [vmem:[%s10666_s3 + $0x160] sm:$0xff]  }
 0x343   :  { %v2968_v16 = vpop.f32.mrf.mxu0  ;;  %v3658_v4 = vrot.slane %v3656_v14, 1  ;;  %v6994_v5 = vld [vmem:[%s10666_s3 + $0x1a0] sm:$0xff]   ;;  %5368 = vmatpush2.bf16.msra.mxu1 %v6993_v56 }
 0x344   :  { %v9101_v44 = vpack.c.bf16 %v3124_v50, %v3123_v52  ;;  %v2969_v24 = vadd.f32 %v2968_v16, %v8672_v59  ;;  %v3129_v35 = vmax.f32 %v2977_v60, 0.0  ;;  %v4043_v50 = vrot.slane %v9052_v20, 1  ;;  %5641 = vmatpush1.bf16.msra.mxu0 %v6994_v5  ;;  %5369 = vmatprep.subr.bf16.mxu1 %v10844_v7 }
 0x345   :  { %v6693_v43 = vpop.f32.mrf.mxu0  ;;  %4848 = vmatmul.mubr.bf16.gmra.mxu1 %v9009_v10  ;;  %v3267_v16 = vor.u32 %v3265_v28, %v9113_v45  ;;  %v3659_v14 = vor.u32 %v3658_v4, %v3654_v41  ;;  %5642 = vmatprep.subr.bf16.mxu0 %v10844_v7  ;;  %v9155_v4 = vsel %vm8675_vm4, %v9081_v17, 0 }
 0x346   :  { %v2980_v0 = vadd.f32 %v6693_v43, %v8719_v29  ;;  %5137 = vmatmul.mubr.bf16.gmra.mxu0 %v9111_v38  ;;  %4855 = vmatprep.mubr.bf16.mxu1 %v9117_v2  ;;  %v9125_v29 = vsel %vm8675_vm4, 0, %v3260_v62  ;;  %v3127_v21 = vmax.f32 %v2969_v24, 0.0  ;;  %v4044_v43 = vrot.slane %v9073_v6, 1 }
 0x347   :  { %v2971_v13 = vpop.f32.mrf.mxu0  ;;  %5144 = vmatprep.mubr.bf16.mxu0 %v9087_v37  ;;  %10993 = vst [vmem:[#allocation52_spill] sm:$0xff] %v9125_v29  ;;  %v3668_v62 = vshll.u32 %v9125_v29, 16  ;;  %v3673_v41 = vshll.u32 %v9155_v4, 16 }
 0x348   :  { %v3130_v23 = vmax.f32 %v2980_v0, 0.0  ;;  %v2972_v59 = vadd.f32 %v2971_v13, %v8688_v48  ;;  %v3661_v48 = vshll.u32 %v9106_v39, 16  ;;  %v9150_v13 = vsel %vm834_vm1, %v4043_v50, %v4044_v43 }
 0x349   :  { %v6696_v11 = vpop.f32.mrf.mxu0  ;;  %v4046_v50 = vrot.slane %v9087_v37, 1 }
 0x34a   :  { %v9136_v8 = vpack.c.bf16 %v3130_v23, %v3129_v35  ;;  %v3128_v52 = vmax.f32 %v2972_v59, 0.0  ;;  %v2993_v46 = vadd.f32 %v6696_v11, %v8738_v9  ;;  %v3663_v24 = vrot.slane %v3661_v48, 1 }
 0x34b   :  { %v2984_v15 = vpop.f32.mrf.mxu0  ;;  %v3670_v23 = vrot.slane %v3668_v62, 1  ;;  %v3666_v11 = vshrl.u32 %v9125_v29, 16  ;;  %v3276_v48 = vshrl.u32 %v9013_v54, 16 }
 0x34c   :  { %v9144_v60 = vpack.c.bf16 %v3128_v52, %v3127_v21  ;;  %v2985_v35 = vadd.f32 %v2984_v15, %v8729_v40  ;;  %v9160_v9 = vsel %vm417_vm0, %v3659_v14, %v3663_v24  ;;  %v3133_v59 = vmax.f32 %v2993_v46, 0.0 }
 0x34d   :  { %v6697_v31 = vpop.f32.mrf.mxu0  ;;  %4856 = vmatmul.mubr.bf16.gmra.mxu1 %v9052_v20  ;;  %10994 = vst [vmem:[#allocation32_spill] sm:$0xff] %v9160_v9  ;;  %v9169_v40 = vsel %vm8675_vm4, 0, %v3267_v16  ;;  %v3272_v21 = vshll.u32 %v9020_v22, 16 }
 0x34e   :  { %v2996_v0 = vadd.f32 %v6697_v31, %v8741_v58  ;;  %5145 = vmatmul.mubr.bf16.gmra.mxu0 %v9150_v13  ;;  %v9163_v58 = vrot.slane %v3269_v36, 7  ;;  %4863 = vmatprep.mubr.bf16.mxu1 %v9160_v9  ;;  %10995 = vst [vmem:[#allocation53_spill] sm:$0xff] %v9169_v40  ;;  %v3131_v16 = vmax.f32 %v2985_v35, 0.0  ;;  %v3671_v36 = vor.u32 %v3670_v23, %v3666_v11  ;;  %v10998_v23 = vld [vmem:[#allocation27_spill] sm:$0xff] }
 0x34f   :  { %v2987_v6 = vpop.f32.mrf.mxu0  ;;  %5152 = vmatprep.mubr.bf16.mxu0 %v9125_v29  ;;  %v9171_v17 = vpop.f32.mrf.mxu1  ;;  %v4047_v31 = vrot.slane %v9106_v39, 1  ;;  %v9192_v35 = vsel %vm8675_vm4, %v9113_v45, 0  ;;  %v9199_v39 = vrot.slane %v3276_v48, 7 }
 0x350   :  { %v3134_v56 = vmax.f32 %v2996_v0, 0.0  ;;  %10996 = vst [vmem:[#allocation25_spill] sm:$0xff] %v9171_v17  ;;  %v2988_v5 = vadd.f32 %v2987_v6, %v8733_v51  ;;  %v3680_v51 = vshll.u32 %v9169_v40, 16  ;;  %v3274_v46 = vor.u32 %v3272_v21, %v9163_v58 }
 0x351   :  { %v6700_v28 = vpop.f32.mrf.mxu0  ;;  %v4803_v15 = vpop.f32.mrf.mxu1  ;;  %v3675_v6 = vrot.slane %v3673_v41, 1  ;;  %v9197_v11 = vsel %vm834_vm1, %v4046_v50, %v4047_v31  ;;  %v6995_v50 = vld [vmem:[%s10666_s3 + $0x158] sm:$0xff]   ;;  %v3685_v31 = vshll.u32 %v9192_v35, 16 }
 0x352   :  { %v9178_v52 = vpack.c.bf16 %v3134_v56, %v3133_v59  ;;  %v3132_v14 = vmax.f32 %v2988_v5, 0.0  ;;  %v3009_v43 = vadd.f32 %v6700_v28, %v8758_v57  ;;  %v10999_v56 = vld [vmem:[#allocation31_spill] sm:$0xff]  ;;  %11000 = vst [vmem:[#allocation55_spill] sm:$0xff] %v9197_v11  ;;  %v3682_v45 = vrot.slane %v3680_v51, 1  ;;  %5370 = vmatpush2.bf16.msra.mxu1 %v6995_v50 }
 0x353   :  { %v3000_v62 = vpop.f32.mrf.mxu0  ;;  %v9185_v24 = vpop.f32.mrf.mxu1  ;;  %v9203_v28 = vsel %vm417_vm0, %v3671_v36, %v3675_v6  ;;  %v9211_v48 = vsel %vm8675_vm4, 0, %v3274_v46  ;;  %v3279_v36 = vshll.u32 %v9013_v54, 16  ;;  %5371 = vmatprep.subr.bf16.mxu1 %v10844_v7  ;;  %v3283_v54 = vshrl.u32 %v9062_v18, 16 }
 0x354   :  { %10997 = vst [vmem:[#allocation54_spill] sm:$0xff] %v9185_v24  ;;  %v9187_v22 = vpack.c.bf16 %v3132_v14, %v3131_v16  ;;  %v3001_v59 = vadd.f32 %v3000_v62, %v10998_v23  ;;  %11001 = vst [vmem:[#allocation56_spill] sm:$0xff] %v9203_v28  ;;  %v3137_v21 = vmax.f32 %v3009_v43, 0.0  ;;  %v11002_v16 = vld [vmem:[#allocation29_spill] sm:$0xff]  ;;  %v3678_v43 = vshrl.u32 %v9169_v40, 16 }
 0x355   :  { %v6701_v0 = vpop.f32.mrf.mxu0  ;;  %v4806_v57 = vpop.f32.mrf.mxu1  ;;  %4864 = vmatmul.mubr.bf16.gmra.mxu1 %v9087_v37  ;;  %11003 = vst [vmem:[#allocation57_spill] sm:$0xff] %v9211_v48  ;;  %v6996_v62 = vld [vmem:[%s10666_s3 + $0x198] sm:$0xff]   ;;  %v4049_v23 = vrot.slane %v9125_v29, 1  ;;  %v3687_v50 = vrot.slane %v3685_v31, 1  ;;  %v11031_v37 = vld [vmem:[#allocation28_spill] sm:$0xff] }
 0x356   :  { %v3012_v5 = vadd.f32 %v6701_v0, %v10999_v56  ;;  %5153 = vmatmul.mubr.bf16.gmra.mxu0 %v9197_v11  ;;  %4871 = vmatprep.mubr.bf16.mxu1 %v9203_v28  ;;  %v3135_v0 = vmax.f32 %v3001_v59, 0.0  ;;  %v3281_v56 = vor.u32 %v3279_v36, %v9199_v39  ;;  %v3683_v57 = vor.u32 %v3682_v45, %v3678_v43  ;;  %v11007_v24 = vld [vmem:[#allocation33_spill] sm:$0xff] }
 0x357   :  { %v3003_v41 = vpop.f32.mrf.mxu0  ;;  %5160 = vmatprep.mubr.bf16.mxu0 %v9169_v40  ;;  %5643 = vmatpush1.bf16.msra.mxu0 %v6996_v62  ;;  %v11005_v62 = vld [vmem:[#allocation2_spill] sm:$0xff]  ;;  %v9241_v43 = vsel %vm8675_vm4, %v9163_v58, 0 }
 0x358   :  { %v3138_v15 = vmax.f32 %v3012_v5, 0.0  ;;  %v3004_v14 = vadd.f32 %v3003_v41, %v11002_v16  ;;  %v3692_v41 = vshll.u32 %v9211_v48, 16  ;;  %5644 = vmatprep.subr.bf16.mxu0 %v10844_v7  ;;  %v4050_v16 = vrot.slane %v9155_v4, 1 }
 0x359   :  { %v6704_v51 = vpop.f32.mrf.mxu0  ;;  %v9255_v58 = vsel %vm8675_vm4, 0, %v3281_v56 }
 0x35a   :  { %v9222_v6 = vpack.c.bf16 %v3138_v15, %v3137_v21  ;;  %v3136_v46 = vmax.f32 %v3004_v14, 0.0  ;;  %v11004_v21 = vld [vmem:[#allocation35_spill] sm:$0xff]  ;;  %v9236_v45 = vsel %vm834_vm1, %v4049_v23, %v4050_v16  ;;  %v3694_v31 = vrot.slane %v3692_v41, 1  ;;  %11009 = vst [vmem:[#allocation60_spill] sm:$0xff] %v9255_v58 }
 0x35b   :  { %v3016_v5 = vpop.f32.mrf.mxu0  ;;  %v3025_v15 = vadd.f32 %v6704_v51, %v11004_v21  ;;  %11006 = vst [vmem:[#allocation58_spill] sm:$0xff] %v9236_v45  ;;  %v9246_v51 = vsel %vm417_vm0, %v3683_v57, %v3687_v50  ;;  %v3690_v21 = vshrl.u32 %v9211_v48, 16  ;;  %v3697_v16 = vshll.u32 %v9241_v43, 16 }
 0x35c   :  { %v9230_v59 = vpack.c.bf16 %v3136_v46, %v3135_v0  ;;  %v3017_v17 = vadd.f32 %v3016_v5, %v11007_v24  ;;  %11008 = vst [vmem:[#allocation59_spill] sm:$0xff] %v9246_v51  ;;  %v9249_v0 = vrot.slane %v3283_v54, 7  ;;  %v11010_v24 = vld [vmem:[#allocation34_spill] sm:$0xff]  ;;  %v3290_v41 = vshrl.u32 %v9054_v27, 16 }
 0x35d   :  { %v6705_v14 = vpop.f32.mrf.mxu0  ;;  %4872 = vmatmul.mubr.bf16.gmra.mxu1 %v9125_v29  ;;  %v3141_v46 = vmax.f32 %v3025_v15, 0.0  ;;  %v3286_v54 = vshll.u32 %v9062_v18, 16  ;;  %v3695_v56 = vor.u32 %v3694_v31, %v3690_v21  ;;  %v4053_v29 = vrot.slane %v9192_v35, 1  ;;  %v11013_v31 = vld [vmem:[#allocation39_spill] sm:$0xff] }
 0x35e   :  { %v3028_v36 = vadd.f32 %v6705_v14, %v11005_v62  ;;  %5161 = vmatmul.mubr.bf16.gmra.mxu0 %v9236_v45  ;;  %4879 = vmatprep.mubr.bf16.mxu1 %v9246_v51  ;;  %v4052_v14 = vrot.slane %v9169_v40, 1  ;;  %v3139_v50 = vmax.f32 %v3017_v17, 0.0  ;;  %v3704_v51 = vshll.u32 %v9255_v58, 16  ;;  %v11012_v17 = vld [vmem:[#allocation36_spill] sm:$0xff] }
 0x35f   :  { %v3019_v4 = vpop.f32.mrf.mxu0  ;;  %5168 = vmatprep.mubr.bf16.mxu0 %v9211_v48  ;;  %v3699_v18 = vrot.slane %v3697_v16, 1 }
 0x360   :  { %v3142_v23 = vmax.f32 %v3028_v36, 0.0  ;;  %v3020_v5 = vadd.f32 %v3019_v4, %v11010_v24  ;;  %v3288_v4 = vor.u32 %v3286_v54, %v9249_v0  ;;  %v11011_v24 = vld [vmem:[#allocation38_spill] sm:$0xff]  ;;  %v9279_v21 = vsel %vm834_vm1, %v4052_v14, %v4053_v29 }
 0x361   :  { %v6708_v57 = vpop.f32.mrf.mxu0  ;;  %11014 = vst [vmem:[#allocation3_spill] sm:$0xff] %v9279_v21  ;;  %v9281_v54 = vrot.slane %v3290_v41, 7  ;;  %v9285_v35 = vsel %vm417_vm0, %v3695_v56, %v3699_v18  ;;  %v3706_v16 = vrot.slane %v3704_v51, 1  ;;  %v3293_v41 = vshll.u32 %v9054_v27, 16 }
 0x362   :  { %v9262_v15 = vpack.c.bf16 %v3142_v23, %v3141_v46  ;;  %v3140_v62 = vmax.f32 %v3020_v5, 0.0  ;;  %v3041_v45 = vadd.f32 %v6708_v57, %v11011_v24  ;;  %v9274_v46 = vsel %vm8675_vm4, %v9199_v39, 0  ;;  %11015 = vst [vmem:[#allocation61_spill] sm:$0xff] %v9285_v35 }
 0x363   :  { %v3032_v36 = vpop.f32.mrf.mxu0  ;;  %v9293_v29 = vsel %vm8675_vm4, 0, %v3288_v4  ;;  %v3709_v56 = vshll.u32 %v9274_v46, 16  ;;  %v4055_v18 = vrot.slane %v9211_v48, 1  ;;  %v6998_v4 = vld [vmem:[%s10666_s3 + $0x190] sm:$0xff]   ;;  %v3295_v27 = vor.u32 %v3293_v41, %v9281_v54  ;;  %v11018_v41 = vld [vmem:[#allocation43_spill] sm:$0xff] }
 0x364   :  { %v9269_v28 = vpack.c.bf16 %v3140_v62, %v3139_v50  ;;  %v3033_v23 = vadd.f32 %v3032_v36, %v11012_v17  ;;  %v3145_v39 = vmax.f32 %v3041_v45, 0.0  ;;  %v11016_v62 = vld [vmem:[#allocation37_spill] sm:$0xff]  ;;  %v3702_v36 = vshrl.u32 %v9255_v58, 16  ;;  %v6997_v17 = vld [vmem:[%s10666_s3 + $0x150] sm:$0xff]   ;;  %5645 = vmatpush1.bf16.msra.mxu0 %v6998_v4 }
 0x365   :  { %v6709_v11 = vpop.f32.mrf.mxu0  ;;  %4880 = vmatmul.mubr.bf16.gmra.mxu1 %v9169_v40  ;;  %5646 = vmatprep.subr.bf16.mxu0 %v10844_v7 }
 0x366   :  { %v3044_v5 = vadd.f32 %v6709_v11, %v11013_v31  ;;  %5169 = vmatmul.mubr.bf16.gmra.mxu0 %v9279_v21  ;;  %4887 = vmatprep.mubr.bf16.mxu1 %v9285_v35  ;;  %v3143_v51 = vmax.f32 %v3033_v23, 0.0  ;;  %v3297_v23 = vshrl.u32 %v9101_v44, 16  ;;  %v3711_v21 = vrot.slane %v3709_v56, 1 }
 0x367   :  { %v3035_v57 = vpop.f32.mrf.mxu0  ;;  %5176 = vmatprep.mubr.bf16.mxu0 %v9255_v58  ;;  %5372 = vmatpush2.bf16.msra.mxu1 %v6997_v17 }
 0x368   :  { %v3146_v50 = vmax.f32 %v3044_v5, 0.0  ;;  %v3036_v11 = vadd.f32 %v3035_v57, %v11016_v62  ;;  %v3707_v5 = vor.u32 %v3706_v16, %v3702_v36  ;;  %v3716_v57 = vshll.u32 %v9293_v29, 16  ;;  %5373 = vmatprep.subr.bf16.mxu1 %v10844_v7 }
 0x369   :  { %v6712_v14 = vpop.f32.mrf.mxu0 }
 0x36a   :  { %v9298_v45 = vpack.c.bf16 %v3146_v50, %v3145_v39  ;;  %v3144_v24 = vmax.f32 %v3036_v11, 0.0  ;;  %v11017_v50 = vld [vmem:[#allocation42_spill] sm:$0xff]  ;;  %v4056_v11 = vrot.slane %v9241_v43, 1  ;;  %v9328_v56 = vsel %vm417_vm0, %v3707_v5, %v3711_v21 }
 0x36b   :  { %v3048_v31 = vpop.f32.mrf.mxu0  ;;  %v3057_v62 = vadd.f32 %v6712_v14, %v11017_v50  ;;  %v11020_v14 = vld [vmem:[#allocation40_spill] sm:$0xff]  ;;  %11021 = vst [vmem:[#allocation5_spill] sm:$0xff] %v9328_v56  ;;  %v3718_v17 = vrot.slane %v3716_v57, 1  ;;  %v3714_v5 = vshrl.u32 %v9293_v29, 16  ;;  %v3300_v57 = vshll.u32 %v9101_v44, 16 }
 0x36c   :  { %v9310_v39 = vpack.c.bf16 %v3144_v24, %v3143_v51  ;;  %v9318_v36 = vsel %vm834_vm1, %v4055_v18, %v4056_v11  ;;  %v9323_v51 = vsel %vm8675_vm4, %v9249_v0, 0  ;;  %v3049_v43 = vadd.f32 %v3048_v31, %v11020_v14  ;;  %v11022_v31 = vld [vmem:[#allocation41_spill] sm:$0xff] }
 0x36d   :  { %v6713_v35 = vpop.f32.mrf.mxu0  ;;  %11019 = vst [vmem:[#allocation4_spill] sm:$0xff] %v9318_v36  ;;  %4888 = vmatmul.mubr.bf16.gmra.mxu1 %v9211_v48  ;;  %v3149_v18 = vmax.f32 %v3057_v62, 0.0  ;;  %v9337_v0 = vsel %vm8675_vm4, 0, %v3295_v27  ;;  %v3721_v11 = vshll.u32 %v9323_v51, 16  ;;  %v4058_v62 = vrot.slane %v9255_v58, 1 }
 0x36e   :  { %v3060_v16 = vadd.f32 %v6713_v35, %v11018_v41  ;;  %5177 = vmatmul.mubr.bf16.gmra.mxu0 %v9318_v36  ;;  %v9331_v35 = vrot.slane %v3297_v23, 7  ;;  %4895 = vmatprep.mubr.bf16.mxu1 %v9328_v56  ;;  %v6999_v41 = vld [vmem:[%s10666_s3 + $0x188] sm:$0xff]   ;;  %v3719_v56 = vor.u32 %v3718_v17, %v3714_v5  ;;  %v11023_v36 = vld [vmem:[#allocation46_spill] sm:$0xff]  ;;  %v4059_v44 = vrot.slane %v9274_v46, 1  ;;  %v11024_v17 = vld [vmem:[#allocation44_spill] sm:$0xff] }
 0x36f   :  { %v3051_v24 = vpop.f32.mrf.mxu0  ;;  %5184 = vmatprep.mubr.bf16.mxu0 %v9293_v29  ;;  %5647 = vmatpush1.bf16.msra.mxu0 %v6999_v41  ;;  %v3723_v40 = vrot.slane %v3721_v11, 1  ;;  %v11025_v5 = vld [vmem:[#allocation47_spill] sm:$0xff]  ;;  %v7000_v46 = vld [vmem:[%s10666_s3 + $0x180] sm:$0xff]  }
 0x370   :  { %v3150_v4 = vmax.f32 %v3060_v16, 0.0  ;;  %v3052_v50 = vadd.f32 %v3051_v24, %v11022_v31  ;;  %v3147_v16 = vmax.f32 %v3049_v43, 0.0  ;;  %v3728_v24 = vshll.u32 %v9337_v0, 16  ;;  %5648 = vmatprep.subr.bf16.mxu0 %v10844_v7 }
 0x371   :  { %v6716_v21 = vpop.f32.mrf.mxu0  ;;  %v3302_v31 = vor.u32 %v3300_v57, %v9331_v35  ;;  %v9359_v43 = vsel %vm8675_vm4, %v9281_v54, 0 }
 0x372   :  { %v9343_v23 = vpack.c.bf16 %v3150_v4, %v3149_v18  ;;  %v3148_v27 = vmax.f32 %v3052_v50, 0.0  ;;  %v3073_v48 = vadd.f32 %v6716_v21, %v11023_v36  ;;  %v9364_v36 = vsel %vm834_vm1, %v4058_v62, %v4059_v44 }
 0x373   :  { %v3064_v14 = vpop.f32.mrf.mxu0  ;;  %11026 = vst [vmem:[#allocation6_spill] sm:$0xff] %v9364_v36  ;;  %v9371_v21 = vsel %vm417_vm0, %v3719_v56, %v3723_v40  ;;  %v3730_v11 = vrot.slane %v3728_v24, 1  ;;  %v3726_v40 = vshrl.u32 %v9337_v0, 16  ;;  %v3733_v56 = vshll.u32 %v9359_v43, 16  ;;  %5649 = vmatpush1.bf16.msra.mxu0 %v7000_v46 }
 0x374   :  { %v9353_v18 = vpack.c.bf16 %v3148_v27, %v3147_v16  ;;  %v3065_v50 = vadd.f32 %v3064_v14, %v11024_v17  ;;  %11027 = vst [vmem:[#allocation7_spill] sm:$0xff] %v9371_v21  ;;  %v3153_v41 = vmax.f32 %v3073_v48, 0.0  ;;  %v11028_v27 = vld [vmem:[#allocation45_spill] sm:$0xff]  ;;  %v9379_v14 = vsel %vm8675_vm4, 0, %v3302_v31  ;;  %5650 = vmatprep.subr.bf16.mxu0 %v10844_v7 }
 0x375   :  { %v6717_v4 = vpop.f32.mrf.mxu0  ;;  %4896 = vmatmul.mubr.bf16.gmra.mxu1 %v9255_v58  ;;  %11029 = vst [vmem:[#allocation8_spill] sm:$0xff] %v9379_v14  ;;  %v4061_v17 = vrot.slane %v9293_v29, 1  ;;  %v7002_v31 = vld [vmem:[%s10666_s3 + $0x1f8] sm:$0xff]   ;;  %v3731_v46 = vor.u32 %v3730_v11, %v3726_v40  ;;  %v3735_v58 = vrot.slane %v3733_v56, 1  ;;  %v3539_v40 = vsel %vm8675_vm4, %v9331_v35, 0  ;;  %v11032_v56 = vld [vmem:[#allocation48_spill] sm:$0xff] }
 0x376   :  { %v3076_v57 = vadd.f32 %v6717_v4, %v11025_v5  ;;  %5185 = vmatmul.mubr.bf16.gmra.mxu0 %v9364_v36  ;;  %4903 = vmatprep.mubr.bf16.mxu1 %v9371_v21  ;;  %v3151_v4 = vmax.f32 %v3065_v50, 0.0  ;;  %v7001_v5 = vld [vmem:[%s10666_s3 + $0x148] sm:$0xff]   ;;  %v3740_v50 = vshll.u32 %v9379_v14, 16  ;;  %v4062_v21 = vrot.slane %v9323_v51, 1  ;;  %v7003_v51 = vld [vmem:[%s10666_s3 + $0x1f0] sm:$0xff]  }
 0x377   :  { %v3067_v54 = vpop.f32.mrf.mxu0  ;;  %5192 = vmatprep.mubr.bf16.mxu0 %v9337_v0  ;;  %5374 = vmatpush2.bf16.msra.mxu1 %v7001_v5  ;;  %v3307_v5 = vshll.u32 %v9094_v63, 16 }
 0x378   :  { %v3154_v16 = vmax.f32 %v3076_v57, 0.0  ;;  %v3068_v62 = vadd.f32 %v3067_v54, %v11028_v27  ;;  %v3304_v57 = vshrl.u32 %v9094_v63, 16  ;;  %v11030_v27 = vld [vmem:[#allocation50_spill] sm:$0xff]  ;;  %5651 = vmatpush2.bf16.msra.mxu0 %v7002_v31  ;;  %5375 = vmatprep.subr.bf16.mxu1 %v10844_v7  ;;  %v9403_v11 = vsel %vm834_vm1, %v4061_v17, %v4062_v21  ;;  %v11033_v31 = vld [vmem:[#allocation49_spill] sm:$0xff] }
 0x379   :  { %v6720_v44 = vpop.f32.mrf.mxu0  ;;  %5652 = vmatprep.subr.bf16.mxu0 %v10844_v7  ;;  %v3742_v21 = vrot.slane %v3740_v50, 1  ;;  %v4064_v50 = vrot.slane %v9337_v0, 1 }
 0x37a   :  { %v9383_v24 = vpack.c.bf16 %v3154_v16, %v3153_v41  ;;  %v3152_v48 = vmax.f32 %v3068_v62, 0.0  ;;  %v3311_v41 = vshrl.u32 %v9144_v60, 16  ;;  %v3089_v62 = vadd.f32 %v6720_v44, %v11030_v27 }
 0x37b   :  { %v3080_v54 = vpop.f32.mrf.mxu0  ;;  %v9412_v44 = vrot.slane %v3304_v57, 7  ;;  %v3745_v27 = vshll.u32 %v3539_v40, 16 }
 0x37c   :  { %v9396_v16 = vpack.c.bf16 %v3152_v48, %v3151_v4  ;;  %v3081_v4 = vadd.f32 %v3080_v54, %v11032_v56  ;;  %v3313_v35 = vrot.slane %v3311_v41, 7  ;;  %v3157_v48 = vmax.f32 %v3089_v62, 0.0  ;;  %5653 = vmatpush2.bf16.msra.mxu0 %v7003_v51 }
 0x37d   :  { %v6721_v36 = vpop.f32.mrf.mxu0  ;;  %4904 = vmatmul.mubr.bf16.gmra.mxu1 %v9293_v29  ;;  %v3738_v54 = vshrl.u32 %v9379_v14, 16  ;;  %5654 = vmatprep.subr.bf16.mxu0 %v10844_v7  ;;  %v3309_v63 = vor.u32 %v3307_v5, %v9412_v44  ;;  %v4065_v51 = vrot.slane %v9359_v43, 1 }
 0x37e   :  { %v3092_v9 = vadd.f32 %v6721_v36, %v11031_v37  ;;  %v9417_v37 = vsel %vm417_vm0, %v3731_v46, %v3735_v58  ;;  %5193 = vmatmul.mubr.bf16.gmra.mxu0 %v9403_v11  ;;  %v3314_v58 = vshll.u32 %v9144_v60, 16  ;;  %v3155_v41 = vmax.f32 %v3081_v4, 0.0  ;;  %v7005_v4 = vld [vmem:[%s10666_s3 + $0x1e0] sm:$0xff]  }
 0x37f   :  { %v3083_v36 = vpop.f32.mrf.mxu0  ;;  %4911 = vmatprep.mubr.bf16.mxu1 %v9417_v37  ;;  %5200 = vmatprep.mubr.bf16.mxu0 %v9379_v14  ;;  %v3743_v56 = vor.u32 %v3742_v21, %v3738_v54  ;;  %v9452_v43 = vsel %vm8675_vm4, 0, %v3309_v63  ;;  %v3321_v54 = vshll.u32 %v9136_v8, 16 }
 0x380   :  { %v3158_v17 = vmax.f32 %v3092_v9, 0.0  ;;  %v3084_v57 = vadd.f32 %v3083_v36, %v11033_v31  ;;  %v7004_v9 = vld [vmem:[%s10666_s3 + $0x1e8] sm:$0xff]   ;;  %v3318_v36 = vshrl.u32 %v9136_v8, 16  ;;  %v3316_v60 = vor.u32 %v3314_v58, %v3313_v35  ;;  %v7006_v58 = vld [vmem:[%s10666_s3 + $0x140] sm:$0xff]  }
 0x381   :  { %5655 = vmatpush2.bf16.msra.mxu0 %v7004_v9  ;;  %v9439_v31 = vsel %vm834_vm1, %v4064_v50, %v4065_v51  ;;  %v7007_v50 = vld [vmem:[%s10666_s3 + $0x1d8] sm:$0xff]   ;;  %5376 = vmatpush2.bf16.msra.mxu1 %v7006_v58 }
 0x382   :  { %v9426_v46 = vpack.c.bf16 %v3158_v17, %v3157_v48  ;;  %v3156_v62 = vmax.f32 %v3084_v57, 0.0  ;;  %v3747_v17 = vrot.slane %v3745_v27, 1  ;;  %5656 = vmatprep.subr.bf16.mxu0 %v10844_v7  ;;  %v3320_v5 = vrot.slane %v3318_v36, 7  ;;  %v7008_v36 = vld [vmem:[%s10666_s3 + $0x1d0] sm:$0xff]  }
 0x383   :  { %v3508_v57 = vsel %vm8675_vm4, 0, %v3316_v60  ;;  %v4067_v27 = vrot.slane %v9379_v14, 1  ;;  %v11035_v60 = vld [vmem:[#allocation24_spill] sm:$0xff] }
 0x384   :  { %v9436_v48 = vpack.c.bf16 %v3156_v62, %v3155_v41  ;;  %v9447_v21 = vsel %vm417_vm0, %v3743_v56, %v3747_v17  ;;  %v3752_v9 = vshll.u32 %v3508_v57, 16  ;;  %v3323_v63 = vor.u32 %v3321_v54, %v3320_v5 }
 0x385   :  { %4912 = vmatmul.mubr.bf16.gmra.mxu1 %v9337_v0  ;;  %5657 = vmatpush2.bf16.msra.mxu0 %v7005_v4  ;;  %v3325_v41 = vshrl.u32 %v9187_v22, 16  ;;  %v4068_v62 = vrot.slane %v3539_v40, 1  ;;  %v3541_v56 = vsel %vm8675_vm4, %v3313_v35, 0  ;;  %v3750_v35 = vshrl.u32 %v3508_v57, 16 }
 0x386   :  { %5201 = vmatmul.mubr.bf16.gmra.mxu0 %v9439_v31  ;;  %4919 = vmatprep.mubr.bf16.mxu1 %v9447_v21  ;;  %v3754_v51 = vrot.slane %v3752_v9, 1  ;;  %v9482_v17 = vsel %vm8675_vm4, 0, %v3323_v63  ;;  %v3757_v4 = vshll.u32 %v3541_v56, 16  ;;  %v3328_v54 = vshll.u32 %v9187_v22, 16  ;;  %v7010_v22 = vld [vmem:[%s10666_s3 + $0x1c0] sm:$0xff]  }
 0x387   :  { %5208 = vmatprep.mubr.bf16.mxu0 %v9452_v43  ;;  %5658 = vmatprep.subr.bf16.mxu0 %v10844_v7  ;;  %v9469_v8 = vsel %vm834_vm1, %v4067_v27, %v4068_v62  ;;  %v3327_v40 = vrot.slane %v3325_v41, 7  ;;  %v7009_v27 = vld [vmem:[%s10666_s3 + $0x1c8] sm:$0xff]   ;;  %v3332_v9 = vshrl.u32 %v9178_v52, 16  ;;  %v3542_v63 = vsel %vm8675_vm4, %v3320_v5, 0  ;;  %v9511_v5 = vld [vmem:[%s10666_s3 + $0x238] sm:$0xff]  }
 0x388   :  { %11034 = vst [vmem:[#allocation9_spill] sm:$0xff] %v9469_v8  ;;  %v3755_v58 = vor.u32 %v3754_v51, %v3750_v35  ;;  %v3759_v62 = vrot.slane %v3757_v4, 1  ;;  %v11038_v35 = vld [vmem:[#allocation51_spill] sm:$0xff]  ;;  %v3762_v4 = vshrl.u32 %v9482_v17, 16  ;;  %6722 = vmatprep.subr.bf16.mxu1 %v9511_v5 }
 0x389   :  { %5659 = vmatpush2.bf16.msra.mxu0 %v7007_v50  ;;  %v3764_v50 = vshll.u32 %v9482_v17, 16  ;;  %v3330_v41 = vor.u32 %v3328_v54, %v3327_v40  ;;  %v3334_v54 = vrot.slane %v3332_v9, 7 }
 0x38a   :  { %5660 = vmatprep.subr.bf16.mxu0 %v10844_v7  ;;  %v9499_v51 = vsel %vm417_vm0, %v3755_v58, %v3759_v62  ;;  %v3335_v58 = vshll.u32 %v9178_v52, 16 }
 0x38b   :  { %11037 = vst [vmem:[#allocation10_spill] sm:$0xff] %v9499_v51 }
 0x38d   :  { %4920 = vmatmul.mubr.bf16.gmra.mxu1 %v9379_v14  ;;  %5661 = vmatpush2.bf16.msra.mxu0 %v7008_v36  ;;  %v11036_v36 = vld [vmem:[#allocation23_spill] sm:$0xff]  ;;  %v3543_v14 = vsel %vm8675_vm4, %v3327_v40, 0  ;;  %v4073_v40 = vrot.slane %v9482_v17, 1 }
 0x38e   :  { %5209 = vmatmul.mubr.bf16.gmra.mxu0 %v9469_v8  ;;  %4927 = vmatprep.mubr.bf16.mxu1 %v11035_v60  ;;  %v3766_v60 = vrot.slane %v3764_v50, 1  ;;  %v4070_v50 = vrot.slane %v3508_v57, 1 }
 0x38f   :  { %5216 = vmatprep.mubr.bf16.mxu0 %v3508_v57  ;;  %5662 = vmatprep.subr.bf16.mxu0 %v10844_v7 }
 0x390   :  { %v3767_v9 = vor.u32 %v3766_v60, %v3762_v4  ;;  %v3781_v4 = vshll.u32 %v3543_v14, 16 }
 0x391   :  { %5663 = vmatpush2.bf16.msra.mxu0 %v7009_v27  ;;  %v3769_v27 = vshll.u32 %v3542_v63, 16 }
 0x392   :  { %5664 = vmatprep.subr.bf16.mxu0 %v10844_v7  ;;  %v9506_v7 = vsel %vm8675_vm4, 0, %v3330_v41  ;;  %v3339_v41 = vshrl.u32 %v9230_v59, 16 }
 0x393   :  { %11039 = vst [vmem:[#allocation11_spill] sm:$0xff] %v9506_v7  ;;  %v3776_v62 = vshll.u32 %v9506_v7, 16 }
 0x395   :  { %4928 = vmatmul.mubr.bf16.gmra.mxu1 %v11036_v36  ;;  %5665 = vmatpush2.bf16.msra.mxu0 %v7010_v22  ;;  %v3771_v36 = vrot.slane %v3769_v27, 1  ;;  %v3778_v60 = vrot.slane %v3776_v62, 1  ;;  %v3341_v22 = vrot.slane %v3339_v41, 7  ;;  %v3783_v62 = vrot.slane %v3781_v4, 1 }
 0x396   :  { %5217 = vmatmul.mubr.bf16.gmra.mxu0 %v11038_v35  ;;  %4935 = vmatprep.mubr.bf16.mxu1 %v9499_v51  ;;  %v3337_v35 = vor.u32 %v3335_v58, %v3334_v54  ;;  %v4071_v51 = vrot.slane %v3541_v56, 1  ;;  %v3346_v58 = vshrl.u32 %v9222_v6, 16  ;;  %v3544_v41 = vsel %vm8675_vm4, %v3334_v54, 0 }
 0x397   :  { %5224 = vmatprep.mubr.bf16.mxu0 %v9482_v17  ;;  %v9524_v52 = vsel %vm417_vm0, %v3767_v9, %v3771_v36  ;;  %v4074_v9 = vrot.slane %v3542_v63, 1  ;;  %v3793_v4 = vshll.u32 %v3544_v41, 16 }
 0x398   :  { %v9519_v8 = vsel %vm834_vm1, %v4070_v50, %v4071_v51  ;;  %v9531_v56 = vsel %vm8675_vm4, 0, %v3337_v35  ;;  %v3774_v51 = vshrl.u32 %v9506_v7, 16 }
 0x399   :  { %11040 = vst [vmem:[#allocation13_spill] sm:$0xff] %v9531_v56  ;;  %v3788_v27 = vshll.u32 %v9531_v56, 16  ;;  %v9541_v35 = vsel %vm834_vm1, %v4073_v40, %v4074_v9  ;;  %v3786_v54 = vshrl.u32 %v9531_v56, 16  ;;  %v4076_v40 = vrot.slane %v9506_v7, 1 }
 0x39a   :  { %v3779_v36 = vor.u32 %v3778_v60, %v3774_v51  ;;  %11041 = vst [vmem:[#allocation14_spill] sm:$0xff] %v9541_v35  ;;  %v3348_v51 = vrot.slane %v3346_v58, 7  ;;  %v3353_v58 = vshrl.u32 %v9269_v28, 16 }
 0x39b   :  { %v3790_v60 = vrot.slane %v3788_v27, 1 }
 0x39d   :  { %4936 = vmatmul.mubr.bf16.gmra.mxu1 %v3508_v57  ;;  %v3342_v57 = vshll.u32 %v9230_v59, 16  ;;  %v9545_v59 = vsel %vm417_vm0, %v3779_v36, %v3783_v62  ;;  %v3791_v36 = vor.u32 %v3790_v60, %v3786_v54  ;;  %v4077_v62 = vrot.slane %v3543_v14, 1 }
 0x39e   :  { %5225 = vmatmul.mubr.bf16.gmra.mxu0 %v9519_v8  ;;  %4943 = vmatprep.mubr.bf16.mxu1 %v9524_v52  ;;  %11042 = vst [vmem:[#allocation18_spill] sm:$0xff] %v9545_v59  ;;  %v3355_v54 = vrot.slane %v3353_v58, 7 }
 0x39f   :  { %5232 = vmatprep.mubr.bf16.mxu0 %v9506_v7  ;;  %v3344_v50 = vor.u32 %v3342_v57, %v3341_v22  ;;  %v3349_v57 = vshll.u32 %v9222_v6, 16 }
 0x3a1   :  { %v9552_v63 = vsel %vm8675_vm4, 0, %v3344_v50  ;;  %v3351_v27 = vor.u32 %v3349_v57, %v3348_v51  ;;  %v3545_v50 = vsel %vm8675_vm4, %v3341_v22, 0  ;;  %v3356_v57 = vshll.u32 %v9269_v28, 16 }
 0x3a2   :  { %11043 = vst [vmem:[#allocation12_spill] sm:$0xff] %v9552_v63  ;;  %v3800_v9 = vshll.u32 %v9552_v63, 16  ;;  %v3805_v22 = vshll.u32 %v3545_v50, 16 }
 0x3a3   :  { %v9573_v14 = vsel %vm8675_vm4, 0, %v3351_v27  ;;  %v3358_v58 = vor.u32 %v3356_v57, %v3355_v54  ;;  %v3363_v57 = vshll.u32 %v9262_v15, 16 }
 0x3a4   :  { %v3802_v60 = vrot.slane %v3800_v9, 1  ;;  %11046 = vst [vmem:[#allocation22_spill] sm:$0xff] %v9573_v14  ;;  %v3360_v9 = vshrl.u32 %v9262_v15, 16 }
 0x3a5   :  { %4944 = vmatmul.mubr.bf16.gmra.mxu1 %v9482_v17 }
 0x3a6   :  { %5233 = vmatmul.mubr.bf16.gmra.mxu0 %v9541_v35  ;;  %4951 = vmatprep.mubr.bf16.mxu1 %v9545_v59  ;;  %v3795_v59 = vrot.slane %v3793_v4, 1  ;;  %v9560_v35 = vsel %vm834_vm1, %v4076_v40, %v4077_v62  ;;  %v3798_v4 = vshrl.u32 %v9552_v63, 16  ;;  %v4080_v62 = vrot.slane %v3544_v41, 1 }
 0x3a7   :  { %5240 = vmatprep.mubr.bf16.mxu0 %v9531_v56  ;;  %11044 = vst [vmem:[#allocation15_spill] sm:$0xff] %v9560_v35  ;;  %v9594_v41 = vsel %vm8675_vm4, 0, %v3358_v58  ;;  %v3547_v58 = vsel %vm8675_vm4, %v3355_v54, 0 }
 0x3a8   :  { %v9566_v6 = vsel %vm417_vm0, %v3791_v36, %v3795_v59  ;;  %v4079_v59 = vrot.slane %v9531_v56, 1  ;;  %v3803_v40 = vor.u32 %v3802_v60, %v3798_v4  ;;  %v3812_v36 = vshll.u32 %v9573_v14, 16  ;;  %11049 = vst [vmem:[#allocation21_spill] sm:$0xff] %v9594_v41 }
 0x3a9   :  { %11045 = vst [vmem:[#allocation17_spill] sm:$0xff] %v9566_v6  ;;  %v3362_v4 = vrot.slane %v3360_v9, 7  ;;  %v3367_v9 = vshrl.u32 %v9310_v39, 16  ;;  %v3829_v54 = vshll.u32 %v3547_v58, 16 }
 0x3aa   :  { %v9583_v27 = vsel %vm834_vm1, %v4079_v59, %v4080_v62  ;;  %v3814_v60 = vrot.slane %v3812_v36, 1  ;;  %v4083_v62 = vrot.slane %v3545_v50, 1 }
 0x3ab   :  { %11047 = vst [vmem:[#allocation19_spill] sm:$0xff] %v9583_v27  ;;  %v3365_v36 = vor.u32 %v3363_v57, %v3362_v4  ;;  %v3370_v57 = vshll.u32 %v9310_v39, 16 }
 0x3ad   :  { %4952 = vmatmul.mubr.bf16.gmra.mxu1 %v9506_v7  ;;  %v9615_v50 = vsel %vm8675_vm4, 0, %v3365_v36 }
 0x3ae   :  { %5241 = vmatmul.mubr.bf16.gmra.mxu0 %v9560_v35  ;;  %4959 = vmatprep.mubr.bf16.mxu1 %v9566_v6  ;;  %v3807_v6 = vrot.slane %v3805_v22, 1  ;;  %v3546_v35 = vsel %vm8675_vm4, %v3348_v51, 0  ;;  %v3810_v51 = vshrl.u32 %v9573_v14, 16  ;;  %11052 = vst [vmem:[#allocation27_spill] sm:$0xff] %v9615_v50 }
 0x3af   :  { %5248 = vmatprep.mubr.bf16.mxu0 %v9552_v63  ;;  %v3817_v22 = vshll.u32 %v3546_v35, 16 }
 0x3b0   :  { %v9587_v28 = vsel %vm417_vm0, %v3803_v40, %v3807_v6  ;;  %v4082_v6 = vrot.slane %v9552_v63, 1  ;;  %v3815_v59 = vor.u32 %v3814_v60, %v3810_v51  ;;  %v3824_v40 = vshll.u32 %v9594_v41, 16 }
 0x3b1   :  { %11048 = vst [vmem:[#allocation16_spill] sm:$0xff] %v9587_v28  ;;  %v3369_v51 = vrot.slane %v3367_v9, 7 }
 0x3b2   :  { %v3826_v60 = vrot.slane %v3824_v40, 1  ;;  %v3374_v40 = vshrl.u32 %v9298_v45, 16 }
 0x3b3   :  { %v3372_v9 = vor.u32 %v3370_v57, %v3369_v51  ;;  %v3377_v57 = vshll.u32 %v9298_v45, 16 }
 0x3b5   :  { %4960 = vmatmul.mubr.bf16.gmra.mxu1 %v9531_v56 }
 0x3b6   :  { %5249 = vmatmul.mubr.bf16.gmra.mxu0 %v9583_v27  ;;  %4967 = vmatprep.mubr.bf16.mxu1 %v9587_v28  ;;  %v3819_v28 = vrot.slane %v3817_v22, 1  ;;  %v9602_v27 = vsel %vm834_vm1, %v4082_v6, %v4083_v62  ;;  %v3822_v22 = vshrl.u32 %v9594_v41, 16  ;;  %v4086_v62 = vrot.slane %v3546_v35, 1 }
 0x3b7   :  { %5256 = vmatprep.mubr.bf16.mxu0 %v9573_v14  ;;  %11050 = vst [vmem:[#allocation20_spill] sm:$0xff] %v9602_v27  ;;  %v9636_v35 = vsel %vm8675_vm4, 0, %v3372_v9  ;;  %v3549_v9 = vsel %vm8675_vm4, %v3369_v51, 0 }
 0x3b8   :  { %v9608_v15 = vsel %vm417_vm0, %v3815_v59, %v3819_v28  ;;  %v4085_v28 = vrot.slane %v9573_v14, 1  ;;  %v3827_v6 = vor.u32 %v3826_v60, %v3822_v22  ;;  %v3836_v59 = vshll.u32 %v9615_v50, 16  ;;  %11055 = vst [vmem:[#allocation35_spill] sm:$0xff] %v9636_v35 }
 0x3b9   :  { %11051 = vst [vmem:[#allocation26_spill] sm:$0xff] %v9608_v15  ;;  %v3376_v22 = vrot.slane %v3374_v40, 7  ;;  %v3381_v40 = vshrl.u32 %v9353_v18, 16  ;;  %v3853_v51 = vshll.u32 %v3549_v9, 16 }
 0x3ba   :  { %v9625_v36 = vsel %vm834_vm1, %v4085_v28, %v4086_v62  ;;  %v3838_v60 = vrot.slane %v3836_v59, 1  ;;  %v4089_v62 = vrot.slane %v3547_v58, 1 }
 0x3bb   :  { %11053 = vst [vmem:[#allocation31_spill] sm:$0xff] %v9625_v36  ;;  %v3379_v59 = vor.u32 %v3377_v57, %v3376_v22  ;;  %v3384_v57 = vshll.u32 %v9353_v18, 16 }
 0x3bd   :  { %4968 = vmatmul.mubr.bf16.gmra.mxu1 %v9552_v63  ;;  %v9657_v58 = vsel %vm8675_vm4, 0, %v3379_v59 }
 0x3be   :  { %5257 = vmatmul.mubr.bf16.gmra.mxu0 %v9602_v27  ;;  %4975 = vmatprep.mubr.bf16.mxu1 %v9608_v15  ;;  %v3831_v15 = vrot.slane %v3829_v54, 1  ;;  %v3548_v27 = vsel %vm8675_vm4, %v3362_v4, 0  ;;  %v3834_v4 = vshrl.u32 %v9615_v50, 16 }
 0x3bf   :  { %5264 = vmatprep.mubr.bf16.mxu0 %v9594_v41  ;;  %v3841_v54 = vshll.u32 %v3548_v27, 16 }
 0x3c0   :  { %v9629_v39 = vsel %vm417_vm0, %v3827_v6, %v3831_v15  ;;  %v4088_v15 = vrot.slane %v9594_v41, 1  ;;  %v3839_v28 = vor.u32 %v3838_v60, %v3834_v4  ;;  %v3848_v6 = vshll.u32 %v9636_v35, 16 }
 0x3c1   :  { %11054 = vst [vmem:[#allocation29_spill] sm:$0xff] %v9629_v39  ;;  %v3383_v4 = vrot.slane %v3381_v40, 7 }
 0x3c2   :  { %v3850_v60 = vrot.slane %v3848_v6, 1  ;;  %v3388_v6 = vshrl.u32 %v9343_v23, 16 }
 0x3c3   :  { %v3386_v40 = vor.u32 %v3384_v57, %v3383_v4 }
 0x3c5   :  { %4976 = vmatmul.mubr.bf16.gmra.mxu1 %v9573_v14 }
 0x3c6   :  { %5265 = vmatmul.mubr.bf16.gmra.mxu0 %v9625_v36  ;;  %4983 = vmatprep.mubr.bf16.mxu1 %v9629_v39  ;;  %v3843_v39 = vrot.slane %v3841_v54, 1  ;;  %v9644_v36 = vsel %vm834_vm1, %v4088_v15, %v4089_v62  ;;  %v3846_v54 = vshrl.u32 %v9636_v35, 16  ;;  %v4092_v62 = vrot.slane %v3548_v27, 1 }
 0x3c7   :  { %5272 = vmatprep.mubr.bf16.mxu0 %v9615_v50  ;;  %11056 = vst [vmem:[#allocation2_spill] sm:$0xff] %v9644_v36  ;;  %v9680_v27 = vsel %vm8675_vm4, 0, %v3386_v40 }
 0x3c8   :  { %v9650_v45 = vsel %vm417_vm0, %v3839_v28, %v3843_v39  ;;  %v4091_v39 = vrot.slane %v9615_v50, 1  ;;  %v3851_v15 = vor.u32 %v3850_v60, %v3846_v54  ;;  %v3860_v28 = vshll.u32 %v9657_v58, 16 }
 0x3c9   :  { %11057 = vst [vmem:[#allocation33_spill] sm:$0xff] %v9650_v45  ;;  %v3390_v54 = vrot.slane %v3388_v6, 7  ;;  %v3872_v6 = vshll.u32 %v9680_v27, 16 }
 0x3ca   :  { %v9667_v59 = vsel %vm834_vm1, %v4091_v39, %v4092_v62  ;;  %v3862_v60 = vrot.slane %v3860_v28, 1  ;;  %v4094_v39 = vrot.slane %v9636_v35, 1 }
 0x3cb   :  { %11058 = vst [vmem:[#allocation34_spill] sm:$0xff] %v9667_v59 }
 0x3cd   :  { %4984 = vmatmul.mubr.bf16.gmra.mxu1 %v9594_v41 }
 0x3ce   :  { %5273 = vmatmul.mubr.bf16.gmra.mxu0 %v9644_v36  ;;  %4991 = vmatprep.mubr.bf16.mxu1 %v9650_v45  ;;  %v3855_v45 = vrot.slane %v3853_v51, 1  ;;  %v3550_v36 = vsel %vm8675_vm4, %v3376_v22, 0  ;;  %v3858_v51 = vshrl.u32 %v9657_v58, 16 }
 0x3cf   :  { %5280 = vmatprep.mubr.bf16.mxu0 %v9636_v35  ;;  %v3865_v57 = vshll.u32 %v3550_v36, 16 }
 0x3d0   :  { %v9671_v18 = vsel %vm417_vm0, %v3851_v15, %v3855_v45  ;;  %v3391_v45 = vshll.u32 %v9343_v23, 16  ;;  %v3863_v28 = vor.u32 %v3862_v60, %v3858_v51  ;;  %v9699_v23 = vld [vmem:[%s10667_s4] ss:$0 sm:$0xff] }
 0x3d1   :  { %11059 = vst [vmem:[#allocation38_spill] sm:$0xff] %v9671_v18  ;;  %v3867_v40 = vrot.slane %v3865_v57, 1 }
 0x3d2   :  { %v3393_v62 = vor.u32 %v3391_v45, %v3390_v54 }
 0x3d3   :  { %v9703_v51 = vsel %vm417_vm0, %v3863_v28, %v3867_v40  ;;  %v3870_v28 = vshrl.u32 %v9680_v27, 16 }
 0x3d4   :  { %11063 = vst [vmem:[#allocation42_spill] sm:$0xff] %v9703_v51 }
 0x3d5   :  { %4992 = vmatmul.mubr.bf16.gmra.mxu1 %v9615_v50  ;;  %v9694_v50 = vsel %vm8675_vm4, %v3383_v4, 0  ;;  %v9711_v4 = vsel %vm8675_vm4, 0, %v3393_v62  ;;  %v3402_v62 = vshrl.u32 %v9383_v24, 16 }
 0x3d6   :  { %v9673_v41 = vpop.f32.mrf.mxu0  ;;  %5281 = vmatmul.mubr.bf16.gmra.mxu0 %v9667_v59  ;;  %4999 = vmatprep.mubr.bf16.mxu1 %v9671_v18  ;;  %v4095_v18 = vrot.slane %v3549_v9, 1  ;;  %v3877_v40 = vshll.u32 %v9694_v50, 16 }
 0x3d7   :  { %11060 = vst [vmem:[#allocation36_spill] sm:$0xff] %v9673_v41  ;;  %5288 = vmatprep.mubr.bf16.mxu0 %v9657_v58  ;;  %v3395_v41 = vshrl.u32 %v9396_v16, 16 }
 0x3d8   :  { %v5092_v22 = vpop.f32.mrf.mxu0  ;;  %v3879_v7 = vrot.slane %v3877_v40, 1 }
 0x3d9   :  { %v9690_v22 = vsel %vm834_vm1, %v4094_v39, %v4095_v18  ;;  %v3397_v18 = vrot.slane %v3395_v41, 7  ;;  %v4097_v41 = vrot.slane %v9657_v58, 1 }
 0x3da   :  { %v9685_v15 = vpop.f32.mrf.mxu0  ;;  %11062 = vst [vmem:[#allocation37_spill] sm:$0xff] %v9690_v22 }
 0x3db   :  { %11061 = vst [vmem:[#allocation39_spill] sm:$0xff] %v9685_v15  ;;  %v3398_v15 = vshll.u32 %v9396_v16, 16  ;;  %v9724_v16 = vsel %vm8675_vm4, %v3390_v54, 0 }
 0x3dc   :  { %v5095_v59 = vpop.f32.mrf.mxu0 }
 0x3dd   :  { %v4809_v60 = vpop.f32.mrf.mxu1  ;;  %5000 = vmatmul.mubr.bf16.gmra.mxu1 %v9636_v35  ;;  %v3874_v59 = vrot.slane %v3872_v6, 1  ;;  %v3884_v35 = vshll.u32 %v9711_v4, 16  ;;  %v3400_v14 = vor.u32 %v3398_v15, %v3397_v18 }
 0x3de   :  { %v5098_v9 = vpop.f32.mrf.mxu0  ;;  %5289 = vmatmul.mubr.bf16.gmra.mxu0 %v9690_v22  ;;  %v4810_v57 = vadd.f32 %v9699_v23, %v4809_v60  ;;  %5007 = vmatprep.mubr.bf16.mxu1 %v9703_v51 }
 0x3df   :  { %5296 = vmatprep.mubr.bf16.mxu0 %v9680_v27  ;;  %v4811_v45 = vpop.f32.mrf.mxu1  ;;  %v3875_v22 = vor.u32 %v3874_v59, %v3870_v28  ;;  %v9741_v54 = vsel %vm8675_vm4, 0, %v3400_v14  ;;  %v3409_v14 = vshrl.u32 %v9436_v48, 16 }
 0x3e0   :  { %v5100_v39 = vpop.f32.mrf.mxu0  ;;  %v9716_v6 = vadd.f32 %v5098_v9, %v4810_v57 }
 0x3e1   :  { %v4812_v60 = vpop.f32.mrf.mxu1  ;;  %v4098_v39 = vrot.slane %v3550_v36, 1  ;;  %v9733_v15 = vsel %vm417_vm0, %v3875_v22, %v3879_v7  ;;  %v3882_v7 = vshrl.u32 %v9711_v4, 16  ;;  %v3889_v22 = vshll.u32 %v9724_v16, 16 }
 0x3e2   :  { %11064 = vst [vmem:[#allocation43_spill] sm:$0xff] %v9716_v6  ;;  %v5101_v51 = vpop.f32.mrf.mxu0  ;;  %v4813_v45 = vadd.f32 %v9699_v23, %v4812_v60  ;;  %11067 = vst [vmem:[#allocation46_spill] sm:$0xff] %v9733_v15  ;;  %v4100_v60 = vrot.slane %v9680_v27, 1 }
 0x3e3   :  { %v4814_v63 = vpop.f32.mrf.mxu1  ;;  %v9729_v57 = vsel %vm834_vm1, %v4097_v41, %v4098_v39  ;;  %v3405_v41 = vshll.u32 %v9383_v24, 16 }
 0x3e4   :  { %v5103_v56 = vpop.f32.mrf.mxu0  ;;  %v9726_v9 = vadd.f32 %v5101_v51, %v4813_v45  ;;  %11066 = vst [vmem:[#allocation41_spill] sm:$0xff] %v9729_v57  ;;  %v3404_v63 = vrot.slane %v3402_v62, 7 }
 0x3e5   :  { %v4817_v59 = vpop.f32.mrf.mxu1  ;;  %5008 = vmatmul.mubr.bf16.gmra.mxu1 %v9657_v58  ;;  %v3886_v56 = vrot.slane %v3884_v35, 1 }
 0x3e6   :  { %11065 = vst [vmem:[#allocation40_spill] sm:$0xff] %v9726_v9  ;;  %v5106_v28 = vpop.f32.mrf.mxu0  ;;  %5297 = vmatmul.mubr.bf16.gmra.mxu0 %v9729_v57  ;;  %v4818_v36 = vadd.f32 %v9699_v23, %v4817_v59  ;;  %5015 = vmatprep.mubr.bf16.mxu1 %v9733_v15  ;;  %v3896_v59 = vshll.u32 %v9741_v54, 16  ;;  %v3407_v9 = vor.u32 %v3405_v41, %v3404_v63  ;;  %v3891_v57 = vrot.slane %v3889_v22, 1 }
 0x3e7   :  { %5304 = vmatprep.mubr.bf16.mxu0 %v9711_v4  ;;  %v4819_v51 = vpop.f32.mrf.mxu1  ;;  %v3887_v39 = vor.u32 %v3886_v56, %v3882_v7  ;;  %v3553_v56 = vsel %vm8675_vm4, %v3397_v18, 0 }
 0x3e8   :  { %v5108_v40 = vpop.f32.mrf.mxu0  ;;  %v9746_v35 = vadd.f32 %v5106_v28, %v4818_v36  ;;  %v9770_v18 = vsel %vm8675_vm4, 0, %v3407_v9 }
 0x3e9   :  { %v4820_v62 = vpop.f32.mrf.mxu1  ;;  %v4101_v40 = vrot.slane %v9694_v50, 1  ;;  %v9762_v7 = vsel %vm417_vm0, %v3887_v39, %v3891_v57  ;;  %v3898_v50 = vrot.slane %v3896_v59, 1  ;;  %v3894_v57 = vshrl.u32 %v9741_v54, 16 }
 0x3ea   :  { %11068 = vst [vmem:[#allocation44_spill] sm:$0xff] %v9746_v35  ;;  %v5109_v45 = vpop.f32.mrf.mxu0  ;;  %v4821_v51 = vadd.f32 %v9699_v23, %v4820_v62  ;;  %11070 = vst [vmem:[#allocation45_spill] sm:$0xff] %v9762_v7  ;;  %v3901_v62 = vshll.u32 %v3553_v56, 16  ;;  %v4103_v59 = vrot.slane %v9711_v4, 1 }
 0x3eb   :  { %v4822_v6 = vpop.f32.mrf.mxu1  ;;  %v9756_v28 = vsel %vm834_vm1, %v4100_v60, %v4101_v40  ;;  %v3899_v40 = vor.u32 %v3898_v50, %v3894_v57 }
 0x3ec   :  { %v5111_v15 = vpop.f32.mrf.mxu0  ;;  %v9753_v24 = vadd.f32 %v5109_v45, %v4821_v51  ;;  %v3411_v6 = vrot.slane %v3409_v14, 7  ;;  %v3412_v45 = vshll.u32 %v9436_v48, 16  ;;  %v3554_v48 = vsel %vm8675_vm4, %v3404_v63, 0 }
 0x3ed   :  { %v4825_v36 = vpop.f32.mrf.mxu1  ;;  %5016 = vmatmul.mubr.bf16.gmra.mxu1 %v9680_v27 }
 0x3ee   :  { %11069 = vst [vmem:[#allocation47_spill] sm:$0xff] %v9753_v24  ;;  %v5114_v41 = vpop.f32.mrf.mxu0  ;;  %5305 = vmatmul.mubr.bf16.gmra.mxu0 %v9756_v28  ;;  %v4826_v15 = vadd.f32 %v9699_v23, %v4825_v36  ;;  %5023 = vmatprep.mubr.bf16.mxu1 %v9762_v7  ;;  %v3908_v36 = vshll.u32 %v9770_v18, 16  ;;  %v3414_v24 = vor.u32 %v3412_v45, %v3411_v6  ;;  %v3903_v7 = vrot.slane %v3901_v62, 1 }
 0x3ef   :  { %5312 = vmatprep.mubr.bf16.mxu0 %v9741_v54  ;;  %v4827_v22 = vpop.f32.mrf.mxu1 }
 0x3f0   :  { %v5116_v60 = vpop.f32.mrf.mxu0  ;;  %v9774_v39 = vadd.f32 %v5114_v41, %v4826_v15  ;;  %v4104_v22 = vrot.slane %v9724_v16, 1  ;;  %v9789_v50 = vsel %vm417_vm0, %v3899_v40, %v3903_v7  ;;  %v3910_v16 = vrot.slane %v3908_v36, 1 }
 0x3f1   :  { %v4828_v14 = vpop.f32.mrf.mxu1  ;;  %11074 = vst [vmem:[#allocation49_spill] sm:$0xff] %v9789_v50  ;;  %v9797_v63 = vsel %vm8675_vm4, 0, %v3414_v24  ;;  %v3913_v7 = vshll.u32 %v3554_v48, 16  ;;  %v3416_v40 = vshrl.u32 %v9426_v46, 16  ;;  %v4107_v24 = vrot.slane %v3553_v56, 1 }
 0x3f2   :  { %11071 = vst [vmem:[#allocation50_spill] sm:$0xff] %v9774_v39  ;;  %v5117_v51 = vpop.f32.mrf.mxu0  ;;  %v4829_v9 = vadd.f32 %v9699_v23, %v4828_v14  ;;  %v9785_v15 = vsel %vm834_vm1, %v4103_v59, %v4104_v22  ;;  %v3906_v59 = vshrl.u32 %v9770_v18, 16  ;;  %v3920_v22 = vshll.u32 %v9797_v63, 16 }
 0x3f3   :  { %v4830_v60 = vpop.f32.mrf.mxu1  ;;  %11073 = vst [vmem:[#allocation48_spill] sm:$0xff] %v9785_v15 }
 0x3f4   :  { %v5119_v35 = vpop.f32.mrf.mxu0  ;;  %v9782_v41 = vadd.f32 %v5117_v51, %v4829_v9  ;;  %v4106_v51 = vrot.slane %v9741_v54, 1  ;;  %v3911_v9 = vor.u32 %v3910_v16, %v3906_v59 }
 0x3f5   :  { %v4833_v39 = vpop.f32.mrf.mxu1  ;;  %5024 = vmatmul.mubr.bf16.gmra.mxu1 %v9711_v4 }
 0x3f6   :  { %11072 = vst [vmem:[#allocation28_spill] sm:$0xff] %v9782_v41  ;;  %v5122_v57 = vpop.f32.mrf.mxu0  ;;  %5313 = vmatmul.mubr.bf16.gmra.mxu0 %v9785_v15  ;;  %v4834_v35 = vadd.f32 %v9699_v23, %v4833_v39  ;;  %5031 = vmatprep.mubr.bf16.mxu1 %v9789_v50 }
 0x3f7   :  { %5320 = vmatprep.mubr.bf16.mxu0 %v9770_v18  ;;  %v4835_v62 = vpop.f32.mrf.mxu1 }
 0x3f8   :  { %v5124_v45 = vpop.f32.mrf.mxu0  ;;  %v9800_v14 = vadd.f32 %v5122_v57, %v4834_v35  ;;  %v9809_v57 = vsel %vm834_vm1, %v4106_v51, %v4107_v24  ;;  %v3555_v35 = vsel %vm8675_vm4, %v3411_v6, 0  ;;  %v3419_v6 = vshll.u32 %v9426_v46, 16 }
 0x3f9   :  { %v4836_v39 = vpop.f32.mrf.mxu1  ;;  %v3915_v45 = vrot.slane %v3913_v7, 1 }
 0x3fa   :  { %11075 = vst [vmem:[#allocation62_spill] sm:$0xff] %v9800_v14  ;;  %v5125_v36 = vpop.f32.mrf.mxu0  ;;  %v4837_v60 = vadd.f32 %v9699_v23, %v4836_v39  ;;  %v9813_v14 = vrot.slane %v3416_v40, 7  ;;  %v3918_v40 = vshrl.u32 %v9797_v63, 16  ;;  %v3925_v39 = vshll.u32 %v3555_v35, 16 }
 0x3fb   :  { %v4838_v41 = vpop.f32.mrf.mxu1  ;;  %v9817_v16 = vsel %vm417_vm0, %v3911_v9, %v3915_v45  ;;  %v4109_v9 = vrot.slane %v9770_v18, 1  ;;  %v4110_v45 = vrot.slane %v3554_v48, 1 }
 0x3fc   :  { %v5127_v62 = vpop.f32.mrf.mxu0  ;;  %v9806_v50 = vadd.f32 %v5125_v36, %v4837_v60  ;;  %11077 = vst [vmem:[#allocation64_spill] sm:$0xff] %v9817_v16  ;;  %v3922_v41 = vrot.slane %v3920_v22, 1  ;;  %v3421_v60 = vor.u32 %v3419_v6, %v9813_v14  ;;  %v3927_v46 = vrot.slane %v3925_v39, 1 }
 0x3fd   :  { %v4841_v15 = vpop.f32.mrf.mxu1  ;;  %5032 = vmatmul.mubr.bf16.gmra.mxu1 %v9741_v54  ;;  %v4112_v39 = vrot.slane %v9797_v63, 1 }
 0x3fe   :  { %11076 = vst [vmem:[#allocation63_spill] sm:$0xff] %v9806_v50  ;;  %v5130_v56 = vpop.f32.mrf.mxu0  ;;  %5321 = vmatmul.mubr.bf16.gmra.mxu0 %v9809_v57  ;;  %v4842_v59 = vadd.f32 %v9699_v23, %v4841_v15  ;;  %5039 = vmatprep.mubr.bf16.mxu1 %v9817_v16  ;;  %v3923_v15 = vor.u32 %v3922_v41, %v3918_v40  ;;  %v9842_v48 = vsel %vm8675_vm4, 0, %v3421_v60 }
 0x3ff   :  { %5328 = vmatprep.mubr.bf16.mxu0 %v9797_v63  ;;  %v4843_v7 = vpop.f32.mrf.mxu1  ;;  %v4159_v53 = vshrl.u32 %v9842_v48, 16 }
 0x400   :  { %v5132_v51 = vpop.f32.mrf.mxu0  ;;  %v9825_v36 = vadd.f32 %v5130_v56, %v4842_v59  ;;  %v9837_v59 = vsel %vm417_vm0, %v3923_v15, %v3927_v46  ;;  %v4113_v15 = vrot.slane %v3555_v35, 1 }
 0x401   :  { %v4844_v22 = vpop.f32.mrf.mxu1  ;;  %v9833_v51 = vsel %vm834_vm1, %v4109_v9, %v4110_v45 }
 0x402   :  { %v5133_v24 = vpop.f32.mrf.mxu0  ;;  %v4845_v62 = vadd.f32 %v9699_v23, %v4844_v22  ;;  %v9854_v46 = vsel %vm834_vm1, %v4112_v39, %v4113_v15 }
 0x403   :  { %v4846_v50 = vpop.f32.mrf.mxu1 }
 0x404   :  { %v5135_v16 = vpop.f32.mrf.mxu0  ;;  %v9830_v7 = vadd.f32 %v5133_v24, %v4845_v62 }
 0x405   :  { %v4849_v56 = vpop.f32.mrf.mxu1  ;;  %5040 = vmatmul.mubr.bf16.gmra.mxu1 %v9770_v18 }
 0x406   :  { %v5138_v6 = vpop.f32.mrf.mxu0  ;;  %5329 = vmatmul.mubr.bf16.gmra.mxu0 %v9833_v51  ;;  %v4850_v50 = vadd.f32 %v9699_v23, %v4849_v56  ;;  %5047 = vmatprep.mubr.bf16.mxu1 %v9837_v59 }
 0x407   :  { %5336 = vmatprep.mubr.bf16.mxu0 %v9842_v48  ;;  %v4851_v16 = vpop.f32.mrf.mxu1 }
 0x408   :  { %v5140_v41 = vpop.f32.mrf.mxu0  ;;  %v9847_v40 = vadd.f32 %v5138_v6, %v4850_v50 }
 0x409   :  { %v4852_v9 = vpop.f32.mrf.mxu1 }
 0x40a   :  { %v5141_v22 = vpop.f32.mrf.mxu0  ;;  %v4853_v24 = vadd.f32 %v9699_v23, %v4852_v9 }
 0x40b   :  { %v4854_v62 = vpop.f32.mrf.mxu1 }
 0x40c   :  { %v5143_v60 = vpop.f32.mrf.mxu0  ;;  %v9851_v45 = vadd.f32 %v5141_v22, %v4853_v24  ;;  %v7012_v62 = vld [vmem:[%s10666_s3 + $0x230] sm:$0xff]  }
 0x40d   :  { %v4857_v56 = vpop.f32.mrf.mxu1  ;;  %5048 = vmatmul.mubr.bf16.gmra.mxu1 %v9797_v63 }
 0x40e   :  { %v5146_v16 = vpop.f32.mrf.mxu0  ;;  %5337 = vmatmul.mubr.bf16.gmra.mxu0 %v9854_v46  ;;  %v4858_v6 = vadd.f32 %v9699_v23, %v4857_v56  ;;  %5377 = vmatprep.mubr.bf16.mxu1 %v8914_v42 }
 0x40f   :  { %5666 = vmatprep.mubr.bf16.mxu0 %v8918_v30  ;;  %v4859_v35 = vpop.f32.mrf.mxu1 }
 0x410   :  { %v5148_v50 = vpop.f32.mrf.mxu0  ;;  %v9861_v41 = vadd.f32 %v5146_v16, %v4858_v6 }
 0x411   :  { %v4860_v9 = vpop.f32.mrf.mxu1  ;;  %v7013_v50 = vld [vmem:[%s10666_s3 + $0x228] sm:$0xff]  }
 0x412   :  { %v5149_v22 = vpop.f32.mrf.mxu0  ;;  %v4861_v39 = vadd.f32 %v9699_v23, %v4860_v9 }
 0x413   :  { %v4862_v24 = vpop.f32.mrf.mxu1 }
 0x414   :  { %v5151_v15 = vpop.f32.mrf.mxu0  ;;  %v9867_v60 = vadd.f32 %v5149_v22, %v4861_v39 }
 0x415   :  { %v4865_v56 = vpop.f32.mrf.mxu1  ;;  %5378 = vmatmul.mubr.bf16.vlgmr.msra.gmra.mxu1 %v8904_v26  ;;  %v7014_v15 = vld [vmem:[%s10666_s3 + $0x220] sm:$0xff]  }
 0x416   :  { %v5154_v42 = vpop.f32.mrf.mxu0  ;;  %5667 = vmatmul.mubr.bf16.vlgmr.msra.gmra.mxu0 %v8868_v1  ;;  %v4866_v16 = vadd.f32 %v9699_v23, %v4865_v56  ;;  %5385 = vmatprep.mubr.bf16.mxu1 %v8952_v55 }
 0x417   :  { %6723 = vmatpush3.bf16.msra.mxu1 %v9511_v5  ;;  %v4867_v6 = vpop.f32.mrf.mxu1  ;;  %5674 = vmatprep.mubr.bf16.mxu0 %v8956_v32 }
 0x418   :  { %v5156_v35 = vpop.f32.mrf.mxu0  ;;  %6724 = vmatprep.subr.bf16.mxu1 %v7012_v62  ;;  %v9878_v9 = vadd.f32 %v5154_v42, %v4866_v16 }
 0x419   :  { %v4868_v26 = vpop.f32.mrf.mxu1 }
 0x41a   :  { %v5157_v22 = vpop.f32.mrf.mxu0  ;;  %v4869_v1 = vadd.f32 %v9699_v23, %v4868_v26  ;;  %v7015_v26 = vld [vmem:[%s10666_s3 + $0x218] sm:$0xff]  }
 0x41b   :  { %6725 = vmatpush3.bf16.msra.mxu1 %v7012_v62  ;;  %v4870_v39 = vpop.f32.mrf.mxu1 }
 0x41c   :  { %v5159_v24 = vpop.f32.mrf.mxu0  ;;  %6726 = vmatprep.subr.bf16.mxu1 %v7013_v50  ;;  %v9881_v5 = vadd.f32 %v5157_v22, %v4869_v1 }
 0x41d   :  { %v4873_v56 = vpop.f32.mrf.mxu1  ;;  %5386 = vmatmul.mubr.bf16.gmra.mxu1 %v8918_v30 }
 0x41e   :  { %v5162_v6 = vpop.f32.mrf.mxu0  ;;  %5675 = vmatmul.mubr.bf16.gmra.mxu0 %v8908_v47  ;;  %v4874_v42 = vadd.f32 %v9699_v23, %v4873_v56  ;;  %5393 = vmatprep.mubr.bf16.mxu1 %v8988_v34 }
 0x41f   :  { %5682 = vmatprep.mubr.bf16.mxu0 %v8997_v61  ;;  %v4875_v62 = vpop.f32.mrf.mxu1  ;;  %6727 = vmatpush3.bf16.msra.mxu1 %v7013_v50 }
 0x420   :  { %v5164_v16 = vpop.f32.mrf.mxu0  ;;  %v9891_v35 = vadd.f32 %v5162_v6, %v4874_v42  ;;  %6728 = vmatprep.subr.bf16.mxu1 %v7014_v15 }
 0x421   :  { %v4876_v30 = vpop.f32.mrf.mxu1 }
 0x422   :  { %v5165_v22 = vpop.f32.mrf.mxu0  ;;  %v4877_v47 = vadd.f32 %v9699_v23, %v4876_v30 }
 0x423   :  { %v4878_v1 = vpop.f32.mrf.mxu1  ;;  %6729 = vmatpush3.bf16.msra.mxu1 %v7014_v15 }
 0x424   :  { %v5167_v39 = vpop.f32.mrf.mxu0  ;;  %v9897_v24 = vadd.f32 %v5165_v22, %v4877_v47  ;;  %6730 = vmatprep.subr.bf16.mxu1 %v7015_v26 }
 0x425   :  { %v4881_v56 = vpop.f32.mrf.mxu1  ;;  %5394 = vmatmul.mubr.bf16.gmra.mxu1 %v8956_v32 }
 0x426   :  { %v5170_v50 = vpop.f32.mrf.mxu0  ;;  %5683 = vmatmul.mubr.bf16.gmra.mxu0 %v8936_v33  ;;  %v4882_v6 = vadd.f32 %v9699_v23, %v4881_v56  ;;  %5401 = vmatprep.mubr.bf16.mxu1 %v9029_v3 }
 0x427   :  { %5690 = vmatprep.mubr.bf16.mxu0 %v9035_v12  ;;  %v4883_v42 = vpop.f32.mrf.mxu1  ;;  %6731 = vmatpush3.bf16.msra.mxu1 %v7015_v26 }
 0x428   :  { %v5172_v62 = vpop.f32.mrf.mxu0  ;;  %v9904_v16 = vadd.f32 %v5170_v50, %v4882_v6 }
 0x429   :  { %v4884_v15 = vpop.f32.mrf.mxu1 }
 0x42a   :  { %v5173_v30 = vpop.f32.mrf.mxu0  ;;  %v4885_v22 = vadd.f32 %v9699_v23, %v4884_v15 }
 0x42b   :  { %v4886_v47 = vpop.f32.mrf.mxu1 }
 0x42c   :  { %v5175_v32 = vpop.f32.mrf.mxu0  ;;  %v9907_v1 = vadd.f32 %v5173_v30, %v4885_v22 }
 0x42d   :  { %v4889_v33 = vpop.f32.mrf.mxu1  ;;  %5402 = vmatmul.mubr.bf16.gmra.mxu1 %v8997_v61 }
 0x42e   :  { %v5178_v39 = vpop.f32.mrf.mxu0  ;;  %5691 = vmatmul.mubr.bf16.gmra.mxu0 %v8975_v49  ;;  %v4890_v56 = vadd.f32 %v9699_v23, %v4889_v33  ;;  %5409 = vmatprep.mubr.bf16.mxu1 %v9068_v25  ;;  %v7016_v33 = vld [vmem:[%s10666_s3 + $0x210] sm:$0xff]  }
 0x42f   :  { %5698 = vmatprep.mubr.bf16.mxu0 %v9078_v19  ;;  %v4891_v26 = vpop.f32.mrf.mxu1  ;;  %6732 = vmatprep.subr.bf16.mxu1 %v7016_v33 }
 0x430   :  { %v5180_v50 = vpop.f32.mrf.mxu0  ;;  %v9914_v6 = vadd.f32 %v5178_v39, %v4890_v56  ;;  %6733 = vmatpush3.bf16.msra.mxu1 %v7016_v33 }
 0x431   :  { %v4892_v42 = vpop.f32.mrf.mxu1 }
 0x432   :  { %v5181_v62 = vpop.f32.mrf.mxu0  ;;  %v4893_v15 = vadd.f32 %v9699_v23, %v4892_v42 }
 0x433   :  { %v4894_v30 = vpop.f32.mrf.mxu1 }
 0x434   :  { %v5183_v22 = vpop.f32.mrf.mxu0  ;;  %v9917_v61 = vadd.f32 %v5181_v62, %v4893_v15 }
 0x435   :  { %v4897_v47 = vpop.f32.mrf.mxu1  ;;  %5410 = vmatmul.mubr.bf16.gmra.mxu1 %v9035_v12 }
 0x436   :  { %11078 = vst [vmem:[#allocation65_spill] sm:$0xff] %v9917_v61  ;;  %v5186_v49 = vpop.f32.mrf.mxu0  ;;  %5699 = vmatmul.mubr.bf16.gmra.mxu0 %v9009_v10  ;;  %v4898_v32 = vadd.f32 %v9699_v23, %v4897_v47  ;;  %5417 = vmatprep.mubr.bf16.mxu1 %v9111_v38 }
 0x437   :  { %5706 = vmatprep.mubr.bf16.mxu0 %v9117_v2  ;;  %v4899_v39 = vpop.f32.mrf.mxu1 }
 0x438   :  { %v5188_v56 = vpop.f32.mrf.mxu0  ;;  %v9927_v26 = vadd.f32 %v5186_v49, %v4898_v32  ;;  %v11081_v49 = vld [vmem:[#allocation32_spill] sm:$0xff] }
 0x439   :  { %v4900_v50 = vpop.f32.mrf.mxu1 }
 0x43a   :  { %11079 = vst [vmem:[#allocation66_spill] sm:$0xff] %v9927_v26  ;;  %v5189_v12 = vpop.f32.mrf.mxu0  ;;  %v4901_v10 = vadd.f32 %v9699_v23, %v4900_v50 }
 0x43b   :  { %v4902_v42 = vpop.f32.mrf.mxu1 }
 0x43c   :  { %v5191_v62 = vpop.f32.mrf.mxu0  ;;  %v9930_v15 = vadd.f32 %v5189_v12, %v4901_v10 }
 0x43d   :  { %v4905_v30 = vpop.f32.mrf.mxu1  ;;  %5418 = vmatmul.mubr.bf16.gmra.mxu1 %v9078_v19 }
 0x43e   :  { %11080 = vst [vmem:[#allocation67_spill] sm:$0xff] %v9930_v15  ;;  %v5194_v22 = vpop.f32.mrf.mxu0  ;;  %5707 = vmatmul.mubr.bf16.gmra.mxu0 %v9052_v20  ;;  %v4906_v47 = vadd.f32 %v9699_v23, %v4905_v30  ;;  %5425 = vmatprep.mubr.bf16.mxu1 %v9150_v13  ;;  %v11084_v30 = vld [vmem:[#allocation30_spill] sm:$0xff] }
 0x43f   :  { %5714 = vmatprep.mubr.bf16.mxu0 %v11081_v49  ;;  %v4907_v32 = vpop.f32.mrf.mxu1 }
 0x440   :  { %v5196_v33 = vpop.f32.mrf.mxu0  ;;  %v9937_v39 = vadd.f32 %v5194_v22, %v4906_v47  ;;  %v11085_v32 = vld [vmem:[#allocation55_spill] sm:$0xff]  ;;  %v11086_v22 = vld [vmem:[#allocation56_spill] sm:$0xff] }
 0x441   :  { %v4908_v56 = vpop.f32.mrf.mxu1 }
 0x442   :  { %11082 = vst [vmem:[#allocation32_spill] sm:$0xff] %v9937_v39  ;;  %v5197_v50 = vpop.f32.mrf.mxu0  ;;  %v4909_v12 = vadd.f32 %v9699_v23, %v4908_v56 }
 0x443   :  { %v4910_v10 = vpop.f32.mrf.mxu1 }
 0x444   :  { %v5199_v42 = vpop.f32.mrf.mxu0  ;;  %v9940_v19 = vadd.f32 %v5197_v50, %v4909_v12 }
 0x445   :  { %v4913_v62 = vpop.f32.mrf.mxu1  ;;  %5426 = vmatmul.mubr.bf16.gmra.mxu1 %v9117_v2 }
 0x446   :  { %11083 = vst [vmem:[#allocation68_spill] sm:$0xff] %v9940_v19  ;;  %v5202_v20 = vpop.f32.mrf.mxu0  ;;  %5715 = vmatmul.mubr.bf16.gmra.mxu0 %v11084_v30  ;;  %v4914_v15 = vadd.f32 %v9699_v23, %v4913_v62  ;;  %5433 = vmatprep.mubr.bf16.mxu1 %v11085_v32  ;;  %v11089_v30 = vld [vmem:[#allocation52_spill] sm:$0xff] }
 0x447   :  { %5722 = vmatprep.mubr.bf16.mxu0 %v11086_v22  ;;  %v4915_v47 = vpop.f32.mrf.mxu1 }
 0x448   :  { %v5204_v33 = vpop.f32.mrf.mxu0  ;;  %v9947_v39 = vadd.f32 %v5202_v20, %v4914_v15  ;;  %v11090_v47 = vld [vmem:[#allocation58_spill] sm:$0xff]  ;;  %v11091_v15 = vld [vmem:[#allocation59_spill] sm:$0xff] }
 0x449   :  { %v4916_v56 = vpop.f32.mrf.mxu1 }
 0x44a   :  { %11087 = vst [vmem:[#allocation30_spill] sm:$0xff] %v9947_v39  ;;  %v5205_v10 = vpop.f32.mrf.mxu0  ;;  %v4917_v50 = vadd.f32 %v9699_v23, %v4916_v56 }
 0x44b   :  { %v4918_v12 = vpop.f32.mrf.mxu1 }
 0x44c   :  { %v5207_v42 = vpop.f32.mrf.mxu0  ;;  %v9950_v2 = vadd.f32 %v5205_v10, %v4917_v50 }
 0x44d   :  { %v4921_v19 = vpop.f32.mrf.mxu1  ;;  %5434 = vmatmul.mubr.bf16.gmra.mxu1 %v11081_v49 }
 0x44e   :  { %11088 = vst [vmem:[#allocation55_spill] sm:$0xff] %v9950_v2  ;;  %v5210_v62 = vpop.f32.mrf.mxu0  ;;  %5723 = vmatmul.mubr.bf16.gmra.mxu0 %v11089_v30  ;;  %v4922_v26 = vadd.f32 %v9699_v23, %v4921_v19  ;;  %5441 = vmatprep.mubr.bf16.mxu1 %v11090_v47  ;;  %v11094_v30 = vld [vmem:[#allocation53_spill] sm:$0xff] }
 0x44f   :  { %5730 = vmatprep.mubr.bf16.mxu0 %v11091_v15  ;;  %v4923_v20 = vpop.f32.mrf.mxu1 }
 0x450   :  { %v5212_v33 = vpop.f32.mrf.mxu0  ;;  %v9957_v39 = vadd.f32 %v5210_v62, %v4922_v26  ;;  %v11095_v20 = vld [vmem:[#allocation3_spill] sm:$0xff]  ;;  %v11096_v26 = vld [vmem:[#allocation61_spill] sm:$0xff] }
 0x451   :  { %v4924_v56 = vpop.f32.mrf.mxu1  ;;  %v7017_v62 = vld [vmem:[%s10666_s3 + $0x208] sm:$0xff]  }
 0x452   :  { %11092 = vst [vmem:[#allocation56_spill] sm:$0xff] %v9957_v39  ;;  %v5213_v12 = vpop.f32.mrf.mxu0  ;;  %v4925_v10 = vadd.f32 %v9699_v23, %v4924_v56  ;;  %6734 = vmatprep.subr.bf16.mxu1 %v7017_v62 }
 0x453   :  { %v4926_v50 = vpop.f32.mrf.mxu1  ;;  %6735 = vmatpush3.bf16.msra.mxu1 %v7017_v62 }
 0x454   :  { %v5215_v42 = vpop.f32.mrf.mxu0  ;;  %v9960_v49 = vadd.f32 %v5213_v12, %v4925_v10 }
 0x455   :  { %v4929_v2 = vpop.f32.mrf.mxu1  ;;  %5442 = vmatmul.mubr.bf16.gmra.mxu1 %v11086_v22 }
 0x456   :  { %11093 = vst [vmem:[#allocation52_spill] sm:$0xff] %v9960_v49  ;;  %v5218_v19 = vpop.f32.mrf.mxu0  ;;  %5731 = vmatmul.mubr.bf16.gmra.mxu0 %v11094_v30  ;;  %v4930_v61 = vadd.f32 %v9699_v23, %v4929_v2  ;;  %5449 = vmatprep.mubr.bf16.mxu1 %v11095_v20  ;;  %v11099_v20 = vld [vmem:[#allocation57_spill] sm:$0xff] }
 0x457   :  { %5738 = vmatprep.mubr.bf16.mxu0 %v11096_v26  ;;  %v4931_v33 = vpop.f32.mrf.mxu1 }
 0x458   :  { %v5220_v56 = vpop.f32.mrf.mxu0  ;;  %v9970_v12 = vadd.f32 %v5218_v19, %v4930_v61  ;;  %v11100_v61 = vld [vmem:[#allocation4_spill] sm:$0xff]  ;;  %v11101_v19 = vld [vmem:[#allocation5_spill] sm:$0xff] }
 0x459   :  { %v4932_v10 = vpop.f32.mrf.mxu1 }
 0x45a   :  { %11097 = vst [vmem:[#allocation58_spill] sm:$0xff] %v9970_v12  ;;  %v5221_v22 = vpop.f32.mrf.mxu0  ;;  %v4933_v50 = vadd.f32 %v9699_v23, %v4932_v10 }
 0x45b   :  { %v4934_v42 = vpop.f32.mrf.mxu1 }
 0x45c   :  { %v5223_v2 = vpop.f32.mrf.mxu0  ;;  %v9973_v30 = vadd.f32 %v5221_v22, %v4933_v50 }
 0x45d   :  { %v4937_v49 = vpop.f32.mrf.mxu1  ;;  %5450 = vmatmul.mubr.bf16.gmra.mxu1 %v11091_v15 }
 0x45e   :  { %11098 = vst [vmem:[#allocation59_spill] sm:$0xff] %v9973_v30  ;;  %v5226_v39 = vpop.f32.mrf.mxu0  ;;  %5739 = vmatmul.mubr.bf16.gmra.mxu0 %v11099_v20  ;;  %v4938_v33 = vadd.f32 %v9699_v23, %v4937_v49  ;;  %5457 = vmatprep.mubr.bf16.mxu1 %v11100_v61  ;;  %v11104_v20 = vld [vmem:[#allocation60_spill] sm:$0xff] }
 0x45f   :  { %5746 = vmatprep.mubr.bf16.mxu0 %v11101_v19  ;;  %v4939_v56 = vpop.f32.mrf.mxu1 }
 0x460   :  { %v5228_v62 = vpop.f32.mrf.mxu0  ;;  %v9980_v12 = vadd.f32 %v5226_v39, %v4938_v33  ;;  %v11105_v56 = vld [vmem:[#allocation6_spill] sm:$0xff]  ;;  %v11106_v39 = vld [vmem:[#allocation7_spill] sm:$0xff] }
 0x461   :  { %v4940_v10 = vpop.f32.mrf.mxu1 }
 0x462   :  { %11102 = vst [vmem:[#allocation53_spill] sm:$0xff] %v9980_v12  ;;  %v5229_v42 = vpop.f32.mrf.mxu0  ;;  %v4941_v22 = vadd.f32 %v9699_v23, %v4940_v10 }
 0x463   :  { %v4942_v50 = vpop.f32.mrf.mxu1 }
 0x464   :  { %v5231_v2 = vpop.f32.mrf.mxu0  ;;  %v9983_v15 = vadd.f32 %v5229_v42, %v4941_v22 }
 0x465   :  { %v4945_v30 = vpop.f32.mrf.mxu1  ;;  %5458 = vmatmul.mubr.bf16.gmra.mxu1 %v11096_v26 }
 0x466   :  { %11103 = vst [vmem:[#allocation61_spill] sm:$0xff] %v9983_v15  ;;  %v5234_v49 = vpop.f32.mrf.mxu0  ;;  %5747 = vmatmul.mubr.bf16.gmra.mxu0 %v11104_v20  ;;  %v4946_v61 = vadd.f32 %v9699_v23, %v4945_v30  ;;  %5465 = vmatprep.mubr.bf16.mxu1 %v11105_v56 }
 0x467   :  { %5754 = vmatprep.mubr.bf16.mxu0 %v11106_v39  ;;  %v4947_v33 = vpop.f32.mrf.mxu1 }
 0x468   :  { %v5236_v62 = vpop.f32.mrf.mxu0  ;;  %v9990_v12 = vadd.f32 %v5234_v49, %v4946_v61 }
 0x469   :  { %v4948_v10 = vpop.f32.mrf.mxu1 }
 0x46a   :  { %11107 = vst [vmem:[#allocation57_spill] sm:$0xff] %v9990_v12  ;;  %v5237_v50 = vpop.f32.mrf.mxu0  ;;  %v4949_v42 = vadd.f32 %v9699_v23, %v4948_v10 }
 0x46b   :  { %v4950_v22 = vpop.f32.mrf.mxu1 }
 0x46c   :  { %v5239_v2 = vpop.f32.mrf.mxu0  ;;  %v9993_v26 = vadd.f32 %v5237_v50, %v4949_v42  ;;  %v4149_v50 = vshll.u32 %v9452_v43, 16 }
 0x46d   :  { %v4953_v15 = vpop.f32.mrf.mxu1  ;;  %5466 = vmatmul.mubr.bf16.gmra.mxu1 %v11101_v19 }
 0x46e   :  { %11108 = vst [vmem:[#allocation5_spill] sm:$0xff] %v9993_v26  ;;  %v5242_v30 = vpop.f32.mrf.mxu0  ;;  %5755 = vmatmul.mubr.bf16.gmra.mxu0 %v9293_v29  ;;  %v4954_v20 = vadd.f32 %v9699_v23, %v4953_v15  ;;  %5473 = vmatprep.mubr.bf16.mxu1 %v9403_v11  ;;  %v3540_v29 = vsel %vm8675_vm4, %v9412_v44, 0 }
 0x46f   :  { %5762 = vmatprep.mubr.bf16.mxu0 %v9417_v37  ;;  %v4955_v61 = vpop.f32.mrf.mxu1 }
 0x470   :  { %v5244_v49 = vpop.f32.mrf.mxu0  ;;  %v10000_v33 = vadd.f32 %v5242_v30, %v4954_v20  ;;  %v4151_v30 = vrot.slane %v4149_v50, 1 }
 0x471   :  { %v4956_v62 = vpop.f32.mrf.mxu1  ;;  %v7018_v49 = vld [vmem:[%s10666_s3 + $0x200] sm:$0xff]  }
 0x472   :  { %11109 = vst [vmem:[#allocation60_spill] sm:$0xff] %v10000_v33  ;;  %v5245_v10 = vpop.f32.mrf.mxu0  ;;  %v4957_v42 = vadd.f32 %v9699_v23, %v4956_v62  ;;  %6736 = vmatprep.subr.bf16.mxu1 %v7018_v49 }
 0x473   :  { %v4958_v19 = vpop.f32.mrf.mxu1  ;;  %6737 = vmatpush3.bf16.msra.mxu1 %v7018_v49 }
 0x474   :  { %v5247_v22 = vpop.f32.mrf.mxu0  ;;  %v10007_v15 = vadd.f32 %v5245_v10, %v4957_v42  ;;  %v4147_v10 = vshrl.u32 %v9452_v43, 16  ;;  %v4154_v42 = vshll.u32 %v3540_v29, 16 }
 0x475   :  { %v4961_v2 = vpop.f32.mrf.mxu1  ;;  %5474 = vmatmul.mubr.bf16.gmra.mxu1 %v11106_v39 }
 0x476   :  { %11110 = vst [vmem:[#allocation6_spill] sm:$0xff] %v10007_v15  ;;  %v5250_v61 = vpop.f32.mrf.mxu0  ;;  %5763 = vmatmul.mubr.bf16.gmra.mxu0 %v9337_v0  ;;  %v4962_v20 = vadd.f32 %v9699_v23, %v4961_v2  ;;  %5481 = vmatprep.mubr.bf16.mxu1 %v9439_v31  ;;  %v4152_v19 = vor.u32 %v4151_v30, %v4147_v10  ;;  %v4156_v33 = vrot.slane %v4154_v42, 1 }
 0x477   :  { %5770 = vmatprep.mubr.bf16.mxu0 %v9447_v21  ;;  %v4963_v44 = vpop.f32.mrf.mxu1 }
 0x478   :  { %v5252_v62 = vpop.f32.mrf.mxu0  ;;  %v10018_v39 = vadd.f32 %v5250_v61, %v4962_v20  ;;  %v4157_v61 = vsel %vm417_vm0, %v4152_v19, %v4156_v33 }
 0x479   :  { %v4964_v0 = vpop.f32.mrf.mxu1  ;;  %v11113_v62 = vld [vmem:[#allocation8_spill] sm:$0xff] }
 0x47a   :  { %11111 = vst [vmem:[#allocation7_spill] sm:$0xff] %v10018_v39  ;;  %v5253_v50 = vpop.f32.mrf.mxu0  ;;  %v4965_v22 = vadd.f32 %v9699_v23, %v4964_v0  ;;  %v11114_v39 = vld [vmem:[#allocation9_spill] sm:$0xff]  ;;  %v4176_v0 = vrot.slane %v9452_v43, 1 }
 0x47b   :  { %v4966_v2 = vpop.f32.mrf.mxu1 }
 0x47c   :  { %v5255_v15 = vpop.f32.mrf.mxu0  ;;  %v10021_v26 = vadd.f32 %v5253_v50, %v4965_v22  ;;  %v4177_v2 = vrot.slane %v3540_v29, 1 }
 0x47d   :  { %v4969_v12 = vpop.f32.mrf.mxu1  ;;  %5482 = vmatmul.mubr.bf16.gmra.mxu1 %v9417_v37 }
 0x47e   :  { %11112 = vst [vmem:[#allocation69_spill] sm:$0xff] %v10021_v26  ;;  %v5258_v44 = vpop.f32.mrf.mxu0  ;;  %5771 = vmatmul.mubr.bf16.gmra.mxu0 %v11113_v62  ;;  %v4970_v20 = vadd.f32 %v9699_v23, %v4969_v12  ;;  %5489 = vmatprep.mubr.bf16.mxu1 %v11114_v39  ;;  %v10036_v19 = vsel %vm834_vm1, %v4176_v0, %v4177_v2  ;;  %v11120_v2 = vld [vmem:[#allocation23_spill] sm:$0xff] }
 0x47f   :  { %5778 = vmatprep.mubr.bf16.mxu0 %v4157_v61  ;;  %v4971_v30 = vpop.f32.mrf.mxu1 }
 0x480   :  { %v5260_v49 = vpop.f32.mrf.mxu0  ;;  %v10028_v10 = vadd.f32 %v5258_v44, %v4970_v20  ;;  %v11117_v20 = vld [vmem:[#allocation24_spill] sm:$0xff] }
 0x481   :  { %v4972_v15 = vpop.f32.mrf.mxu1 }
 0x482   :  { %11115 = vst [vmem:[#allocation8_spill] sm:$0xff] %v10028_v10  ;;  %v5261_v42 = vpop.f32.mrf.mxu0  ;;  %v4973_v37 = vadd.f32 %v9699_v23, %v4972_v15 }
 0x483   :  { %v4974_v50 = vpop.f32.mrf.mxu1 }
 0x484   :  { %v5263_v22 = vpop.f32.mrf.mxu0  ;;  %v10032_v62 = vadd.f32 %v5261_v42, %v4973_v37 }
 0x485   :  { %v4977_v33 = vpop.f32.mrf.mxu1  ;;  %5490 = vmatmul.mubr.bf16.gmra.mxu1 %v9447_v21 }
 0x486   :  { %11116 = vst [vmem:[#allocation9_spill] sm:$0xff] %v10032_v62  ;;  %v5266_v12 = vpop.f32.mrf.mxu0  ;;  %5779 = vmatmul.mubr.bf16.gmra.mxu0 %v9452_v43  ;;  %v4978_v44 = vadd.f32 %v9699_v23, %v4977_v33  ;;  %5497 = vmatprep.mubr.bf16.mxu1 %v10036_v19  ;;  %v11138_v62 = vld [vmem:[#allocation12_spill] sm:$0xff] }
 0x487   :  { %5786 = vmatprep.mubr.bf16.mxu0 %v11117_v20  ;;  %v4979_v30 = vpop.f32.mrf.mxu1 }
 0x488   :  { %v5268_v49 = vpop.f32.mrf.mxu0  ;;  %v10042_v29 = vadd.f32 %v5266_v12, %v4978_v44 }
 0x489   :  { %v4980_v15 = vpop.f32.mrf.mxu1 }
 0x48a   :  { %11118 = vst [vmem:[#allocation24_spill] sm:$0xff] %v10042_v29  ;;  %v5269_v42 = vpop.f32.mrf.mxu0  ;;  %v4981_v21 = vadd.f32 %v9699_v23, %v4980_v15 }
 0x48b   :  { %v4982_v37 = vpop.f32.mrf.mxu1 }
 0x48c   :  { %v5271_v50 = vpop.f32.mrf.mxu0  ;;  %v10045_v0 = vadd.f32 %v5269_v42, %v4981_v21 }
 0x48d   :  { %v4985_v22 = vpop.f32.mrf.mxu1  ;;  %5498 = vmatmul.mubr.bf16.gmra.mxu1 %v4157_v61 }
 0x48e   :  { %11119 = vst [vmem:[#allocation70_spill] sm:$0xff] %v10045_v0  ;;  %v5274_v43 = vpop.f32.mrf.mxu0  ;;  %5787 = vmatmul.mubr.bf16.gmra.mxu0 %v11120_v2  ;;  %v4986_v33 = vadd.f32 %v9699_v23, %v4985_v22  ;;  %5505 = vmatprep.mubr.bf16.mxu1 %v9519_v8  ;;  %v11123_v0 = vld [vmem:[#allocation10_spill] sm:$0xff] }
 0x48f   :  { %5794 = vmatprep.mubr.bf16.mxu0 %v9524_v52  ;;  %v4987_v12 = vpop.f32.mrf.mxu1 }
 0x490   :  { %v5276_v44 = vpop.f32.mrf.mxu0  ;;  %v10051_v30 = vadd.f32 %v5274_v43, %v4986_v33  ;;  %v11124_v12 = vld [vmem:[#allocation14_spill] sm:$0xff] }
 0x491   :  { %v4988_v49 = vpop.f32.mrf.mxu1  ;;  %v11125_v43 = vld [vmem:[#allocation18_spill] sm:$0xff] }
 0x492   :  { %11121 = vst [vmem:[#allocation23_spill] sm:$0xff] %v10051_v30  ;;  %v5277_v15 = vpop.f32.mrf.mxu0  ;;  %v4989_v42 = vadd.f32 %v9699_v23, %v4988_v49 }
 0x493   :  { %v4990_v21 = vpop.f32.mrf.mxu1 }
 0x494   :  { %v5279_v37 = vpop.f32.mrf.mxu0  ;;  %v10054_v61 = vadd.f32 %v5277_v15, %v4989_v42 }
 0x495   :  { %v4993_v50 = vpop.f32.mrf.mxu1  ;;  %5506 = vmatmul.mubr.bf16.gmra.mxu1 %v11123_v0 }
 0x496   :  { %11122 = vst [vmem:[#allocation71_spill] sm:$0xff] %v10054_v61  ;;  %v5282_v22 = vpop.f32.mrf.mxu0  ;;  %5795 = vmatmul.mubr.bf16.gmra.mxu0 %v9482_v17  ;;  %v4994_v8 = vadd.f32 %v9699_v23, %v4993_v50  ;;  %5513 = vmatprep.mubr.bf16.mxu1 %v11124_v12  ;;  %v11128_v50 = vld [vmem:[#allocation11_spill] sm:$0xff] }
 0x497   :  { %5802 = vmatprep.mubr.bf16.mxu0 %v11125_v43  ;;  %v4995_v33 = vpop.f32.mrf.mxu1 }
 0x498   :  { %v5284_v44 = vpop.f32.mrf.mxu0  ;;  %v10061_v30 = vadd.f32 %v5282_v22, %v4994_v8  ;;  %v11129_v33 = vld [vmem:[#allocation15_spill] sm:$0xff]  ;;  %v11130_v22 = vld [vmem:[#allocation17_spill] sm:$0xff] }
 0x499   :  { %v4996_v49 = vpop.f32.mrf.mxu1 }
 0x49a   :  { %11126 = vst [vmem:[#allocation10_spill] sm:$0xff] %v10061_v30  ;;  %v5285_v21 = vpop.f32.mrf.mxu0  ;;  %v4997_v15 = vadd.f32 %v9699_v23, %v4996_v49 }
 0x49b   :  { %v4998_v42 = vpop.f32.mrf.mxu1 }
 0x49c   :  { %v5287_v37 = vpop.f32.mrf.mxu0  ;;  %v10064_v0 = vadd.f32 %v5285_v21, %v4997_v15 }
 0x49d   :  { %v5001_v61 = vpop.f32.mrf.mxu1  ;;  %5514 = vmatmul.mubr.bf16.gmra.mxu1 %v9524_v52 }
 0x49e   :  { %11127 = vst [vmem:[#allocation14_spill] sm:$0xff] %v10064_v0  ;;  %v5290_v17 = vpop.f32.mrf.mxu0  ;;  %5803 = vmatmul.mubr.bf16.gmra.mxu0 %v11128_v50  ;;  %v5002_v29 = vadd.f32 %v9699_v23, %v5001_v61  ;;  %5521 = vmatprep.mubr.bf16.mxu1 %v11129_v33  ;;  %v11133_v50 = vld [vmem:[#allocation13_spill] sm:$0xff] }
 0x49f   :  { %5810 = vmatprep.mubr.bf16.mxu0 %v11130_v22  ;;  %v5003_v8 = vpop.f32.mrf.mxu1 }
 0x4a0   :  { %v5292_v44 = vpop.f32.mrf.mxu0  ;;  %v10071_v30 = vadd.f32 %v5290_v17, %v5002_v29  ;;  %v10081_v8 = vld [vmem:[%s10667_s4] ss:$0 sm:$0xff]  ;;  %v11134_v17 = vld [vmem:[#allocation19_spill] sm:$0xff] }
 0x4a1   :  { %v5004_v49 = vpop.f32.mrf.mxu1 }
 0x4a2   :  { %11131 = vst [vmem:[#allocation18_spill] sm:$0xff] %v10071_v30  ;;  %v5293_v42 = vpop.f32.mrf.mxu0  ;;  %v5005_v21 = vadd.f32 %v9699_v23, %v5004_v49  ;;  %v11135_v23 = vld [vmem:[#allocation16_spill] sm:$0xff] }
 0x4a3   :  { %v5006_v15 = vpop.f32.mrf.mxu1 }
 0x4a4   :  { %v5295_v37 = vpop.f32.mrf.mxu0  ;;  %v10074_v52 = vadd.f32 %v5293_v42, %v5005_v21 }
 0x4a5   :  { %v5009_v0 = vpop.f32.mrf.mxu1  ;;  %5522 = vmatmul.mubr.bf16.gmra.mxu1 %v11125_v43 }
 0x4a6   :  { %11132 = vst [vmem:[#allocation11_spill] sm:$0xff] %v10074_v52  ;;  %v5298_v61 = vpop.f32.mrf.mxu0  ;;  %5811 = vmatmul.mubr.bf16.gmra.mxu0 %v11133_v50  ;;  %v5010_v29 = vadd.f32 %v10081_v8, %v5009_v0  ;;  %5529 = vmatprep.mubr.bf16.mxu1 %v11134_v17 }
 0x4a7   :  { %5818 = vmatprep.mubr.bf16.mxu0 %v11135_v23  ;;  %v5011_v44 = vpop.f32.mrf.mxu1 }
 0x4a8   :  { %v5300_v49 = vpop.f32.mrf.mxu0  ;;  %v10086_v42 = vadd.f32 %v5298_v61, %v5010_v29  ;;  %v11139_v44 = vld [vmem:[#allocation20_spill] sm:$0xff]  ;;  %v11140_v61 = vld [vmem:[#allocation26_spill] sm:$0xff] }
 0x4a9   :  { %v5012_v21 = vpop.f32.mrf.mxu1 }
 0x4aa   :  { %11136 = vst [vmem:[#allocation17_spill] sm:$0xff] %v10086_v42  ;;  %v5301_v43 = vpop.f32.mrf.mxu0  ;;  %v5013_v15 = vadd.f32 %v10081_v8, %v5012_v21 }
 0x4ab   :  { %v5014_v37 = vpop.f32.mrf.mxu1 }
 0x4ac   :  { %v5303_v50 = vpop.f32.mrf.mxu0  ;;  %v10089_v52 = vadd.f32 %v5301_v43, %v5013_v15 }
 0x4ad   :  { %v5017_v30 = vpop.f32.mrf.mxu1  ;;  %5530 = vmatmul.mubr.bf16.gmra.mxu1 %v11130_v22 }
 0x4ae   :  { %11137 = vst [vmem:[#allocation13_spill] sm:$0xff] %v10089_v52  ;;  %v5306_v0 = vpop.f32.mrf.mxu0  ;;  %5819 = vmatmul.mubr.bf16.gmra.mxu0 %v11138_v62  ;;  %v5018_v10 = vadd.f32 %v10081_v8, %v5017_v30  ;;  %5537 = vmatprep.mubr.bf16.mxu1 %v11139_v44  ;;  %v11143_v30 = vld [vmem:[#allocation22_spill] sm:$0xff] }
 0x4af   :  { %5826 = vmatprep.mubr.bf16.mxu0 %v11140_v61  ;;  %v5019_v29 = vpop.f32.mrf.mxu1 }
 0x4b0   :  { %v5308_v49 = vpop.f32.mrf.mxu0  ;;  %v10096_v42 = vadd.f32 %v5306_v0, %v5018_v10  ;;  %v11144_v29 = vld [vmem:[#allocation31_spill] sm:$0xff]  ;;  %v11145_v10 = vld [vmem:[#allocation29_spill] sm:$0xff] }
 0x4b1   :  { %v5020_v21 = vpop.f32.mrf.mxu1 }
 0x4b2   :  { %11141 = vst [vmem:[#allocation16_spill] sm:$0xff] %v10096_v42  ;;  %v5309_v37 = vpop.f32.mrf.mxu0  ;;  %v5021_v43 = vadd.f32 %v10081_v8, %v5020_v21 }
 0x4b3   :  { %v5022_v15 = vpop.f32.mrf.mxu1 }
 0x4b4   :  { %v5311_v50 = vpop.f32.mrf.mxu0  ;;  %v10099_v22 = vadd.f32 %v5309_v37, %v5021_v43 }
 0x4b5   :  { %v5025_v52 = vpop.f32.mrf.mxu1  ;;  %5538 = vmatmul.mubr.bf16.gmra.mxu1 %v11135_v23 }
 0x4b6   :  { %11142 = vst [vmem:[#allocation12_spill] sm:$0xff] %v10099_v22  ;;  %v5314_v62 = vpop.f32.mrf.mxu0  ;;  %5827 = vmatmul.mubr.bf16.gmra.mxu0 %v11143_v30  ;;  %v5026_v26 = vadd.f32 %v10081_v8, %v5025_v52  ;;  %5545 = vmatprep.mubr.bf16.mxu1 %v11144_v29  ;;  %v11148_v30 = vld [vmem:[#allocation21_spill] sm:$0xff] }
 0x4b7   :  { %5834 = vmatprep.mubr.bf16.mxu0 %v11145_v10  ;;  %v5027_v0 = vpop.f32.mrf.mxu1 }
 0x4b8   :  { %v5316_v49 = vpop.f32.mrf.mxu0  ;;  %v10106_v42 = vadd.f32 %v5314_v62, %v5026_v26  ;;  %v11149_v0 = vld [vmem:[#allocation2_spill] sm:$0xff]  ;;  %v11150_v26 = vld [vmem:[#allocation33_spill] sm:$0xff] }
 0x4b9   :  { %v5028_v21 = vpop.f32.mrf.mxu1 }
 0x4ba   :  { %11146 = vst [vmem:[#allocation26_spill] sm:$0xff] %v10106_v42  ;;  %v5317_v15 = vpop.f32.mrf.mxu0  ;;  %v5029_v37 = vadd.f32 %v10081_v8, %v5028_v21 }
 0x4bb   :  { %v5030_v43 = vpop.f32.mrf.mxu1 }
 0x4bc   :  { %v5319_v50 = vpop.f32.mrf.mxu0  ;;  %v10109_v23 = vadd.f32 %v5317_v15, %v5029_v37 }
 0x4bd   :  { %v5033_v22 = vpop.f32.mrf.mxu1  ;;  %5546 = vmatmul.mubr.bf16.gmra.mxu1 %v11140_v61 }
 0x4be   :  { %11147 = vst [vmem:[#allocation22_spill] sm:$0xff] %v10109_v23  ;;  %v5322_v52 = vpop.f32.mrf.mxu0  ;;  %5835 = vmatmul.mubr.bf16.gmra.mxu0 %v11148_v30  ;;  %v5034_v29 = vadd.f32 %v10081_v8, %v5033_v22  ;;  %5553 = vmatprep.mubr.bf16.mxu1 %v11149_v0  ;;  %v11153_v30 = vld [vmem:[#allocation27_spill] sm:$0xff] }
 0x4bf   :  { %5842 = vmatprep.mubr.bf16.mxu0 %v11150_v26  ;;  %v5035_v62 = vpop.f32.mrf.mxu1 }
 0x4c0   :  { %v5324_v49 = vpop.f32.mrf.mxu0  ;;  %v10116_v42 = vadd.f32 %v5322_v52, %v5034_v29  ;;  %v11154_v62 = vld [vmem:[#allocation34_spill] sm:$0xff] }
 0x4c1   :  { %v5036_v21 = vpop.f32.mrf.mxu1  ;;  %v11155_v29 = vld [vmem:[#allocation38_spill] sm:$0xff] }
 0x4c2   :  { %11151 = vst [vmem:[#allocation29_spill] sm:$0xff] %v10116_v42  ;;  %v5325_v43 = vpop.f32.mrf.mxu0  ;;  %v5037_v15 = vadd.f32 %v10081_v8, %v5036_v21 }
 0x4c3   :  { %v5038_v37 = vpop.f32.mrf.mxu1 }
 0x4c4   :  { %v5327_v50 = vpop.f32.mrf.mxu0  ;;  %v10119_v61 = vadd.f32 %v5325_v43, %v5037_v15 }
 0x4c5   :  { %v5041_v23 = vpop.f32.mrf.mxu1  ;;  %5554 = vmatmul.mubr.bf16.gmra.mxu1 %v11145_v10 }
 0x4c6   :  { %11152 = vst [vmem:[#allocation21_spill] sm:$0xff] %v10119_v61  ;;  %v5330_v22 = vpop.f32.mrf.mxu0  ;;  %5843 = vmatmul.mubr.bf16.gmra.mxu0 %v11153_v30  ;;  %v5042_v0 = vadd.f32 %v10081_v8, %v5041_v23  ;;  %5561 = vmatprep.mubr.bf16.mxu1 %v11154_v62  ;;  %v11158_v30 = vld [vmem:[#allocation35_spill] sm:$0xff] }
 0x4c7   :  { %5850 = vmatprep.mubr.bf16.mxu0 %v11155_v29  ;;  %v5043_v52 = vpop.f32.mrf.mxu1 }
 0x4c8   :  { %v5332_v49 = vpop.f32.mrf.mxu0  ;;  %v10126_v42 = vadd.f32 %v5330_v22, %v5042_v0  ;;  %v11159_v52 = vld [vmem:[#allocation37_spill] sm:$0xff]  ;;  %v11160_v0 = vld [vmem:[#allocation42_spill] sm:$0xff] }
 0x4c9   :  { %v5044_v21 = vpop.f32.mrf.mxu1 }
 0x4ca   :  { %11156 = vst [vmem:[#allocation33_spill] sm:$0xff] %v10126_v42  ;;  %v5333_v37 = vpop.f32.mrf.mxu0  ;;  %v5045_v43 = vadd.f32 %v10081_v8, %v5044_v21  ;;  %v11161_v42 = vld [vmem:[#allocation25_spill] sm:$0xff] }
 0x4cb   :  { %v5046_v15 = vpop.f32.mrf.mxu1  ;;  %v4802_v21 = vadd.f32 %v10081_v8, %v11161_v42 }
 0x4cc   :  { %v5335_v50 = vpop.f32.mrf.mxu0  ;;  %v10129_v10 = vadd.f32 %v5333_v37, %v5045_v43 }
 0x4cd   :  { %v5049_v61 = vpop.f32.mrf.mxu1  ;;  %5562 = vmatmul.mubr.bf16.gmra.mxu1 %v11150_v26 }
 0x4ce   :  { %11157 = vst [vmem:[#allocation27_spill] sm:$0xff] %v10129_v10  ;;  %v5338_v23 = vpop.f32.mrf.mxu0  ;;  %5851 = vmatmul.mubr.bf16.gmra.mxu0 %v11158_v30  ;;  %v5050_v62 = vadd.f32 %v10081_v8, %v5049_v61  ;;  %5569 = vmatprep.mubr.bf16.mxu1 %v11159_v52  ;;  %v11163_v30 = vld [vmem:[#allocation36_spill] sm:$0xff] }
 0x4cf   :  { %5858 = vmatprep.mubr.bf16.mxu0 %v11160_v0  ;;  %v5051_v22 = vpop.f32.mrf.mxu1  ;;  %v5091_v44 = vadd.f32 %v11163_v30, %v4802_v21 }
 0x4d0   :  { %v5340_v49 = vpop.f32.mrf.mxu0  ;;  %v10138_v15 = vadd.f32 %v5338_v23, %v5050_v62  ;;  %v11166_v23 = vld [vmem:[#allocation41_spill] sm:$0xff] }
 0x4d1   :  { %v5052_v37 = vpop.f32.mrf.mxu1  ;;  %v11165_v49 = vld [vmem:[#allocation54_spill] sm:$0xff] }
 0x4d2   :  { %11162 = vst [vmem:[#allocation38_spill] sm:$0xff] %v10138_v15  ;;  %v5341_v43 = vpop.f32.mrf.mxu0  ;;  %v5053_v26 = vadd.f32 %v10081_v8, %v5052_v37  ;;  %v4805_v42 = vadd.f32 %v10081_v8, %v11165_v49  ;;  %v11167_v15 = vld [vmem:[#allocation46_spill] sm:$0xff]  ;;  %v11170_v49 = vld [vmem:[#allocation45_spill] sm:$0xff] }
 0x4d3   :  { %v5054_v50 = vpop.f32.mrf.mxu1 }
 0x4d4   :  { %v5343_v10 = vpop.f32.mrf.mxu0  ;;  %v10142_v61 = vadd.f32 %v5341_v43, %v5053_v26  ;;  %v11168_v50 = vld [vmem:[#allocation39_spill] sm:$0xff] }
 0x4d5   :  { %v5379_v52 = vpop.f32.mrf.mxu1  ;;  %5570 = vmatmul.mubr.bf16.gmra.mxu1 %v11155_v29  ;;  %v5094_v21 = vadd.f32 %v11168_v50, %v4805_v42 }
 0x4d6   :  { %11164 = vst [vmem:[#allocation35_spill] sm:$0xff] %v10142_v61  ;;  %v5668_v22 = vpop.f32.mrf.mxu0  ;;  %5859 = vmatmul.mubr.bf16.gmra.mxu0 %v9657_v58  ;;  %v5380_v62 = vadd.f32 %v5379_v52, %v5091_v44  ;;  %5577 = vmatprep.mubr.bf16.mxu1 %v11166_v23  ;;  %v11169_v44 = vld [vmem:[#allocation43_spill] sm:$0xff] }
 0x4d7   :  { %5866 = vmatprep.mubr.bf16.mxu0 %v11167_v15  ;;  %v5381_v37 = vpop.f32.mrf.mxu1 }
 0x4d8   :  { %v5670_v10 = vpop.f32.mrf.mxu0  ;;  %v10151_v43 = vadd.f32 %v5668_v22, %v5380_v62  ;;  %v11171_v37 = vld [vmem:[#allocation40_spill] sm:$0xff] }
 0x4d9   :  { %v5382_v26 = vpop.f32.mrf.mxu1 }
 0x4da   :  { %v5671_v30 = vpop.f32.mrf.mxu0  ;;  %v5383_v29 = vadd.f32 %v5382_v26, %v5094_v21 }
 0x4db   :  { %v5384_v61 = vpop.f32.mrf.mxu1 }
 0x4dc   :  { %v5673_v17 = vpop.f32.mrf.mxu0  ;;  %v10153_v58 = vadd.f32 %v5671_v30, %v5383_v29  ;;  %v11173_v29 = vld [vmem:[#allocation48_spill] sm:$0xff] }
 0x4dd   :  { %v5387_v33 = vpop.f32.mrf.mxu1  ;;  %5578 = vmatmul.mubr.bf16.gmra.mxu1 %v11160_v0 }
 0x4de   :  { %v5676_v8 = vpop.f32.mrf.mxu0  ;;  %5867 = vmatmul.mubr.bf16.gmra.mxu0 %v9680_v27  ;;  %v5388_v52 = vadd.f32 %v5387_v33, %v11169_v44  ;;  %5585 = vmatprep.mubr.bf16.mxu1 %v9756_v28  ;;  %v11172_v33 = vld [vmem:[#allocation44_spill] sm:$0xff] }
 0x4df   :  { %5874 = vmatprep.mubr.bf16.mxu0 %v11170_v49  ;;  %v5389_v22 = vpop.f32.mrf.mxu1 }
 0x4e0   :  { %v5678_v42 = vpop.f32.mrf.mxu0  ;;  %v10160_v62 = vadd.f32 %v5676_v8, %v5388_v52  ;;  %v11174_v8 = vld [vmem:[#allocation49_spill] sm:$0xff] }
 0x4e1   :  { %v5390_v61 = vpop.f32.mrf.mxu1 }
 0x4e2   :  { %v5679_v17 = vpop.f32.mrf.mxu0  ;;  %v5391_v10 = vadd.f32 %v5390_v61, %v11171_v37 }
 0x4e3   :  { %v5392_v50 = vpop.f32.mrf.mxu1 }
 0x4e4   :  { %v5681_v21 = vpop.f32.mrf.mxu0  ;;  %v10163_v0 = vadd.f32 %v5679_v17, %v5391_v10  ;;  %v11175_v17 = vld [vmem:[#allocation47_spill] sm:$0xff] }
 0x4e5   :  { %v5395_v26 = vpop.f32.mrf.mxu1  ;;  %5586 = vmatmul.mubr.bf16.gmra.mxu1 %v11167_v15 }
 0x4e6   :  { %v5684_v27 = vpop.f32.mrf.mxu0  ;;  %5875 = vmatmul.mubr.bf16.gmra.mxu0 %v9711_v4  ;;  %v5396_v30 = vadd.f32 %v5395_v26, %v11172_v33  ;;  %5593 = vmatprep.mubr.bf16.mxu1 %v11173_v29  ;;  %v11177_v26 = vld [vmem:[#allocation50_spill] sm:$0xff] }
 0x4e7   :  { %5882 = vmatprep.mubr.bf16.mxu0 %v11174_v8  ;;  %v5397_v44 = vpop.f32.mrf.mxu1 }
 0x4e8   :  { %v5686_v52 = vpop.f32.mrf.mxu0  ;;  %v10170_v22 = vadd.f32 %v5684_v27, %v5396_v30  ;;  %v11178_v27 = vld [vmem:[#allocation64_spill] sm:$0xff] }
 0x4e9   :  { %v5398_v42 = vpop.f32.mrf.mxu1 }
 0x4ea   :  { %v5687_v61 = vpop.f32.mrf.mxu0  ;;  %v5399_v37 = vadd.f32 %v5398_v42, %v11175_v17 }
 0x4eb   :  { %v5400_v10 = vpop.f32.mrf.mxu1 }
 0x4ec   :  { %v5689_v50 = vpop.f32.mrf.mxu0  ;;  %v10173_v15 = vadd.f32 %v5687_v61, %v5399_v37  ;;  %v4161_v61 = vshll.u32 %v9842_v48, 16  ;;  %v11179_v37 = vld [vmem:[#allocation28_spill] sm:$0xff] }
 0x4ed   :  { %v5403_v21 = vpop.f32.mrf.mxu1  ;;  %5594 = vmatmul.mubr.bf16.gmra.mxu1 %v11170_v49 }
 0x4ee   :  { %11176 = vst [vmem:[#allocation42_spill] sm:$0xff] %v10173_v15  ;;  %v5692_v4 = vpop.f32.mrf.mxu0  ;;  %5883 = vmatmul.mubr.bf16.gmra.mxu0 %v9741_v54  ;;  %v5404_v33 = vadd.f32 %v5403_v21, %v11177_v26  ;;  %5601 = vmatprep.mubr.bf16.mxu1 %v9809_v57  ;;  %v3556_v54 = vsel %vm8675_vm4, %v9813_v14, 0 }
 0x4ef   :  { %5890 = vmatprep.mubr.bf16.mxu0 %v11178_v27  ;;  %v5405_v30 = vpop.f32.mrf.mxu1  ;;  %v4166_v14 = vshll.u32 %v3556_v54, 16 }
 0x4f0   :  { %v5694_v44 = vpop.f32.mrf.mxu0  ;;  %v10180_v52 = vadd.f32 %v5692_v4, %v5404_v33  ;;  %v4163_v4 = vrot.slane %v4161_v61, 1  ;;  %v11181_v33 = vld [vmem:[#allocation62_spill] sm:$0xff] }
 0x4f1   :  { %v5406_v42 = vpop.f32.mrf.mxu1 }
 0x4f2   :  { %v5695_v17 = vpop.f32.mrf.mxu0  ;;  %v5407_v10 = vadd.f32 %v5406_v42, %v11179_v37 }
 0x4f3   :  { %v5408_v49 = vpop.f32.mrf.mxu1 }
 0x4f4   :  { %v5697_v50 = vpop.f32.mrf.mxu0  ;;  %v10187_v21 = vadd.f32 %v5695_v17, %v5407_v10 }
 0x4f5   :  { %v5411_v26 = vpop.f32.mrf.mxu1  ;;  %5602 = vmatmul.mubr.bf16.gmra.mxu1 %v11174_v8  ;;  %v4164_v8 = vor.u32 %v4163_v4, %v4159_v53  ;;  %v11182_v50 = vld [vmem:[#allocation63_spill] sm:$0xff] }
 0x4f6   :  { %11180 = vst [vmem:[#allocation25_spill] sm:$0xff] %v10187_v21  ;;  %v5700_v30 = vpop.f32.mrf.mxu0  ;;  %5891 = vmatmul.mubr.bf16.gmra.mxu0 %v9770_v18  ;;  %v5412_v44 = vadd.f32 %v5411_v26, %v11181_v33  ;;  %5609 = vmatprep.mubr.bf16.mxu1 %v9833_v51  ;;  %v4168_v21 = vrot.slane %v4166_v14, 1 }
 0x4f7   :  { %5898 = vmatprep.mubr.bf16.mxu0 %v9837_v59  ;;  %v5413_v42 = vpop.f32.mrf.mxu1 }
 0x4f8   :  { %v5702_v37 = vpop.f32.mrf.mxu0  ;;  %v10195_v17 = vadd.f32 %v5700_v30, %v5412_v44 }
 0x4f9   :  { %v5414_v10 = vpop.f32.mrf.mxu1  ;;  %v4169_v37 = vsel %vm417_vm0, %v4164_v8, %v4168_v21 }
 0x4fa   :  { %v5703_v49 = vpop.f32.mrf.mxu0  ;;  %v5415_v15 = vadd.f32 %v5414_v10, %v11182_v50  ;;  %v4179_v10 = vrot.slane %v9842_v48, 1 }
 0x4fb   :  { %v5416_v18 = vpop.f32.mrf.mxu1 }
 0x4fc   :  { %v5705_v61 = vpop.f32.mrf.mxu0  ;;  %v10198_v26 = vadd.f32 %v5703_v49, %v5415_v15 }
 0x4fd   :  { %v5419_v33 = vpop.f32.mrf.mxu1  ;;  %5610 = vmatmul.mubr.bf16.gmra.mxu1 %v11178_v27 }
 0x4fe   :  { %v5708_v42 = vpop.f32.mrf.mxu0  ;;  %5899 = vmatmul.mubr.bf16.gmra.mxu0 %v9797_v63  ;;  %v5420_v30 = vadd.f32 %v5419_v33, %v9825_v36  ;;  %5617 = vmatprep.mubr.bf16.mxu1 %v9854_v46  ;;  %v4180_v63 = vrot.slane %v3556_v54, 1 }
 0x4ff   :  { %5906 = vmatprep.mubr.bf16.mxu0 %v4169_v37  ;;  %v5421_v4 = vpop.f32.mrf.mxu1 }
 0x500   :  { %v5710_v44 = vpop.f32.mrf.mxu0  ;;  %v10205_v53 = vadd.f32 %v5708_v42, %v5420_v30  ;;  %v10213_v36 = vsel %vm834_vm1, %v4179_v10, %v4180_v63 }
 0x501   :  { %v5422_v14 = vpop.f32.mrf.mxu1 }
 0x502   :  { %v5711_v15 = vpop.f32.mrf.mxu0  ;;  %v5423_v27 = vadd.f32 %v5422_v14, %v9830_v7 }
 0x503   :  { %v5424_v49 = vpop.f32.mrf.mxu1 }
 0x504   :  { %v5713_v50 = vpop.f32.mrf.mxu0  ;;  %v10209_v18 = vadd.f32 %v5711_v15, %v5423_v27 }
 0x505   :  { %v5427_v21 = vpop.f32.mrf.mxu1  ;;  %5618 = vmatmul.mubr.bf16.gmra.mxu1 %v9837_v59 }
 0x506   :  { %v5716_v8 = vpop.f32.mrf.mxu0  ;;  %5907 = vmatmul.mubr.bf16.gmra.mxu0 %v9842_v48  ;;  %v5428_v61 = vadd.f32 %v5427_v21, %v9847_v40  ;;  %5625 = vmatprep.mubr.bf16.mxu1 %v10213_v36 }
 0x507   :  { %5914 = vmatprep.mubr.bf16.mxu0 %v11117_v20  ;;  %v5429_v7 = vpop.f32.mrf.mxu1 }
 0x508   :  { %v5718_v33 = vpop.f32.mrf.mxu0  ;;  %v10219_v54 = vadd.f32 %v5716_v8, %v5428_v61 }
 0x509   :  { %v5430_v42 = vpop.f32.mrf.mxu1 }
 0x50a   :  { %v5719_v30 = vpop.f32.mrf.mxu0  ;;  %v5431_v59 = vadd.f32 %v5430_v42, %v9851_v45 }
 0x50b   :  { %v5432_v4 = vpop.f32.mrf.mxu1 }
 0x50c   :  { %v5721_v44 = vpop.f32.mrf.mxu0  ;;  %v10222_v14 = vadd.f32 %v5719_v30, %v5431_v59 }
 0x50d   :  { %v5435_v15 = vpop.f32.mrf.mxu1  ;;  %5626 = vmatmul.mubr.bf16.gmra.mxu1 %v4169_v37 }
 0x50e   :  { %v5724_v48 = vpop.f32.mrf.mxu0  ;;  %5915 = vmatmul.mubr.bf16.gmra.mxu0 %v11120_v2  ;;  %v5436_v40 = vadd.f32 %v5435_v15, %v9861_v41  ;;  %6738 = vmatprep.mubr.bf16.mxu1 %v8952_v55 }
 0x50f   :  { %v5437_v20 = vpop.f32.mrf.mxu1 }
 0x510   :  { %v5726_v10 = vpop.f32.mrf.mxu0  ;;  %v10227_v27 = vadd.f32 %v5724_v48, %v5436_v40 }
 0x511   :  { %v5438_v49 = vpop.f32.mrf.mxu1 }
 0x512   :  { %v5727_v50 = vpop.f32.mrf.mxu0  ;;  %v5439_v45 = vadd.f32 %v5438_v49, %v9867_v60 }
 0x513   :  { %v5440_v63 = vpop.f32.mrf.mxu1 }
 0x514   :  { %v5729_v21 = vpop.f32.mrf.mxu0  ;;  %v10230_v8 = vadd.f32 %v5727_v50, %v5439_v45 }
 0x515   :  { %v5443_v37 = vpop.f32.mrf.mxu1  ;;  %6739 = vmatmul.mubr.bf16.vlgmr.msra.gmra.mxu1 %v8988_v34 }
 0x516   :  { %v5732_v2 = vpop.f32.mrf.mxu0  ;;  %v5444_v41 = vadd.f32 %v5443_v37, %v9878_v9  ;;  %6742 = vmatprep.mubr.bf16.mxu1 %v9029_v3 }
 0x517   :  { %v5445_v55 = vpop.f32.mrf.mxu1 }
 0x518   :  { %v5734_v61 = vpop.f32.mrf.mxu0  ;;  %v10235_v7 = vadd.f32 %v5732_v2, %v5444_v41 }
 0x519   :  { %v5446_v33 = vpop.f32.mrf.mxu1 }
 0x51a   :  { %v5735_v42 = vpop.f32.mrf.mxu0  ;;  %v5447_v60 = vadd.f32 %v5446_v33, %v9881_v5 }
 0x51b   :  { %v5448_v30 = vpop.f32.mrf.mxu1 }
 0x51c   :  { %v5737_v59 = vpop.f32.mrf.mxu0  ;;  %v10238_v4 = vadd.f32 %v5735_v42, %v5447_v60  ;;  %v11183_v42 = vld [vmem:[#allocation3_spill] sm:$0xff] }
 0x51d   :  { %v5451_v44 = vpop.f32.mrf.mxu1  ;;  %6743 = vmatmul.mubr.bf16.gmra.mxu1 %v9068_v25 }
 0x51e   :  { %v5740_v34 = vpop.f32.mrf.mxu0  ;;  %v5452_v9 = vadd.f32 %v5451_v44, %v9891_v35  ;;  %6746 = vmatprep.mubr.bf16.mxu1 %v9111_v38 }
 0x51f   :  { %v5453_v3 = vpop.f32.mrf.mxu1 }
 0x520   :  { %v5742_v15 = vpop.f32.mrf.mxu0  ;;  %v10243_v48 = vadd.f32 %v5740_v34, %v5452_v9  ;;  %v11184_v34 = vld [vmem:[#allocation65_spill] sm:$0xff] }
 0x521   :  { %v5454_v40 = vpop.f32.mrf.mxu1 }
 0x522   :  { %v5743_v20 = vpop.f32.mrf.mxu0  ;;  %v5455_v5 = vadd.f32 %v5454_v40, %v9897_v24 }
 0x523   :  { %v5456_v10 = vpop.f32.mrf.mxu1 }
 0x524   :  { %v5745_v49 = vpop.f32.mrf.mxu0  ;;  %v10246_v50 = vadd.f32 %v5743_v20, %v5455_v5  ;;  %v11185_v20 = vld [vmem:[#allocation4_spill] sm:$0xff]  ;;  %v11186_v5 = vld [vmem:[#allocation66_spill] sm:$0xff] }
 0x525   :  { %v5459_v45 = vpop.f32.mrf.mxu1  ;;  %6747 = vmatmul.mubr.bf16.gmra.mxu1 %v9150_v13 }
 0x526   :  { %v5748_v25 = vpop.f32.mrf.mxu0  ;;  %v5460_v35 = vadd.f32 %v5459_v45, %v9904_v16  ;;  %6750 = vmatprep.mubr.bf16.mxu1 %v11085_v32 }
 0x527   :  { %v5461_v38 = vpop.f32.mrf.mxu1 }
 0x528   :  { %v5750_v63 = vpop.f32.mrf.mxu0  ;;  %v10251_v21 = vadd.f32 %v5748_v25, %v5460_v35  ;;  %v11187_v38 = vld [vmem:[#allocation67_spill] sm:$0xff] }
 0x529   :  { %v5462_v37 = vpop.f32.mrf.mxu1 }
 0x52a   :  { %v5751_v2 = vpop.f32.mrf.mxu0  ;;  %v5463_v24 = vadd.f32 %v5462_v37, %v9907_v1 }
 0x52b   :  { %v5464_v41 = vpop.f32.mrf.mxu1 }
 0x52c   :  { %v5753_v55 = vpop.f32.mrf.mxu0  ;;  %v10254_v61 = vadd.f32 %v5751_v2, %v5463_v24 }
 0x52d   :  { %v5467_v33 = vpop.f32.mrf.mxu1  ;;  %6751 = vmatmul.mubr.bf16.gmra.mxu1 %v11090_v47 }
 0x52e   :  { %v5756_v13 = vpop.f32.mrf.mxu0  ;;  %v5468_v16 = vadd.f32 %v5467_v33, %v9914_v6  ;;  %6754 = vmatprep.mubr.bf16.mxu1 %v11183_v42  ;;  %v11188_v33 = vld [vmem:[#allocation32_spill] sm:$0xff] }
 0x52f   :  { %v5469_v32 = vpop.f32.mrf.mxu1 }
 0x530   :  { %v5758_v60 = vpop.f32.mrf.mxu0  ;;  %v10259_v30 = vadd.f32 %v5756_v13, %v5468_v16 }
 0x531   :  { %v5470_v59 = vpop.f32.mrf.mxu1 }
 0x532   :  { %v5759_v44 = vpop.f32.mrf.mxu0  ;;  %v5471_v1 = vadd.f32 %v5470_v59, %v11184_v34  ;;  %v11189_v59 = vld [vmem:[#allocation68_spill] sm:$0xff] }
 0x533   :  { %v5472_v9 = vpop.f32.mrf.mxu1 }
 0x534   :  { %v5761_v3 = vpop.f32.mrf.mxu0  ;;  %v10262_v15 = vadd.f32 %v5759_v44, %v5471_v1 }
 0x535   :  { %v5475_v40 = vpop.f32.mrf.mxu1  ;;  %6755 = vmatmul.mubr.bf16.gmra.mxu1 %v11185_v20 }
 0x536   :  { %v5764_v47 = vpop.f32.mrf.mxu0  ;;  %v5476_v6 = vadd.f32 %v5475_v40, %v11186_v5  ;;  %6758 = vmatprep.mubr.bf16.mxu1 %v11105_v56  ;;  %v11190_v40 = vld [vmem:[#allocation30_spill] sm:$0xff] }
 0x537   :  { %v5477_v10 = vpop.f32.mrf.mxu1 }
 0x538   :  { %v5766_v49 = vpop.f32.mrf.mxu0  ;;  %v10267_v45 = vadd.f32 %v5764_v47, %v5476_v6 }
 0x539   :  { %v5478_v25 = vpop.f32.mrf.mxu1  ;;  %v11191_v49 = vld [vmem:[#allocation55_spill] sm:$0xff] }
 0x53a   :  { %v5767_v35 = vpop.f32.mrf.mxu0  ;;  %v5479_v63 = vadd.f32 %v5478_v25, %v11187_v38 }
 0x53b   :  { %v5480_v37 = vpop.f32.mrf.mxu1 }
 0x53c   :  { %v5769_v2 = vpop.f32.mrf.mxu0  ;;  %v10270_v24 = vadd.f32 %v5767_v35, %v5479_v63 }
 0x53d   :  { %v5483_v41 = vpop.f32.mrf.mxu1  ;;  %6759 = vmatmul.mubr.bf16.gmra.mxu1 %v9403_v11  ;;  %v11192_v2 = vld [vmem:[#allocation51_spill] sm:$0xff] }
 0x53e   :  { %v5772_v55 = vpop.f32.mrf.mxu0  ;;  %v5484_v13 = vadd.f32 %v5483_v41, %v11188_v33  ;;  %6762 = vmatprep.mubr.bf16.mxu1 %v9439_v31  ;;  %v11193_v41 = vld [vmem:[#allocation56_spill] sm:$0xff] }
 0x53f   :  { %v5485_v56 = vpop.f32.mrf.mxu1 }
 0x540   :  { %v5774_v16 = vpop.f32.mrf.mxu0  ;;  %v10275_v42 = vadd.f32 %v5772_v55, %v5484_v13 }
 0x541   :  { %v5486_v32 = vpop.f32.mrf.mxu1 }
 0x542   :  { %v5775_v60 = vpop.f32.mrf.mxu0  ;;  %v5487_v44 = vadd.f32 %v5486_v32, %v11189_v59  ;;  %v11194_v32 = vld [vmem:[#allocation52_spill] sm:$0xff] }
 0x543   :  { %v5488_v34 = vpop.f32.mrf.mxu1 }
 0x544   :  { %v5777_v1 = vpop.f32.mrf.mxu0  ;;  %v10278_v9 = vadd.f32 %v5775_v60, %v5487_v44 }
 0x545   :  { %v5491_v3 = vpop.f32.mrf.mxu1  ;;  %6763 = vmatmul.mubr.bf16.gmra.mxu1 %v11114_v39 }
 0x546   :  { %v5780_v11 = vpop.f32.mrf.mxu0  ;;  %v5492_v20 = vadd.f32 %v5491_v3, %v11190_v40  ;;  %6766 = vmatprep.mubr.bf16.mxu1 %v10036_v19  ;;  %v11195_v3 = vld [vmem:[#allocation15_spill] sm:$0xff]  ;;  %v11196_v40 = vld [vmem:[#allocation58_spill] sm:$0xff] }
 0x547   :  { %v5493_v31 = vpop.f32.mrf.mxu1 }
 0x548   :  { %v5782_v47 = vpop.f32.mrf.mxu0  ;;  %v10283_v5 = vadd.f32 %v5780_v11, %v5492_v20  ;;  %v11197_v31 = vld [vmem:[#allocation19_spill] sm:$0xff] }
 0x549   :  { %v5494_v6 = vpop.f32.mrf.mxu1 }
 0x54a   :  { %v5783_v10 = vpop.f32.mrf.mxu0  ;;  %v5495_v25 = vadd.f32 %v5494_v6, %v11191_v49 }
 0x54b   :  { %v5496_v35 = vpop.f32.mrf.mxu1 }
 0x54c   :  { %v5785_v38 = vpop.f32.mrf.mxu0  ;;  %v10286_v63 = vadd.f32 %v5783_v10, %v5495_v25  ;;  %v11198_v25 = vld [vmem:[#allocation59_spill] sm:$0xff] }
 0x54d   :  { %v5499_v37 = vpop.f32.mrf.mxu1  ;;  %6767 = vmatmul.mubr.bf16.gmra.mxu1 %v11192_v2 }
 0x54e   :  { %v5788_v39 = vpop.f32.mrf.mxu0  ;;  %v5500_v55 = vadd.f32 %v5499_v37, %v11193_v41  ;;  %6770 = vmatprep.mubr.bf16.mxu1 %v11124_v12 }
 0x54f   :  { %v5501_v19 = vpop.f32.mrf.mxu1 }
 0x550   :  { %v5790_v33 = vpop.f32.mrf.mxu0  ;;  %v10291_v13 = vadd.f32 %v5788_v39, %v5500_v55  ;;  %v11199_v55 = vld [vmem:[#allocation20_spill] sm:$0xff] }
 0x551   :  { %v5502_v56 = vpop.f32.mrf.mxu1  ;;  %v11200_v33 = vld [vmem:[#allocation53_spill] sm:$0xff] }
 0x552   :  { %v5791_v16 = vpop.f32.mrf.mxu0  ;;  %v5503_v60 = vadd.f32 %v5502_v56, %v11194_v32 }
 0x553   :  { %v5504_v59 = vpop.f32.mrf.mxu1 }
 0x554   :  { %v5793_v44 = vpop.f32.mrf.mxu0  ;;  %v10294_v34 = vadd.f32 %v5791_v16, %v5503_v60  ;;  %v11201_v16 = vld [vmem:[#allocation31_spill] sm:$0xff] }
 0x555   :  { %v5507_v1 = vpop.f32.mrf.mxu1  ;;  %6771 = vmatmul.mubr.bf16.gmra.mxu1 %v11195_v3  ;;  %v11202_v3 = vld [vmem:[#allocation61_spill] sm:$0xff] }
 0x556   :  { %v5796_v11 = vpop.f32.mrf.mxu0  ;;  %v5508_v20 = vadd.f32 %v5507_v1, %v11196_v40  ;;  %6774 = vmatprep.mubr.bf16.mxu1 %v11197_v31 }
 0x557   :  { %v5509_v12 = vpop.f32.mrf.mxu1 }
 0x558   :  { %v5798_v47 = vpop.f32.mrf.mxu0  ;;  %v10299_v6 = vadd.f32 %v5796_v11, %v5508_v20 }
 0x559   :  { %v5510_v10 = vpop.f32.mrf.mxu1  ;;  %v11203_v47 = vld [vmem:[#allocation2_spill] sm:$0xff] }
 0x55a   :  { %v5799_v49 = vpop.f32.mrf.mxu0  ;;  %v5511_v35 = vadd.f32 %v5510_v10, %v11198_v25 }
 0x55b   :  { %v5512_v38 = vpop.f32.mrf.mxu1 }
 0x55c   :  { %v5801_v37 = vpop.f32.mrf.mxu0  ;;  %v10302_v39 = vadd.f32 %v5799_v49, %v5511_v35  ;;  %v11204_v49 = vld [vmem:[#allocation57_spill] sm:$0xff]  ;;  %v11205_v35 = vld [vmem:[#allocation34_spill] sm:$0xff] }
 0x55d   :  { %v5515_v41 = vpop.f32.mrf.mxu1  ;;  %6775 = vmatmul.mubr.bf16.gmra.mxu1 %v11199_v55 }
 0x55e   :  { %v5804_v19 = vpop.f32.mrf.mxu0  ;;  %v5516_v56 = vadd.f32 %v5515_v41, %v11200_v33  ;;  %6778 = vmatprep.mubr.bf16.mxu1 %v11201_v16  ;;  %v11206_v33 = vld [vmem:[#allocation5_spill] sm:$0xff] }
 0x55f   :  { %v5517_v32 = vpop.f32.mrf.mxu1 }
 0x560   :  { %v5806_v60 = vpop.f32.mrf.mxu0  ;;  %v10307_v59 = vadd.f32 %v5804_v19, %v5516_v56 }
 0x561   :  { %v5518_v44 = vpop.f32.mrf.mxu1 }
 0x562   :  { %v5807_v1 = vpop.f32.mrf.mxu0  ;;  %v5519_v11 = vadd.f32 %v5518_v44, %v11202_v3 }
 0x563   :  { %v5520_v40 = vpop.f32.mrf.mxu1 }
 0x564   :  { %v5809_v20 = vpop.f32.mrf.mxu0  ;;  %v10310_v31 = vadd.f32 %v5807_v1, %v5519_v11  ;;  %v11207_v1 = vld [vmem:[#allocation37_spill] sm:$0xff]  ;;  %v11208_v11 = vld [vmem:[#allocation60_spill] sm:$0xff] }
 0x565   :  { %v5523_v12 = vpop.f32.mrf.mxu1  ;;  %6779 = vmatmul.mubr.bf16.gmra.mxu1 %v11203_v47 }
 0x566   :  { %v5812_v10 = vpop.f32.mrf.mxu0  ;;  %v5524_v25 = vadd.f32 %v5523_v12, %v11204_v49  ;;  %6782 = vmatprep.mubr.bf16.mxu1 %v11205_v35 }
 0x567   :  { %v5525_v38 = vpop.f32.mrf.mxu1 }
 0x568   :  { %v5814_v37 = vpop.f32.mrf.mxu0  ;;  %v10315_v41 = vadd.f32 %v5812_v10, %v5524_v25  ;;  %v11209_v25 = vld [vmem:[#allocation6_spill] sm:$0xff] }
 0x569   :  { %v5526_v55 = vpop.f32.mrf.mxu1 }
 0x56a   :  { %v5815_v19 = vpop.f32.mrf.mxu0  ;;  %v5527_v56 = vadd.f32 %v5526_v55, %v11206_v33 }
 0x56b   :  { %v5528_v16 = vpop.f32.mrf.mxu1 }
 0x56c   :  { %v5817_v32 = vpop.f32.mrf.mxu0  ;;  %v10318_v60 = vadd.f32 %v5815_v19, %v5527_v56  ;;  %v11210_v56 = vld [vmem:[#allocation7_spill] sm:$0xff] }
 0x56d   :  { %v5531_v44 = vpop.f32.mrf.mxu1  ;;  %6783 = vmatmul.mubr.bf16.gmra.mxu1 %v11207_v1 }
 0x56e   :  { %v5820_v3 = vpop.f32.mrf.mxu0  ;;  %v5532_v40 = vadd.f32 %v5531_v44, %v11208_v11  ;;  %6786 = vmatprep.mubr.bf16.mxu1 %v11166_v23  ;;  %v11211_v11 = vld [vmem:[#allocation69_spill] sm:$0xff] }
 0x56f   :  { %v5533_v20 = vpop.f32.mrf.mxu1 }
 0x570   :  { %v5822_v12 = vpop.f32.mrf.mxu0  ;;  %v10323_v47 = vadd.f32 %v5820_v3, %v5532_v40 }
 0x571   :  { %v5534_v10 = vpop.f32.mrf.mxu1 }
 0x572   :  { %v5823_v49 = vpop.f32.mrf.mxu0  ;;  %v5535_v35 = vadd.f32 %v5534_v10, %v11209_v25  ;;  %v11212_v25 = vld [vmem:[#allocation8_spill] sm:$0xff] }
 0x573   :  { %v5536_v38 = vpop.f32.mrf.mxu1 }
 0x574   :  { %v5825_v37 = vpop.f32.mrf.mxu0  ;;  %v10326_v55 = vadd.f32 %v5823_v49, %v5535_v35 }
 0x575   :  { %v5539_v19 = vpop.f32.mrf.mxu1  ;;  %6787 = vmatmul.mubr.bf16.gmra.mxu1 %v9756_v28 }
 0x576   :  { %v5828_v33 = vpop.f32.mrf.mxu0  ;;  %v5540_v16 = vadd.f32 %v5539_v19, %v11210_v56  ;;  %6790 = vmatprep.mubr.bf16.mxu1 %v11173_v29  ;;  %v11213_v56 = vld [vmem:[#allocation9_spill] sm:$0xff] }
 0x577   :  { %v5541_v23 = vpop.f32.mrf.mxu1 }
 0x578   :  { %v5830_v32 = vpop.f32.mrf.mxu0  ;;  %v10331_v44 = vadd.f32 %v5828_v33, %v5540_v16 }
 0x579   :  { %v5542_v1 = vpop.f32.mrf.mxu1 }
 0x57a   :  { %v5831_v3 = vpop.f32.mrf.mxu0  ;;  %v5543_v40 = vadd.f32 %v5542_v1, %v11211_v11  ;;  %v11214_v11 = vld [vmem:[#allocation24_spill] sm:$0xff] }
 0x57b   :  { %v5544_v20 = vpop.f32.mrf.mxu1 }
 0x57c   :  { %v5833_v12 = vpop.f32.mrf.mxu0  ;;  %v10334_v10 = vadd.f32 %v5831_v3, %v5543_v40 }
 0x57d   :  { %v5547_v49 = vpop.f32.mrf.mxu1  ;;  %6791 = vmatmul.mubr.bf16.gmra.mxu1 %v9809_v57 }
 0x57e   :  { %v5836_v28 = vpop.f32.mrf.mxu0  ;;  %v5548_v35 = vadd.f32 %v5547_v49, %v11212_v25  ;;  %6794 = vmatprep.mubr.bf16.mxu1 %v9833_v51  ;;  %v11216_v25 = vld [vmem:[#allocation70_spill] sm:$0xff] }
 0x57f   :  { %v5549_v29 = vpop.f32.mrf.mxu1 }
 0x580   :  { %v5838_v38 = vpop.f32.mrf.mxu0  ;;  %v10339_v37 = vadd.f32 %v5836_v28, %v5548_v35 }
 0x581   :  { %v5550_v19 = vpop.f32.mrf.mxu1 }
 0x582   :  { %v5839_v33 = vpop.f32.mrf.mxu0  ;;  %v5551_v16 = vadd.f32 %v5550_v19, %v11213_v56  ;;  %v11218_v56 = vld [vmem:[#allocation23_spill] sm:$0xff] }
 0x583   :  { %v5552_v23 = vpop.f32.mrf.mxu1 }
 0x584   :  { %v5841_v32 = vpop.f32.mrf.mxu0  ;;  %v10342_v1 = vadd.f32 %v5839_v33, %v5551_v16 }
 0x585   :  { %v5555_v3 = vpop.f32.mrf.mxu1  ;;  %6795 = vmatmul.mubr.bf16.gmra.mxu1 %v9854_v46 }
 0x586   :  { %v5844_v57 = vpop.f32.mrf.mxu0  ;;  %v5556_v40 = vadd.f32 %v5555_v3, %v11214_v11  ;;  %6798 = vmatprep.mubr.bf16.mxu1 %v10213_v36  ;;  %v11219_v11 = vld [vmem:[#allocation71_spill] sm:$0xff] }
 0x587   :  { %v5557_v51 = vpop.f32.mrf.mxu1 }
 0x588   :  { %v5846_v20 = vpop.f32.mrf.mxu0  ;;  %v10347_v12 = vadd.f32 %v5844_v57, %v5556_v40 }
 0x589   :  { %v5558_v49 = vpop.f32.mrf.mxu1 }
 0x58a   :  { %11215 = vst [vmem:[#allocation36_spill] sm:$0xff] %v10347_v12  ;;  %v5847_v28 = vpop.f32.mrf.mxu0  ;;  %v5559_v35 = vadd.f32 %v5558_v49, %v11216_v25 }
 0x58b   :  { %v5560_v29 = vpop.f32.mrf.mxu1 }
 0x58c   :  { %v5849_v38 = vpop.f32.mrf.mxu0  ;;  %v10350_v19 = vadd.f32 %v5847_v28, %v5559_v35  ;;  %v11221_v35 = vld [vmem:[#allocation10_spill] sm:$0xff] }
 0x58d   :  { %v5563_v33 = vpop.f32.mrf.mxu1  ;;  %6799 = vmatmul.mubr.bf16.gmra.mxu1 %v11192_v2 }
 0x58e   :  { %11217 = vst [vmem:[#allocation54_spill] sm:$0xff] %v10350_v19  ;;  %v5852_v46 = vpop.f32.mrf.mxu0  ;;  %v5564_v16 = vadd.f32 %v5563_v33, %v11218_v56 }
 0x58f   :  { %v5565_v23 = vpop.f32.mrf.mxu1 }
 0x590   :  { %v5854_v36 = vpop.f32.mrf.mxu0  ;;  %v10354_v32 = vadd.f32 %v5852_v46, %v5564_v16  ;;  %v11223_v46 = vld [vmem:[#allocation14_spill] sm:$0xff] }
 0x591   :  { %v5566_v3 = vpop.f32.mrf.mxu1 }
 0x592   :  { %v5855_v57 = vpop.f32.mrf.mxu0  ;;  %v5567_v40 = vadd.f32 %v5566_v3, %v11219_v11 }
 0x593   :  { %v5568_v51 = vpop.f32.mrf.mxu1 }
 0x594   :  { %v5857_v20 = vpop.f32.mrf.mxu0  ;;  %v10357_v49 = vadd.f32 %v5855_v57, %v5567_v40  ;;  %v11225_v57 = vld [vmem:[#allocation18_spill] sm:$0xff] }
 0x595   :  { %v5571_v28 = vpop.f32.mrf.mxu1 }
 0x596   :  { %11220 = vst [vmem:[#allocation41_spill] sm:$0xff] %v10357_v49  ;;  %v5860_v25 = vpop.f32.mrf.mxu0  ;;  %v5572_v29 = vadd.f32 %v5571_v28, %v11221_v35 }
 0x597   :  { %v5573_v2 = vpop.f32.mrf.mxu1 }
 0x598   :  { %v5862_v38 = vpop.f32.mrf.mxu0  ;;  %v10360_v19 = vadd.f32 %v5860_v25, %v5572_v29  ;;  %v11227_v25 = vld [vmem:[#allocation11_spill] sm:$0xff] }
 0x599   :  { %v5574_v33 = vpop.f32.mrf.mxu1 }
 0x59a   :  { %11222 = vst [vmem:[#allocation46_spill] sm:$0xff] %v10360_v19  ;;  %v5863_v56 = vpop.f32.mrf.mxu0  ;;  %v5575_v16 = vadd.f32 %v5574_v33, %v11223_v46 }
 0x59b   :  { %v5576_v23 = vpop.f32.mrf.mxu1 }
 0x59c   :  { %v5865_v36 = vpop.f32.mrf.mxu0  ;;  %v10363_v12 = vadd.f32 %v5863_v56, %v5575_v16  ;;  %v11229_v56 = vld [vmem:[#allocation17_spill] sm:$0xff] }
 0x59d   :  { %v5579_v3 = vpop.f32.mrf.mxu1 }
 0x59e   :  { %11224 = vst [vmem:[#allocation39_spill] sm:$0xff] %v10363_v12  ;;  %v5868_v11 = vpop.f32.mrf.mxu0  ;;  %v5580_v40 = vadd.f32 %v5579_v3, %v11225_v57 }
 0x59f   :  { %v5581_v51 = vpop.f32.mrf.mxu1 }
 0x5a0   :  { %v5870_v20 = vpop.f32.mrf.mxu0  ;;  %v10366_v49 = vadd.f32 %v5868_v11, %v5580_v40  ;;  %v11231_v11 = vld [vmem:[#allocation13_spill] sm:$0xff] }
 0x5a1   :  { %v5582_v28 = vpop.f32.mrf.mxu1 }
 0x5a2   :  { %11226 = vst [vmem:[#allocation43_spill] sm:$0xff] %v10366_v49  ;;  %v5871_v35 = vpop.f32.mrf.mxu0  ;;  %v5583_v29 = vadd.f32 %v5582_v28, %v11227_v25 }
 0x5a3   :  { %v5584_v2 = vpop.f32.mrf.mxu1 }
 0x5a4   :  { %v5873_v38 = vpop.f32.mrf.mxu0  ;;  %v10369_v19 = vadd.f32 %v5871_v35, %v5583_v29  ;;  %v11233_v35 = vld [vmem:[#allocation16_spill] sm:$0xff] }
 0x5a5   :  { %v5587_v33 = vpop.f32.mrf.mxu1 }
 0x5a6   :  { %11228 = vst [vmem:[#allocation45_spill] sm:$0xff] %v10369_v19  ;;  %v5876_v46 = vpop.f32.mrf.mxu0  ;;  %v5588_v16 = vadd.f32 %v5587_v33, %v11229_v56 }
 0x5a7   :  { %v5589_v23 = vpop.f32.mrf.mxu1 }
 0x5a8   :  { %v5878_v36 = vpop.f32.mrf.mxu0  ;;  %v10372_v12 = vadd.f32 %v5876_v46, %v5588_v16  ;;  %v11235_v46 = vld [vmem:[#allocation12_spill] sm:$0xff] }
 0x5a9   :  { %v5590_v3 = vpop.f32.mrf.mxu1 }
 0x5aa   :  { %11230 = vst [vmem:[#allocation40_spill] sm:$0xff] %v10372_v12  ;;  %v5879_v57 = vpop.f32.mrf.mxu0  ;;  %v5591_v40 = vadd.f32 %v5590_v3, %v11231_v11 }
 0x5ab   :  { %v5592_v51 = vpop.f32.mrf.mxu1 }
 0x5ac   :  { %v5881_v20 = vpop.f32.mrf.mxu0  ;;  %v10375_v49 = vadd.f32 %v5879_v57, %v5591_v40  ;;  %v11237_v57 = vld [vmem:[#allocation26_spill] sm:$0xff] }
 0x5ad   :  { %v5595_v28 = vpop.f32.mrf.mxu1 }
 0x5ae   :  { %11232 = vst [vmem:[#allocation44_spill] sm:$0xff] %v10375_v49  ;;  %v5884_v25 = vpop.f32.mrf.mxu0  ;;  %v5596_v29 = vadd.f32 %v5595_v28, %v11233_v35 }
 0x5af   :  { %v5597_v2 = vpop.f32.mrf.mxu1 }
 0x5b0   :  { %v5886_v38 = vpop.f32.mrf.mxu0  ;;  %v10378_v19 = vadd.f32 %v5884_v25, %v5596_v29  ;;  %v11239_v25 = vld [vmem:[#allocation22_spill] sm:$0xff] }
 0x5b1   :  { %v5598_v33 = vpop.f32.mrf.mxu1 }
 0x5b2   :  { %11234 = vst [vmem:[#allocation48_spill] sm:$0xff] %v10378_v19  ;;  %v5887_v56 = vpop.f32.mrf.mxu0  ;;  %v5599_v16 = vadd.f32 %v5598_v33, %v11235_v46 }
 0x5b3   :  { %v5600_v23 = vpop.f32.mrf.mxu1 }
 0x5b4   :  { %v5889_v36 = vpop.f32.mrf.mxu0  ;;  %v10381_v12 = vadd.f32 %v5887_v56, %v5599_v16  ;;  %v11241_v56 = vld [vmem:[#allocation29_spill] sm:$0xff] }
 0x5b5   :  { %v5603_v3 = vpop.f32.mrf.mxu1 }
 0x5b6   :  { %11236 = vst [vmem:[#allocation49_spill] sm:$0xff] %v10381_v12  ;;  %v5892_v11 = vpop.f32.mrf.mxu0  ;;  %v5604_v40 = vadd.f32 %v5603_v3, %v11237_v57 }
 0x5b7   :  { %v5605_v51 = vpop.f32.mrf.mxu1 }
 0x5b8   :  { %v5894_v20 = vpop.f32.mrf.mxu0  ;;  %v10384_v49 = vadd.f32 %v5892_v11, %v5604_v40  ;;  %v11243_v11 = vld [vmem:[#allocation21_spill] sm:$0xff] }
 0x5b9   :  { %v5606_v28 = vpop.f32.mrf.mxu1 }
 0x5ba   :  { %11238 = vst [vmem:[#allocation47_spill] sm:$0xff] %v10384_v49  ;;  %v5895_v35 = vpop.f32.mrf.mxu0  ;;  %v5607_v29 = vadd.f32 %v5606_v28, %v11239_v25 }
 0x5bb   :  { %v5608_v2 = vpop.f32.mrf.mxu1 }
 0x5bc   :  { %v5897_v38 = vpop.f32.mrf.mxu0  ;;  %v10387_v19 = vadd.f32 %v5895_v35, %v5607_v29  ;;  %v11245_v35 = vld [vmem:[#allocation33_spill] sm:$0xff] }
 0x5bd   :  { %v5611_v33 = vpop.f32.mrf.mxu1 }
 0x5be   :  { %11240 = vst [vmem:[#allocation50_spill] sm:$0xff] %v10387_v19  ;;  %v5900_v46 = vpop.f32.mrf.mxu0  ;;  %v5612_v16 = vadd.f32 %v5611_v33, %v11241_v56 }
 0x5bf   :  { %v5613_v23 = vpop.f32.mrf.mxu1 }
 0x5c0   :  { %v5902_v36 = vpop.f32.mrf.mxu0  ;;  %v10390_v12 = vadd.f32 %v5900_v46, %v5612_v16  ;;  %v11247_v46 = vld [vmem:[#allocation27_spill] sm:$0xff] }
 0x5c1   :  { %v5614_v3 = vpop.f32.mrf.mxu1 }
 0x5c2   :  { %11242 = vst [vmem:[#allocation64_spill] sm:$0xff] %v10390_v12  ;;  %v5903_v57 = vpop.f32.mrf.mxu0  ;;  %v5615_v40 = vadd.f32 %v5614_v3, %v11243_v11 }
 0x5c3   :  { %v5616_v51 = vpop.f32.mrf.mxu1 }
 0x5c4   :  { %v5905_v20 = vpop.f32.mrf.mxu0  ;;  %v10393_v49 = vadd.f32 %v5903_v57, %v5615_v40  ;;  %v11248_v57 = vld [vmem:[#allocation38_spill] sm:$0xff] }
 0x5c5   :  { %v5619_v28 = vpop.f32.mrf.mxu1 }
 0x5c6   :  { %11244 = vst [vmem:[#allocation28_spill] sm:$0xff] %v10393_v49  ;;  %v5908_v25 = vpop.f32.mrf.mxu0  ;;  %v5620_v29 = vadd.f32 %v5619_v28, %v11245_v35 }
 0x5c7   :  { %v5621_v2 = vpop.f32.mrf.mxu1 }
 0x5c8   :  { %v5910_v38 = vpop.f32.mrf.mxu0  ;;  %v10396_v19 = vadd.f32 %v5908_v25, %v5620_v29  ;;  %v11249_v25 = vld [vmem:[#allocation35_spill] sm:$0xff] }
 0x5c9   :  { %v5622_v33 = vpop.f32.mrf.mxu1 }
 0x5ca   :  { %11246 = vst [vmem:[#allocation62_spill] sm:$0xff] %v10396_v19  ;;  %v5911_v56 = vpop.f32.mrf.mxu0  ;;  %v5623_v16 = vadd.f32 %v5622_v33, %v11247_v46 }
 0x5cb   :  { %v5624_v23 = vpop.f32.mrf.mxu1 }
 0x5cc   :  { %v5913_v36 = vpop.f32.mrf.mxu0  ;;  %v10399_v12 = vadd.f32 %v5911_v56, %v5623_v16 }
 0x5cd   :  { %v5627_v3 = vpop.f32.mrf.mxu1 }
 0x5ce   :  { %v5916_v11 = vpop.f32.mrf.mxu0  ;;  %v5628_v40 = vadd.f32 %v5627_v3, %v11248_v57 }
 0x5cf   :  { %v5629_v51 = vpop.f32.mrf.mxu1 }
 0x5d0   :  { %v5918_v20 = vpop.f32.mrf.mxu0  ;;  %v10402_v49 = vadd.f32 %v5916_v11, %v5628_v40 }
 0x5d1   :  { %v5630_v28 = vpop.f32.mrf.mxu1 }
 0x5d2   :  { %v5919_v35 = vpop.f32.mrf.mxu0  ;;  %v5631_v29 = vadd.f32 %v5630_v28, %v11249_v25 }
 0x5d3   :  { %v5632_v2 = vpop.f32.mrf.mxu1 }
 0x5d4   :  { %v5921_v38 = vpop.f32.mrf.mxu0  ;;  %v10405_v19 = vadd.f32 %v5919_v35, %v5631_v29  ;;  %v11250_v29 = vld [vmem:[#allocation25_spill] sm:$0xff] }
 0x5d5   :  { %v6740_v33 = vpop.f32.mrf.mxu1 }
 0x5d6   :  { %v5966_v56 = vadd.f32 %v6740_v33, %v10160_v62  ;;  %v11251_v33 = vld [vmem:[#allocation42_spill] sm:$0xff] }
 0x5d7   :  { %v5957_v46 = vpop.f32.mrf.mxu1 }
 0x5d8   :  { %v6214_v16 = vmax.f32 %v5966_v56, 0.0  ;;  %v5958_v23 = vadd.f32 %v5957_v46, %v10151_v43 }
 0x5d9   :  { %v6741_v36 = vpop.f32.mrf.mxu1 }
 0x5da   :  { %6278 = vst [vmem:[%s10668_s5 + $0x10] sm:$0xff] %v6214_v16  ;;  %v6212_v3 = vmax.f32 %v5958_v23, 0.0  ;;  %v5969_v11 = vadd.f32 %v6741_v36, %v10163_v0 }
 0x5db   :  { %v5960_v57 = vpop.f32.mrf.mxu1 }
 0x5dc   :  { %6276 = vst [vmem:[%s10668_s5] sm:$0xff] %v6212_v3  ;;  %v6215_v40 = vmax.f32 %v5969_v11, 0.0  ;;  %v5961_v62 = vadd.f32 %v5960_v57, %v10153_v58 }
 0x5dd   :  { %v6744_v51 = vpop.f32.mrf.mxu1 }
 0x5de   :  { %6279 = vst [vmem:[%s10668_s5 + $0x18] sm:$0xff] %v6215_v40  ;;  %v6213_v43 = vmax.f32 %v5961_v62, 0.0  ;;  %v5982_v20 = vadd.f32 %v6744_v51, %v10180_v52 }
 0x5df   :  { %v5973_v28 = vpop.f32.mrf.mxu1 }
 0x5e0   :  { %6277 = vst [vmem:[%s10668_s5 + $0x8] sm:$0xff] %v6213_v43  ;;  %v6218_v0 = vmax.f32 %v5982_v20, 0.0  ;;  %v5974_v35 = vadd.f32 %v5973_v28, %v10170_v22 }
 0x5e1   :  { %v6745_v25 = vpop.f32.mrf.mxu1 }
 0x5e2   :  { %6282 = vst [vmem:[%s10668_s5 + $0x30] sm:$0xff] %v6218_v0  ;;  %v6216_v58 = vmax.f32 %v5974_v35, 0.0  ;;  %v5985_v2 = vadd.f32 %v6745_v25, %v11250_v29 }
 0x5e3   :  { %v5976_v38 = vpop.f32.mrf.mxu1 }
 0x5e4   :  { %6280 = vst [vmem:[%s10668_s5 + $0x20] sm:$0xff] %v6216_v58  ;;  %v6219_v52 = vmax.f32 %v5985_v2, 0.0  ;;  %v5977_v56 = vadd.f32 %v5976_v38, %v11251_v33 }
 0x5e5   :  { %v6748_v46 = vpop.f32.mrf.mxu1 }
 0x5e6   :  { %6283 = vst [vmem:[%s10668_s5 + $0x38] sm:$0xff] %v6219_v52  ;;  %v6217_v22 = vmax.f32 %v5977_v56, 0.0  ;;  %v5998_v16 = vadd.f32 %v6748_v46, %v10205_v53 }
 0x5e7   :  { %v5989_v23 = vpop.f32.mrf.mxu1 }
 0x5e8   :  { %6281 = vst [vmem:[%s10668_s5 + $0x28] sm:$0xff] %v6217_v22  ;;  %v6222_v36 = vmax.f32 %v5998_v16, 0.0  ;;  %v5990_v3 = vadd.f32 %v5989_v23, %v10195_v17 }
 0x5e9   :  { %v6749_v11 = vpop.f32.mrf.mxu1 }
 0x5ea   :  { %6286 = vst [vmem:[%s10668_s5 + $0x50] sm:$0xff] %v6222_v36  ;;  %v6220_v57 = vmax.f32 %v5990_v3, 0.0  ;;  %v6001_v40 = vadd.f32 %v6749_v11, %v10209_v18 }
 0x5eb   :  { %v5992_v62 = vpop.f32.mrf.mxu1 }
 0x5ec   :  { %6284 = vst [vmem:[%s10668_s5 + $0x40] sm:$0xff] %v6220_v57  ;;  %v6223_v53 = vmax.f32 %v6001_v40, 0.0  ;;  %v5993_v51 = vadd.f32 %v5992_v62, %v10198_v26 }
 0x5ed   :  { %v6752_v43 = vpop.f32.mrf.mxu1 }
 0x5ee   :  { %6287 = vst [vmem:[%s10668_s5 + $0x58] sm:$0xff] %v6223_v53  ;;  %v6221_v17 = vmax.f32 %v5993_v51, 0.0  ;;  %v6014_v20 = vadd.f32 %v6752_v43, %v10227_v27 }
 0x5ef   :  { %v6005_v28 = vpop.f32.mrf.mxu1 }
 0x5f0   :  { %6285 = vst [vmem:[%s10668_s5 + $0x48] sm:$0xff] %v6221_v17  ;;  %v6226_v18 = vmax.f32 %v6014_v20, 0.0  ;;  %v6006_v0 = vadd.f32 %v6005_v28, %v10219_v54 }
 0x5f1   :  { %v6753_v35 = vpop.f32.mrf.mxu1 }
 0x5f2   :  { %6290 = vst [vmem:[%s10668_s5 + $0x70] sm:$0xff] %v6226_v18  ;;  %v6224_v26 = vmax.f32 %v6006_v0, 0.0  ;;  %v6017_v25 = vadd.f32 %v6753_v35, %v10230_v8 }
 0x5f3   :  { %v6008_v58 = vpop.f32.mrf.mxu1 }
 0x5f4   :  { %6288 = vst [vmem:[%s10668_s5 + $0x60] sm:$0xff] %v6224_v26  ;;  %v6227_v27 = vmax.f32 %v6017_v25, 0.0  ;;  %v6009_v29 = vadd.f32 %v6008_v58, %v10222_v14 }
 0x5f5   :  { %v6756_v2 = vpop.f32.mrf.mxu1 }
 0x5f6   :  { %6291 = vst [vmem:[%s10668_s5 + $0x78] sm:$0xff] %v6227_v27  ;;  %v6225_v54 = vmax.f32 %v6009_v29, 0.0  ;;  %v6030_v38 = vadd.f32 %v6756_v2, %v10243_v48 }
 0x5f7   :  { %v6021_v52 = vpop.f32.mrf.mxu1 }
 0x5f8   :  { %6289 = vst [vmem:[%s10668_s5 + $0x68] sm:$0xff] %v6225_v54  ;;  %v6230_v8 = vmax.f32 %v6030_v38, 0.0  ;;  %v6022_v33 = vadd.f32 %v6021_v52, %v10235_v7 }
 0x5f9   :  { %v6757_v56 = vpop.f32.mrf.mxu1 }
 0x5fa   :  { %6294 = vst [vmem:[%s10668_s5 + $0x90] sm:$0xff] %v6230_v8  ;;  %v6228_v14 = vmax.f32 %v6022_v33, 0.0  ;;  %v6033_v46 = vadd.f32 %v6757_v56, %v10246_v50 }
 0x5fb   :  { %v6024_v22 = vpop.f32.mrf.mxu1 }
 0x5fc   :  { %6292 = vst [vmem:[%s10668_s5 + $0x80] sm:$0xff] %v6228_v14  ;;  %v6231_v48 = vmax.f32 %v6033_v46, 0.0  ;;  %v6025_v16 = vadd.f32 %v6024_v22, %v10238_v4 }
 0x5fd   :  { %v6760_v23 = vpop.f32.mrf.mxu1 }
 0x5fe   :  { %6295 = vst [vmem:[%s10668_s5 + $0x98] sm:$0xff] %v6231_v48  ;;  %v6229_v7 = vmax.f32 %v6025_v16, 0.0  ;;  %v6046_v36 = vadd.f32 %v6760_v23, %v10259_v30 }
 0x5ff   :  { %v6037_v3 = vpop.f32.mrf.mxu1 }
 0x600   :  { %6293 = vst [vmem:[%s10668_s5 + $0x88] sm:$0xff] %v6229_v7  ;;  %v6234_v50 = vmax.f32 %v6046_v36, 0.0  ;;  %v6038_v11 = vadd.f32 %v6037_v3, %v10251_v21 }
 0x601   :  { %v6761_v57 = vpop.f32.mrf.mxu1 }
 0x602   :  { %6298 = vst [vmem:[%s10668_s5 + $0xb0] sm:$0xff] %v6234_v50  ;;  %v6232_v4 = vmax.f32 %v6038_v11, 0.0  ;;  %v6049_v40 = vadd.f32 %v6761_v57, %v10262_v15 }
 0x603   :  { %v6040_v62 = vpop.f32.mrf.mxu1 }
 0x604   :  { %6296 = vst [vmem:[%s10668_s5 + $0xa0] sm:$0xff] %v6232_v4  ;;  %v6235_v30 = vmax.f32 %v6049_v40, 0.0  ;;  %v6041_v53 = vadd.f32 %v6040_v62, %v10254_v61 }
 0x605   :  { %v6764_v51 = vpop.f32.mrf.mxu1 }
 0x606   :  { %6299 = vst [vmem:[%s10668_s5 + $0xb8] sm:$0xff] %v6235_v30  ;;  %v6233_v21 = vmax.f32 %v6041_v53, 0.0  ;;  %v6062_v43 = vadd.f32 %v6764_v51, %v10275_v42 }
 0x607   :  { %v6053_v17 = vpop.f32.mrf.mxu1 }
 0x608   :  { %6297 = vst [vmem:[%s10668_s5 + $0xa8] sm:$0xff] %v6233_v21  ;;  %v6238_v15 = vmax.f32 %v6062_v43, 0.0  ;;  %v6054_v20 = vadd.f32 %v6053_v17, %v10267_v45 }
 0x609   :  { %v6765_v28 = vpop.f32.mrf.mxu1 }
 0x60a   :  { %6302 = vst [vmem:[%s10668_s5 + $0xd0] sm:$0xff] %v6238_v15  ;;  %v6236_v61 = vmax.f32 %v6054_v20, 0.0  ;;  %v6065_v18 = vadd.f32 %v6765_v28, %v10278_v9  ;;  %v11252_v28 = vld [vmem:[#allocation36_spill] sm:$0xff] }
 0x60b   :  { %v6056_v0 = vpop.f32.mrf.mxu1 }
 0x60c   :  { %6300 = vst [vmem:[%s10668_s5 + $0xc0] sm:$0xff] %v6236_v61  ;;  %v6239_v42 = vmax.f32 %v6065_v18, 0.0  ;;  %v6057_v35 = vadd.f32 %v6056_v0, %v10270_v24  ;;  %v11253_v0 = vld [vmem:[#allocation41_spill] sm:$0xff] }
 0x60d   :  { %v6768_v26 = vpop.f32.mrf.mxu1 }
 0x60e   :  { %6303 = vst [vmem:[%s10668_s5 + $0xd8] sm:$0xff] %v6239_v42  ;;  %v6237_v45 = vmax.f32 %v6057_v35, 0.0  ;;  %v6078_v25 = vadd.f32 %v6768_v26, %v10291_v13  ;;  %v11254_v26 = vld [vmem:[#allocation54_spill] sm:$0xff] }
 0x60f   :  { %v6069_v58 = vpop.f32.mrf.mxu1 }
 0x610   :  { %6301 = vst [vmem:[%s10668_s5 + $0xc8] sm:$0xff] %v6237_v45  ;;  %v6242_v9 = vmax.f32 %v6078_v25, 0.0  ;;  %v6070_v27 = vadd.f32 %v6069_v58, %v10283_v5 }
 0x611   :  { %v6769_v29 = vpop.f32.mrf.mxu1 }
 0x612   :  { %6306 = vst [vmem:[%s10668_s5 + $0xf0] sm:$0xff] %v6242_v9  ;;  %v6240_v24 = vmax.f32 %v6070_v27, 0.0  ;;  %v6081_v2 = vadd.f32 %v6769_v29, %v10294_v34  ;;  %v11255_v9 = vld [vmem:[#allocation43_spill] sm:$0xff] }
 0x613   :  { %v6072_v54 = vpop.f32.mrf.mxu1 }
 0x614   :  { %6304 = vst [vmem:[%s10668_s5 + $0xe0] sm:$0xff] %v6240_v24  ;;  %v6243_v13 = vmax.f32 %v6081_v2, 0.0  ;;  %v6073_v38 = vadd.f32 %v6072_v54, %v10286_v63  ;;  %v11256_v2 = vld [vmem:[#allocation46_spill] sm:$0xff] }
 0x615   :  { %v6772_v52 = vpop.f32.mrf.mxu1 }
 0x616   :  { %6307 = vst [vmem:[%s10668_s5 + $0xf8] sm:$0xff] %v6243_v13  ;;  %v6241_v5 = vmax.f32 %v6073_v38, 0.0  ;;  %v6094_v8 = vadd.f32 %v6772_v52, %v10307_v59  ;;  %v11257_v52 = vld [vmem:[#allocation45_spill] sm:$0xff] }
 0x617   :  { %v6085_v33 = vpop.f32.mrf.mxu1 }
 0x618   :  { %6305 = vst [vmem:[%s10668_s5 + $0xe8] sm:$0xff] %v6241_v5  ;;  %v6246_v34 = vmax.f32 %v6094_v8, 0.0  ;;  %v6086_v56 = vadd.f32 %v6085_v33, %v10299_v6 }
 0x619   :  { %v6773_v14 = vpop.f32.mrf.mxu1 }
 0x61a   :  { %6310 = vst [vmem:[%s10668_s5 + $0x110] sm:$0xff] %v6246_v34  ;;  %v6244_v63 = vmax.f32 %v6086_v56, 0.0  ;;  %v6097_v46 = vadd.f32 %v6773_v14, %v10310_v31  ;;  %v11258_v34 = vld [vmem:[#allocation39_spill] sm:$0xff] }
 0x61b   :  { %v6088_v22 = vpop.f32.mrf.mxu1 }
 0x61c   :  { %6308 = vst [vmem:[%s10668_s5 + $0x100] sm:$0xff] %v6244_v63  ;;  %v6247_v59 = vmax.f32 %v6097_v46, 0.0  ;;  %v6089_v48 = vadd.f32 %v6088_v22, %v10302_v39  ;;  %v11259_v46 = vld [vmem:[#allocation48_spill] sm:$0xff] }
 0x61d   :  { %v6776_v16 = vpop.f32.mrf.mxu1 }
 0x61e   :  { %6311 = vst [vmem:[%s10668_s5 + $0x118] sm:$0xff] %v6247_v59  ;;  %v6245_v6 = vmax.f32 %v6089_v48, 0.0  ;;  %v6110_v23 = vadd.f32 %v6776_v16, %v10323_v47  ;;  %v11260_v16 = vld [vmem:[#allocation40_spill] sm:$0xff] }
 0x61f   :  { %v6101_v7 = vpop.f32.mrf.mxu1 }
 0x620   :  { %6309 = vst [vmem:[%s10668_s5 + $0x108] sm:$0xff] %v6245_v6  ;;  %v6250_v31 = vmax.f32 %v6110_v23, 0.0  ;;  %v6102_v36 = vadd.f32 %v6101_v7, %v10315_v41 }
 0x621   :  { %v6777_v3 = vpop.f32.mrf.mxu1 }
 0x622   :  { %6314 = vst [vmem:[%s10668_s5 + $0x130] sm:$0xff] %v6250_v31  ;;  %v6248_v39 = vmax.f32 %v6102_v36, 0.0  ;;  %v6113_v50 = vadd.f32 %v6777_v3, %v10326_v55  ;;  %v11261_v31 = vld [vmem:[#allocation49_spill] sm:$0xff] }
 0x623   :  { %v6104_v11 = vpop.f32.mrf.mxu1 }
 0x624   :  { %6312 = vst [vmem:[%s10668_s5 + $0x120] sm:$0xff] %v6248_v39  ;;  %v6251_v47 = vmax.f32 %v6113_v50, 0.0  ;;  %v6105_v57 = vadd.f32 %v6104_v11, %v10318_v60  ;;  %v11262_v50 = vld [vmem:[#allocation44_spill] sm:$0xff] }
 0x625   :  { %v6780_v4 = vpop.f32.mrf.mxu1 }
 0x626   :  { %6315 = vst [vmem:[%s10668_s5 + $0x138] sm:$0xff] %v6251_v47  ;;  %v6249_v41 = vmax.f32 %v6105_v57, 0.0  ;;  %v6126_v40 = vadd.f32 %v6780_v4, %v10339_v37  ;;  %v11263_v4 = vld [vmem:[#allocation64_spill] sm:$0xff] }
 0x627   :  { %v6117_v62 = vpop.f32.mrf.mxu1 }
 0x628   :  { %6313 = vst [vmem:[%s10668_s5 + $0x128] sm:$0xff] %v6249_v41  ;;  %v6254_v55 = vmax.f32 %v6126_v40, 0.0  ;;  %v6118_v30 = vadd.f32 %v6117_v62, %v10331_v44 }
 0x629   :  { %v6781_v53 = vpop.f32.mrf.mxu1 }
 0x62a   :  { %6318 = vst [vmem:[%s10668_s5 + $0x150] sm:$0xff] %v6254_v55  ;;  %v6252_v60 = vmax.f32 %v6118_v30, 0.0  ;;  %v6129_v51 = vadd.f32 %v6781_v53, %v10342_v1  ;;  %v11264_v55 = vld [vmem:[#allocation47_spill] sm:$0xff] }
 0x62b   :  { %v6120_v21 = vpop.f32.mrf.mxu1 }
 0x62c   :  { %6316 = vst [vmem:[%s10668_s5 + $0x140] sm:$0xff] %v6252_v60  ;;  %v6255_v37 = vmax.f32 %v6129_v51, 0.0  ;;  %v6121_v43 = vadd.f32 %v6120_v21, %v10334_v10  ;;  %v11265_v51 = vld [vmem:[#allocation28_spill] sm:$0xff] }
 0x62d   :  { %v6784_v17 = vpop.f32.mrf.mxu1 }
 0x62e   :  { %6319 = vst [vmem:[%s10668_s5 + $0x158] sm:$0xff] %v6255_v37  ;;  %v6253_v44 = vmax.f32 %v6121_v43, 0.0  ;;  %v6142_v15 = vadd.f32 %v6784_v17, %v10354_v32  ;;  %v11266_v17 = vld [vmem:[#allocation50_spill] sm:$0xff] }
 0x62f   :  { %v6133_v20 = vpop.f32.mrf.mxu1 }
 0x630   :  { %6317 = vst [vmem:[%s10668_s5 + $0x148] sm:$0xff] %v6253_v44  ;;  %v6258_v1 = vmax.f32 %v6142_v15, 0.0  ;;  %v6134_v61 = vadd.f32 %v6133_v20, %v11252_v28 }
 0x631   :  { %v6785_v18 = vpop.f32.mrf.mxu1 }
 0x632   :  { %6322 = vst [vmem:[%s10668_s5 + $0x170] sm:$0xff] %v6258_v1  ;;  %v6256_v10 = vmax.f32 %v6134_v61, 0.0  ;;  %v6145_v42 = vadd.f32 %v6785_v18, %v11253_v0  ;;  %v11267_v18 = vld [vmem:[#allocation62_spill] sm:$0xff] }
 0x633   :  { %v6136_v35 = vpop.f32.mrf.mxu1 }
 0x634   :  { %6320 = vst [vmem:[%s10668_s5 + $0x160] sm:$0xff] %v6256_v10  ;;  %v6259_v32 = vmax.f32 %v6145_v42, 0.0  ;;  %v6137_v45 = vadd.f32 %v6136_v35, %v11254_v26 }
 0x635   :  { %v6788_v25 = vpop.f32.mrf.mxu1 }
 0x636   :  { %6323 = vst [vmem:[%s10668_s5 + $0x178] sm:$0xff] %v6259_v32  ;;  %v6257_v58 = vmax.f32 %v6137_v45, 0.0  ;;  %v6158_v27 = vadd.f32 %v6788_v25, %v11255_v9 }
 0x637   :  { %v6149_v29 = vpop.f32.mrf.mxu1 }
 0x638   :  { %6321 = vst [vmem:[%s10668_s5 + $0x168] sm:$0xff] %v6257_v58  ;;  %v6262_v24 = vmax.f32 %v6158_v27, 0.0  ;;  %v6150_v54 = vadd.f32 %v6149_v29, %v11256_v2 }
 0x639   :  { %v6789_v13 = vpop.f32.mrf.mxu1 }
 0x63a   :  { %6326 = vst [vmem:[%s10668_s5 + $0x190] sm:$0xff] %v6262_v24  ;;  %v6260_v38 = vmax.f32 %v6150_v54, 0.0  ;;  %v6161_v5 = vadd.f32 %v6789_v13, %v11257_v52 }
 0x63b   :  { %v6152_v8 = vpop.f32.mrf.mxu1 }
 0x63c   :  { %6324 = vst [vmem:[%s10668_s5 + $0x180] sm:$0xff] %v6260_v38  ;;  %v6263_v33 = vmax.f32 %v6161_v5, 0.0  ;;  %v6153_v56 = vadd.f32 %v6152_v8, %v11258_v34 }
 0x63d   :  { %v6792_v14 = vpop.f32.mrf.mxu1 }
 0x63e   :  { %6327 = vst [vmem:[%s10668_s5 + $0x198] sm:$0xff] %v6263_v33  ;;  %v6261_v63 = vmax.f32 %v6153_v56, 0.0  ;;  %v6174_v22 = vadd.f32 %v6792_v14, %v11259_v46 }
 0x63f   :  { %v6165_v59 = vpop.f32.mrf.mxu1 }
 0x640   :  { %6325 = vst [vmem:[%s10668_s5 + $0x188] sm:$0xff] %v6261_v63  ;;  %v6266_v48 = vmax.f32 %v6174_v22, 0.0  ;;  %v6166_v6 = vadd.f32 %v6165_v59, %v11260_v16 }
 0x641   :  { %v6793_v23 = vpop.f32.mrf.mxu1 }
 0x642   :  { %6330 = vst [vmem:[%s10668_s5 + $0x1b0] sm:$0xff] %v6266_v48  ;;  %v6264_v7 = vmax.f32 %v6166_v6, 0.0  ;;  %v6177_v36 = vadd.f32 %v6793_v23, %v11261_v31 }
 0x643   :  { %v6168_v3 = vpop.f32.mrf.mxu1 }
 0x644   :  { %6328 = vst [vmem:[%s10668_s5 + $0x1a0] sm:$0xff] %v6264_v7  ;;  %v6267_v39 = vmax.f32 %v6177_v36, 0.0  ;;  %v6169_v11 = vadd.f32 %v6168_v3, %v11262_v50 }
 0x645   :  { %v6796_v47 = vpop.f32.mrf.mxu1 }
 0x646   :  { %6331 = vst [vmem:[%s10668_s5 + $0x1b8] sm:$0xff] %v6267_v39  ;;  %v6265_v57 = vmax.f32 %v6169_v11, 0.0  ;;  %v6190_v41 = vadd.f32 %v6796_v47, %v11263_v4 }
 0x647   :  { %v6181_v40 = vpop.f32.mrf.mxu1 }
 0x648   :  { %6329 = vst [vmem:[%s10668_s5 + $0x1a8] sm:$0xff] %v6265_v57  ;;  %v6270_v62 = vmax.f32 %v6190_v41, 0.0  ;;  %v6182_v30 = vadd.f32 %v6181_v40, %v11264_v55 }
 0x649   :  { %v6797_v53 = vpop.f32.mrf.mxu1 }
 0x64a   :  { %6334 = vst [vmem:[%s10668_s5 + $0x1d0] sm:$0xff] %v6270_v62  ;;  %v6268_v60 = vmax.f32 %v6182_v30, 0.0  ;;  %v6193_v21 = vadd.f32 %v6797_v53, %v11265_v51 }
 0x64b   :  { %v6184_v37 = vpop.f32.mrf.mxu1 }
 0x64c   :  { %6332 = vst [vmem:[%s10668_s5 + $0x1c0] sm:$0xff] %v6268_v60  ;;  %v6271_v43 = vmax.f32 %v6193_v21, 0.0  ;;  %v6185_v44 = vadd.f32 %v6184_v37, %v11266_v17 }
 0x64d   :  { %v6800_v15 = vpop.f32.mrf.mxu1 }
 0x64e   :  { %6335 = vst [vmem:[%s10668_s5 + $0x1d8] sm:$0xff] %v6271_v43  ;;  %v6269_v20 = vmax.f32 %v6185_v44, 0.0  ;;  %v6206_v1 = vadd.f32 %v6800_v15, %v10402_v49 }
 0x64f   :  { %v6197_v28 = vpop.f32.mrf.mxu1 }
 0x650   :  { %6333 = vst [vmem:[%s10668_s5 + $0x1c8] sm:$0xff] %v6269_v20  ;;  %v6274_v61 = vmax.f32 %v6206_v1, 0.0  ;;  %v6198_v10 = vadd.f32 %v6197_v28, %v11267_v18 }
 0x651   :  { %v6801_v0 = vpop.f32.mrf.mxu1 }
 0x652   :  { %6338 = vst [vmem:[%s10668_s5 + $0x1f0] sm:$0xff] %v6274_v61  ;;  %v6272_v42 = vmax.f32 %v6198_v10, 0.0  ;;  %v6209_v35 = vadd.f32 %v6801_v0, %v10405_v19 }
 0x653   :  { %v6200_v32 = vpop.f32.mrf.mxu1 }
 0x654   :  { %6336 = vst [vmem:[%s10668_s5 + $0x1e0] sm:$0xff] %v6272_v42  ;;  %v6275_v49 = vmax.f32 %v6209_v35, 0.0  ;;  %v6201_v26 = vadd.f32 %v6200_v32, %v10399_v12 }
 0x656   :  { %6339 = vst [vmem:[%s10668_s5 + $0x1f8] sm:$0xff] %v6275_v49  ;;  %v6273_v45 = vmax.f32 %v6201_v26, 0.0 }
 0x658   :  { %6337 = vst [vmem:[%s10668_s5 + $0x1e8] sm:$0xff] %v6273_v45 }

</bundles_post_ra>
